<compile_context>
chip_gen: v6e
topology: v6e:2x2x1
jax: 0.10.0
libtpu: 0.0.40
codegen_flags: <defaults>
</compile_context>

<pallas_src>
import jax
import jax.numpy as jnp
from jax import lax
from jax.experimental import pallas as pl
from jax.experimental.pallas import tpu as pltpu

INPUT_SIZE = 2085 - 10     # 2075
HIDDEN_SIZE = 1300
OUTPUT_SIZE = 5
BN_EPS = 1e-5

# Lane-aligned padded dims.
IN_PAD = 2176              # 17 * 128
HID_PAD = 1536             # 12 * 128 (divisible by TILE_N)
OUT_PAD = 128
TILE_N = 512               # hidden-feature columns streamed per grid step
N_TILES = HID_PAD // TILE_N

VMEM_LIMIT = 40 << 20      # <= 64 MiB physical VMEM on v7x


def _bn_relu_f32(h, gamma, beta):
    """Training-mode BatchNorm1d over the batch axis (biased var) + ReLU, f32 math."""
    mean = jnp.mean(h, axis=0, keepdims=True)
    var = jnp.mean(jnp.square(h - mean), axis=0, keepdims=True)
    y = (h - mean) * lax.rsqrt(var + BN_EPS) * gamma + beta
    return jnp.maximum(y, 0.0)


def layer1_kernel(x_ref, w1_ref, gamma_ref, beta_ref, h1_ref):
    # x_ref:  (B, IN_PAD) bf16  -- constant block index => loaded once, resident
    # w1_ref: (IN_PAD, TILE_N) bf16 slab, double-buffered by BlockSpec
    h = jnp.dot(x_ref[...], w1_ref[...], preferred_element_type=jnp.float32)
    # b1 omitted: cancels under the batch-mean subtraction below.
    y = _bn_relu_f32(h, gamma_ref[...], beta_ref[...])
    h1_ref[...] = y.astype(h1_ref.dtype)


def layer23_kernel(h1_ref, w2_ref, gamma_ref, beta_ref, w3_ref, b3_ref,
                   out_ref, acc_ref):
    j = pl.program_id(0)

    @pl.when(j == 0)
    def _():
        acc_ref[...] = jnp.zeros_like(acc_ref)

    h = jnp.dot(h1_ref[...], w2_ref[...], preferred_element_type=jnp.float32)
    # b2 omitted: cancels under the batch-mean subtraction below.
    y = _bn_relu_f32(h, gamma_ref[...], beta_ref[...])
    acc_ref[...] += jnp.dot(y.astype(jnp.bfloat16), w3_ref[...],
                            preferred_element_type=jnp.float32)

    @pl.when(j == pl.num_programs(0) - 1)
    def _():
        logits = acc_ref[...] + b3_ref[...]
        # F.log_softmax(x, dim=0): normalize over the BATCH axis per output column.
        m = jnp.max(logits, axis=0, keepdims=True)
        z = logits - m
        lse = jnp.log(jnp.sum(jnp.exp(z), axis=0, keepdims=True))
        out_ref[...] = z - lse


@jax.jit
def network_forward(x, params):
    batch = x.shape[0]

    # Pad input features to the lane-aligned width and cast to bf16.
    x_p = jnp.zeros((batch, IN_PAD), jnp.bfloat16)
    x_p = x_p.at[:, :INPUT_SIZE].set(x.astype(jnp.bfloat16))

    h1 = pl.pallas_call(
        layer1_kernel,
        out_shape=jax.ShapeDtypeStruct((batch, HID_PAD), jnp.bfloat16),
        grid_spec=pltpu.PrefetchScalarGridSpec(
            num_scalar_prefetch=0,
            grid=(N_TILES,),
            in_specs=[
                pl.BlockSpec((batch, IN_PAD), lambda j: (0, 0)),
                pl.BlockSpec((IN_PAD, TILE_N), lambda j: (0, j)),
                pl.BlockSpec((1, TILE_N), lambda j: (0, j)),
                pl.BlockSpec((1, TILE_N), lambda j: (0, j)),
            ],
            out_specs=pl.BlockSpec((batch, TILE_N), lambda j: (0, j)),
        ),
        compiler_params=pltpu.CompilerParams(
            dimension_semantics=("parallel",),
            vmem_limit_bytes=VMEM_LIMIT,
        ),
    )(x_p, params["w1"], params["gamma"], params["beta"])

    out_p = pl.pallas_call(
        layer23_kernel,
        out_shape=jax.ShapeDtypeStruct((batch, OUT_PAD), jnp.float32),
        grid_spec=pltpu.PrefetchScalarGridSpec(
            num_scalar_prefetch=0,
            grid=(N_TILES,),
            in_specs=[
                pl.BlockSpec((batch, HID_PAD), lambda j: (0, 0)),
                pl.BlockSpec((HID_PAD, TILE_N), lambda j: (0, j)),
                pl.BlockSpec((1, TILE_N), lambda j: (0, j)),
                pl.BlockSpec((1, TILE_N), lambda j: (0, j)),
                pl.BlockSpec((TILE_N, OUT_PAD), lambda j: (j, 0)),
                pl.BlockSpec((1, OUT_PAD), lambda j: (0, 0)),
            ],
            out_specs=pl.BlockSpec((batch, OUT_PAD), lambda j: (0, 0)),
            scratch_shapes=[pltpu.VMEM((batch, OUT_PAD), jnp.float32)],
        ),
        compiler_params=pltpu.CompilerParams(
            dimension_semantics=("arbitrary",),   # l3 K-reduction accumulator
            vmem_limit_bytes=VMEM_LIMIT,
        ),
    )(h1, params["w2"], params["gamma"], params["beta"],
      params["w3"], params["b3"])

    return out_p[:, :OUTPUT_SIZE]


def init_raw_params(key):
    """nn.Linear-style init (U(-1/sqrt(fan_in), 1/sqrt(fan_in))), BN gamma=1 beta=0."""
    k1, k2, k3, k4, k5, k6 = jax.random.split(key, 6)

    def linear(kw, kb, fan_in, fan_out):
        bound = 1.0 / float(fan_in) ** 0.5
        w = jax.random.uniform(kw, (fan_in, fan_out), jnp.float32, -bound, bound)
        b = jax.random.uniform(kb, (fan_out,), jnp.float32, -bound, bound)
        return w, b

    w1, b1 = linear(k1, k2, INPUT_SIZE, HIDDEN_SIZE)
    w2, b2 = linear(k3, k4, HIDDEN_SIZE, HIDDEN_SIZE)
    w3, b3 = linear(k5, k6, HIDDEN_SIZE, OUTPUT_SIZE)
    return {
        "w1": w1, "b1": b1, "w2": w2, "b2": b2, "w3": w3, "b3": b3,
        "gamma": jnp.ones((HIDDEN_SIZE,), jnp.float32),
        "beta": jnp.zeros((HIDDEN_SIZE,), jnp.float32),
    }


def pack_params(raw):
    """Zero-pad to lane-aligned shapes and cast matmul weights to bf16.
    b1/b2 are dropped (mathematically inert under training-mode BN).
    Padded gamma/beta lanes are 0 so padded features stay 0 through BN+ReLU."""
    def pad2(a, rows, cols):
        out = jnp.zeros((rows, cols), a.dtype)
        return out.at[:a.shape[0], :a.shape[1]].set(a)

    w1 = pad2(raw["w1"], IN_PAD, HID_PAD).astype(jnp.bfloat16)
    w2 = pad2(raw["w2"], HID_PAD, HID_PAD).astype(jnp.bfloat16)
    w3 = pad2(raw["w3"], HID_PAD, OUT_PAD).astype(jnp.bfloat16)
    b3 = jnp.zeros((1, OUT_PAD), jnp.float32).at[0, :OUTPUT_SIZE].set(raw["b3"])
    gamma = jnp.zeros((1, HID_PAD), jnp.float32).at[0, :HIDDEN_SIZE].set(raw["gamma"])
    beta = jnp.zeros((1, HID_PAD), jnp.float32).at[0, :HIDDEN_SIZE].set(raw["beta"])
    return {"w1": w1, "w2": w2, "w3": w3, "b3": b3, "gamma": gamma, "beta": beta}


def reference_forward(x, raw):
    """Pure-JAX f32 reference matching the PyTorch module (training-mode BN)."""
    def bn_relu(h):
        mean = jnp.mean(h, axis=0, keepdims=True)
        var = jnp.mean(jnp.square(h - mean), axis=0, keepdims=True)
        y = (h - mean) / jnp.sqrt(var + BN_EPS) * raw["gamma"] + raw["beta"]
        return jnp.maximum(y, 0.0)

    h = bn_relu(x @ raw["w1"] + raw["b1"])
    h = bn_relu(h @ raw["w2"] + raw["b2"])
    logits = h @ raw["w3"] + raw["b3"]
    return jax.nn.log_softmax(logits, axis=0)


if __name__ == "__main__":
    batch = 8
    kx, kp = jax.random.split(jax.random.PRNGKey(0))
    x = jax.random.normal(kx, (batch, INPUT_SIZE), jnp.float32)
    raw = init_raw_params(kp)
    params = pack_params(raw)

    out = jax.block_until_ready(network_forward(x, params))

    assert out.shape == (batch, OUTPUT_SIZE), out.shape
    assert bool(jnp.all(jnp.isfinite(out)))
    # log_softmax over dim=0 => each output column sums to 1 in probability space.
    col_sums = jnp.sum(jnp.exp(out), axis=0)
    assert bool(jnp.allclose(col_sums, 1.0, atol=1e-3)), col_sums

    # Loose check against the f32 reference (kernel uses bf16 matmul inputs).
    ref = reference_forward(x, raw)
    max_err = float(jnp.max(jnp.abs(out - ref)))
    assert max_err < 0.25, max_err

    print("KERNEL_OK")
</pallas_src>

<mosaic_0001>
module attributes {stable_mosaic.version = 11 : i64} {
  func.func @layer1_kernel(%arg0: i32, %arg1: memref<8x2176xbf16, #tpu.memory_space<vmem>>, %arg2: memref<2176x512xbf16, #tpu.memory_space<vmem>>, %arg3: memref<1x512xf32, #tpu.memory_space<vmem>>, %arg4: memref<1x512xf32, #tpu.memory_space<vmem>>, %arg5: memref<8x512xbf16, #tpu.memory_space<vmem>>) attributes {dimension_semantics = [#tpu.dimension_semantics<parallel>], iteration_bounds = array<i64: 3>, scalar_prefetch = 0 : i64, scratch_operands = 0 : i64, tpu.core_type = #tpu.core_type<tc>, window_params = [{pipeline_mode = #tpu.pipeline_mode<synchronous>, transform_indices = @transform_0, window_bounds = array<i64: 8, 2176>}, {transform_indices = @transform_1, window_bounds = array<i64: 2176, 512>}, {transform_indices = @transform_2, window_bounds = array<i64: 1, 512>}, {transform_indices = @transform_3, window_bounds = array<i64: 1, 512>}, {transform_indices = @transform_4, window_bounds = array<i64: 8, 512>}]} {
    %c0 = arith.constant 0 : index
    %c0_0 = arith.constant 0 : index
    %0 = vector.load %arg1[%c0, %c0_0] : memref<8x2176xbf16, #tpu.memory_space<vmem>>, vector<8x2176xbf16>
    %c0_1 = arith.constant 0 : index
    %c0_2 = arith.constant 0 : index
    %1 = vector.load %arg2[%c0_1, %c0_2] : memref<2176x512xbf16, #tpu.memory_space<vmem>>, vector<2176x512xbf16>
    %cst = arith.constant dense<0.000000e+00> : vector<8x512xf32>
    %2 = tpu.matmul %0, %1, %cst {dimension_numbers = #tpu.dot_dimension_numbers<[1], [0], [0], [1], [0, 0, 1, 1], [], []>} : vector<8x2176xbf16>, vector<2176x512xbf16>, vector<8x512xf32> -> vector<8x512xf32>
    %c0_3 = arith.constant 0 : index
    %c0_4 = arith.constant 0 : index
    %3 = vector.load %arg3[%c0_3, %c0_4] : memref<1x512xf32, #tpu.memory_space<vmem>>, vector<1x512xf32>
    %c0_5 = arith.constant 0 : index
    %c0_6 = arith.constant 0 : index
    %4 = vector.load %arg4[%c0_5, %c0_6] : memref<1x512xf32, #tpu.memory_space<vmem>>, vector<1x512xf32>
    %cst_7 = arith.constant dense<0.000000e+00> : vector<512xf32>
    %5 = vector.multi_reduction <add>, %2, %cst_7 [0] : vector<8x512xf32> to vector<512xf32>
    %6 = vector.shape_cast %5 : vector<512xf32> to vector<1x512xf32>
    %cst_8 = arith.constant 8.000000e+00 : f32
    %7 = vector.broadcast %cst_8 : f32 to vector<1x512xf32>
    %8 = arith.divf %6, %7 : vector<1x512xf32>
    %9 = vector.broadcast %8 : vector<1x512xf32> to vector<8x512xf32>
    %10 = arith.subf %2, %9 : vector<8x512xf32>
    %11 = arith.mulf %10, %10 : vector<8x512xf32>
    %cst_9 = arith.constant dense<0.000000e+00> : vector<512xf32>
    %12 = vector.multi_reduction <add>, %11, %cst_9 [0] : vector<8x512xf32> to vector<512xf32>
    %13 = vector.shape_cast %12 : vector<512xf32> to vector<1x512xf32>
    %cst_10 = arith.constant 8.000000e+00 : f32
    %14 = vector.broadcast %cst_10 : f32 to vector<1x512xf32>
    %15 = arith.divf %13, %14 : vector<1x512xf32>
    %16 = vector.broadcast %8 : vector<1x512xf32> to vector<8x512xf32>
    %17 = arith.subf %2, %16 : vector<8x512xf32>
    %cst_11 = arith.constant 9.99999974E-6 : f32
    %18 = vector.broadcast %cst_11 : f32 to vector<1x512xf32>
    %19 = arith.addf %15, %18 : vector<1x512xf32>
    %20 = math.rsqrt %19 : vector<1x512xf32>
    %21 = vector.broadcast %20 : vector<1x512xf32> to vector<8x512xf32>
    %22 = arith.mulf %17, %21 : vector<8x512xf32>
    %23 = vector.broadcast %3 : vector<1x512xf32> to vector<8x512xf32>
    %24 = arith.mulf %22, %23 : vector<8x512xf32>
    %25 = vector.broadcast %4 : vector<1x512xf32> to vector<8x512xf32>
    %26 = arith.addf %24, %25 : vector<8x512xf32>
    %cst_12 = arith.constant 0.000000e+00 : f32
    %27 = vector.broadcast %cst_12 : f32 to vector<8x512xf32>
    %28 = arith.maximumf %26, %27 : vector<8x512xf32>
    %29 = arith.truncf %28 : vector<8x512xf32> to vector<8x512xbf16>
    %c0_13 = arith.constant 0 : index
    %c0_14 = arith.constant 0 : index
    %30 = vector.load %arg5[%c0_13, %c0_14] : memref<8x512xbf16, #tpu.memory_space<vmem>>, vector<8x512xbf16>
    tpu.vector_store %arg5[%c0_13, %c0_14], %29 {strides = array<i32>} : memref<8x512xbf16, #tpu.memory_space<vmem>>, vector<8x512xbf16>,
    return
  }
  func.func @transform_0(%arg0: i32) -> (i32, i32) {
    %c0_i32 = arith.constant 0 : i32
    %c0_i32_0 = arith.constant 0 : i32
    %c0_i32_1 = arith.constant 0 : i32
    return %c0_i32, %c0_i32_0 : i32, i32
  }
  func.func @transform_1(%arg0: i32) -> (i32, i32) {
    %c0_i32 = arith.constant 0 : i32
    %c0_i32_0 = arith.constant 0 : i32
    return %c0_i32, %arg0 : i32, i32
  }
  func.func @transform_2(%arg0: i32) -> (i32, i32) {
    %c0_i32 = arith.constant 0 : i32
    %c0_i32_0 = arith.constant 0 : i32
    return %c0_i32, %arg0 : i32, i32
  }
  func.func @transform_3(%arg0: i32) -> (i32, i32) {
    %c0_i32 = arith.constant 0 : i32
    %c0_i32_0 = arith.constant 0 : i32
    return %c0_i32, %arg0 : i32, i32
  }
  func.func @transform_4(%arg0: i32) -> (i32, i32) {
    %c0_i32 = arith.constant 0 : i32
    %c0_i32_0 = arith.constant 0 : i32
    return %c0_i32, %arg0 : i32, i32
  }
}

module attributes {stable_mosaic.version = 11 : i64} {
  func.func @layer23_kernel(%arg0: i32, %arg1: memref<8x1536xbf16, #tpu.memory_space<vmem>>, %arg2: memref<1536x512xbf16, #tpu.memory_space<vmem>>, %arg3: memref<1x512xf32, #tpu.memory_space<vmem>>, %arg4: memref<1x512xf32, #tpu.memory_space<vmem>>, %arg5: memref<512x128xbf16, #tpu.memory_space<vmem>>, %arg6: memref<1x128xf32, #tpu.memory_space<vmem>>, %arg7: memref<8x128xf32, #tpu.memory_space<vmem>>, %arg8: memref<8x128xf32, #tpu.memory_space<vmem>>) attributes {dimension_semantics = [#tpu.dimension_semantics<arbitrary>], iteration_bounds = array<i64: 3>, scalar_prefetch = 0 : i64, scratch_operands = 1 : i64, tpu.core_type = #tpu.core_type<tc>, window_params = [{pipeline_mode = #tpu.pipeline_mode<synchronous>, transform_indices = @transform_0, window_bounds = array<i64: 8, 1536>}, {transform_indices = @transform_1, window_bounds = array<i64: 1536, 512>}, {transform_indices = @transform_2, window_bounds = array<i64: 1, 512>}, {transform_indices = @transform_3, window_bounds = array<i64: 1, 512>}, {transform_indices = @transform_4, window_bounds = array<i64: 512, 128>}, {pipeline_mode = #tpu.pipeline_mode<synchronous>, transform_indices = @transform_5, window_bounds = array<i64: 1, 128>}, {pipeline_mode = #tpu.pipeline_mode<synchronous>, transform_indices = @transform_6, window_bounds = array<i64: 8, 128>}]} {
    %c0_i32 = arith.constant 0 : i32
    %0 = arith.cmpi eq, %arg0, %c0_i32 : i32
    %1 = arith.extui %0 : i1 to i32
    %c0_i32_0 = arith.constant 0 : i32
    %2 = arith.cmpi ne, %1, %c0_i32_0 : i32
    scf.if %2 {
      %cst_22 = arith.constant 0.000000e+00 : f32
      %41 = vector.broadcast %cst_22 : f32 to vector<8x128xf32>
      %c0_23 = arith.constant 0 : index
      %c0_24 = arith.constant 0 : index
      %42 = vector.load %arg8[%c0_23, %c0_24] : memref<8x128xf32, #tpu.memory_space<vmem>>, vector<8x128xf32>
      tpu.vector_store %arg8[%c0_23, %c0_24], %41 {strides = array<i32>} : memref<8x128xf32, #tpu.memory_space<vmem>>, vector<8x128xf32>,
    } else {
    }
    %c0 = arith.constant 0 : index
    %c0_1 = arith.constant 0 : index
    %3 = vector.load %arg1[%c0, %c0_1] : memref<8x1536xbf16, #tpu.memory_space<vmem>>, vector<8x1536xbf16>
    %c0_2 = arith.constant 0 : index
    %c0_3 = arith.constant 0 : index
    %4 = vector.load %arg2[%c0_2, %c0_3] : memref<1536x512xbf16, #tpu.memory_space<vmem>>, vector<1536x512xbf16>
    %cst = arith.constant dense<0.000000e+00> : vector<8x512xf32>
    %5 = tpu.matmul %3, %4, %cst {dimension_numbers = #tpu.dot_dimension_numbers<[1], [0], [0], [1], [0, 0, 1, 1], [], []>} : vector<8x1536xbf16>, vector<1536x512xbf16>, vector<8x512xf32> -> vector<8x512xf32>
    %c0_4 = arith.constant 0 : index
    %c0_5 = arith.constant 0 : index
    %6 = vector.load %arg3[%c0_4, %c0_5] : memref<1x512xf32, #tpu.memory_space<vmem>>, vector<1x512xf32>
    %c0_6 = arith.constant 0 : index
    %c0_7 = arith.constant 0 : index
    %7 = vector.load %arg4[%c0_6, %c0_7] : memref<1x512xf32, #tpu.memory_space<vmem>>, vector<1x512xf32>
    %cst_8 = arith.constant dense<0.000000e+00> : vector<512xf32>
    %8 = vector.multi_reduction <add>, %5, %cst_8 [0] : vector<8x512xf32> to vector<512xf32>
    %9 = vector.shape_cast %8 : vector<512xf32> to vector<1x512xf32>
    %cst_9 = arith.constant 8.000000e+00 : f32
    %10 = vector.broadcast %cst_9 : f32 to vector<1x512xf32>
    %11 = arith.divf %9, %10 : vector<1x512xf32>
    %12 = vector.broadcast %11 : vector<1x512xf32> to vector<8x512xf32>
    %13 = arith.subf %5, %12 : vector<8x512xf32>
    %14 = arith.mulf %13, %13 : vector<8x512xf32>
    %cst_10 = arith.constant dense<0.000000e+00> : vector<512xf32>
    %15 = vector.multi_reduction <add>, %14, %cst_10 [0] : vector<8x512xf32> to vector<512xf32>
    %16 = vector.shape_cast %15 : vector<512xf32> to vector<1x512xf32>
    %cst_11 = arith.constant 8.000000e+00 : f32
    %17 = vector.broadcast %cst_11 : f32 to vector<1x512xf32>
    %18 = arith.divf %16, %17 : vector<1x512xf32>
    %19 = vector.broadcast %11 : vector<1x512xf32> to vector<8x512xf32>
    %20 = arith.subf %5, %19 : vector<8x512xf32>
    %cst_12 = arith.constant 9.99999974E-6 : f32
    %21 = vector.broadcast %cst_12 : f32 to vector<1x512xf32>
    %22 = arith.addf %18, %21 : vector<1x512xf32>
    %23 = math.rsqrt %22 : vector<1x512xf32>
    %24 = vector.broadcast %23 : vector<1x512xf32> to vector<8x512xf32>
    %25 = arith.mulf %20, %24 : vector<8x512xf32>
    %26 = vector.broadcast %6 : vector<1x512xf32> to vector<8x512xf32>
    %27 = arith.mulf %25, %26 : vector<8x512xf32>
    %28 = vector.broadcast %7 : vector<1x512xf32> to vector<8x512xf32>
    %29 = arith.addf %27, %28 : vector<8x512xf32>
    %cst_13 = arith.constant 0.000000e+00 : f32
    %30 = vector.broadcast %cst_13 : f32 to vector<8x512xf32>
    %31 = arith.maximumf %29, %30 : vector<8x512xf32>
    %c0_14 = arith.constant 0 : index
    %c0_15 = arith.constant 0 : index
    %32 = vector.load %arg8[%c0_14, %c0_15] : memref<8x128xf32, #tpu.memory_space<vmem>>, vector<8x128xf32>
    %33 = arith.truncf %31 : vector<8x512xf32> to vector<8x512xbf16>
    %c0_16 = arith.constant 0 : index
    %c0_17 = arith.constant 0 : index
    %34 = vector.load %arg5[%c0_16, %c0_17] : memref<512x128xbf16, #tpu.memory_space<vmem>>, vector<512x128xbf16>
    %cst_18 = arith.constant dense<0.000000e+00> : vector<8x128xf32>
    %35 = tpu.matmul %33, %34, %cst_18 {dimension_numbers = #tpu.dot_dimension_numbers<[1], [0], [0], [1], [0, 0, 1, 1], [], []>} : vector<8x512xbf16>, vector<512x128xbf16>, vector<8x128xf32> -> vector<8x128xf32>
    %36 = arith.addf %32, %35 : vector<8x128xf32>
    %c0_19 = arith.constant 0 : index
    %c0_20 = arith.constant 0 : index
    %37 = vector.load %arg8[%c0_19, %c0_20] : memref<8x128xf32, #tpu.memory_space<vmem>>, vector<8x128xf32>
    tpu.vector_store %arg8[%c0_19, %c0_20], %36 {strides = array<i32>} : memref<8x128xf32, #tpu.memory_space<vmem>>, vector<8x128xf32>,
    %c2_i32 = arith.constant 2 : i32
    %38 = arith.cmpi eq, %arg0, %c2_i32 : i32
    %39 = arith.extui %38 : i1 to i32
    %c0_i32_21 = arith.constant 0 : i32
    %40 = arith.cmpi ne, %39, %c0_i32_21 : i32
    scf.if %40 {
      %c0_22 = arith.constant 0 : index
      %c0_23 = arith.constant 0 : index
      %41 = vector.load %arg8[%c0_22, %c0_23] : memref<8x128xf32, #tpu.memory_space<vmem>>, vector<8x128xf32>
      %c0_24 = arith.constant 0 : index
      %c0_25 = arith.constant 0 : index
      %42 = vector.load %arg6[%c0_24, %c0_25] : memref<1x128xf32, #tpu.memory_space<vmem>>, vector<1x128xf32>
      %43 = vector.broadcast %42 : vector<1x128xf32> to vector<8x128xf32>
      %44 = arith.addf %41, %43 : vector<8x128xf32>
      %cst_26 = arith.constant dense<0xFF800000> : vector<128xf32>
      %45 = vector.multi_reduction <maximumf>, %44, %cst_26 [0] : vector<8x128xf32> to vector<128xf32>
      %46 = vector.shape_cast %45 : vector<128xf32> to vector<1x128xf32>
      %47 = vector.broadcast %46 : vector<1x128xf32> to vector<8x128xf32>
      %48 = arith.subf %44, %47 : vector<8x128xf32>
      %49 = math.exp %48 : vector<8x128xf32>
      %cst_27 = arith.constant dense<0.000000e+00> : vector<128xf32>
      %50 = vector.multi_reduction <add>, %49, %cst_27 [0] : vector<8x128xf32> to vector<128xf32>
      %51 = vector.shape_cast %50 : vector<128xf32> to vector<1x128xf32>
      %52 = math.log %51 : vector<1x128xf32>
      %53 = vector.broadcast %52 : vector<1x128xf32> to vector<8x128xf32>
      %54 = arith.subf %48, %53 : vector<8x128xf32>
      %c0_28 = arith.constant 0 : index
      %c0_29 = arith.constant 0 : index
      %55 = vector.load %arg7[%c0_28, %c0_29] : memref<8x128xf32, #tpu.memory_space<vmem>>, vector<8x128xf32>
      tpu.vector_store %arg7[%c0_28, %c0_29], %54 {strides = array<i32>} : memref<8x128xf32, #tpu.memory_space<vmem>>, vector<8x128xf32>,
    } else {
    }
    return
  }
  func.func @transform_0(%arg0: i32) -> (i32, i32) {
    %c0_i32 = arith.constant 0 : i32
    %c0_i32_0 = arith.constant 0 : i32
    %c0_i32_1 = arith.constant 0 : i32
    return %c0_i32, %c0_i32_0 : i32, i32
  }
  func.func @transform_1(%arg0: i32) -> (i32, i32) {
    %c0_i32 = arith.constant 0 : i32
    %c0_i32_0 = arith.constant 0 : i32
    return %c0_i32, %arg0 : i32, i32
  }
  func.func @transform_2(%arg0: i32) -> (i32, i32) {
    %c0_i32 = arith.constant 0 : i32
    %c0_i32_0 = arith.constant 0 : i32
    return %c0_i32, %arg0 : i32, i32
  }
  func.func @transform_3(%arg0: i32) -> (i32, i32) {
    %c0_i32 = arith.constant 0 : i32
    %c0_i32_0 = arith.constant 0 : i32
    return %c0_i32, %arg0 : i32, i32
  }
  func.func @transform_4(%arg0: i32) -> (i32, i32) {
    %c0_i32 = arith.constant 0 : i32
    %c0_i32_0 = arith.constant 0 : i32
    return %arg0, %c0_i32 : i32, i32
  }
  func.func @transform_5(%arg0: i32) -> (i32, i32) {
    %c0_i32 = arith.constant 0 : i32
    %c0_i32_0 = arith.constant 0 : i32
    %c0_i32_1 = arith.constant 0 : i32
    return %c0_i32, %c0_i32_0 : i32, i32
  }
  func.func @transform_6(%arg0: i32) -> (i32, i32) {
    %c0_i32 = arith.constant 0 : i32
    %c0_i32_0 = arith.constant 0 : i32
    %c0_i32_1 = arith.constant 0 : i32
    return %c0_i32, %c0_i32_0 : i32, i32
  }
}

</mosaic_0001>

<bundles_post_ra>
// kernel: network_forward.2
= control target key start
LH: loop header
LB: loop body
LE: loop exit
PB: predicated region body
PF: predicated region fallthrough
CT: control target
= control target key end

     0   :  { %9 = vsyncpa [#allocation3], 0  ;;  %s7211_s0 = inlined_call_operand.vmem [shape: bf16[8,2176], index: 0, kind: input, shape index: {}]   ;;  %s7212_s1 = inlined_call_operand.hbm [shape: bf16[2176,1536], index: 1, kind: input, shape index: {}]   ;;  %s7213_s2 = inlined_call_operand.hbm [shape: f32[1,1536], index: 2, kind: input, shape index: {}]   ;;  %s7214_s3 = inlined_call_operand.hbm [shape: f32[1,1536], index: 3, kind: input, shape index: {}]   ;;  %s7215_s4 = inlined_call_operand.vmem [shape: bf16[8,1536], index: 4, kind: output, shape index: {}]  }
   0x1   :  { %11 = vsyncpa [#allocation3 + $0x1], 0 }
   0x2   :  { %12 = vsyncpa [#allocation5], 0 }
   0x3   :  { %14 = vsyncpa [#allocation5 + $0x1], 0  ;;  %s6268_s15 = smov 0   ;;  %s6270_s16 = smov 0  }
   0x4   :  { %s6272_s17 = smov 0   ;;  %s6274_s18 = smov 0  }
   0x5 LB: > { %s6287_s19 = sadd.s32 4294967295, %s6234_s18   ;;  %s6290_s20 = sadd.s32 1, %s6234_s18   ;;  %s6234_s18 = sphi %s6274_s18, %s7227_s18   ;;  %s6230_s17 = sphi %s6272_s17, %s7226_s17   ;;  %s6226_s16 = sphi %s6270_s16, %s7225_s16   ;;  %s6222_s15 = sphi %s6268_s15, %s7224_s15  }
   0x6   : > { %s45_s21 = ssub.s32 %s6234_s18, %s6290_s20  ;;  %s48_s22 = sadd.s32 1, %s6230_s17 }
   0x7   : > { %p46_p0 = scmp.eq.s32.totalorder %s45_s21, 0  ;;  %p55_p1 = scmp.ne.s32.totalorder %s6230_s17, %s6226_s16 }
   0x8   : > { %p56_p2 = scmp.eq.s32.totalorder %s6234_s18, 0  ;;  %p61_p3 = scmp.ne.s32.totalorder %s6226_s16, %s6222_s15 }
   0x9   : > { %s6300_s23 = scalar_select %p46_p0, %s6230_s17, %s48_s22  }
   0xa   : > { %p57_p4 = por %p56_p2, %p55_p1  ;;  %p62_p5 = scmp.eq.s32.totalorder %s6287_s19, 0 }
   0xb   : > { %p5233_p6 = scmp.lt.s32.totalorder %s6234_s18, 3  ;;  %s6309_s25 = sand.u32 1, %s6230_s17  }
   0xc   : > { %p6304_p7 = por %p62_p5, %p61_p3  ;;  %s5215_s26 = smul.u32 4352, %s6309_s25 }
   0xd   : > { %p6312_p8 = pnand %p5233_p6, %p57_p4  ;;  %s187_s28 = sand.u32 1, %s6234_s18  }
   0xe   : > { %s7217_s24 = scalar_select %p6304_p7, 1, 0 }
   0xf   : > { %s170_s29 = scalar_lea.vmem [#allocation2], %s5215_s26  ;;  %s4634_s5 = sshll.u32 %s6309_s25, 2 }
  0x10   : > { %s177_s30 = sshll.u32 %s170_s29, 4  ;;  %s5211_s6 = sshll.u32 %s6234_s18, 6  ;;  %s6317_s30 = int_to_ptr.vmem [resolvable:$true] %s177_s30 }
  0x11   : > { %s6326_s9 = scalar_lea.hbm %s7213_s2, %s5211_s6  ;;  %s191_s10 = scalar_lea.vmem [#allocation4], %s4634_s5 }
  0x12   : > { %s199_s11 = sshll.u32 %s191_s10, 4  ;;  %s6330_s12 = scalar_lea.sflag [#allocation5], %s187_s28  ;;  %s200_s11 = int_to_ptr.vmem [resolvable:$true] %s199_s11 }
  0x13   : > { %s6112_s13 = scalar_lea.hbm %s6326_s9, 64  ;;  %p6336_p10 = pneg %p6312_p8 }
  0x14   : > { %p6113_p9 = scmp.ne.s32.totalorder %s6326_s9, %s6112_s13  ;;  %s6117_s22 = scalar_lea.hbm %s7213_s2, 192 }
  0x15   : > { %p6118_p13 = scmp.lt.s32.totalorder %s6326_s9, %s7213_s2  ;;  %p6119_p0 = scmp.lt.s32.totalorder %s6117_s22, %s6112_s13 }
  0x16   : > { %p6115_p11 = pnand %p6336_p10, %p6113_p9 }
  0x17   : > { %p6120_p1 = por %p6119_p0, %p6118_p13 }
  0x18   : > { %p6116_p12 = pneg %p6115_p11 }
  0x1a   : > { %p6121_p2 = pnand %p6120_p1, %p6116_p12 }
  0x1c   : > { %6124 = shalt.err (!%p6121_p2)
}
  0x1d   : > { %s6125_s28 = scalar_lea.vmem %s200_s11, 64  ;;  %s6236_s7 = smov [#allocation4]  }
  0x1e   : > { %p6126_p3 = scmp.ne.s32.totalorder %s200_s11, %s6125_s28  ;;  %s6130_s8 = sshll.u32 %s6236_s7, 4  ;;  %s6131_s8 = int_to_ptr.vmem [resolvable:$false] %s6130_s8 }
  0x1f   : > { %s6132_s10 = scalar_lea.vmem %s6131_s8, 128  ;;  %p6133_p6 = scmp.lt.s32.totalorder %s200_s11, %s6131_s8 }
  0x20   : > { %p6128_p4 = pnand %p6126_p3, %p6336_p10  ;;  %p6134_p9 = scmp.lt.s32.totalorder %s6132_s10, %s6125_s28 }
  0x22   : > { %p6129_p5 = pneg %p6128_p4  ;;  %p6135_p11 = por %p6134_p9, %p6133_p6 }
  0x24   : > { %p6136_p7 = pnand %p6135_p11, %p6129_p5 }
  0x26   : > { %6139 = shalt.err (!%p6136_p7)
}
  0x27   : > { %5229 = dma.hbm_to_vmem [thread:$0]  (!%p6312_p8), %s6326_s9, 64, %s200_s11, %s6330_s12  }
  0x28   : > { %s6360_s21 = scalar_lea.hbm %s7214_s3, %s5211_s6  ;;  %p4640_p12 = scmp.ge.s32.totalorder %s6234_s18, 1 }
  0x29   : > { %p223_p7 = scmp.lt.s32.totalorder %s6234_s18, 4  ;;  %s5210_s22 = sshll.u32 %s6234_s18, 8 }
  0x2a   : > { %s6368_s28 = scalar_lea.hbm %s7212_s1, %s5210_s22  ;;  %s6376_s9 = scalar_lea.vmem [#allocation6], %s4634_s5 }
  0x2b   : > { %p6370_p13 = pnand %p4640_p12, %p223_p7  ;;  %s218_s6 = sshll.u32 %s6376_s9, 4  ;;  %s219_s6 = int_to_ptr.vmem [resolvable:$true] %s218_s6 }
  0x2c   : > { %s167_s11 = scalar_lea.sflag [#allocation3], %s6309_s25  ;;  %s6140_s8 = scalar_lea.hbm %s6368_s28, 69632 }
  0x2d   : > { %s7220_s7 = scalar_select %p6370_p13, 1, 0 }
  0x2e   : > { %p6141_p0 = scmp.ne.s32.totalorder %s6368_s28, %s6140_s8  ;;  %s6145_s13 = scalar_lea.hbm %s7212_s1, 208896 }
  0x2f   : > { %p6146_p3 = scmp.lt.s32.totalorder %s6368_s28, %s7212_s1  ;;  %p6147_p4 = scmp.lt.s32.totalorder %s6145_s13, %s6140_s8 }
  0x30   : > { %p6143_p1 = pnand %p6141_p0, %p6336_p10 }
  0x31   : > { %p6148_p5 = por %p6147_p4, %p6146_p3 }
  0x32   : > { %p6144_p2 = pneg %p6143_p1 }
  0x34   : > { %p6149_p6 = pnand %p6148_p5, %p6144_p2 }
  0x36   : > { %6152 = shalt.err (!%p6149_p6)
}
  0x37   : > { %s6153_s5 = scalar_lea.vmem %s6317_s30, 69632  ;;  %s6237_s26 = smov [#allocation2]  }
  0x38   : > { %p6154_p9 = scmp.ne.s32.totalorder %s6317_s30, %s6153_s5  ;;  %s6158_s29 = sshll.u32 %s6237_s26, 4  ;;  %s6159_s29 = int_to_ptr.vmem [resolvable:$false] %s6158_s29 }
  0x39   : > { %s6160_s18 = scalar_lea.vmem %s6159_s29, 139264  ;;  %p6161_p7 = scmp.lt.s32.totalorder %s6317_s30, %s6159_s29 }
  0x3a   : > { %p6156_p11 = pnand %p6154_p9, %p6336_p10  ;;  %p6162_p0 = scmp.lt.s32.totalorder %s6160_s18, %s6153_s5 }
  0x3c   : > { %p6157_p12 = pneg %p6156_p11  ;;  %p6163_p1 = por %p6162_p0, %p6161_p7 }
  0x3e   : > { %p6164_p13 = pnand %p6163_p1, %p6157_p12 }
  0x40   : > { %6167 = shalt.err (!%p6164_p13)
}
  0x41   : > { %s6238_s8 = smov 768   ;;  %s6239_s10 = smov 256  }
  0x42   : > { %s6240_s13 = smov 16   ;;  %s6168_s15 = scalar_lea.hbm %s6360_s21, 64 }
  0x43   : > { %5226 = dma.hbm_to_vmem [thread:$0]  (!%p6312_p8), %s6368_s28, 69632, %s6317_s30, %s167_s11, %s6238_s8, %s6239_s10, %s6240_s13  }
  0x44   : > { %p6169_p2 = scmp.ne.s32.totalorder %s6360_s21, %s6168_s15  ;;  %s6173_s26 = scalar_lea.hbm %s7214_s3, 192 }
  0x45   : > { %p6174_p4 = scmp.lt.s32.totalorder %s6360_s21, %s7214_s3  ;;  %p6175_p5 = scmp.lt.s32.totalorder %s6173_s26, %s6168_s15 }
  0x46   : > { %p6171_p13 = pnand %p6169_p2, %p6336_p10 }
  0x47   : > { %p6176_p6 = por %p6175_p5, %p6174_p4 }
  0x48   : > { %p6172_p3 = pneg %p6171_p13 }
  0x4a   : > { %p6177_p9 = pnand %p6176_p6, %p6172_p3 }
  0x4c   : > { %6180 = shalt.err (!%p6177_p9)
}
  0x4d   : > { %s6181_s25 = scalar_lea.vmem %s219_s6, 64  ;;  %s6241_s30 = smov [#allocation6]  }
  0x4e   : > { %p6182_p11 = scmp.ne.s32.totalorder %s219_s6, %s6181_s25  ;;  %s6186_s28 = sshll.u32 %s6241_s30, 4  ;;  %s6187_s28 = int_to_ptr.vmem [resolvable:$false] %s6186_s28 }
  0x4f   : > { %s6188_s9 = scalar_lea.vmem %s6187_s28, 128  ;;  %p6189_p0 = scmp.lt.s32.totalorder %s219_s6, %s6187_s28 }
  0x50   : > { %p6184_p12 = pnand %p6182_p11, %p6336_p10  ;;  %p6190_p1 = scmp.lt.s32.totalorder %s6188_s9, %s6181_s25 }
  0x52   : > { %p6185_p7 = pneg %p6184_p12  ;;  %p6191_p2 = por %p6190_p1, %p6189_p0 }
  0x54   : > { %p6192_p13 = pnand %p6191_p2, %p6185_p7 }
  0x56   : > { %6195 = shalt.err (!%p6192_p13)
}
  0x57   : > { %5232 = dma.hbm_to_vmem [thread:$0]  (!%p6312_p8), %s6360_s21, 64, %s219_s6, %s6330_s12  }
  0x58   : > { %p7221_p3 = scmp.ne.s32.totalorder %s7220_s7, 0 }
  0x59   : > { %s6424_s14 = sand.u32 (!%p7221_p3), 1, %s6226_s16   ;;  %p7222_p10 = scmp.ne.s32.totalorder (!%p7221_p3), %s7217_s24, 0 }
  0x5a   : > { %227 = sbr.rel (%p7221_p3) target bundleno = 902 (0x386), region = 36  ;;  %s230_s8 = scalar_lea.sflag (!%p7221_p3), [#allocation3], %s6424_s14 }
  0x5b   : > { %s5216_s11 = smul.u32 (!%p7221_p3), 4352, %s6424_s14 }
  0x5d   : > { %s6428_s10 = scalar_lea.vmem (!%p7221_p3), [#allocation2], %s5216_s11 }
  0x5f   : > { %6213 = dma.done.wait (%p7222_p10), %s230_s8, 69632  }
  0x60   : > { %6215 = vsyncadd (%p7222_p10), %s230_s8, 4294897664  ;;  %s238_s27 = sand.u32 1, %s6287_s19   ;;  %s4641_s12 = sshll.u32 %s6424_s14, 2 }
  0x61   : > { %s239_s21 = scalar_lea.sflag [#allocation5], %s238_s27  ;;  %s6438_s7 = scalar_lea.vmem [#allocation4], %s4641_s12 }
  0x62   : > { %6217 = dma.done.wait (%p7222_p10), %s239_s21, 128  }
  0x63   : > { %6219 = vsyncadd (%p7222_p10), %s239_s21, 4294967168  ;;  %v5270_v0 = vld [vmem:[%s6428_s10 + $0xe4] ss:$16 sps:$4 sm:$0xff]   ;;  %v5274_v2 = vld [vmem:[%s6428_s10 + $0xe0] ss:$16 sps:$4 sm:$0xff]   ;;  %s4643_s6 = sshll.u32 %s6287_s19, 2 }
  0x64   : > { %v5272_v1 = vld [vmem:[%s6428_s10 + $0x2e4] ss:$16 sps:$4 sm:$0xff]   ;;  %3629 = vmatprep.subr.bf16.mxu0 %v5270_v0  ;;  %v5275_v3 = vld [vmem:[%s6428_s10 + $0x2e0] ss:$16 sps:$4 sm:$0xff]   ;;  %v297_v48 = vld [vmem:[%s7211_s0 + $0x8] sm:$0xff]  ;;  %p7158_p8 = scmp.lt.s32.totalorder %s4643_s6, 11 }
  0x65   : > { %3670 = vmatprep.subr.bf16.mxu1 %v5272_v1  ;;  %v5276_v4 = vld [vmem:[%s6428_s10 + $0xc4] ss:$16 sps:$4 sm:$0xff]   ;;  %3630 = vmatpush1.bf16.msra.mxu0 %v5274_v2  ;;  %v5280_v6 = vld [vmem:[%s6428_s10 + $0xc0] ss:$16 sps:$4 sm:$0xff]   ;;  %v6500_v51 = vcombine.high %v297_v48, %v297_v48 }
  0x66   : > { %3671 = vmatpush1.bf16.msra.mxu1 %v5275_v3  ;;  %v5278_v5 = vld [vmem:[%s6428_s10 + $0x2c4] ss:$16 sps:$4 sm:$0xff]   ;;  %3631 = vmatprep.subr.bf16.mxu0 %v5276_v4  ;;  %v5281_v7 = vld [vmem:[%s6428_s10 + $0x2c0] ss:$16 sps:$4 sm:$0xff]   ;;  %s7229_s6 = smov (!%p7158_p8, %s4643_s6), 11 }
  0x67   : > { %3672 = vmatprep.subr.bf16.mxu1 %v5278_v5  ;;  %v5282_v8 = vld [vmem:[%s6428_s10 + $0xa4] ss:$16 sps:$4 sm:$0xff]   ;;  %v5286_v10 = vld [vmem:[%s6428_s10 + $0xa0] ss:$16 sps:$4 sm:$0xff]   ;;  %3702 = vmatprep.mubr.bf16.mxu1 %v6500_v51  ;;  %s4644_s19 = sshll.u32 %s7229_s6, 2 }
  0x68   : > { %v5284_v9 = vld [vmem:[%s6428_s10 + $0x2a4] ss:$16 sps:$4 sm:$0xff]   ;;  %v5287_v11 = vld [vmem:[%s6428_s10 + $0x2a0] ss:$16 sps:$4 sm:$0xff]   ;;  %s7182_s15 = scalar_lea.vmem %s7215_s4, %s4644_s19 }
  0x69   : > { %3632 = vmatpush1.bf16.msra.mxu0 %v5280_v6  ;;  %v5288_v12 = vld [vmem:[%s6428_s10 + $0x84] ss:$16 sps:$4 sm:$0xff]   ;;  %v5292_v14 = vld [vmem:[%s6428_s10 + $0x80] ss:$16 sps:$4 sm:$0xff]  }
  0x6a   : > { %3673 = vmatpush1.bf16.msra.mxu1 %v5281_v7  ;;  %3633 = vmatprep.subr.bf16.mxu0 %v5282_v8  ;;  %v5290_v13 = vld [vmem:[%s6428_s10 + $0x284] ss:$16 sps:$4 sm:$0xff]   ;;  %v5293_v15 = vld [vmem:[%s6428_s10 + $0x280] ss:$16 sps:$4 sm:$0xff]   ;;  %v6524_v7 = vcombine.low %v297_v48, %v297_v48 }
  0x6b   : > { %3674 = vmatprep.subr.bf16.mxu1 %v5284_v9  ;;  %v5294_v16 = vld [vmem:[%s6428_s10 + $0x64] ss:$16 sps:$4 sm:$0xff]   ;;  %v5298_v18 = vld [vmem:[%s6428_s10 + $0x60] ss:$16 sps:$4 sm:$0xff]  }
  0x6c   : > { %v5296_v17 = vld [vmem:[%s6428_s10 + $0x264] ss:$16 sps:$4 sm:$0xff]   ;;  %v5299_v19 = vld [vmem:[%s6428_s10 + $0x260] ss:$16 sps:$4 sm:$0xff]  }
  0x6d   : > { %3634 = vmatpush1.bf16.msra.mxu0 %v5286_v10  ;;  %v5300_v20 = vld [vmem:[%s6428_s10 + $0x44] ss:$16 sps:$4 sm:$0xff]   ;;  %v5304_v22 = vld [vmem:[%s6428_s10 + $0x40] ss:$16 sps:$4 sm:$0xff]  }
  0x6e   : > { %3675 = vmatpush1.bf16.msra.mxu1 %v5287_v11  ;;  %3635 = vmatprep.subr.bf16.mxu0 %v5288_v12  ;;  %v5302_v21 = vld [vmem:[%s6428_s10 + $0x244] ss:$16 sps:$4 sm:$0xff]   ;;  %v5305_v23 = vld [vmem:[%s6428_s10 + $0x240] ss:$16 sps:$4 sm:$0xff]  }
  0x6f   : > { %3676 = vmatprep.subr.bf16.mxu1 %v5290_v13  ;;  %v5306_v24 = vld [vmem:[%s6428_s10 + $0x24] ss:$16 sps:$4 sm:$0xff]   ;;  %v5310_v26 = vld [vmem:[%s6428_s10 + $0x20] ss:$16 sps:$4 sm:$0xff]  }
  0x70   : > { %v5308_v25 = vld [vmem:[%s6428_s10 + $0x224] ss:$16 sps:$4 sm:$0xff]   ;;  %v5311_v27 = vld [vmem:[%s6428_s10 + $0x220] ss:$16 sps:$4 sm:$0xff]  }
  0x71   : > { %3636 = vmatpush1.bf16.msra.mxu0 %v5292_v14  ;;  %v5312_v28 = vld [vmem:[%s6428_s10 + $0x4] ss:$16 sps:$4 sm:$0xff]   ;;  %v5316_v30 = vld [vmem:[%s6428_s10] ss:$16 sps:$4 sm:$0xff]  }
  0x72   : > { %3677 = vmatpush1.bf16.msra.mxu1 %v5293_v15  ;;  %3637 = vmatprep.subr.bf16.mxu0 %v5294_v16  ;;  %v5314_v29 = vld [vmem:[%s6428_s10 + $0x204] ss:$16 sps:$4 sm:$0xff]   ;;  %v5317_v31 = vld [vmem:[%s6428_s10 + $0x200] ss:$16 sps:$4 sm:$0xff]  }
  0x73   : > { %3678 = vmatprep.subr.bf16.mxu1 %v5296_v17  ;;  %v5318_v32 = vld [vmem:[%s6428_s10 + $0x1e4] ss:$16 sps:$4 sm:$0xff]   ;;  %v5322_v34 = vld [vmem:[%s6428_s10 + $0x1e0] ss:$16 sps:$4 sm:$0xff]  }
  0x74   : > { %v5320_v33 = vld [vmem:[%s6428_s10 + $0x3e4] ss:$16 sps:$4 sm:$0xff]   ;;  %v5323_v35 = vld [vmem:[%s6428_s10 + $0x3e0] ss:$16 sps:$4 sm:$0xff]  }
  0x75   : > { %3638 = vmatpush1.bf16.msra.mxu0 %v5298_v18  ;;  %v5324_v36 = vld [vmem:[%s6428_s10 + $0x1c4] ss:$16 sps:$4 sm:$0xff]   ;;  %v5328_v38 = vld [vmem:[%s6428_s10 + $0x1c0] ss:$16 sps:$4 sm:$0xff]  }
  0x76   : > { %3679 = vmatpush1.bf16.msra.mxu1 %v5299_v19  ;;  %3639 = vmatprep.subr.bf16.mxu0 %v5300_v20  ;;  %v5326_v37 = vld [vmem:[%s6428_s10 + $0x3c4] ss:$16 sps:$4 sm:$0xff]   ;;  %v5329_v39 = vld [vmem:[%s6428_s10 + $0x3c0] ss:$16 sps:$4 sm:$0xff]  }
  0x77   : > { %3680 = vmatprep.subr.bf16.mxu1 %v5302_v21  ;;  %v5330_v40 = vld [vmem:[%s6428_s10 + $0x1a4] ss:$16 sps:$4 sm:$0xff]   ;;  %v5334_v42 = vld [vmem:[%s6428_s10 + $0x1a0] ss:$16 sps:$4 sm:$0xff]  }
  0x78   : > { %v5332_v41 = vld [vmem:[%s6428_s10 + $0x3a4] ss:$16 sps:$4 sm:$0xff]   ;;  %v5335_v43 = vld [vmem:[%s6428_s10 + $0x3a0] ss:$16 sps:$4 sm:$0xff]  }
  0x79   : > { %3640 = vmatpush1.bf16.msra.mxu0 %v5304_v22  ;;  %v5336_v44 = vld [vmem:[%s6428_s10 + $0x184] ss:$16 sps:$4 sm:$0xff]   ;;  %v5340_v49 = vld [vmem:[%s6428_s10 + $0x180] ss:$16 sps:$4 sm:$0xff]  }
  0x7a   : > { %3681 = vmatpush1.bf16.msra.mxu1 %v5305_v23  ;;  %3641 = vmatprep.subr.bf16.mxu0 %v5306_v24  ;;  %v5338_v45 = vld [vmem:[%s6428_s10 + $0x384] ss:$16 sps:$4 sm:$0xff]   ;;  %v5341_v50 = vld [vmem:[%s6428_s10 + $0x380] ss:$16 sps:$4 sm:$0xff]  }
  0x7b   : > { %3682 = vmatprep.subr.bf16.mxu1 %v5308_v25  ;;  %v296_v46 = vld [vmem:[%s7211_s0] sm:$0xff] }
  0x7c   : > { %v6493_v47 = vcombine.high %v296_v46, %v296_v46  ;;  %v5342_v52 = vld [vmem:[%s6428_s10 + $0x164] ss:$16 sps:$4 sm:$0xff]   ;;  %v5346_v54 = vld [vmem:[%s6428_s10 + $0x160] ss:$16 sps:$4 sm:$0xff]   ;;  %v6522_v6 = vcombine.low %v296_v46, %v296_v46 }
  0x7d   : > { %3642 = vmatpush1.bf16.msra.mxu0 %v5310_v26  ;;  %v5344_v53 = vld [vmem:[%s6428_s10 + $0x364] ss:$16 sps:$4 sm:$0xff]   ;;  %v5347_v55 = vld [vmem:[%s6428_s10 + $0x360] ss:$16 sps:$4 sm:$0xff]  }
  0x7e   : > { %3683 = vmatpush1.bf16.msra.mxu1 %v5311_v27  ;;  %3643 = vmatprep.subr.bf16.mxu0 %v5312_v28  ;;  %v5348_v56 = vld [vmem:[%s6428_s10 + $0x144] ss:$16 sps:$4 sm:$0xff]   ;;  %v5352_v58 = vld [vmem:[%s6428_s10 + $0x140] ss:$16 sps:$4 sm:$0xff]  }
  0x7f   : > { %3684 = vmatprep.subr.bf16.mxu1 %v5314_v29  ;;  %3661 = vmatprep.mubr.bf16.mxu0 %v6493_v47  ;;  %v5350_v57 = vld [vmem:[%s6428_s10 + $0x344] ss:$16 sps:$4 sm:$0xff]   ;;  %v5353_v59 = vld [vmem:[%s6428_s10 + $0x340] ss:$16 sps:$4 sm:$0xff]  }
  0x80   : > { %v5354_v60 = vld [vmem:[%s6428_s10 + $0x124] ss:$16 sps:$4 sm:$0xff]   ;;  %v5358_v62 = vld [vmem:[%s6428_s10 + $0x120] ss:$16 sps:$4 sm:$0xff]  }
  0x81   : > { %3644 = vmatpush1.bf16.msra.mxu0 %v5316_v30  ;;  %v5356_v61 = vld [vmem:[%s6428_s10 + $0x324] ss:$16 sps:$4 sm:$0xff]   ;;  %v5359_v63 = vld [vmem:[%s6428_s10 + $0x320] ss:$16 sps:$4 sm:$0xff]  }
  0x82   : > { %3685 = vmatpush1.bf16.msra.mxu1 %v5317_v31  ;;  %3645 = vmatprep.subr.bf16.mxu0 %v5318_v32  ;;  %v5360_v0 = vld [vmem:[%s6428_s10 + $0x104] ss:$16 sps:$4 sm:$0xff]   ;;  %v5364_v2 = vld [vmem:[%s6428_s10 + $0x100] ss:$16 sps:$4 sm:$0xff]  }
  0x83   : > { %3686 = vmatprep.subr.bf16.mxu1 %v5320_v33  ;;  %v5362_v1 = vld [vmem:[%s6428_s10 + $0x304] ss:$16 sps:$4 sm:$0xff]   ;;  %v5365_v3 = vld [vmem:[%s6428_s10 + $0x300] ss:$16 sps:$4 sm:$0xff]   ;;  %v6560_v33 = vld [vmem:[%s7211_s0 + $0x18] sm:$0xff] }
  0x84   : > { %v5372_v4 = vld [vmem:[%s6428_s10 + $0x4e4] ss:$16 sps:$4 sm:$0xff]   ;;  %v5370_v8 = vld [vmem:[%s6428_s10 + $0x4e0] ss:$16 sps:$4 sm:$0xff]  }
  0x85   : > { %3646 = vmatpush2.bf16.msra.mxu0 %v5322_v34  ;;  %v5375_v5 = vld [vmem:[%s6428_s10 + $0x6e4] ss:$16 sps:$4 sm:$0xff]   ;;  %v5373_v9 = vld [vmem:[%s6428_s10 + $0x6e0] ss:$16 sps:$4 sm:$0xff]  }
  0x86   : > { %3687 = vmatpush2.bf16.msra.mxu1 %v5323_v35  ;;  %3647 = vmatprep.subr.bf16.mxu0 %v5324_v36  ;;  %v5378_v10 = vld [vmem:[%s6428_s10 + $0x4c4] ss:$16 sps:$4 sm:$0xff]   ;;  %v5376_v12 = vld [vmem:[%s6428_s10 + $0x4c0] ss:$16 sps:$4 sm:$0xff]  }
  0x87   : > { %3688 = vmatprep.subr.bf16.mxu1 %v5326_v37  ;;  %v5381_v11 = vld [vmem:[%s6428_s10 + $0x6c4] ss:$16 sps:$4 sm:$0xff]   ;;  %v5379_v13 = vld [vmem:[%s6428_s10 + $0x6c0] ss:$16 sps:$4 sm:$0xff]   ;;  %v6570_v37 = vcombine.high %v6560_v33, %v6560_v33 }
  0x88   : > { %v5384_v14 = vld [vmem:[%s6428_s10 + $0x4a4] ss:$16 sps:$4 sm:$0xff]   ;;  %v5382_v16 = vld [vmem:[%s6428_s10 + $0x4a0] ss:$16 sps:$4 sm:$0xff]  }
  0x89   : > { %3648 = vmatpush2.bf16.msra.mxu0 %v5328_v38  ;;  %v5387_v15 = vld [vmem:[%s6428_s10 + $0x6a4] ss:$16 sps:$4 sm:$0xff]   ;;  %v5385_v17 = vld [vmem:[%s6428_s10 + $0x6a0] ss:$16 sps:$4 sm:$0xff]  }
  0x8a   : > { %3689 = vmatpush2.bf16.msra.mxu1 %v5329_v39  ;;  %3649 = vmatprep.subr.bf16.mxu0 %v5330_v40  ;;  %v5390_v18 = vld [vmem:[%s6428_s10 + $0x484] ss:$16 sps:$4 sm:$0xff]   ;;  %v5388_v20 = vld [vmem:[%s6428_s10 + $0x480] ss:$16 sps:$4 sm:$0xff]  }
  0x8b   : > { %3690 = vmatprep.subr.bf16.mxu1 %v5332_v41  ;;  %v5393_v19 = vld [vmem:[%s6428_s10 + $0x684] ss:$16 sps:$4 sm:$0xff]   ;;  %v5391_v21 = vld [vmem:[%s6428_s10 + $0x680] ss:$16 sps:$4 sm:$0xff]  }
  0x8c   : > { %v5396_v22 = vld [vmem:[%s6428_s10 + $0x464] ss:$16 sps:$4 sm:$0xff]   ;;  %v5394_v24 = vld [vmem:[%s6428_s10 + $0x460] ss:$16 sps:$4 sm:$0xff]  }
  0x8d   : > { %3650 = vmatpush2.bf16.msra.mxu0 %v5334_v42  ;;  %v5399_v23 = vld [vmem:[%s6428_s10 + $0x664] ss:$16 sps:$4 sm:$0xff]   ;;  %v5397_v25 = vld [vmem:[%s6428_s10 + $0x660] ss:$16 sps:$4 sm:$0xff]  }
  0x8e   : > { %3691 = vmatpush2.bf16.msra.mxu1 %v5335_v43  ;;  %3651 = vmatprep.subr.bf16.mxu0 %v5336_v44  ;;  %v5402_v26 = vld [vmem:[%s6428_s10 + $0x444] ss:$16 sps:$4 sm:$0xff]   ;;  %v5400_v28 = vld [vmem:[%s6428_s10 + $0x440] ss:$16 sps:$4 sm:$0xff]  }
  0x8f   : > { %3692 = vmatprep.subr.bf16.mxu1 %v5338_v45  ;;  %v5405_v27 = vld [vmem:[%s6428_s10 + $0x644] ss:$16 sps:$4 sm:$0xff]   ;;  %v5403_v29 = vld [vmem:[%s6428_s10 + $0x640] ss:$16 sps:$4 sm:$0xff]  }
  0x90   : > { %v5408_v30 = vld [vmem:[%s6428_s10 + $0x424] ss:$16 sps:$4 sm:$0xff]   ;;  %v5406_v34 = vld [vmem:[%s6428_s10 + $0x420] ss:$16 sps:$4 sm:$0xff]  }
  0x91   : > { %3652 = vmatpush2.bf16.msra.mxu0 %v5340_v49  ;;  %v5411_v31 = vld [vmem:[%s6428_s10 + $0x624] ss:$16 sps:$4 sm:$0xff]   ;;  %v5409_v35 = vld [vmem:[%s6428_s10 + $0x620] ss:$16 sps:$4 sm:$0xff]  }
  0x92   : > { %3693 = vmatpush2.bf16.msra.mxu1 %v5341_v50  ;;  %3653 = vmatprep.subr.bf16.mxu0 %v5342_v52  ;;  %v6555_v32 = vld [vmem:[%s7211_s0 + $0x10] sm:$0xff] }
  0x93   : > { %3694 = vmatprep.subr.bf16.mxu1 %v5344_v53  ;;  %v6566_v36 = vcombine.high %v6555_v32, %v6555_v32  ;;  %v5414_v38 = vld [vmem:[%s6428_s10 + $0x404] ss:$16 sps:$4 sm:$0xff]   ;;  %v5412_v40 = vld [vmem:[%s6428_s10 + $0x400] ss:$16 sps:$4 sm:$0xff]  }
  0x94   : > { %v5417_v39 = vld [vmem:[%s6428_s10 + $0x604] ss:$16 sps:$4 sm:$0xff]   ;;  %v5415_v41 = vld [vmem:[%s6428_s10 + $0x600] ss:$16 sps:$4 sm:$0xff]  }
  0x95   : > { %3654 = vmatpush2.bf16.msra.mxu0 %v5346_v54  ;;  %v5420_v42 = vld [vmem:[%s6428_s10 + $0x5e4] ss:$16 sps:$4 sm:$0xff]   ;;  %v5418_v44 = vld [vmem:[%s6428_s10 + $0x5e0] ss:$16 sps:$4 sm:$0xff]  }
  0x96   : > { %3695 = vmatpush2.bf16.msra.mxu1 %v5347_v55  ;;  %3655 = vmatprep.subr.bf16.mxu0 %v5348_v56  ;;  %v5423_v43 = vld [vmem:[%s6428_s10 + $0x7e4] ss:$16 sps:$4 sm:$0xff]   ;;  %v5421_v45 = vld [vmem:[%s6428_s10 + $0x7e0] ss:$16 sps:$4 sm:$0xff]  }
  0x97   : > { %3696 = vmatprep.subr.bf16.mxu1 %v5350_v57  ;;  %v5426_v46 = vld [vmem:[%s6428_s10 + $0x5c4] ss:$16 sps:$4 sm:$0xff]   ;;  %v5424_v49 = vld [vmem:[%s6428_s10 + $0x5c0] ss:$16 sps:$4 sm:$0xff]  }
  0x98   : > { %v5429_v48 = vld [vmem:[%s6428_s10 + $0x7c4] ss:$16 sps:$4 sm:$0xff]   ;;  %v5427_v50 = vld [vmem:[%s6428_s10 + $0x7c0] ss:$16 sps:$4 sm:$0xff]  }
  0x99   : > { %3656 = vmatpush2.bf16.msra.mxu0 %v5352_v58  ;;  %v5432_v52 = vld [vmem:[%s6428_s10 + $0x5a4] ss:$16 sps:$4 sm:$0xff]   ;;  %v5430_v54 = vld [vmem:[%s6428_s10 + $0x5a0] ss:$16 sps:$4 sm:$0xff]  }
  0x9a   : > { %3697 = vmatpush2.bf16.msra.mxu1 %v5353_v59  ;;  %3657 = vmatprep.subr.bf16.mxu0 %v5354_v60  ;;  %v5435_v53 = vld [vmem:[%s6428_s10 + $0x7a4] ss:$16 sps:$4 sm:$0xff]   ;;  %v5433_v55 = vld [vmem:[%s6428_s10 + $0x7a0] ss:$16 sps:$4 sm:$0xff]  }
  0x9b   : > { %3698 = vmatprep.subr.bf16.mxu1 %v5356_v61  ;;  %v5438_v56 = vld [vmem:[%s6428_s10 + $0x584] ss:$16 sps:$4 sm:$0xff]   ;;  %v5436_v58 = vld [vmem:[%s6428_s10 + $0x580] ss:$16 sps:$4 sm:$0xff]  }
  0x9c   : > { %v5441_v57 = vld [vmem:[%s6428_s10 + $0x784] ss:$16 sps:$4 sm:$0xff]   ;;  %v5439_v59 = vld [vmem:[%s6428_s10 + $0x780] ss:$16 sps:$4 sm:$0xff]  }
  0x9d   : > { %3658 = vmatpush2.bf16.msra.mxu0 %v5358_v62  ;;  %v5444_v60 = vld [vmem:[%s6428_s10 + $0x564] ss:$16 sps:$4 sm:$0xff]   ;;  %v5442_v62 = vld [vmem:[%s6428_s10 + $0x560] ss:$16 sps:$4 sm:$0xff]  }
  0x9e   : > { %3699 = vmatpush2.bf16.msra.mxu1 %v5359_v63  ;;  %3659 = vmatprep.subr.bf16.mxu0 %v5360_v0  ;;  %v5447_v61 = vld [vmem:[%s6428_s10 + $0x764] ss:$16 sps:$4 sm:$0xff]   ;;  %v5445_v63 = vld [vmem:[%s6428_s10 + $0x760] ss:$16 sps:$4 sm:$0xff]  }
  0x9f   : > { %3700 = vmatprep.subr.bf16.mxu1 %v5362_v1  ;;  %v5450_v0 = vld [vmem:[%s6428_s10 + $0x544] ss:$16 sps:$4 sm:$0xff]  }
  0xa0   : > { %v5453_v1 = vld [vmem:[%s6428_s10 + $0x744] ss:$16 sps:$4 sm:$0xff]  }
  0xa1   : > { %3660 = vmatpush2.bf16.msra.mxu0 %v5364_v2  ;;  %v5448_v2 = vld [vmem:[%s6428_s10 + $0x540] ss:$16 sps:$4 sm:$0xff]  }
  0xa2   : > { %3701 = vmatpush2.bf16.msra.mxu1 %v5365_v3  ;;  %3711 = vmatprep.subr.bf16.mxu0 %v5372_v4  ;;  %v5451_v3 = vld [vmem:[%s6428_s10 + $0x740] ss:$16 sps:$4 sm:$0xff]   ;;  %v5456_v4 = vld [vmem:[%s6428_s10 + $0x524] ss:$16 sps:$4 sm:$0xff]  }
  0xa3   : > { %3752 = vmatprep.subr.bf16.mxu1 %v5375_v5  ;;  %v5459_v5 = vld [vmem:[%s6428_s10 + $0x724] ss:$16 sps:$4 sm:$0xff]  }
  0xa4   : > { %3662 = vmatmul.mubr.bf16.vlgmr.msra.gmra.mxu0 %v6522_v6 }
  0xa5   : > { %3703 = vmatmul.mubr.bf16.vlgmr.msra.gmra.mxu1 %v6524_v7  ;;  %3712 = vmatpush1.bf16.msra.mxu0 %v5370_v8  ;;  %v5454_v8 = vld [vmem:[%s6428_s10 + $0x520] ss:$16 sps:$4 sm:$0xff]  }
  0xa6   : > { %3753 = vmatpush1.bf16.msra.mxu1 %v5373_v9  ;;  %3713 = vmatprep.subr.bf16.mxu0 %v5378_v10  ;;  %v5457_v9 = vld [vmem:[%s6428_s10 + $0x720] ss:$16 sps:$4 sm:$0xff]   ;;  %v5462_v10 = vld [vmem:[%s6428_s10 + $0x504] ss:$16 sps:$4 sm:$0xff]  }
  0xa7   : > { %3754 = vmatprep.subr.bf16.mxu1 %v5381_v11  ;;  %3743 = vmatprep.mubr.bf16.mxu0 %v6566_v36  ;;  %v5465_v11 = vld [vmem:[%s6428_s10 + $0x704] ss:$16 sps:$4 sm:$0xff]  }
  0xa8   : > { %3784 = vmatprep.mubr.bf16.mxu1 %v6570_v37 }
  0xa9   : > { %3714 = vmatpush1.bf16.msra.mxu0 %v5376_v12  ;;  %v5460_v12 = vld [vmem:[%s6428_s10 + $0x500] ss:$16 sps:$4 sm:$0xff]  }
  0xaa   : > { %3755 = vmatpush1.bf16.msra.mxu1 %v5379_v13  ;;  %3715 = vmatprep.subr.bf16.mxu0 %v5384_v14  ;;  %v5463_v13 = vld [vmem:[%s6428_s10 + $0x700] ss:$16 sps:$4 sm:$0xff]   ;;  %v5472_v14 = vld [vmem:[%s6428_s10 + $0x8e4] ss:$16 sps:$4 sm:$0xff]  }
  0xab   : > { %3756 = vmatprep.subr.bf16.mxu1 %v5387_v15  ;;  %v5475_v15 = vld [vmem:[%s6428_s10 + $0xae4] ss:$16 sps:$4 sm:$0xff]  }
  0xad   : > { %3716 = vmatpush1.bf16.msra.mxu0 %v5382_v16  ;;  %v6614_v16 = vcombine.low %v6555_v32, %v6555_v32  ;;  %v5490_v32 = vld [vmem:[%s6428_s10 + $0x884] ss:$16 sps:$4 sm:$0xff]  }
  0xae   : > { %3757 = vmatpush1.bf16.msra.mxu1 %v5385_v17  ;;  %3717 = vmatprep.subr.bf16.mxu0 %v5390_v18  ;;  %v6618_v17 = vcombine.low %v6560_v33, %v6560_v33  ;;  %v5470_v18 = vld [vmem:[%s6428_s10 + $0x8e0] ss:$16 sps:$4 sm:$0xff]   ;;  %v5493_v33 = vld [vmem:[%s6428_s10 + $0xa84] ss:$16 sps:$4 sm:$0xff]  }
  0xaf   : > { %3758 = vmatprep.subr.bf16.mxu1 %v5393_v19  ;;  %v5473_v19 = vld [vmem:[%s6428_s10 + $0xae0] ss:$16 sps:$4 sm:$0xff]  }
  0xb1   : > { %3718 = vmatpush1.bf16.msra.mxu0 %v5388_v20  ;;  %v5478_v20 = vld [vmem:[%s6428_s10 + $0x8c4] ss:$16 sps:$4 sm:$0xff]  }
  0xb2   : > { %3759 = vmatpush1.bf16.msra.mxu1 %v5391_v21  ;;  %3719 = vmatprep.subr.bf16.mxu0 %v5396_v22  ;;  %v5481_v21 = vld [vmem:[%s6428_s10 + $0xac4] ss:$16 sps:$4 sm:$0xff]  }
  0xb3   : > { %3760 = vmatprep.subr.bf16.mxu1 %v5399_v23  ;;  %v6627_v22 = vld [vmem:[%s7211_s0 + $0x20] sm:$0xff]  ;;  %v6632_v23 = vld [vmem:[%s7211_s0 + $0x28] sm:$0xff] }
  0xb5   : > { %3720 = vmatpush1.bf16.msra.mxu0 %v5394_v24  ;;  %v6636_v24 = vcombine.high %v6627_v22, %v6627_v22 }
  0xb6   : > { %3761 = vmatpush1.bf16.msra.mxu1 %v5397_v25  ;;  %3721 = vmatprep.subr.bf16.mxu0 %v5402_v26  ;;  %v6640_v25 = vcombine.high %v6632_v23, %v6632_v23  ;;  %v5476_v26 = vld [vmem:[%s6428_s10 + $0x8c0] ss:$16 sps:$4 sm:$0xff]  }
  0xb7   : > { %3762 = vmatprep.subr.bf16.mxu1 %v5405_v27  ;;  %v5479_v27 = vld [vmem:[%s6428_s10 + $0xac0] ss:$16 sps:$4 sm:$0xff]  }
  0xb9   : > { %3722 = vmatpush1.bf16.msra.mxu0 %v5400_v28  ;;  %v5484_v28 = vld [vmem:[%s6428_s10 + $0x8a4] ss:$16 sps:$4 sm:$0xff]  }
  0xba   : > { %3763 = vmatpush1.bf16.msra.mxu1 %v5403_v29  ;;  %3723 = vmatprep.subr.bf16.mxu0 %v5408_v30  ;;  %v5487_v29 = vld [vmem:[%s6428_s10 + $0xaa4] ss:$16 sps:$4 sm:$0xff]   ;;  %v5482_v30 = vld [vmem:[%s6428_s10 + $0x8a0] ss:$16 sps:$4 sm:$0xff]  }
  0xbb   : > { %3764 = vmatprep.subr.bf16.mxu1 %v5411_v31  ;;  %v5485_v31 = vld [vmem:[%s6428_s10 + $0xaa0] ss:$16 sps:$4 sm:$0xff]  }
  0xbd   : > { %3724 = vmatpush1.bf16.msra.mxu0 %v5406_v34  ;;  %v5488_v34 = vld [vmem:[%s6428_s10 + $0x880] ss:$16 sps:$4 sm:$0xff]  }
  0xbe   : > { %3765 = vmatpush1.bf16.msra.mxu1 %v5409_v35  ;;  %3725 = vmatprep.subr.bf16.mxu0 %v5414_v38  ;;  %v5491_v35 = vld [vmem:[%s6428_s10 + $0xa80] ss:$16 sps:$4 sm:$0xff]   ;;  %v5496_v38 = vld [vmem:[%s6428_s10 + $0x864] ss:$16 sps:$4 sm:$0xff]  }
  0xbf   : > { %3766 = vmatprep.subr.bf16.mxu1 %v5417_v39  ;;  %v5499_v39 = vld [vmem:[%s6428_s10 + $0xa64] ss:$16 sps:$4 sm:$0xff]  }
  0xc1   : > { %3726 = vmatpush1.bf16.msra.mxu0 %v5412_v40  ;;  %v5494_v40 = vld [vmem:[%s6428_s10 + $0x860] ss:$16 sps:$4 sm:$0xff]  }
  0xc2   : > { %3767 = vmatpush1.bf16.msra.mxu1 %v5415_v41  ;;  %3727 = vmatprep.subr.bf16.mxu0 %v5420_v42  ;;  %v5497_v41 = vld [vmem:[%s6428_s10 + $0xa60] ss:$16 sps:$4 sm:$0xff]   ;;  %v5502_v42 = vld [vmem:[%s6428_s10 + $0x844] ss:$16 sps:$4 sm:$0xff]  }
  0xc3   : > { %3768 = vmatprep.subr.bf16.mxu1 %v5423_v43  ;;  %v5505_v43 = vld [vmem:[%s6428_s10 + $0xa44] ss:$16 sps:$4 sm:$0xff]  }
  0xc5   : > { %3728 = vmatpush2.bf16.msra.mxu0 %v5418_v44  ;;  %v5500_v44 = vld [vmem:[%s6428_s10 + $0x840] ss:$16 sps:$4 sm:$0xff]  }
  0xc6   : > { %3769 = vmatpush2.bf16.msra.mxu1 %v5421_v45  ;;  %3729 = vmatprep.subr.bf16.mxu0 %v5426_v46  ;;  %v5503_v45 = vld [vmem:[%s6428_s10 + $0xa40] ss:$16 sps:$4 sm:$0xff]   ;;  %v5508_v46 = vld [vmem:[%s6428_s10 + $0x824] ss:$16 sps:$4 sm:$0xff]  }
  0xc7   : > { %3770 = vmatprep.subr.bf16.mxu1 %v5429_v48  ;;  %v5511_v48 = vld [vmem:[%s6428_s10 + $0xa24] ss:$16 sps:$4 sm:$0xff]  }
  0xc9   : > { %3730 = vmatpush2.bf16.msra.mxu0 %v5424_v49  ;;  %v5506_v49 = vld [vmem:[%s6428_s10 + $0x820] ss:$16 sps:$4 sm:$0xff]  }
  0xca   : > { %3771 = vmatpush2.bf16.msra.mxu1 %v5427_v50  ;;  %3731 = vmatprep.subr.bf16.mxu0 %v5432_v52  ;;  %v5509_v50 = vld [vmem:[%s6428_s10 + $0xa20] ss:$16 sps:$4 sm:$0xff]   ;;  %v5514_v52 = vld [vmem:[%s6428_s10 + $0x804] ss:$16 sps:$4 sm:$0xff]  }
  0xcb   : > { %3772 = vmatprep.subr.bf16.mxu1 %v5435_v53  ;;  %v5517_v53 = vld [vmem:[%s6428_s10 + $0xa04] ss:$16 sps:$4 sm:$0xff]  }
  0xcd   : > { %3732 = vmatpush2.bf16.msra.mxu0 %v5430_v54  ;;  %v5512_v54 = vld [vmem:[%s6428_s10 + $0x800] ss:$16 sps:$4 sm:$0xff]  }
  0xce   : > { %3773 = vmatpush2.bf16.msra.mxu1 %v5433_v55  ;;  %3733 = vmatprep.subr.bf16.mxu0 %v5438_v56  ;;  %v5515_v55 = vld [vmem:[%s6428_s10 + $0xa00] ss:$16 sps:$4 sm:$0xff]   ;;  %v5520_v56 = vld [vmem:[%s6428_s10 + $0x9e4] ss:$16 sps:$4 sm:$0xff]  }
  0xcf   : > { %3774 = vmatprep.subr.bf16.mxu1 %v5441_v57  ;;  %v5523_v57 = vld [vmem:[%s6428_s10 + $0xbe4] ss:$16 sps:$4 sm:$0xff]  }
  0xd1   : > { %3734 = vmatpush2.bf16.msra.mxu0 %v5436_v58  ;;  %v5518_v58 = vld [vmem:[%s6428_s10 + $0x9e0] ss:$16 sps:$4 sm:$0xff]  }
  0xd2   : > { %3775 = vmatpush2.bf16.msra.mxu1 %v5439_v59  ;;  %3735 = vmatprep.subr.bf16.mxu0 %v5444_v60  ;;  %v5521_v59 = vld [vmem:[%s6428_s10 + $0xbe0] ss:$16 sps:$4 sm:$0xff]   ;;  %v5526_v60 = vld [vmem:[%s6428_s10 + $0x9c4] ss:$16 sps:$4 sm:$0xff]  }
  0xd3   : > { %3776 = vmatprep.subr.bf16.mxu1 %v5447_v61  ;;  %v5529_v61 = vld [vmem:[%s6428_s10 + $0xbc4] ss:$16 sps:$4 sm:$0xff]  }
  0xd5   : > { %3736 = vmatpush2.bf16.msra.mxu0 %v5442_v62  ;;  %v5524_v62 = vld [vmem:[%s6428_s10 + $0x9c0] ss:$16 sps:$4 sm:$0xff]  }
  0xd6   : > { %3777 = vmatpush2.bf16.msra.mxu1 %v5445_v63  ;;  %3737 = vmatprep.subr.bf16.mxu0 %v5450_v0  ;;  %v5527_v63 = vld [vmem:[%s6428_s10 + $0xbc0] ss:$16 sps:$4 sm:$0xff]   ;;  %v5532_v0 = vld [vmem:[%s6428_s10 + $0x9a4] ss:$16 sps:$4 sm:$0xff]  }
  0xd7   : > { %3778 = vmatprep.subr.bf16.mxu1 %v5453_v1  ;;  %v5535_v1 = vld [vmem:[%s6428_s10 + $0xba4] ss:$16 sps:$4 sm:$0xff]  }
  0xd9   : > { %3738 = vmatpush2.bf16.msra.mxu0 %v5448_v2  ;;  %v5530_v2 = vld [vmem:[%s6428_s10 + $0x9a0] ss:$16 sps:$4 sm:$0xff]  }
  0xda   : > { %3779 = vmatpush2.bf16.msra.mxu1 %v5451_v3  ;;  %3739 = vmatprep.subr.bf16.mxu0 %v5456_v4  ;;  %v5533_v3 = vld [vmem:[%s6428_s10 + $0xba0] ss:$16 sps:$4 sm:$0xff]   ;;  %v5538_v4 = vld [vmem:[%s6428_s10 + $0x984] ss:$16 sps:$4 sm:$0xff]  }
  0xdb   : > { %3780 = vmatprep.subr.bf16.mxu1 %v5459_v5  ;;  %v5541_v5 = vld [vmem:[%s6428_s10 + $0xb84] ss:$16 sps:$4 sm:$0xff]  }
  0xdd   : > { %3740 = vmatpush2.bf16.msra.mxu0 %v5454_v8  ;;  %v5536_v8 = vld [vmem:[%s6428_s10 + $0x980] ss:$16 sps:$4 sm:$0xff]  }
  0xde   : > { %3781 = vmatpush2.bf16.msra.mxu1 %v5457_v9  ;;  %3741 = vmatprep.subr.bf16.mxu0 %v5462_v10  ;;  %v5539_v9 = vld [vmem:[%s6428_s10 + $0xb80] ss:$16 sps:$4 sm:$0xff]   ;;  %v5544_v10 = vld [vmem:[%s6428_s10 + $0x964] ss:$16 sps:$4 sm:$0xff]  }
  0xdf   : > { %3782 = vmatprep.subr.bf16.mxu1 %v5465_v11  ;;  %v5547_v11 = vld [vmem:[%s6428_s10 + $0xb64] ss:$16 sps:$4 sm:$0xff]  }
  0xe1   : > { %3742 = vmatpush2.bf16.msra.mxu0 %v5460_v12  ;;  %v5542_v12 = vld [vmem:[%s6428_s10 + $0x960] ss:$16 sps:$4 sm:$0xff]  }
  0xe2   : > { %3783 = vmatpush2.bf16.msra.mxu1 %v5463_v13  ;;  %3793 = vmatprep.subr.bf16.mxu0 %v5472_v14  ;;  %v5545_v13 = vld [vmem:[%s6428_s10 + $0xb60] ss:$16 sps:$4 sm:$0xff]   ;;  %v5550_v14 = vld [vmem:[%s6428_s10 + $0x944] ss:$16 sps:$4 sm:$0xff]  }
  0xe3   : > { %3834 = vmatprep.subr.bf16.mxu1 %v5475_v15  ;;  %v5553_v15 = vld [vmem:[%s6428_s10 + $0xb44] ss:$16 sps:$4 sm:$0xff]  }
  0xe4   : > { %3744 = vmatmul.mubr.bf16.vlgmr.msra.gmra.mxu0 %v6614_v16 }
  0xe5   : > { %3785 = vmatmul.mubr.bf16.vlgmr.msra.gmra.mxu1 %v6618_v17  ;;  %3794 = vmatpush1.bf16.msra.mxu0 %v5470_v18  ;;  %v5548_v18 = vld [vmem:[%s6428_s10 + $0x940] ss:$16 sps:$4 sm:$0xff]  }
  0xe6   : > { %3835 = vmatpush1.bf16.msra.mxu1 %v5473_v19  ;;  %3795 = vmatprep.subr.bf16.mxu0 %v5478_v20  ;;  %v5551_v19 = vld [vmem:[%s6428_s10 + $0xb40] ss:$16 sps:$4 sm:$0xff]   ;;  %v5556_v20 = vld [vmem:[%s6428_s10 + $0x924] ss:$16 sps:$4 sm:$0xff]  }
  0xe7   : > { %3836 = vmatprep.subr.bf16.mxu1 %v5481_v21  ;;  %3825 = vmatprep.mubr.bf16.mxu0 %v6636_v24  ;;  %v5559_v21 = vld [vmem:[%s6428_s10 + $0xb24] ss:$16 sps:$4 sm:$0xff]  }
  0xe8   : > { %3866 = vmatprep.mubr.bf16.mxu1 %v6640_v25 }
  0xe9   : > { %3796 = vmatpush1.bf16.msra.mxu0 %v5476_v26  ;;  %v5554_v26 = vld [vmem:[%s6428_s10 + $0x920] ss:$16 sps:$4 sm:$0xff]  }
  0xea   : > { %3837 = vmatpush1.bf16.msra.mxu1 %v5479_v27  ;;  %3797 = vmatprep.subr.bf16.mxu0 %v5484_v28  ;;  %v5557_v27 = vld [vmem:[%s6428_s10 + $0xb20] ss:$16 sps:$4 sm:$0xff]   ;;  %v5562_v28 = vld [vmem:[%s6428_s10 + $0x904] ss:$16 sps:$4 sm:$0xff]  }
  0xeb   : > { %3838 = vmatprep.subr.bf16.mxu1 %v5487_v29  ;;  %v5565_v29 = vld [vmem:[%s6428_s10 + $0xb04] ss:$16 sps:$4 sm:$0xff]  }
  0xed   : > { %3798 = vmatpush1.bf16.msra.mxu0 %v5482_v30  ;;  %v5560_v30 = vld [vmem:[%s6428_s10 + $0x900] ss:$16 sps:$4 sm:$0xff]  }
  0xee   : > { %3839 = vmatpush1.bf16.msra.mxu1 %v5485_v31  ;;  %3799 = vmatprep.subr.bf16.mxu0 %v5490_v32  ;;  %v5563_v31 = vld [vmem:[%s6428_s10 + $0xb00] ss:$16 sps:$4 sm:$0xff]   ;;  %v5572_v32 = vld [vmem:[%s6428_s10 + $0xce4] ss:$16 sps:$4 sm:$0xff]  }
  0xef   : > { %3840 = vmatprep.subr.bf16.mxu1 %v5493_v33  ;;  %v5575_v33 = vld [vmem:[%s6428_s10 + $0xee4] ss:$16 sps:$4 sm:$0xff]  }
  0xf1   : > { %3800 = vmatpush1.bf16.msra.mxu0 %v5488_v34  ;;  %v5570_v34 = vld [vmem:[%s6428_s10 + $0xce0] ss:$16 sps:$4 sm:$0xff]  }
  0xf2   : > { %3841 = vmatpush1.bf16.msra.mxu1 %v5491_v35  ;;  %3801 = vmatprep.subr.bf16.mxu0 %v5496_v38  ;;  %v5573_v35 = vld [vmem:[%s6428_s10 + $0xee0] ss:$16 sps:$4 sm:$0xff]   ;;  %v6710_v38 = vcombine.low %v6627_v22, %v6627_v22  ;;  %v5578_v22 = vld [vmem:[%s6428_s10 + $0xcc4] ss:$16 sps:$4 sm:$0xff]  }
  0xf3   : > { %3842 = vmatprep.subr.bf16.mxu1 %v5499_v39  ;;  %v6714_v39 = vcombine.low %v6632_v23, %v6632_v23  ;;  %v5581_v23 = vld [vmem:[%s6428_s10 + $0xec4] ss:$16 sps:$4 sm:$0xff]  }
  0xf5   : > { %3802 = vmatpush1.bf16.msra.mxu0 %v5494_v40  ;;  %v6719_v40 = vld [vmem:[%s7211_s0 + $0x30] sm:$0xff] }
  0xf6   : > { %3843 = vmatpush1.bf16.msra.mxu1 %v5497_v41  ;;  %3803 = vmatprep.subr.bf16.mxu0 %v5502_v42  ;;  %v6724_v41 = vld [vmem:[%s7211_s0 + $0x38] sm:$0xff]  ;;  %v6730_v42 = vcombine.high %v6719_v40, %v6719_v40 }
  0xf7   : > { %3844 = vmatprep.subr.bf16.mxu1 %v5505_v43  ;;  %v6734_v43 = vcombine.high %v6724_v41, %v6724_v41 }
  0xf9   : > { %3804 = vmatpush1.bf16.msra.mxu0 %v5500_v44  ;;  %v5576_v44 = vld [vmem:[%s6428_s10 + $0xcc0] ss:$16 sps:$4 sm:$0xff]  }
  0xfa   : > { %3845 = vmatpush1.bf16.msra.mxu1 %v5503_v45  ;;  %3805 = vmatprep.subr.bf16.mxu0 %v5508_v46  ;;  %v5579_v45 = vld [vmem:[%s6428_s10 + $0xec0] ss:$16 sps:$4 sm:$0xff]   ;;  %v5584_v46 = vld [vmem:[%s6428_s10 + $0xca4] ss:$16 sps:$4 sm:$0xff]  }
  0xfb   : > { %3846 = vmatprep.subr.bf16.mxu1 %v5511_v48  ;;  %v5587_v48 = vld [vmem:[%s6428_s10 + $0xea4] ss:$16 sps:$4 sm:$0xff]  }
  0xfd   : > { %3806 = vmatpush1.bf16.msra.mxu0 %v5506_v49  ;;  %v5582_v49 = vld [vmem:[%s6428_s10 + $0xca0] ss:$16 sps:$4 sm:$0xff]  }
  0xfe   : > { %3847 = vmatpush1.bf16.msra.mxu1 %v5509_v50  ;;  %3807 = vmatprep.subr.bf16.mxu0 %v5514_v52  ;;  %v5585_v50 = vld [vmem:[%s6428_s10 + $0xea0] ss:$16 sps:$4 sm:$0xff]   ;;  %v5590_v52 = vld [vmem:[%s6428_s10 + $0xc84] ss:$16 sps:$4 sm:$0xff]  }
  0xff   : > { %3848 = vmatprep.subr.bf16.mxu1 %v5517_v53  ;;  %v5593_v53 = vld [vmem:[%s6428_s10 + $0xe84] ss:$16 sps:$4 sm:$0xff]  }
 0x101   : > { %3808 = vmatpush1.bf16.msra.mxu0 %v5512_v54  ;;  %v5588_v54 = vld [vmem:[%s6428_s10 + $0xc80] ss:$16 sps:$4 sm:$0xff]  }
 0x102   : > { %3849 = vmatpush1.bf16.msra.mxu1 %v5515_v55  ;;  %3809 = vmatprep.subr.bf16.mxu0 %v5520_v56  ;;  %v5591_v55 = vld [vmem:[%s6428_s10 + $0xe80] ss:$16 sps:$4 sm:$0xff]   ;;  %v5596_v56 = vld [vmem:[%s6428_s10 + $0xc64] ss:$16 sps:$4 sm:$0xff]  }
 0x103   : > { %3850 = vmatprep.subr.bf16.mxu1 %v5523_v57  ;;  %v5599_v57 = vld [vmem:[%s6428_s10 + $0xe64] ss:$16 sps:$4 sm:$0xff]  }
 0x105   : > { %3810 = vmatpush2.bf16.msra.mxu0 %v5518_v58  ;;  %v5594_v58 = vld [vmem:[%s6428_s10 + $0xc60] ss:$16 sps:$4 sm:$0xff]  }
 0x106   : > { %3851 = vmatpush2.bf16.msra.mxu1 %v5521_v59  ;;  %3811 = vmatprep.subr.bf16.mxu0 %v5526_v60  ;;  %v5597_v59 = vld [vmem:[%s6428_s10 + $0xe60] ss:$16 sps:$4 sm:$0xff]   ;;  %v5602_v60 = vld [vmem:[%s6428_s10 + $0xc44] ss:$16 sps:$4 sm:$0xff]  }
 0x107   : > { %3852 = vmatprep.subr.bf16.mxu1 %v5529_v61  ;;  %v5605_v61 = vld [vmem:[%s6428_s10 + $0xe44] ss:$16 sps:$4 sm:$0xff]  }
 0x109   : > { %3812 = vmatpush2.bf16.msra.mxu0 %v5524_v62  ;;  %v5600_v62 = vld [vmem:[%s6428_s10 + $0xc40] ss:$16 sps:$4 sm:$0xff]  }
 0x10a   : > { %3853 = vmatpush2.bf16.msra.mxu1 %v5527_v63  ;;  %3813 = vmatprep.subr.bf16.mxu0 %v5532_v0  ;;  %v5603_v63 = vld [vmem:[%s6428_s10 + $0xe40] ss:$16 sps:$4 sm:$0xff]   ;;  %v5608_v0 = vld [vmem:[%s6428_s10 + $0xc24] ss:$16 sps:$4 sm:$0xff]  }
 0x10b   : > { %3854 = vmatprep.subr.bf16.mxu1 %v5535_v1  ;;  %v5611_v1 = vld [vmem:[%s6428_s10 + $0xe24] ss:$16 sps:$4 sm:$0xff]  }
 0x10d   : > { %3814 = vmatpush2.bf16.msra.mxu0 %v5530_v2  ;;  %v5606_v2 = vld [vmem:[%s6428_s10 + $0xc20] ss:$16 sps:$4 sm:$0xff]  }
 0x10e   : > { %3855 = vmatpush2.bf16.msra.mxu1 %v5533_v3  ;;  %3815 = vmatprep.subr.bf16.mxu0 %v5538_v4  ;;  %v5609_v3 = vld [vmem:[%s6428_s10 + $0xe20] ss:$16 sps:$4 sm:$0xff]   ;;  %v5614_v4 = vld [vmem:[%s6428_s10 + $0xc04] ss:$16 sps:$4 sm:$0xff]  }
 0x10f   : > { %3856 = vmatprep.subr.bf16.mxu1 %v5541_v5  ;;  %v5617_v5 = vld [vmem:[%s6428_s10 + $0xe04] ss:$16 sps:$4 sm:$0xff]  }
 0x111   : > { %3816 = vmatpush2.bf16.msra.mxu0 %v5536_v8  ;;  %v5612_v8 = vld [vmem:[%s6428_s10 + $0xc00] ss:$16 sps:$4 sm:$0xff]  }
 0x112   : > { %3857 = vmatpush2.bf16.msra.mxu1 %v5539_v9  ;;  %3817 = vmatprep.subr.bf16.mxu0 %v5544_v10  ;;  %v5615_v9 = vld [vmem:[%s6428_s10 + $0xe00] ss:$16 sps:$4 sm:$0xff]   ;;  %v5620_v10 = vld [vmem:[%s6428_s10 + $0xde4] ss:$16 sps:$4 sm:$0xff]  }
 0x113   : > { %3858 = vmatprep.subr.bf16.mxu1 %v5547_v11  ;;  %v5623_v11 = vld [vmem:[%s6428_s10 + $0xfe4] ss:$16 sps:$4 sm:$0xff]  }
 0x115   : > { %3818 = vmatpush2.bf16.msra.mxu0 %v5542_v12  ;;  %v5618_v12 = vld [vmem:[%s6428_s10 + $0xde0] ss:$16 sps:$4 sm:$0xff]  }
 0x116   : > { %3859 = vmatpush2.bf16.msra.mxu1 %v5545_v13  ;;  %3819 = vmatprep.subr.bf16.mxu0 %v5550_v14  ;;  %v5621_v13 = vld [vmem:[%s6428_s10 + $0xfe0] ss:$16 sps:$4 sm:$0xff]   ;;  %v5626_v14 = vld [vmem:[%s6428_s10 + $0xdc4] ss:$16 sps:$4 sm:$0xff]  }
 0x117   : > { %3860 = vmatprep.subr.bf16.mxu1 %v5553_v15  ;;  %v5629_v15 = vld [vmem:[%s6428_s10 + $0xfc4] ss:$16 sps:$4 sm:$0xff]  }
 0x119   : > { %3820 = vmatpush2.bf16.msra.mxu0 %v5548_v18  ;;  %v5624_v18 = vld [vmem:[%s6428_s10 + $0xdc0] ss:$16 sps:$4 sm:$0xff]  }
 0x11a   : > { %3861 = vmatpush2.bf16.msra.mxu1 %v5551_v19  ;;  %3821 = vmatprep.subr.bf16.mxu0 %v5556_v20  ;;  %v5627_v19 = vld [vmem:[%s6428_s10 + $0xfc0] ss:$16 sps:$4 sm:$0xff]   ;;  %v5632_v20 = vld [vmem:[%s6428_s10 + $0xda4] ss:$16 sps:$4 sm:$0xff]  }
 0x11b   : > { %3862 = vmatprep.subr.bf16.mxu1 %v5559_v21  ;;  %v5635_v21 = vld [vmem:[%s6428_s10 + $0xfa4] ss:$16 sps:$4 sm:$0xff]  }
 0x11d   : > { %3822 = vmatpush2.bf16.msra.mxu0 %v5554_v26  ;;  %v5630_v26 = vld [vmem:[%s6428_s10 + $0xda0] ss:$16 sps:$4 sm:$0xff]  }
 0x11e   : > { %3863 = vmatpush2.bf16.msra.mxu1 %v5557_v27  ;;  %3823 = vmatprep.subr.bf16.mxu0 %v5562_v28  ;;  %v5633_v27 = vld [vmem:[%s6428_s10 + $0xfa0] ss:$16 sps:$4 sm:$0xff]   ;;  %v5638_v28 = vld [vmem:[%s6428_s10 + $0xd84] ss:$16 sps:$4 sm:$0xff]  }
 0x11f   : > { %3864 = vmatprep.subr.bf16.mxu1 %v5565_v29  ;;  %v5641_v29 = vld [vmem:[%s6428_s10 + $0xf84] ss:$16 sps:$4 sm:$0xff]  }
 0x121   : > { %3824 = vmatpush2.bf16.msra.mxu0 %v5560_v30  ;;  %v5636_v30 = vld [vmem:[%s6428_s10 + $0xd80] ss:$16 sps:$4 sm:$0xff]  }
 0x122   : > { %3865 = vmatpush2.bf16.msra.mxu1 %v5563_v31  ;;  %3875 = vmatprep.subr.bf16.mxu0 %v5572_v32  ;;  %v5639_v31 = vld [vmem:[%s6428_s10 + $0xf80] ss:$16 sps:$4 sm:$0xff]   ;;  %v5644_v32 = vld [vmem:[%s6428_s10 + $0xd64] ss:$16 sps:$4 sm:$0xff]  }
 0x123   : > { %3916 = vmatprep.subr.bf16.mxu1 %v5575_v33  ;;  %v5647_v33 = vld [vmem:[%s6428_s10 + $0xf64] ss:$16 sps:$4 sm:$0xff]  }
 0x124   : > { %3826 = vmatmul.mubr.bf16.vlgmr.msra.gmra.mxu0 %v6710_v38 }
 0x125   : > { %3867 = vmatmul.mubr.bf16.vlgmr.msra.gmra.mxu1 %v6714_v39  ;;  %3876 = vmatpush1.bf16.msra.mxu0 %v5570_v34  ;;  %v5642_v34 = vld [vmem:[%s6428_s10 + $0xd60] ss:$16 sps:$4 sm:$0xff]  }
 0x126   : > { %3917 = vmatpush1.bf16.msra.mxu1 %v5573_v35  ;;  %3877 = vmatprep.subr.bf16.mxu0 %v5578_v22  ;;  %v5645_v35 = vld [vmem:[%s6428_s10 + $0xf60] ss:$16 sps:$4 sm:$0xff]   ;;  %v5650_v22 = vld [vmem:[%s6428_s10 + $0xd44] ss:$16 sps:$4 sm:$0xff]  }
 0x127   : > { %3918 = vmatprep.subr.bf16.mxu1 %v5581_v23  ;;  %3907 = vmatprep.mubr.bf16.mxu0 %v6730_v42  ;;  %v5653_v23 = vld [vmem:[%s6428_s10 + $0xf44] ss:$16 sps:$4 sm:$0xff]  }
 0x128   : > { %3948 = vmatprep.mubr.bf16.mxu1 %v6734_v43 }
 0x129   : > { %3878 = vmatpush1.bf16.msra.mxu0 %v5576_v44  ;;  %v5648_v44 = vld [vmem:[%s6428_s10 + $0xd40] ss:$16 sps:$4 sm:$0xff]  }
 0x12a   : > { %3919 = vmatpush1.bf16.msra.mxu1 %v5579_v45  ;;  %3879 = vmatprep.subr.bf16.mxu0 %v5584_v46  ;;  %v5651_v45 = vld [vmem:[%s6428_s10 + $0xf40] ss:$16 sps:$4 sm:$0xff]   ;;  %v5656_v46 = vld [vmem:[%s6428_s10 + $0xd24] ss:$16 sps:$4 sm:$0xff]  }
 0x12b   : > { %3920 = vmatprep.subr.bf16.mxu1 %v5587_v48  ;;  %v5659_v48 = vld [vmem:[%s6428_s10 + $0xf24] ss:$16 sps:$4 sm:$0xff]  }
 0x12d   : > { %3880 = vmatpush1.bf16.msra.mxu0 %v5582_v49  ;;  %v5654_v49 = vld [vmem:[%s6428_s10 + $0xd20] ss:$16 sps:$4 sm:$0xff]  }
 0x12e   : > { %3921 = vmatpush1.bf16.msra.mxu1 %v5585_v50  ;;  %3881 = vmatprep.subr.bf16.mxu0 %v5590_v52  ;;  %v5657_v50 = vld [vmem:[%s6428_s10 + $0xf20] ss:$16 sps:$4 sm:$0xff]   ;;  %v5662_v52 = vld [vmem:[%s6428_s10 + $0xd04] ss:$16 sps:$4 sm:$0xff]  }
 0x12f   : > { %3922 = vmatprep.subr.bf16.mxu1 %v5593_v53  ;;  %v5665_v53 = vld [vmem:[%s6428_s10 + $0xf04] ss:$16 sps:$4 sm:$0xff]  }
 0x131   : > { %3882 = vmatpush1.bf16.msra.mxu0 %v5588_v54  ;;  %v5660_v54 = vld [vmem:[%s6428_s10 + $0xd00] ss:$16 sps:$4 sm:$0xff]  }
 0x132   : > { %3923 = vmatpush1.bf16.msra.mxu1 %v5591_v55  ;;  %3883 = vmatprep.subr.bf16.mxu0 %v5596_v56  ;;  %v5663_v55 = vld [vmem:[%s6428_s10 + $0xf00] ss:$16 sps:$4 sm:$0xff]   ;;  %v5672_v56 = vld [vmem:[%s6428_s10 + $0x10e4] ss:$16 sps:$4 sm:$0xff]  }
 0x133   : > { %3924 = vmatprep.subr.bf16.mxu1 %v5599_v57  ;;  %v5675_v57 = vld [vmem:[%s6428_s10 + $0xec] ss:$16 sps:$4 sm:$0xff]  }
 0x135   : > { %3884 = vmatpush1.bf16.msra.mxu0 %v5594_v58  ;;  %v6802_v58 = vcombine.low %v6719_v40, %v6719_v40 }
 0x136   : > { %3925 = vmatpush1.bf16.msra.mxu1 %v5597_v59  ;;  %3885 = vmatprep.subr.bf16.mxu0 %v5602_v60  ;;  %v6806_v59 = vcombine.low %v6724_v41, %v6724_v41  ;;  %v5670_v60 = vld [vmem:[%s6428_s10 + $0x10e0] ss:$16 sps:$4 sm:$0xff]  }
 0x137   : > { %3926 = vmatprep.subr.bf16.mxu1 %v5605_v61  ;;  %v5673_v61 = vld [vmem:[%s6428_s10 + $0xe8] ss:$16 sps:$4 sm:$0xff]   ;;  %v5676_v41 = vld [vmem:[%s6428_s10 + $0x10c0] ss:$16 sps:$4 sm:$0xff]  }
 0x139   : > { %3886 = vmatpush1.bf16.msra.mxu0 %v5600_v62  ;;  %v5678_v62 = vld [vmem:[%s6428_s10 + $0x10c4] ss:$16 sps:$4 sm:$0xff]  }
 0x13a   : > { %3927 = vmatpush1.bf16.msra.mxu1 %v5603_v63  ;;  %3887 = vmatprep.subr.bf16.mxu0 %v5608_v0  ;;  %v5681_v63 = vld [vmem:[%s6428_s10 + $0xcc] ss:$16 sps:$4 sm:$0xff]  }
 0x13b   : > { %3928 = vmatprep.subr.bf16.mxu1 %v5611_v1 }
 0x13d   : > { %3888 = vmatpush1.bf16.msra.mxu0 %v5606_v2  ;;  %v5679_v2 = vld [vmem:[%s6428_s10 + $0xc8] ss:$16 sps:$4 sm:$0xff]  }
 0x13e   : > { %3929 = vmatpush1.bf16.msra.mxu1 %v5609_v3  ;;  %3889 = vmatprep.subr.bf16.mxu0 %v5614_v4 }
 0x13f   : > { %3930 = vmatprep.subr.bf16.mxu1 %v5617_v5  ;;  %v5684_v5 = vld [vmem:[%s6428_s10 + $0x10a4] ss:$16 sps:$4 sm:$0xff]  }
 0x141   : > { %3890 = vmatpush1.bf16.msra.mxu0 %v5612_v8  ;;  %v5687_v8 = vld [vmem:[%s6428_s10 + $0xac] ss:$16 sps:$4 sm:$0xff]  }
 0x142   : > { %3931 = vmatpush1.bf16.msra.mxu1 %v5615_v9  ;;  %3891 = vmatprep.subr.bf16.mxu0 %v5620_v10  ;;  %v6242_v10 = vmov 0  }
 0x143   : > { %3932 = vmatprep.subr.bf16.mxu1 %v5623_v11 }
 0x145   : > { %3892 = vmatpush2.bf16.msra.mxu0 %v5618_v12 }
 0x146   : > { %3933 = vmatpush2.bf16.msra.mxu1 %v5621_v13  ;;  %3893 = vmatprep.subr.bf16.mxu0 %v5626_v14  ;;  %v5682_v13 = vld [vmem:[%s6428_s10 + $0x10a0] ss:$16 sps:$4 sm:$0xff]   ;;  %v5685_v14 = vld [vmem:[%s6428_s10 + $0xa8] ss:$16 sps:$4 sm:$0xff]  }
 0x147   : > { %3934 = vmatprep.subr.bf16.mxu1 %v5629_v15 }
 0x149   : > { %3894 = vmatpush2.bf16.msra.mxu0 %v5624_v18 }
 0x14a   : > { %3935 = vmatpush2.bf16.msra.mxu1 %v5627_v19  ;;  %3895 = vmatprep.subr.bf16.mxu0 %v5632_v20  ;;  %v5690_v19 = vld [vmem:[%s6428_s10 + $0x1084] ss:$16 sps:$4 sm:$0xff]   ;;  %v5693_v20 = vld [vmem:[%s6428_s10 + $0x8c] ss:$16 sps:$4 sm:$0xff]  }
 0x14b   : > { %3936 = vmatprep.subr.bf16.mxu1 %v5635_v21  ;;  %v5691_v21 = vld [vmem:[%s6428_s10 + $0x88] ss:$16 sps:$4 sm:$0xff]  }
 0x14d   : > { %3896 = vmatpush2.bf16.msra.mxu0 %v5630_v26  ;;  %v5696_v26 = vld [vmem:[%s6428_s10 + $0x1064] ss:$16 sps:$4 sm:$0xff]  }
 0x14e   : > { %3937 = vmatpush2.bf16.msra.mxu1 %v5633_v27  ;;  %3897 = vmatprep.subr.bf16.mxu0 %v5638_v28  ;;  %v5699_v27 = vld [vmem:[%s6428_s10 + $0x6c] ss:$16 sps:$4 sm:$0xff]   ;;  %v5694_v28 = vld [vmem:[%s6428_s10 + $0x1060] ss:$16 sps:$4 sm:$0xff]  }
 0x14f   : > { %3938 = vmatprep.subr.bf16.mxu1 %v5641_v29  ;;  %v5697_v29 = vld [vmem:[%s6428_s10 + $0x68] ss:$16 sps:$4 sm:$0xff]  }
 0x151   : > { %3898 = vmatpush2.bf16.msra.mxu0 %v5636_v30  ;;  %v5702_v30 = vld [vmem:[%s6428_s10 + $0x1044] ss:$16 sps:$4 sm:$0xff]  }
 0x152   : > { %3939 = vmatpush2.bf16.msra.mxu1 %v5639_v31  ;;  %3899 = vmatprep.subr.bf16.mxu0 %v5644_v32  ;;  %v5705_v31 = vld [vmem:[%s6428_s10 + $0x4c] ss:$16 sps:$4 sm:$0xff]   ;;  %v5700_v32 = vld [vmem:[%s6428_s10 + $0x1040] ss:$16 sps:$4 sm:$0xff]  }
 0x153   : > { %3940 = vmatprep.subr.bf16.mxu1 %v5647_v33  ;;  %v5703_v33 = vld [vmem:[%s6428_s10 + $0x48] ss:$16 sps:$4 sm:$0xff]  }
 0x155   : > { %3900 = vmatpush2.bf16.msra.mxu0 %v5642_v34  ;;  %v5708_v34 = vld [vmem:[%s6428_s10 + $0x1024] ss:$16 sps:$4 sm:$0xff]  }
 0x156   : > { %3941 = vmatpush2.bf16.msra.mxu1 %v5645_v35  ;;  %3901 = vmatprep.subr.bf16.mxu0 %v5650_v22  ;;  %v5711_v35 = vld [vmem:[%s6428_s10 + $0x2c] ss:$16 sps:$4 sm:$0xff]   ;;  %v5706_v22 = vld [vmem:[%s6428_s10 + $0x1020] ss:$16 sps:$4 sm:$0xff]  }
 0x157   : > { %3942 = vmatprep.subr.bf16.mxu1 %v5653_v23  ;;  %v5709_v23 = vld [vmem:[%s6428_s10 + $0x28] ss:$16 sps:$4 sm:$0xff]  }
 0x159   : > { %3902 = vmatpush2.bf16.msra.mxu0 %v5648_v44  ;;  %v5714_v44 = vld [vmem:[%s6428_s10 + $0x1004] ss:$16 sps:$4 sm:$0xff]  }
 0x15a   : > { %3943 = vmatpush2.bf16.msra.mxu1 %v5651_v45  ;;  %3903 = vmatprep.subr.bf16.mxu0 %v5656_v46  ;;  %v5717_v45 = vld [vmem:[%s6428_s10 + $0xc] ss:$16 sps:$4 sm:$0xff]   ;;  %v5712_v46 = vld [vmem:[%s6428_s10 + $0x1000] ss:$16 sps:$4 sm:$0xff]  }
 0x15b   : > { %3944 = vmatprep.subr.bf16.mxu1 %v5659_v48  ;;  %v5715_v48 = vld [vmem:[%s6428_s10 + $0x8] ss:$16 sps:$4 sm:$0xff]  }
 0x15d   : > { %3904 = vmatpush2.bf16.msra.mxu0 %v5654_v49  ;;  %v5718_v49 = vld [vmem:[%s7211_s0 + $0x40] ss:$0 sps:$4 sm:$0xff]  }
 0x15e   : > { %3945 = vmatpush2.bf16.msra.mxu1 %v5657_v50  ;;  %3905 = vmatprep.subr.bf16.mxu0 %v5662_v52  ;;  %v5721_v50 = vld [vmem:[%s6428_s10 + $0x1ec] ss:$16 sps:$4 sm:$0xff]  }
 0x15f   : > { %3946 = vmatprep.subr.bf16.mxu1 %v5665_v53  ;;  %v5724_v52 = vld [vmem:[%s6428_s10 + $0x2ec] ss:$16 sps:$4 sm:$0xff]   ;;  %v5719_v53 = vld [vmem:[%s6428_s10 + $0x1e8] ss:$16 sps:$4 sm:$0xff]  }
 0x161   : > { %3906 = vmatpush2.bf16.msra.mxu0 %v5660_v54  ;;  %v5722_v54 = vld [vmem:[%s6428_s10 + $0x2e8] ss:$16 sps:$4 sm:$0xff]  }
 0x162   : > { %3947 = vmatpush2.bf16.msra.mxu1 %v5663_v55  ;;  %3957 = vmatprep.subr.bf16.mxu0 %v5672_v56  ;;  %v5727_v55 = vld [vmem:[%s6428_s10 + $0x1cc] ss:$16 sps:$4 sm:$0xff]  }
 0x163   : > { %3998 = vmatprep.subr.bf16.mxu1 %v5675_v57  ;;  %v5730_v56 = vld [vmem:[%s6428_s10 + $0x2cc] ss:$16 sps:$4 sm:$0xff]   ;;  %v5725_v57 = vld [vmem:[%s6428_s10 + $0x1c8] ss:$16 sps:$4 sm:$0xff]  }
 0x164   : > { %v3663_v0 = vpop.f32.mrf.mxu0  ;;  %3908 = vmatmul.mubr.bf16.vlgmr.msra.gmra.mxu0 %v6802_v58 }
 0x165   : > { %v3704_v1 = vpop.f32.mrf.mxu1  ;;  %3949 = vmatmul.mubr.bf16.vlgmr.msra.gmra.mxu1 %v6806_v59  ;;  %3958 = vmatpush1.bf16.msra.mxu0 %v5670_v60  ;;  %v5728_v60 = vld [vmem:[%s6428_s10 + $0x2c8] ss:$16 sps:$4 sm:$0xff]  }
 0x166   : > { %v6814_v40 = vadd.f32 %v3704_v1, %v3663_v0  ;;  %3999 = vmatpush1.bf16.msra.mxu1 %v5673_v61  ;;  %v3665_v3 = vpop.f32.mrf.mxu0  ;;  %3959 = vmatprep.subr.bf16.mxu0 %v5678_v62  ;;  %v5733_v61 = vld [vmem:[%s6428_s10 + $0x1ac] ss:$16 sps:$4 sm:$0xff]   ;;  %v5734_v0 = vld [vmem:[%s6428_s10 + $0x2a8] ss:$16 sps:$4 sm:$0xff]  }
 0x167   : > { %v3706_v4 = vpop.f32.mrf.mxu1  ;;  %4000 = vmatprep.subr.bf16.mxu1 %v5681_v63  ;;  %3989 = vmatprep.mubr.bf16.mxu0 %v6242_v10  ;;  %v5736_v62 = vld [vmem:[%s6428_s10 + $0x2ac] ss:$16 sps:$4 sm:$0xff]   ;;  %v5731_v63 = vld [vmem:[%s6428_s10 + $0x1a8] ss:$16 sps:$4 sm:$0xff]  }
 0x168   : > { %v6820_v9 = vadd.f32 %v3706_v4, %v3665_v3  ;;  %4030 = vmatprep.mubr.bf16.mxu1 %v6493_v47  ;;  %v3667_v11 = vpop.f32.mrf.mxu0  ;;  %v5688_v47 = vld [vmem:[%s6428_s10 + $0x1080] ss:$16 sps:$4 sm:$0xff]   ;;  %v5739_v1 = vld [vmem:[%s6428_s10 + $0x18c] ss:$16 sps:$4 sm:$0xff]   ;;  %v5740_v3 = vld [vmem:[%s6428_s10 + $0x288] ss:$16 sps:$4 sm:$0xff]  }
 0x169   : > { %v3708_v12 = vpop.f32.mrf.mxu1  ;;  %3960 = vmatpush1.bf16.msra.mxu0 %v5676_v41  ;;  %v5742_v41 = vld [vmem:[%s6428_s10 + $0x28c] ss:$16 sps:$4 sm:$0xff]  }
 0x16a   : > { %4001 = vmatpush1.bf16.msra.mxu1 %v5679_v2  ;;  %v3668_v15 = vpop.f32.mrf.mxu0  ;;  %3961 = vmatprep.subr.bf16.mxu0 %v5684_v5  ;;  %v5737_v2 = vld [vmem:[%s6428_s10 + $0x188] ss:$16 sps:$4 sm:$0xff]   ;;  %v5748_v4 = vld [vmem:[%s6428_s10 + $0x26c] ss:$16 sps:$4 sm:$0xff]  }
 0x16b   : > { %v3709_v18 = vpop.f32.mrf.mxu1  ;;  %4002 = vmatprep.subr.bf16.mxu1 %v5687_v8  ;;  %v5743_v5 = vld [vmem:[%s6428_s10 + $0x168] ss:$16 sps:$4 sm:$0xff]   ;;  %v5751_v11 = vld [vmem:[%s6428_s10 + $0x14c] ss:$16 sps:$4 sm:$0xff]  }
 0x16c   : > { %v5746_v8 = vld [vmem:[%s6428_s10 + $0x268] ss:$16 sps:$4 sm:$0xff]   ;;  %v5754_v12 = vld [vmem:[%s6428_s10 + $0x24c] ss:$16 sps:$4 sm:$0xff]  }
 0x16d   : > { %3962 = vmatpush1.bf16.msra.mxu0 %v5682_v13  ;;  %v5749_v13 = vld [vmem:[%s6428_s10 + $0x148] ss:$16 sps:$4 sm:$0xff]   ;;  %v5757_v15 = vld [vmem:[%s6428_s10 + $0x12c] ss:$16 sps:$4 sm:$0xff]  }
 0x16e   : > { %4003 = vmatpush1.bf16.msra.mxu1 %v5685_v14  ;;  %3963 = vmatprep.subr.bf16.mxu0 %v5690_v19  ;;  %v5752_v14 = vld [vmem:[%s6428_s10 + $0x248] ss:$16 sps:$4 sm:$0xff]   ;;  %v5760_v18 = vld [vmem:[%s6428_s10 + $0x22c] ss:$16 sps:$4 sm:$0xff]  }
 0x16f   : > { %4004 = vmatprep.subr.bf16.mxu1 %v5693_v20  ;;  %v5755_v19 = vld [vmem:[%s6428_s10 + $0x128] ss:$16 sps:$4 sm:$0xff]  }
 0x170   : > { %v5758_v20 = vld [vmem:[%s6428_s10 + $0x228] ss:$16 sps:$4 sm:$0xff]  }
 0x171   : > { %3964 = vmatpush1.bf16.msra.mxu0 %v5688_v47  ;;  %v5763_v47 = vld [vmem:[%s6428_s10 + $0x10c] ss:$16 sps:$4 sm:$0xff]  }
 0x172   : > { %4005 = vmatpush1.bf16.msra.mxu1 %v5691_v21  ;;  %3965 = vmatprep.subr.bf16.mxu0 %v5696_v26  ;;  %v5766_v21 = vld [vmem:[%s6428_s10 + $0x20c] ss:$16 sps:$4 sm:$0xff]   ;;  %v5761_v26 = vld [vmem:[%s6428_s10 + $0x108] ss:$16 sps:$4 sm:$0xff]  }
 0x173   : > { %4006 = vmatprep.subr.bf16.mxu1 %v5699_v27  ;;  %v5764_v27 = vld [vmem:[%s6428_s10 + $0x208] ss:$16 sps:$4 sm:$0xff]  }
 0x175   : > { %3966 = vmatpush1.bf16.msra.mxu0 %v5694_v28  ;;  %v5769_v28 = vld [vmem:[%s6428_s10 + $0x3ec] ss:$16 sps:$4 sm:$0xff]  }
 0x176   : > { %4007 = vmatpush1.bf16.msra.mxu1 %v5697_v29  ;;  %3967 = vmatprep.subr.bf16.mxu0 %v5702_v30  ;;  %v5772_v29 = vld [vmem:[%s6428_s10 + $0x4ec] ss:$16 sps:$4 sm:$0xff]   ;;  %v5767_v30 = vld [vmem:[%s6428_s10 + $0x3e8] ss:$16 sps:$4 sm:$0xff]  }
 0x177   : > { %4008 = vmatprep.subr.bf16.mxu1 %v5705_v31  ;;  %v5770_v31 = vld [vmem:[%s6428_s10 + $0x4e8] ss:$16 sps:$4 sm:$0xff]  }
 0x179   : > { %3968 = vmatpush1.bf16.msra.mxu0 %v5700_v32  ;;  %v5775_v32 = vld [vmem:[%s6428_s10 + $0x3cc] ss:$16 sps:$4 sm:$0xff]  }
 0x17a   : > { %4009 = vmatpush1.bf16.msra.mxu1 %v5703_v33  ;;  %3969 = vmatprep.subr.bf16.mxu0 %v5708_v34  ;;  %v5778_v33 = vld [vmem:[%s6428_s10 + $0x4cc] ss:$16 sps:$4 sm:$0xff]   ;;  %v5773_v34 = vld [vmem:[%s6428_s10 + $0x3c8] ss:$16 sps:$4 sm:$0xff]  }
 0x17b   : > { %4010 = vmatprep.subr.bf16.mxu1 %v5711_v35  ;;  %v5776_v35 = vld [vmem:[%s6428_s10 + $0x4c8] ss:$16 sps:$4 sm:$0xff]  }
 0x17d   : > { %3970 = vmatpush1.bf16.msra.mxu0 %v5706_v22 }
 0x17e   : > { %4011 = vmatpush1.bf16.msra.mxu1 %v5709_v23  ;;  %3971 = vmatprep.subr.bf16.mxu0 %v5714_v44 }
 0x17f   : > { %4012 = vmatprep.subr.bf16.mxu1 %v5717_v45 }
 0x181   : > { %3972 = vmatpush1.bf16.msra.mxu0 %v5712_v46 }
 0x182   : > { %4013 = vmatpush1.bf16.msra.mxu1 %v5715_v48  ;;  %4039 = vmatprep.subr.bf16.mxu0 %v5724_v52  ;;  %v5781_v48 = vld [vmem:[%s6428_s10 + $0x3ac] ss:$16 sps:$4 sm:$0xff]  }
 0x183   : > { %4014 = vmatprep.subr.bf16.mxu1 %v5721_v50 }
 0x184   : > { %3990 = vmatmul.mubr.bf16.vlgmr.msra.gmra.mxu0 %v5718_v49  ;;  %v5784_v49 = vld [vmem:[%s6428_s10 + $0x4ac] ss:$16 sps:$4 sm:$0xff]  }
 0x185   : > { %4040 = vmatpush1.bf16.msra.mxu0 %v5722_v54  ;;  %4071 = vmatprep.mubr.bf16.mxu0 %v6500_v51  ;;  %v5745_v51 = vld [vmem:[%s6428_s10 + $0x16c] ss:$16 sps:$4 sm:$0xff]   ;;  %v5782_v54 = vld [vmem:[%s6428_s10 + $0x4a8] ss:$16 sps:$4 sm:$0xff]  }
 0x186   : > { %4015 = vmatpush2.bf16.msra.mxu1 %v5719_v53  ;;  %4041 = vmatprep.subr.bf16.mxu0 %v5730_v56  ;;  %v5779_v53 = vld [vmem:[%s6428_s10 + $0x3a8] ss:$16 sps:$4 sm:$0xff]  }
 0x187   : > { %4016 = vmatprep.subr.bf16.mxu1 %v5727_v55 }
 0x189   : > { %4042 = vmatpush1.bf16.msra.mxu0 %v5728_v60  ;;  %v5790_v60 = vld [vmem:[%s6428_s10 + $0x48c] ss:$16 sps:$4 sm:$0xff]  }
 0x18a   : > { %4017 = vmatpush2.bf16.msra.mxu1 %v5725_v57  ;;  %4043 = vmatprep.subr.bf16.mxu0 %v5736_v62  ;;  %v5793_v62 = vld [vmem:[%s6428_s10 + $0x36c] ss:$16 sps:$4 sm:$0xff]  }
 0x18b   : > { %4018 = vmatprep.subr.bf16.mxu1 %v5733_v61  ;;  %v5788_v61 = vld [vmem:[%s6428_s10 + $0x488] ss:$16 sps:$4 sm:$0xff]  }
 0x18d   : > { %4044 = vmatpush1.bf16.msra.mxu0 %v5734_v0  ;;  %v5791_v0 = vld [vmem:[%s6428_s10 + $0x368] ss:$16 sps:$4 sm:$0xff]  }
 0x18e   : > { %4019 = vmatpush2.bf16.msra.mxu1 %v5731_v63  ;;  %4045 = vmatprep.subr.bf16.mxu0 %v5742_v41  ;;  %v5796_v63 = vld [vmem:[%s6428_s10 + $0x46c] ss:$16 sps:$4 sm:$0xff]  }
 0x18f   : > { %4020 = vmatprep.subr.bf16.mxu1 %v5739_v1  ;;  %v5794_v1 = vld [vmem:[%s6428_s10 + $0x468] ss:$16 sps:$4 sm:$0xff]   ;;  %v5799_v41 = vld [vmem:[%s6428_s10 + $0x34c] ss:$16 sps:$4 sm:$0xff]  }
 0x191   : > { %4046 = vmatpush1.bf16.msra.mxu0 %v5740_v3  ;;  %v5797_v3 = vld [vmem:[%s6428_s10 + $0x348] ss:$16 sps:$4 sm:$0xff]  }
 0x192   : > { %4021 = vmatpush2.bf16.msra.mxu1 %v5737_v2  ;;  %4047 = vmatprep.subr.bf16.mxu0 %v5748_v4  ;;  %v5802_v2 = vld [vmem:[%s6428_s10 + $0x44c] ss:$16 sps:$4 sm:$0xff]  }
 0x193   : > { %4022 = vmatprep.subr.bf16.mxu1 %v5745_v51  ;;  %v5800_v51 = vld [vmem:[%s6428_s10 + $0x448] ss:$16 sps:$4 sm:$0xff]   ;;  %v5805_v4 = vld [vmem:[%s6428_s10 + $0x32c] ss:$16 sps:$4 sm:$0xff]  }
 0x195   : > { %4048 = vmatpush1.bf16.msra.mxu0 %v5746_v8  ;;  %v5803_v8 = vld [vmem:[%s6428_s10 + $0x328] ss:$16 sps:$4 sm:$0xff]  }
 0x196   : > { %4023 = vmatpush2.bf16.msra.mxu1 %v5743_v5  ;;  %4049 = vmatprep.subr.bf16.mxu0 %v5754_v12  ;;  %v5808_v5 = vld [vmem:[%s6428_s10 + $0x42c] ss:$16 sps:$4 sm:$0xff]  }
 0x197   : > { %4024 = vmatprep.subr.bf16.mxu1 %v5751_v11  ;;  %v5806_v11 = vld [vmem:[%s6428_s10 + $0x428] ss:$16 sps:$4 sm:$0xff]   ;;  %v5811_v12 = vld [vmem:[%s6428_s10 + $0x30c] ss:$16 sps:$4 sm:$0xff]  }
 0x199   : > { %4050 = vmatpush1.bf16.msra.mxu0 %v5752_v14  ;;  %v5809_v14 = vld [vmem:[%s6428_s10 + $0x308] ss:$16 sps:$4 sm:$0xff]  }
 0x19a   : > { %4025 = vmatpush2.bf16.msra.mxu1 %v5749_v13  ;;  %4051 = vmatprep.subr.bf16.mxu0 %v5760_v18  ;;  %v5814_v13 = vld [vmem:[%s6428_s10 + $0x40c] ss:$16 sps:$4 sm:$0xff]  }
 0x19b   : > { %4026 = vmatprep.subr.bf16.mxu1 %v5757_v15  ;;  %v5812_v15 = vld [vmem:[%s6428_s10 + $0x408] ss:$16 sps:$4 sm:$0xff]   ;;  %v5817_v18 = vld [vmem:[%s6428_s10 + $0x5ec] ss:$16 sps:$4 sm:$0xff]  }
 0x19d   : > { %4052 = vmatpush1.bf16.msra.mxu0 %v5758_v20  ;;  %v5815_v20 = vld [vmem:[%s6428_s10 + $0x5e8] ss:$16 sps:$4 sm:$0xff]  }
 0x19e   : > { %4027 = vmatpush2.bf16.msra.mxu1 %v5755_v19  ;;  %4053 = vmatprep.subr.bf16.mxu0 %v5766_v21  ;;  %v5820_v19 = vld [vmem:[%s6428_s10 + $0x6ec] ss:$16 sps:$4 sm:$0xff]  }
 0x19f   : > { %4028 = vmatprep.subr.bf16.mxu1 %v5763_v47  ;;  %v5818_v47 = vld [vmem:[%s6428_s10 + $0x6e8] ss:$16 sps:$4 sm:$0xff]   ;;  %v5823_v21 = vld [vmem:[%s6428_s10 + $0x5cc] ss:$16 sps:$4 sm:$0xff]  }
 0x1a1   : > { %4054 = vmatpush1.bf16.msra.mxu0 %v5764_v27  ;;  %v5821_v27 = vld [vmem:[%s6428_s10 + $0x5c8] ss:$16 sps:$4 sm:$0xff]  }
 0x1a2   : > { %4029 = vmatpush2.bf16.msra.mxu1 %v5761_v26  ;;  %4055 = vmatprep.subr.bf16.mxu0 %v5769_v28  ;;  %v5826_v26 = vld [vmem:[%s6428_s10 + $0x6cc] ss:$16 sps:$4 sm:$0xff]   ;;  %v5824_v28 = vld [vmem:[%s6428_s10 + $0x6c8] ss:$16 sps:$4 sm:$0xff]  }
 0x1a3   : > { %4080 = vmatprep.subr.bf16.mxu1 %v5772_v29  ;;  %v5829_v29 = vld [vmem:[%s6428_s10 + $0x5ac] ss:$16 sps:$4 sm:$0xff]  }
 0x1a4   : > { %v3745_v22 = vpop.f32.mrf.mxu0 }
 0x1a5   : > { %v3786_v23 = vpop.f32.mrf.mxu1  ;;  %4031 = vmatmul.mubr.bf16.vlgmr.msra.gmra.mxu1 %v6522_v6  ;;  %v3746_v44 = vadd.f32 %v3745_v22, %v6814_v40  ;;  %4056 = vmatpush2.bf16.msra.mxu0 %v5767_v30  ;;  %v5832_v30 = vld [vmem:[%s6428_s10 + $0x6ac] ss:$16 sps:$4 sm:$0xff]  }
 0x1a6   : > { %4081 = vmatpush1.bf16.msra.mxu1 %v5770_v31  ;;  %v3747_v45 = vpop.f32.mrf.mxu0  ;;  %4057 = vmatprep.subr.bf16.mxu0 %v5775_v32  ;;  %v5827_v31 = vld [vmem:[%s6428_s10 + $0x5a8] ss:$16 sps:$4 sm:$0xff]   ;;  %v5835_v32 = vld [vmem:[%s6428_s10 + $0x58c] ss:$16 sps:$4 sm:$0xff]  }
 0x1a7   : > { %v3788_v46 = vpop.f32.mrf.mxu1  ;;  %4082 = vmatprep.subr.bf16.mxu1 %v5778_v33  ;;  %v6894_v50 = vadd.f32 %v3786_v23, %v3746_v44  ;;  %v3748_v52 = vadd.f32 %v3747_v45, %v6820_v9  ;;  %4112 = vmatprep.mubr.bf16.mxu1 %v6566_v36  ;;  %v5787_v9 = vld [vmem:[%s6428_s10 + $0x38c] ss:$16 sps:$4 sm:$0xff]   ;;  %v5785_v36 = vld [vmem:[%s6428_s10 + $0x388] ss:$16 sps:$4 sm:$0xff]  }
 0x1a8   : > { %v3749_v6 = vpop.f32.mrf.mxu0  ;;  %v5838_v33 = vld [vmem:[%s6428_s10 + $0x68c] ss:$16 sps:$4 sm:$0xff]   ;;  %v5839_v23 = vld [vmem:[%s6428_s10 + $0x568] ss:$16 sps:$4 sm:$0xff]  }
 0x1a9   : > { %v3790_v40 = vpop.f32.mrf.mxu1  ;;  %v6900_v55 = vadd.f32 %v3788_v46, %v3748_v52  ;;  %4058 = vmatpush2.bf16.msra.mxu0 %v5773_v34  ;;  %v5833_v34 = vld [vmem:[%s6428_s10 + $0x588] ss:$16 sps:$4 sm:$0xff]   ;;  %v5844_v22 = vld [vmem:[%s6428_s10 + $0x66c] ss:$16 sps:$4 sm:$0xff]  }
 0x1aa   : > { %4083 = vmatpush1.bf16.msra.mxu1 %v5776_v35  ;;  %v3750_v56 = vpop.f32.mrf.mxu0  ;;  %4059 = vmatprep.subr.bf16.mxu0 %v5781_v48  ;;  %v5836_v35 = vld [vmem:[%s6428_s10 + $0x688] ss:$16 sps:$4 sm:$0xff]   ;;  %v5847_v45 = vld [vmem:[%s6428_s10 + $0x54c] ss:$16 sps:$4 sm:$0xff]  }
 0x1ab   : > { %v3791_v57 = vpop.f32.mrf.mxu1  ;;  %4084 = vmatprep.subr.bf16.mxu1 %v5784_v49  ;;  %v5842_v44 = vld [vmem:[%s6428_s10 + $0x668] ss:$16 sps:$4 sm:$0xff]   ;;  %v5850_v46 = vld [vmem:[%s6428_s10 + $0x64c] ss:$16 sps:$4 sm:$0xff]  }
 0x1ac   : > { %v5845_v48 = vld [vmem:[%s6428_s10 + $0x548] ss:$16 sps:$4 sm:$0xff]   ;;  %v5853_v52 = vld [vmem:[%s6428_s10 + $0x52c] ss:$16 sps:$4 sm:$0xff]  }
 0x1ad   : > { %4060 = vmatpush2.bf16.msra.mxu0 %v5779_v53  ;;  %v5848_v49 = vld [vmem:[%s6428_s10 + $0x648] ss:$16 sps:$4 sm:$0xff]   ;;  %v5856_v53 = vld [vmem:[%s6428_s10 + $0x62c] ss:$16 sps:$4 sm:$0xff]  }
 0x1ae   : > { %4085 = vmatpush1.bf16.msra.mxu1 %v5782_v54  ;;  %4061 = vmatprep.subr.bf16.mxu0 %v5787_v9  ;;  %v5851_v54 = vld [vmem:[%s6428_s10 + $0x528] ss:$16 sps:$4 sm:$0xff]   ;;  %v5859_v40 = vld [vmem:[%s6428_s10 + $0x50c] ss:$16 sps:$4 sm:$0xff]  }
 0x1af   : > { %4086 = vmatprep.subr.bf16.mxu1 %v5790_v60  ;;  %v5854_v6 = vld [vmem:[%s6428_s10 + $0x628] ss:$16 sps:$4 sm:$0xff]   ;;  %v5862_v56 = vld [vmem:[%s6428_s10 + $0x60c] ss:$16 sps:$4 sm:$0xff]  }
 0x1b0   : > { %v5857_v57 = vld [vmem:[%s6428_s10 + $0x508] ss:$16 sps:$4 sm:$0xff]   ;;  %v5865_v60 = vld [vmem:[%s6428_s10 + $0x7ec] ss:$16 sps:$4 sm:$0xff]  }
 0x1b1   : > { %4062 = vmatpush2.bf16.msra.mxu0 %v5785_v36  ;;  %v5860_v9 = vld [vmem:[%s6428_s10 + $0x608] ss:$16 sps:$4 sm:$0xff]   ;;  %v5868_v36 = vld [vmem:[%s6428_s10 + $0x8ec] ss:$16 sps:$4 sm:$0xff]  }
 0x1b2   : > { %4087 = vmatpush1.bf16.msra.mxu1 %v5788_v61  ;;  %4063 = vmatprep.subr.bf16.mxu0 %v5793_v62  ;;  %v5863_v61 = vld [vmem:[%s6428_s10 + $0x7e8] ss:$16 sps:$4 sm:$0xff]  }
 0x1b3   : > { %4088 = vmatprep.subr.bf16.mxu1 %v5796_v63  ;;  %v5866_v62 = vld [vmem:[%s6428_s10 + $0x8e8] ss:$16 sps:$4 sm:$0xff]   ;;  %v5871_v63 = vld [vmem:[%s6428_s10 + $0x7cc] ss:$16 sps:$4 sm:$0xff]  }
 0x1b5   : > { %4064 = vmatpush2.bf16.msra.mxu0 %v5791_v0  ;;  %v5874_v0 = vld [vmem:[%s6428_s10 + $0x8cc] ss:$16 sps:$4 sm:$0xff]  }
 0x1b6   : > { %4089 = vmatpush1.bf16.msra.mxu1 %v5794_v1  ;;  %4065 = vmatprep.subr.bf16.mxu0 %v5799_v41 }
 0x1b7   : > { %4090 = vmatprep.subr.bf16.mxu1 %v5802_v2 }
 0x1b9   : > { %4066 = vmatpush2.bf16.msra.mxu0 %v5797_v3  ;;  %v5869_v3 = vld [vmem:[%s6428_s10 + $0x7c8] ss:$16 sps:$4 sm:$0xff]  }
 0x1ba   : > { %4091 = vmatpush1.bf16.msra.mxu1 %v5800_v51  ;;  %4067 = vmatprep.subr.bf16.mxu0 %v5805_v4  ;;  %v5872_v51 = vld [vmem:[%s6428_s10 + $0x8c8] ss:$16 sps:$4 sm:$0xff]  }
 0x1bb   : > { %4092 = vmatprep.subr.bf16.mxu1 %v5808_v5 }
 0x1bd   : > { %4068 = vmatpush2.bf16.msra.mxu0 %v5803_v8  ;;  %v5877_v8 = vld [vmem:[%s6428_s10 + $0x7ac] ss:$16 sps:$4 sm:$0xff]  }
 0x1be   : > { %4093 = vmatpush1.bf16.msra.mxu1 %v5806_v11  ;;  %4069 = vmatprep.subr.bf16.mxu0 %v5811_v12  ;;  %v5880_v11 = vld [vmem:[%s6428_s10 + $0x8ac] ss:$16 sps:$4 sm:$0xff]  }
 0x1bf   : > { %4094 = vmatprep.subr.bf16.mxu1 %v5814_v13 }
 0x1c1   : > { %4070 = vmatpush2.bf16.msra.mxu0 %v5809_v14 }
 0x1c2   : > { %4095 = vmatpush1.bf16.msra.mxu1 %v5812_v15  ;;  %4121 = vmatprep.subr.bf16.mxu0 %v5820_v19  ;;  %v5875_v15 = vld [vmem:[%s6428_s10 + $0x7a8] ss:$16 sps:$4 sm:$0xff]  }
 0x1c3   : > { %4096 = vmatprep.subr.bf16.mxu1 %v5817_v18  ;;  %v5878_v18 = vld [vmem:[%s6428_s10 + $0x8a8] ss:$16 sps:$4 sm:$0xff]  }
 0x1c4   : > { %4072 = vmatmul.mubr.bf16.vlgmr.msra.gmra.mxu0 %v6524_v7  ;;  %v5830_v7 = vld [vmem:[%s6428_s10 + $0x6a8] ss:$16 sps:$4 sm:$0xff]  }
 0x1c5   : > { %4122 = vmatpush1.bf16.msra.mxu0 %v5818_v47  ;;  %4153 = vmatprep.mubr.bf16.mxu0 %v6570_v37  ;;  %v5841_v37 = vld [vmem:[%s6428_s10 + $0x56c] ss:$16 sps:$4 sm:$0xff]   ;;  %v5881_v47 = vld [vmem:[%s6428_s10 + $0x788] ss:$16 sps:$4 sm:$0xff]  }
 0x1c6   : > { %4097 = vmatpush2.bf16.msra.mxu1 %v5815_v20  ;;  %4123 = vmatprep.subr.bf16.mxu0 %v5826_v26  ;;  %v5889_v26 = vld [vmem:[%s6428_s10 + $0x76c] ss:$16 sps:$4 sm:$0xff]  }
 0x1c7   : > { %4098 = vmatprep.subr.bf16.mxu1 %v5823_v21  ;;  %v5884_v21 = vld [vmem:[%s6428_s10 + $0x888] ss:$16 sps:$4 sm:$0xff]  }
 0x1c9   : > { %4124 = vmatpush1.bf16.msra.mxu0 %v5824_v28  ;;  %v5887_v28 = vld [vmem:[%s6428_s10 + $0x768] ss:$16 sps:$4 sm:$0xff]  }
 0x1ca   : > { %4099 = vmatpush2.bf16.msra.mxu1 %v5821_v27  ;;  %4125 = vmatprep.subr.bf16.mxu0 %v5832_v30  ;;  %v5892_v27 = vld [vmem:[%s6428_s10 + $0x86c] ss:$16 sps:$4 sm:$0xff]  }
 0x1cb   : > { %4100 = vmatprep.subr.bf16.mxu1 %v5829_v29  ;;  %v5890_v29 = vld [vmem:[%s6428_s10 + $0x868] ss:$16 sps:$4 sm:$0xff]   ;;  %v5895_v30 = vld [vmem:[%s6428_s10 + $0x74c] ss:$16 sps:$4 sm:$0xff]  }
 0x1cd   : > { %4126 = vmatpush1.bf16.msra.mxu0 %v5830_v7  ;;  %v5893_v7 = vld [vmem:[%s6428_s10 + $0x748] ss:$16 sps:$4 sm:$0xff]  }
 0x1ce   : > { %4101 = vmatpush2.bf16.msra.mxu1 %v5827_v31  ;;  %4127 = vmatprep.subr.bf16.mxu0 %v5838_v33  ;;  %v5898_v31 = vld [vmem:[%s6428_s10 + $0x84c] ss:$16 sps:$4 sm:$0xff]  }
 0x1cf   : > { %4102 = vmatprep.subr.bf16.mxu1 %v5835_v32  ;;  %v5896_v32 = vld [vmem:[%s6428_s10 + $0x848] ss:$16 sps:$4 sm:$0xff]   ;;  %v5901_v33 = vld [vmem:[%s6428_s10 + $0x72c] ss:$16 sps:$4 sm:$0xff]  }
 0x1d1   : > { %4128 = vmatpush1.bf16.msra.mxu0 %v5836_v35  ;;  %v5899_v35 = vld [vmem:[%s6428_s10 + $0x728] ss:$16 sps:$4 sm:$0xff]  }
 0x1d2   : > { %4103 = vmatpush2.bf16.msra.mxu1 %v5833_v34  ;;  %4129 = vmatprep.subr.bf16.mxu0 %v5844_v22  ;;  %v5904_v34 = vld [vmem:[%s6428_s10 + $0x82c] ss:$16 sps:$4 sm:$0xff]  }
 0x1d3   : > { %4104 = vmatprep.subr.bf16.mxu1 %v5841_v37  ;;  %v5902_v37 = vld [vmem:[%s6428_s10 + $0x828] ss:$16 sps:$4 sm:$0xff]   ;;  %v5907_v22 = vld [vmem:[%s6428_s10 + $0x70c] ss:$16 sps:$4 sm:$0xff]  }
 0x1d5   : > { %4130 = vmatpush1.bf16.msra.mxu0 %v5842_v44  ;;  %v5905_v44 = vld [vmem:[%s6428_s10 + $0x708] ss:$16 sps:$4 sm:$0xff]  }
 0x1d6   : > { %4105 = vmatpush2.bf16.msra.mxu1 %v5839_v23  ;;  %4131 = vmatprep.subr.bf16.mxu0 %v5850_v46  ;;  %v5910_v23 = vld [vmem:[%s6428_s10 + $0x80c] ss:$16 sps:$4 sm:$0xff]  }
 0x1d7   : > { %4106 = vmatprep.subr.bf16.mxu1 %v5847_v45  ;;  %v5908_v45 = vld [vmem:[%s6428_s10 + $0x808] ss:$16 sps:$4 sm:$0xff]   ;;  %v5913_v46 = vld [vmem:[%s6428_s10 + $0x9ec] ss:$16 sps:$4 sm:$0xff]  }
 0x1d9   : > { %4132 = vmatpush1.bf16.msra.mxu0 %v5848_v49  ;;  %v5911_v49 = vld [vmem:[%s6428_s10 + $0x9e8] ss:$16 sps:$4 sm:$0xff]  }
 0x1da   : > { %4107 = vmatpush2.bf16.msra.mxu1 %v5845_v48  ;;  %4133 = vmatprep.subr.bf16.mxu0 %v5856_v53  ;;  %v5916_v48 = vld [vmem:[%s6428_s10 + $0xaec] ss:$16 sps:$4 sm:$0xff]  }
 0x1db   : > { %4108 = vmatprep.subr.bf16.mxu1 %v5853_v52  ;;  %v5914_v52 = vld [vmem:[%s6428_s10 + $0xae8] ss:$16 sps:$4 sm:$0xff]   ;;  %v5919_v53 = vld [vmem:[%s6428_s10 + $0x9cc] ss:$16 sps:$4 sm:$0xff]  }
 0x1dd   : > { %4134 = vmatpush1.bf16.msra.mxu0 %v5854_v6  ;;  %v5917_v6 = vld [vmem:[%s6428_s10 + $0x9c8] ss:$16 sps:$4 sm:$0xff]  }
 0x1de   : > { %4109 = vmatpush2.bf16.msra.mxu1 %v5851_v54  ;;  %4135 = vmatprep.subr.bf16.mxu0 %v5862_v56  ;;  %v5922_v54 = vld [vmem:[%s6428_s10 + $0xacc] ss:$16 sps:$4 sm:$0xff]  }
 0x1df   : > { %4110 = vmatprep.subr.bf16.mxu1 %v5859_v40  ;;  %v5920_v40 = vld [vmem:[%s6428_s10 + $0xac8] ss:$16 sps:$4 sm:$0xff]   ;;  %v5925_v56 = vld [vmem:[%s6428_s10 + $0x9ac] ss:$16 sps:$4 sm:$0xff]  }
 0x1e1   : > { %4136 = vmatpush1.bf16.msra.mxu0 %v5860_v9  ;;  %v5923_v9 = vld [vmem:[%s6428_s10 + $0x9a8] ss:$16 sps:$4 sm:$0xff]  }
 0x1e2   : > { %4111 = vmatpush2.bf16.msra.mxu1 %v5857_v57  ;;  %4137 = vmatprep.subr.bf16.mxu0 %v5865_v60  ;;  %v5928_v57 = vld [vmem:[%s6428_s10 + $0xaac] ss:$16 sps:$4 sm:$0xff]  }
 0x1e3   : > { %4162 = vmatprep.subr.bf16.mxu1 %v5868_v36  ;;  %v5931_v60 = vld [vmem:[%s6428_s10 + $0x98c] ss:$16 sps:$4 sm:$0xff]  }
 0x1e4   : > { %v3827_v1 = vpop.f32.mrf.mxu0  ;;  %v5934_v36 = vld [vmem:[%s6428_s10 + $0xa8c] ss:$16 sps:$4 sm:$0xff]  }
 0x1e5   : > { %v3868_v41 = vpop.f32.mrf.mxu1  ;;  %4113 = vmatmul.mubr.bf16.vlgmr.msra.gmra.mxu1 %v6614_v16  ;;  %v3828_v2 = vadd.f32 %v3827_v1, %v6894_v50  ;;  %4138 = vmatpush2.bf16.msra.mxu0 %v5863_v61  ;;  %v5929_v61 = vld [vmem:[%s6428_s10 + $0x988] ss:$16 sps:$4 sm:$0xff]  }
 0x1e6   : > { %4163 = vmatpush1.bf16.msra.mxu1 %v5866_v62  ;;  %v3829_v4 = vpop.f32.mrf.mxu0  ;;  %4139 = vmatprep.subr.bf16.mxu0 %v5871_v63  ;;  %v5932_v62 = vld [vmem:[%s6428_s10 + $0xa88] ss:$16 sps:$4 sm:$0xff]   ;;  %v5940_v63 = vld [vmem:[%s6428_s10 + $0xa6c] ss:$16 sps:$4 sm:$0xff]  }
 0x1e7   : > { %v3870_v5 = vpop.f32.mrf.mxu1  ;;  %4164 = vmatprep.subr.bf16.mxu1 %v5874_v0  ;;  %v6968_v12 = vadd.f32 %v3868_v41, %v3828_v2  ;;  %v3830_v16 = vadd.f32 %v3829_v4, %v6900_v55  ;;  %4194 = vmatprep.mubr.bf16.mxu1 %v6636_v24  ;;  %v5883_v55 = vld [vmem:[%s6428_s10 + $0x78c] ss:$16 sps:$4 sm:$0xff]   ;;  %v5935_v0 = vld [vmem:[%s6428_s10 + $0x968] ss:$16 sps:$4 sm:$0xff]  }
 0x1e8   : > { %v3831_v50 = vpop.f32.mrf.mxu0  ;;  %v5886_v24 = vld [vmem:[%s6428_s10 + $0x88c] ss:$16 sps:$4 sm:$0xff]   ;;  %v5938_v1 = vld [vmem:[%s6428_s10 + $0xa68] ss:$16 sps:$4 sm:$0xff]  }
 0x1e9   : > { %v3872_v13 = vpop.f32.mrf.mxu1  ;;  %v6972_v14 = vadd.f32 %v3870_v5, %v3830_v16  ;;  %4140 = vmatpush2.bf16.msra.mxu0 %v5869_v3  ;;  %v5943_v41 = vld [vmem:[%s6428_s10 + $0x94c] ss:$16 sps:$4 sm:$0xff]   ;;  %v5941_v3 = vld [vmem:[%s6428_s10 + $0x948] ss:$16 sps:$4 sm:$0xff]  }
 0x1ea   : > { %4165 = vmatpush1.bf16.msra.mxu1 %v5872_v51  ;;  %v3832_v19 = vpop.f32.mrf.mxu0  ;;  %4141 = vmatprep.subr.bf16.mxu0 %v5877_v8  ;;  %v5946_v2 = vld [vmem:[%s6428_s10 + $0xa4c] ss:$16 sps:$4 sm:$0xff]   ;;  %v5944_v51 = vld [vmem:[%s6428_s10 + $0xa48] ss:$16 sps:$4 sm:$0xff]  }
 0x1eb   : > { %v3873_v20 = vpop.f32.mrf.mxu1  ;;  %4166 = vmatprep.subr.bf16.mxu1 %v5880_v11  ;;  %v5949_v4 = vld [vmem:[%s6428_s10 + $0x92c] ss:$16 sps:$4 sm:$0xff]   ;;  %v5947_v8 = vld [vmem:[%s6428_s10 + $0x928] ss:$16 sps:$4 sm:$0xff]  }
 0x1ec   : > { %v5952_v5 = vld [vmem:[%s6428_s10 + $0xa2c] ss:$16 sps:$4 sm:$0xff]   ;;  %v5950_v11 = vld [vmem:[%s6428_s10 + $0xa28] ss:$16 sps:$4 sm:$0xff]  }
 0x1ed   : > { %4142 = vmatpush2.bf16.msra.mxu0 %v5875_v15  ;;  %v5955_v16 = vld [vmem:[%s6428_s10 + $0x90c] ss:$16 sps:$4 sm:$0xff]   ;;  %v5953_v13 = vld [vmem:[%s6428_s10 + $0x908] ss:$16 sps:$4 sm:$0xff]  }
 0x1ee   : > { %4167 = vmatpush1.bf16.msra.mxu1 %v5878_v18  ;;  %4143 = vmatprep.subr.bf16.mxu0 %v5883_v55  ;;  %v5958_v50 = vld [vmem:[%s6428_s10 + $0xa0c] ss:$16 sps:$4 sm:$0xff]   ;;  %v5956_v15 = vld [vmem:[%s6428_s10 + $0xa08] ss:$16 sps:$4 sm:$0xff]  }
 0x1ef   : > { %4168 = vmatprep.subr.bf16.mxu1 %v5886_v24  ;;  %v5961_v18 = vld [vmem:[%s6428_s10 + $0xbec] ss:$16 sps:$4 sm:$0xff]   ;;  %v5959_v20 = vld [vmem:[%s6428_s10 + $0xbe8] ss:$16 sps:$4 sm:$0xff]  }
 0x1f0   : > { %v5964_v19 = vld [vmem:[%s6428_s10 + $0xcec] ss:$16 sps:$4 sm:$0xff]   ;;  %v5962_v55 = vld [vmem:[%s6428_s10 + $0xce8] ss:$16 sps:$4 sm:$0xff]  }
 0x1f1   : > { %4144 = vmatpush2.bf16.msra.mxu0 %v5881_v47  ;;  %v5967_v24 = vld [vmem:[%s6428_s10 + $0xbcc] ss:$16 sps:$4 sm:$0xff]  }
 0x1f2   : > { %4169 = vmatpush1.bf16.msra.mxu1 %v5884_v21  ;;  %4145 = vmatprep.subr.bf16.mxu0 %v5889_v26  ;;  %v5970_v47 = vld [vmem:[%s6428_s10 + $0xccc] ss:$16 sps:$4 sm:$0xff]  }
 0x1f3   : > { %4170 = vmatprep.subr.bf16.mxu1 %v5892_v27  ;;  %v5965_v27 = vld [vmem:[%s6428_s10 + $0xbc8] ss:$16 sps:$4 sm:$0xff]  }
 0x1f5   : > { %4146 = vmatpush2.bf16.msra.mxu0 %v5887_v28  ;;  %v5968_v28 = vld [vmem:[%s6428_s10 + $0xcc8] ss:$16 sps:$4 sm:$0xff]  }
 0x1f6   : > { %4171 = vmatpush1.bf16.msra.mxu1 %v5890_v29  ;;  %4147 = vmatprep.subr.bf16.mxu0 %v5895_v30 }
 0x1f7   : > { %4172 = vmatprep.subr.bf16.mxu1 %v5898_v31  ;;  %v5973_v31 = vld [vmem:[%s6428_s10 + $0xbac] ss:$16 sps:$4 sm:$0xff]  }
 0x1f9   : > { %4148 = vmatpush2.bf16.msra.mxu0 %v5893_v7  ;;  %v5976_v7 = vld [vmem:[%s6428_s10 + $0xcac] ss:$16 sps:$4 sm:$0xff]  }
 0x1fa   : > { %4173 = vmatpush1.bf16.msra.mxu1 %v5896_v32  ;;  %4149 = vmatprep.subr.bf16.mxu0 %v5901_v33  ;;  %v5971_v33 = vld [vmem:[%s6428_s10 + $0xba8] ss:$16 sps:$4 sm:$0xff]  }
 0x1fb   : > { %4174 = vmatprep.subr.bf16.mxu1 %v5904_v34  ;;  %v5974_v34 = vld [vmem:[%s6428_s10 + $0xca8] ss:$16 sps:$4 sm:$0xff]  }
 0x1fd   : > { %4150 = vmatpush2.bf16.msra.mxu0 %v5899_v35 }
 0x1fe   : > { %4175 = vmatpush1.bf16.msra.mxu1 %v5902_v37  ;;  %4151 = vmatprep.subr.bf16.mxu0 %v5907_v22  ;;  %v5979_v22 = vld [vmem:[%s6428_s10 + $0xb8c] ss:$16 sps:$4 sm:$0xff]  }
 0x1ff   : > { %4176 = vmatprep.subr.bf16.mxu1 %v5910_v23  ;;  %v5982_v23 = vld [vmem:[%s6428_s10 + $0xc8c] ss:$16 sps:$4 sm:$0xff]  }
 0x201   : > { %4152 = vmatpush2.bf16.msra.mxu0 %v5905_v44  ;;  %v5980_v44 = vld [vmem:[%s6428_s10 + $0xc88] ss:$16 sps:$4 sm:$0xff]  }
 0x202   : > { %4177 = vmatpush1.bf16.msra.mxu1 %v5908_v45  ;;  %4203 = vmatprep.subr.bf16.mxu0 %v5916_v48  ;;  %v5985_v45 = vld [vmem:[%s6428_s10 + $0xb6c] ss:$16 sps:$4 sm:$0xff]   ;;  %v5983_v48 = vld [vmem:[%s6428_s10 + $0xb68] ss:$16 sps:$4 sm:$0xff]  }
 0x203   : > { %4178 = vmatprep.subr.bf16.mxu1 %v5913_v46  ;;  %v5988_v46 = vld [vmem:[%s6428_s10 + $0xc6c] ss:$16 sps:$4 sm:$0xff]  }
 0x204   : > { %4154 = vmatmul.mubr.bf16.vlgmr.msra.gmra.mxu0 %v6618_v17  ;;  %v5926_v17 = vld [vmem:[%s6428_s10 + $0xaa8] ss:$16 sps:$4 sm:$0xff]  }
 0x205   : > { %4204 = vmatpush1.bf16.msra.mxu0 %v5914_v52  ;;  %4235 = vmatprep.mubr.bf16.mxu0 %v6640_v25  ;;  %v5937_v25 = vld [vmem:[%s6428_s10 + $0x96c] ss:$16 sps:$4 sm:$0xff]  }
 0x206   : > { %4179 = vmatpush2.bf16.msra.mxu1 %v5911_v49  ;;  %4205 = vmatprep.subr.bf16.mxu0 %v5922_v54  ;;  %v5986_v49 = vld [vmem:[%s6428_s10 + $0xc68] ss:$16 sps:$4 sm:$0xff]   ;;  %v5991_v52 = vld [vmem:[%s6428_s10 + $0xb4c] ss:$16 sps:$4 sm:$0xff]  }
 0x207   : > { %4180 = vmatprep.subr.bf16.mxu1 %v5919_v53  ;;  %v5994_v53 = vld [vmem:[%s6428_s10 + $0xc4c] ss:$16 sps:$4 sm:$0xff]   ;;  %v5989_v54 = vld [vmem:[%s6428_s10 + $0xb48] ss:$16 sps:$4 sm:$0xff]  }
 0x209   : > { %4206 = vmatpush1.bf16.msra.mxu0 %v5920_v40  ;;  %v5997_v40 = vld [vmem:[%s6428_s10 + $0xb2c] ss:$16 sps:$4 sm:$0xff]  }
 0x20a   : > { %4181 = vmatpush2.bf16.msra.mxu1 %v5917_v6  ;;  %4207 = vmatprep.subr.bf16.mxu0 %v5928_v57  ;;  %v5992_v6 = vld [vmem:[%s6428_s10 + $0xc48] ss:$16 sps:$4 sm:$0xff]  }
 0x20b   : > { %4182 = vmatprep.subr.bf16.mxu1 %v5925_v56  ;;  %v6000_v56 = vld [vmem:[%s6428_s10 + $0xc2c] ss:$16 sps:$4 sm:$0xff]   ;;  %v5995_v57 = vld [vmem:[%s6428_s10 + $0xb28] ss:$16 sps:$4 sm:$0xff]  }
 0x20d   : > { %4208 = vmatpush1.bf16.msra.mxu0 %v5926_v17  ;;  %v6003_v17 = vld [vmem:[%s6428_s10 + $0xb0c] ss:$16 sps:$4 sm:$0xff]  }
 0x20e   : > { %4183 = vmatpush2.bf16.msra.mxu1 %v5923_v9  ;;  %4209 = vmatprep.subr.bf16.mxu0 %v5934_v36  ;;  %v5998_v9 = vld [vmem:[%s6428_s10 + $0xc28] ss:$16 sps:$4 sm:$0xff]  }
 0x20f   : > { %4184 = vmatprep.subr.bf16.mxu1 %v5931_v60  ;;  %v6006_v60 = vld [vmem:[%s6428_s10 + $0xc0c] ss:$16 sps:$4 sm:$0xff]   ;;  %v6001_v36 = vld [vmem:[%s6428_s10 + $0xb08] ss:$16 sps:$4 sm:$0xff]  }
 0x211   : > { %4210 = vmatpush1.bf16.msra.mxu0 %v5932_v62  ;;  %v6009_v62 = vld [vmem:[%s6428_s10 + $0xdec] ss:$16 sps:$4 sm:$0xff]  }
 0x212   : > { %4185 = vmatpush2.bf16.msra.mxu1 %v5929_v61  ;;  %4211 = vmatprep.subr.bf16.mxu0 %v5940_v63  ;;  %v6004_v61 = vld [vmem:[%s6428_s10 + $0xc08] ss:$16 sps:$4 sm:$0xff]  }
 0x213   : > { %4186 = vmatprep.subr.bf16.mxu1 %v5937_v25  ;;  %v6012_v25 = vld [vmem:[%s6428_s10 + $0xeec] ss:$16 sps:$4 sm:$0xff]  }
 0x215   : > { %4212 = vmatpush1.bf16.msra.mxu0 %v5938_v1  ;;  %v6007_v1 = vld [vmem:[%s6428_s10 + $0xde8] ss:$16 sps:$4 sm:$0xff]  }
 0x216   : > { %4187 = vmatpush2.bf16.msra.mxu1 %v5935_v0  ;;  %4213 = vmatprep.subr.bf16.mxu0 %v5946_v2  ;;  %v6015_v2 = vld [vmem:[%s6428_s10 + $0xdcc] ss:$16 sps:$4 sm:$0xff]  }
 0x217   : > { %4188 = vmatprep.subr.bf16.mxu1 %v5943_v41  ;;  %v6010_v41 = vld [vmem:[%s6428_s10 + $0xee8] ss:$16 sps:$4 sm:$0xff]  }
 0x219   : > { %4214 = vmatpush1.bf16.msra.mxu0 %v5944_v51 }
 0x21a   : > { %4189 = vmatpush2.bf16.msra.mxu1 %v5941_v3  ;;  %4215 = vmatprep.subr.bf16.mxu0 %v5952_v5  ;;  %v6018_v3 = vld [vmem:[%s6428_s10 + $0xecc] ss:$16 sps:$4 sm:$0xff]   ;;  %v6013_v5 = vld [vmem:[%s6428_s10 + $0xdc8] ss:$16 sps:$4 sm:$0xff]  }
 0x21b   : > { %4190 = vmatprep.subr.bf16.mxu1 %v5949_v4 }
 0x21d   : > { %4216 = vmatpush1.bf16.msra.mxu0 %v5950_v11 }
 0x21e   : > { %4191 = vmatpush2.bf16.msra.mxu1 %v5947_v8  ;;  %4217 = vmatprep.subr.bf16.mxu0 %v5958_v50  ;;  %v6016_v8 = vld [vmem:[%s6428_s10 + $0xec8] ss:$16 sps:$4 sm:$0xff]   ;;  %v6024_v50 = vld [vmem:[%s6428_s10 + $0xeac] ss:$16 sps:$4 sm:$0xff]  }
 0x21f   : > { %4192 = vmatprep.subr.bf16.mxu1 %v5955_v16  ;;  %v6021_v16 = vld [vmem:[%s6428_s10 + $0xdac] ss:$16 sps:$4 sm:$0xff]  }
 0x221   : > { %4218 = vmatpush1.bf16.msra.mxu0 %v5956_v15 }
 0x222   : > { %4193 = vmatpush2.bf16.msra.mxu1 %v5953_v13  ;;  %4219 = vmatprep.subr.bf16.mxu0 %v5961_v18 }
 0x223   : > { %4244 = vmatprep.subr.bf16.mxu1 %v5964_v19 }
 0x224   : > { %v7036_v21 = vpop.f32.mrf.mxu0 }
 0x225   : > { %v7038_v26 = vpop.f32.mrf.mxu1  ;;  %4195 = vmatmul.mubr.bf16.vlgmr.msra.gmra.mxu1 %v6710_v38  ;;  %4220 = vmatpush2.bf16.msra.mxu0 %v5959_v20  ;;  %v3910_v63 = vadd.f32 %v7036_v21, %v6968_v12  ;;  %v6019_v20 = vld [vmem:[%s6428_s10 + $0xda8] ss:$16 sps:$4 sm:$0xff]   ;;  %v6030_v21 = vld [vmem:[%s6428_s10 + $0xe8c] ss:$16 sps:$4 sm:$0xff]  }
 0x226   : > { %4245 = vmatpush1.bf16.msra.mxu1 %v5962_v55  ;;  %v3911_v29 = vpop.f32.mrf.mxu0  ;;  %4221 = vmatprep.subr.bf16.mxu0 %v5967_v24  ;;  %v6022_v55 = vld [vmem:[%s6428_s10 + $0xea8] ss:$16 sps:$4 sm:$0xff]  }
 0x227   : > { %v7043_v30 = vpop.f32.mrf.mxu1  ;;  %4246 = vmatprep.subr.bf16.mxu1 %v5970_v47  ;;  %4276 = vmatprep.mubr.bf16.mxu1 %v6730_v42  ;;  %v5977_v42 = vld [vmem:[%s6428_s10 + $0xb88] ss:$16 sps:$4 sm:$0xff]   ;;  %v3912_v0 = vadd.f32 %v3911_v29, %v6972_v14  ;;  %v3951_v51 = vadd.f32 %v7038_v26, %v3910_v63  ;;  %v6027_v47 = vld [vmem:[%s6428_s10 + $0xd8c] ss:$16 sps:$4 sm:$0xff]  }
 0x228   : > { %v3913_v38 = vpop.f32.mrf.mxu0  ;;  %v6025_v29 = vld [vmem:[%s6428_s10 + $0xd88] ss:$16 sps:$4 sm:$0xff]  }
 0x229   : > { %v3954_v32 = vpop.f32.mrf.mxu1  ;;  %4222 = vmatpush2.bf16.msra.mxu0 %v5965_v27  ;;  %v3953_v12 = vadd.f32 %v7043_v30, %v3912_v0  ;;  %v6028_v30 = vld [vmem:[%s6428_s10 + $0xe88] ss:$16 sps:$4 sm:$0xff]  }
 0x22a   : > { %4247 = vmatpush1.bf16.msra.mxu1 %v5968_v28  ;;  %v3914_v35 = vpop.f32.mrf.mxu0  ;;  %4223 = vmatprep.subr.bf16.mxu0 %v5973_v31  ;;  %v6033_v31 = vld [vmem:[%s6428_s10 + $0xd6c] ss:$16 sps:$4 sm:$0xff]   ;;  %v6049_v63 = vld [vmem:[%s6428_s10 + $0xd08] ss:$16 sps:$4 sm:$0xff]  }
 0x22b   : > { %v3955_v37 = vpop.f32.mrf.mxu1  ;;  %4248 = vmatprep.subr.bf16.mxu1 %v5976_v7  ;;  %v6036_v7 = vld [vmem:[%s6428_s10 + $0xe6c] ss:$16 sps:$4 sm:$0xff]   ;;  %v6031_v35 = vld [vmem:[%s6428_s10 + $0xd68] ss:$16 sps:$4 sm:$0xff]  }
 0x22c   : > { %v6034_v37 = vld [vmem:[%s6428_s10 + $0xe68] ss:$16 sps:$4 sm:$0xff]  }
 0x22d   : > { %4224 = vmatpush2.bf16.msra.mxu0 %v5971_v33  ;;  %v6052_v0 = vld [vmem:[%s6428_s10 + $0xe08] ss:$16 sps:$4 sm:$0xff]  }
 0x22e   : > { %4249 = vmatpush1.bf16.msra.mxu1 %v5974_v34  ;;  %4225 = vmatprep.subr.bf16.mxu0 %v5979_v22  ;;  %v6039_v22 = vld [vmem:[%s6428_s10 + $0xd4c] ss:$16 sps:$4 sm:$0xff]  }
 0x22f   : > { %4250 = vmatprep.subr.bf16.mxu1 %v5982_v23  ;;  %v6042_v23 = vld [vmem:[%s6428_s10 + $0xe4c] ss:$16 sps:$4 sm:$0xff]  }
 0x231   : > { %4226 = vmatpush2.bf16.msra.mxu0 %v5977_v42 }
 0x232   : > { %4251 = vmatpush1.bf16.msra.mxu1 %v5980_v44  ;;  %4227 = vmatprep.subr.bf16.mxu0 %v5985_v45 }
 0x233   : > { %4252 = vmatprep.subr.bf16.mxu1 %v5988_v46 }
 0x235   : > { %4228 = vmatpush2.bf16.msra.mxu0 %v5983_v48  ;;  %v6037_v48 = vld [vmem:[%s6428_s10 + $0xd48] ss:$16 sps:$4 sm:$0xff]  }
 0x236   : > { %4253 = vmatpush1.bf16.msra.mxu1 %v5986_v49  ;;  %4229 = vmatprep.subr.bf16.mxu0 %v5991_v52  ;;  %v6040_v49 = vld [vmem:[%s6428_s10 + $0xe48] ss:$16 sps:$4 sm:$0xff]   ;;  %v6045_v52 = vld [vmem:[%s6428_s10 + $0xd2c] ss:$16 sps:$4 sm:$0xff]  }
 0x237   : > { %4254 = vmatprep.subr.bf16.mxu1 %v5994_v53  ;;  %v6048_v53 = vld [vmem:[%s6428_s10 + $0xe2c] ss:$16 sps:$4 sm:$0xff]  }
 0x239   : > { %4230 = vmatpush2.bf16.msra.mxu0 %v5989_v54 }
 0x23a   : > { %4255 = vmatpush1.bf16.msra.mxu1 %v5992_v6  ;;  %4231 = vmatprep.subr.bf16.mxu0 %v5997_v40 }
 0x23b   : > { %4256 = vmatprep.subr.bf16.mxu1 %v6000_v56 }
 0x23d   : > { %4232 = vmatpush2.bf16.msra.mxu0 %v5995_v57  ;;  %v6043_v57 = vld [vmem:[%s6428_s10 + $0xd28] ss:$16 sps:$4 sm:$0xff]  }
 0x23e   : > { %4257 = vmatpush1.bf16.msra.mxu1 %v5998_v9  ;;  %4233 = vmatprep.subr.bf16.mxu0 %v6003_v17  ;;  %v6046_v9 = vld [vmem:[%s6428_s10 + $0xe28] ss:$16 sps:$4 sm:$0xff]   ;;  %v6051_v17 = vld [vmem:[%s6428_s10 + $0xd0c] ss:$16 sps:$4 sm:$0xff]  }
 0x23f   : > { %4258 = vmatprep.subr.bf16.mxu1 %v6006_v60  ;;  %v6054_v60 = vld [vmem:[%s6428_s10 + $0xe0c] ss:$16 sps:$4 sm:$0xff]  }
 0x241   : > { %4234 = vmatpush2.bf16.msra.mxu0 %v6001_v36 }
 0x242   : > { %4259 = vmatpush1.bf16.msra.mxu1 %v6004_v61  ;;  %4285 = vmatprep.subr.bf16.mxu0 %v6012_v25 }
 0x243   : > { %4260 = vmatprep.subr.bf16.mxu1 %v6009_v62 }
 0x244   : > { %v3991_v4 = vpop.f32.mrf.mxu0  ;;  %4236 = vmatmul.mubr.bf16.vlgmr.msra.gmra.mxu0 %v6714_v39 }
 0x245   : > { %v3992_v14 = vadd.f32 %v3991_v4, %v3951_v51  ;;  %4286 = vmatpush1.bf16.msra.mxu0 %v6010_v41  ;;  %4317 = vmatprep.mubr.bf16.mxu0 %v6734_v43  ;;  %v6060_v41 = vld [vmem:[%s6428_s10 + $0x10ec] ss:$16 sps:$4 sm:$0xff]  }
 0x246   : > { %4261 = vmatpush2.bf16.msra.mxu1 %v6007_v1  ;;  %v3993_v11 = vpop.f32.mrf.mxu0  ;;  %4287 = vmatprep.subr.bf16.mxu0 %v6018_v3  ;;  %v6057_v1 = vld [vmem:[%s6428_s10 + $0xfec] ss:$16 sps:$4 sm:$0xff]  }
 0x247   : > { %4262 = vmatprep.subr.bf16.mxu1 %v6015_v2  ;;  %v4369_v13 = vrot.slane %v3992_v14, 4  ;;  %v3994_v15 = vadd.f32 %v3993_v11, %v3953_v12  ;;  %v6055_v12 = vld [vmem:[%s6428_s10 + $0xfe8] ss:$16 sps:$4 sm:$0xff]  }
 0x248   : > { %v3995_v39 = vpop.f32.mrf.mxu0 }
 0x249   : > { %v4370_v18 = vadd.f32 %v4369_v13, %v3992_v14  ;;  %v4375_v19 = vrot.slane %v3994_v15, 4  ;;  %4288 = vmatpush1.bf16.msra.mxu0 %v6016_v8  ;;  %v6066_v8 = vld [vmem:[%s6428_s10 + $0x10cc] ss:$16 sps:$4 sm:$0xff]   ;;  %v6061_v39 = vld [vmem:[%s6428_s10 + $0xfc8] ss:$16 sps:$4 sm:$0xff]  }
 0x24a   : > { %4263 = vmatpush2.bf16.msra.mxu1 %v6013_v5  ;;  %v3996_v24 = vpop.f32.mrf.mxu0  ;;  %4289 = vmatprep.subr.bf16.mxu0 %v6024_v50  ;;  %v6063_v5 = vld [vmem:[%s6428_s10 + $0xfcc] ss:$16 sps:$4 sm:$0xff]  }
 0x24b   : > { %4264 = vmatprep.subr.bf16.mxu1 %v6021_v16  ;;  %v4371_v26 = vrot.slane %v4370_v18, 2  ;;  %v4376_v27 = vadd.f32 %v4375_v19, %v3994_v15 }
 0x24d   : > { %v4372_v28 = vadd.f32 %v4371_v26, %v4370_v18  ;;  %v4377_v43 = vrot.slane %v4376_v27, 2  ;;  %4290 = vmatpush1.bf16.msra.mxu0 %v6022_v55  ;;  %v6064_v18 = vld [vmem:[%s6428_s10 + $0x10c8] ss:$16 sps:$4 sm:$0xff]   ;;  %v6072_v55 = vld [vmem:[%s6428_s10 + $0x10ac] ss:$16 sps:$4 sm:$0xff]  }
 0x24e   : > { %4265 = vmatpush2.bf16.msra.mxu1 %v6019_v20  ;;  %4291 = vmatprep.subr.bf16.mxu0 %v6030_v21  ;;  %v6069_v20 = vld [vmem:[%s6428_s10 + $0xfac] ss:$16 sps:$4 sm:$0xff]   ;;  %v4447_v21 = vlaneseq }
 0x24f   : > { %4266 = vmatprep.subr.bf16.mxu1 %v6027_v47  ;;  %v4373_v38 = vrot.slane %v4372_v28, 1  ;;  %v4378_v32 = vadd.f32 %v4377_v43, %v4376_v27  ;;  %v6067_v27 = vld [vmem:[%s6428_s10 + $0xfa8] ss:$16 sps:$4 sm:$0xff]  }
 0x251   : > { %v4374_v33 = vadd.f32 %v4373_v38, %v4372_v28  ;;  %v4379_v34 = vrot.slane %v4378_v32, 1  ;;  %4292 = vmatpush1.bf16.msra.mxu0 %v6028_v30  ;;  %v6070_v28 = vld [vmem:[%s6428_s10 + $0x10a8] ss:$16 sps:$4 sm:$0xff]   ;;  %v6078_v30 = vld [vmem:[%s6428_s10 + $0x108c] ss:$16 sps:$4 sm:$0xff]  }
 0x252   : > { %4267 = vmatpush2.bf16.msra.mxu1 %v6025_v29  ;;  %4293 = vmatprep.subr.bf16.mxu0 %v6036_v7  ;;  %v6075_v29 = vld [vmem:[%s6428_s10 + $0xf8c] ss:$16 sps:$4 sm:$0xff]   ;;  %v6076_v7 = vld [vmem:[%s6428_s10 + $0x1088] ss:$16 sps:$4 sm:$0xff]  }
 0x253   : > { %4268 = vmatprep.subr.bf16.mxu1 %v6033_v31  ;;  %v4394_v42 = vmul.f32 0.125, %v4374_v33  ;;  %v4380_v44 = vadd.f32 %v4379_v34, %v4378_v32  ;;  %v6073_v31 = vld [vmem:[%s6428_s10 + $0xf88] ss:$16 sps:$4 sm:$0xff]   ;;  %v6081_v38 = vld [vmem:[%s6428_s10 + $0xf6c] ss:$16 sps:$4 sm:$0xff]  }
 0x254   : > { %v6084_v32 = vld [vmem:[%s6428_s10 + $0x106c] ss:$16 sps:$4 sm:$0xff]   ;;  %v7144_v33 = vld [vmem:[%s6438_s7] sm:$0xf]  ;;  %s251_s7 = scalar_lea.vmem [#allocation6], %s4641_s12 }
 0x255   : > { %v7099_v45 = vsub.f32 %v3992_v14, %v4394_v42  ;;  %v4395_v46 = vmul.f32 0.125, %v4380_v44  ;;  %4294 = vmatpush1.bf16.msra.mxu0 %v6034_v37  ;;  %v6058_v14 = vld [vmem:[%s6428_s10 + $0x10e8] ss:$16 sps:$4 sm:$0xff]  }
 0x256   : > { %4269 = vmatpush2.bf16.msra.mxu1 %v6031_v35  ;;  %4295 = vmatprep.subr.bf16.mxu0 %v6042_v23  ;;  %v6079_v35 = vld [vmem:[%s6428_s10 + $0xf68] ss:$16 sps:$4 sm:$0xff]   ;;  %v6090_v23 = vld [vmem:[%s6428_s10 + $0x104c] ss:$16 sps:$4 sm:$0xff]  }
 0x257   : > { %4270 = vmatprep.subr.bf16.mxu1 %v6039_v22  ;;  %v4402_v54 = vmul.f32 %v7099_v45, %v7099_v45  ;;  %v7107_v6 = vsub.f32 %v3994_v15, %v4395_v46  ;;  %v6082_v37 = vld [vmem:[%s6428_s10 + $0x1068] ss:$16 sps:$4 sm:$0xff]   ;;  %v6087_v22 = vld [vmem:[%s6428_s10 + $0xf4c] ss:$16 sps:$4 sm:$0xff]  }
 0x258   : > { %v7155_v44 = vld [vmem:[%s251_s7] sm:$0xf] }
 0x259   : > { %v4406_v40 = vrot.slane %v4402_v54, 4  ;;  %v4403_v56 = vmul.f32 %v7107_v6, %v7107_v6  ;;  %4296 = vmatpush1.bf16.msra.mxu0 %v6040_v49  ;;  %v6088_v49 = vld [vmem:[%s6428_s10 + $0x1048] ss:$16 sps:$4 sm:$0xff]  }
 0x25a   : > { %4271 = vmatpush2.bf16.msra.mxu1 %v6037_v48  ;;  %4297 = vmatprep.subr.bf16.mxu0 %v6048_v53  ;;  %v6085_v48 = vld [vmem:[%s6428_s10 + $0xf48] ss:$16 sps:$4 sm:$0xff]   ;;  %v6093_v53 = vld [vmem:[%s6428_s10 + $0xf2c] ss:$16 sps:$4 sm:$0xff]  }
 0x25b   : > { %4272 = vmatprep.subr.bf16.mxu1 %v6045_v52  ;;  %v4407_v36 = vadd.f32 %v4406_v40, %v4402_v54  ;;  %v4412_v61 = vrot.slane %v4403_v56, 4  ;;  %v6096_v54 = vld [vmem:[%s6428_s10 + $0x102c] ss:$16 sps:$4 sm:$0xff]  }
 0x25d   : > { %v4408_v62 = vrot.slane %v4407_v36, 2  ;;  %v4413_v25 = vadd.f32 %v4412_v61, %v4403_v56  ;;  %4298 = vmatpush1.bf16.msra.mxu0 %v6046_v9  ;;  %v6091_v61 = vld [vmem:[%s6428_s10 + $0xf28] ss:$16 sps:$4 sm:$0xff]  }
 0x25e   : > { %4273 = vmatpush2.bf16.msra.mxu1 %v6043_v57  ;;  %4299 = vmatprep.subr.bf16.mxu0 %v6054_v60 }
 0x25f   : > { %4274 = vmatprep.subr.bf16.mxu1 %v6051_v17  ;;  %v4409_v2 = vadd.f32 %v4408_v62, %v4407_v36  ;;  %v4414_v3 = vrot.slane %v4413_v25, 2  ;;  %v6094_v62 = vld [vmem:[%s6428_s10 + $0x1028] ss:$16 sps:$4 sm:$0xff]  }
 0x261   : > { %v4410_v51 = vrot.slane %v4409_v2, 1  ;;  %v4415_v4 = vadd.f32 %v4414_v3, %v4413_v25  ;;  %4300 = vmatpush1.bf16.msra.mxu0 %v6052_v0  ;;  %v6102_v25 = vld [vmem:[%s6428_s10 + $0x100c] ss:$16 sps:$4 sm:$0xff]  }
 0x262   : > { %4275 = vmatpush2.bf16.msra.mxu1 %v6049_v63  ;;  %4301 = vmatprep.subr.bf16.mxu0 %v6057_v1 }
 0x263   : > { %4326 = vmatprep.subr.bf16.mxu1 %v6060_v41  ;;  %v4411_v11 = vadd.f32 %v4410_v51, %v4409_v2  ;;  %v4416_v16 = vrot.slane %v4415_v4, 1  ;;  %v6097_v41 = vld [vmem:[%s6428_s10 + $0xf08] ss:$16 sps:$4 sm:$0xff]  }
 0x265   : > { %v7123_v50 = vpop.f32.mrf.mxu1  ;;  %4277 = vmatmul.mubr.bf16.vlgmr.msra.gmra.mxu1 %v6802_v58  ;;  %v4430_v13 = vmul.f32 0.125, %v4411_v11  ;;  %v4417_v15 = vadd.f32 %v4416_v16, %v4415_v4  ;;  %4302 = vmatpush2.bf16.msra.mxu0 %v6055_v12  ;;  %v6111_v12 = vld [vmem:[%s7211_s0 + $0x40] ss:$0 sps:$4 sm:$0xff]  }
 0x266   : > { %4327 = vmatpush1.bf16.msra.mxu1 %v6058_v14  ;;  %4303 = vmatprep.subr.bf16.mxu0 %v6063_v5 }
 0x267   : > { %v7128_v19 = vpop.f32.mrf.mxu1  ;;  %4328 = vmatprep.subr.bf16.mxu1 %v6066_v8  ;;  %v4434_v24 = vadd.f32 1e-05, %v4430_v13  ;;  %v4431_v47 = vmul.f32 0.125, %v4417_v15  ;;  %4358 = vmatprep.mubr.bf16.mxu1 %v6242_v10  ;;  %v7137_v10 = vshrl.u32 %v4447_v21, 7 }
 0x269   : > { %v4036_v58 = vpop.f32.mrf.mxu1  ;;  %6103 = vrsqrt.f32 %v4434_v24  ;;  %v4435_v26 = vadd.f32 1e-05, %v4431_v47  ;;  %4304 = vmatpush2.bf16.msra.mxu0 %v6061_v39  ;;  %v4449_v34 = vsub.s32 0, %v7137_v10  ;;  %v4453_v42 = vsub.s32 1, %v7137_v10 }
 0x26a   : > { %4329 = vmatpush1.bf16.msra.mxu1 %v6064_v18  ;;  %4305 = vmatprep.subr.bf16.mxu0 %v6069_v20 }
 0x26b   : > { %v4037_v43 = vpop.f32.mrf.mxu1  ;;  %4330 = vmatprep.subr.bf16.mxu1 %v6072_v55  ;;  %6105 = vrsqrt.f32 %v4435_v26  ;;  %v4450_v46 = vrot.slane %v7144_v33, %v4449_v34  ;;  %v4475_v56 = vrot.slane %v7155_v44, %v4449_v34  ;;  %v4454_v57 = vrot.slane %v7144_v33, %v4453_v42 }
 0x26c   : > { %v4479_v36 = vrot.slane %v7155_v44, %v4453_v42 }
 0x26d   : > { %4306 = vmatpush2.bf16.msra.mxu0 %v6067_v27 }
 0x26e   : > { %4331 = vmatpush1.bf16.msra.mxu1 %v6070_v28  ;;  %4307 = vmatprep.subr.bf16.mxu0 %v6075_v29 }
 0x26f   : > { %4332 = vmatprep.subr.bf16.mxu1 %v6078_v30 }
 0x271   : > { %4308 = vmatpush2.bf16.msra.mxu0 %v6073_v31 }
 0x272   : > { %4333 = vmatpush1.bf16.msra.mxu1 %v6076_v7  ;;  %4309 = vmatprep.subr.bf16.mxu0 %v6081_v38 }
 0x273   : > { %4334 = vmatprep.subr.bf16.mxu1 %v6084_v32 }
 0x275   : > { %4310 = vmatpush2.bf16.msra.mxu0 %v6079_v35 }
 0x276   : > { %4335 = vmatpush1.bf16.msra.mxu1 %v6082_v37  ;;  %v6104_v52 = vpop.eup %6103  ;;  %4311 = vmatprep.subr.bf16.mxu0 %v6087_v22 }
 0x277   : > { %4336 = vmatprep.subr.bf16.mxu1 %v6090_v23  ;;  %v4442_v40 = vmul.f32 %v6104_v52, %v7099_v45  ;;  %v6099_v45 = vld [vmem:[%s6428_s10 + $0xf0c] ss:$16 sps:$4 sm:$0xff]  }
 0x278   : > { %v6106_v9 = vpop.eup %6105 }
 0x279   : > { %v4467_v17 = vmul.f32 %v4450_v46, %v4442_v40  ;;  %v4443_v60 = vmul.f32 %v6106_v9, %v7107_v6  ;;  %4312 = vmatpush2.bf16.msra.mxu0 %v6085_v48  ;;  %v6100_v6 = vld [vmem:[%s6428_s10 + $0x1008] ss:$16 sps:$4 sm:$0xff]  }
 0x27a   : > { %4337 = vmatpush1.bf16.msra.mxu1 %v6088_v49  ;;  %4313 = vmatprep.subr.bf16.mxu0 %v6093_v53 }
 0x27b   : > { %4338 = vmatprep.subr.bf16.mxu1 %v6096_v54  ;;  %v4492_v63 = vadd.f32 %v4475_v56, %v4467_v17  ;;  %v4468_v0 = vmul.f32 %v4454_v57, %v4443_v60 }
 0x27d   : > { %v4493_v1 = vadd.f32 %v4479_v36, %v4468_v0  ;;  %4314 = vmatpush2.bf16.msra.mxu0 %v6091_v61  ;;  %v4496_v2 = vmax.f32 %v4492_v63, 0.0 }
 0x27e   : > { %4339 = vmatpush1.bf16.msra.mxu1 %v6094_v62  ;;  %4315 = vmatprep.subr.bf16.mxu0 %v6099_v45 }
 0x27f   : > { %4340 = vmatprep.subr.bf16.mxu1 %v6102_v25  ;;  %v4497_v3 = vmax.f32 %v4493_v1, 0.0 }
 0x281   : > { %v5213_v51 = vpack.c.bf16 %v4497_v3, %v4496_v2  ;;  %4316 = vmatpush2.bf16.msra.mxu0 %v6097_v41 }
 0x282   : > { %4341 = vmatpush1.bf16.msra.mxu1 %v6100_v6 }
 0x283   : > { %4516 = vst [vmem:[%s7182_s15] sm:$0xff] %v5213_v51 }
 0x284   : > { %v4073_v4 = vpop.f32.mrf.mxu0  ;;  %4318 = vmatmul.mubr.bf16.vlgmr.msra.gmra.mxu0 %v6806_v59 }
 0x285   : > { %4359 = vmatmul.mubr.bf16.vlgmr.msra.gmra.mxu1 %v6111_v12  ;;  %v4074_v14 = vadd.f32 %v4073_v4, %v7123_v50 }
 0x286   : > { %v4075_v5 = vpop.f32.mrf.mxu0 }
 0x287   : > { %v4076_v8 = vadd.f32 %v4075_v5, %v7128_v19 }
 0x288   : > { %v4077_v11 = vpop.f32.mrf.mxu0 }
 0x28a   : > { %v4078_v16 = vpop.f32.mrf.mxu0 }
 0x2a5   : > { %v4114_v13 = vpop.f32.mrf.mxu1 }
 0x2a6   : > { %v4115_v15 = vadd.f32 %v4114_v13, %v4074_v14 }
 0x2a7   : > { %v4116_v39 = vpop.f32.mrf.mxu1 }
 0x2a8   : > { %v4117_v18 = vadd.f32 %v4116_v39, %v4076_v8 }
 0x2a9   : > { %v4118_v20 = vpop.f32.mrf.mxu1 }
 0x2ab   : > { %v4119_v55 = vpop.f32.mrf.mxu1 }
 0x2c4   : > { %v4155_v24 = vpop.f32.mrf.mxu0 }
 0x2c5   : > { %v4156_v59 = vadd.f32 %v4155_v24, %v4115_v15 }
 0x2c6   : > { %v4157_v47 = vpop.f32.mrf.mxu0 }
 0x2c7   : > { %v4158_v58 = vadd.f32 %v4157_v47, %v4117_v18 }
 0x2c8   : > { %v4159_v21 = vpop.f32.mrf.mxu0 }
 0x2ca   : > { %v4160_v26 = vpop.f32.mrf.mxu0 }
 0x2e5   : > { %v4196_v27 = vpop.f32.mrf.mxu1 }
 0x2e6   : > { %v4197_v28 = vadd.f32 %v4196_v27, %v4156_v59 }
 0x2e7   : > { %v4198_v50 = vpop.f32.mrf.mxu1 }
 0x2e8   : > { %v4199_v43 = vadd.f32 %v4198_v50, %v4158_v58 }
 0x2e9   : > { %v4200_v29 = vpop.f32.mrf.mxu1 }
 0x2ea   : > { %v4461_v29 = vsub.s32 3, %v7137_v10 }
 0x2eb   : > { %v4201_v19 = vpop.f32.mrf.mxu1 }
 0x304   : > { %v4237_v30 = vpop.f32.mrf.mxu0 }
 0x305   : > { %v4238_v22 = vadd.f32 %v4237_v30, %v4197_v28 }
 0x306   : > { %v4239_v31 = vpop.f32.mrf.mxu0 }
 0x307   : > { %v4240_v23 = vadd.f32 %v4239_v31, %v4199_v43  ;;  %v4457_v43 = vsub.s32 2, %v7137_v10 }
 0x308   : > { %v4241_v7 = vpop.f32.mrf.mxu0 }
 0x309   : > { %v4458_v19 = vrot.slane %v7144_v33, %v4457_v43  ;;  %v4483_v7 = vrot.slane %v7155_v44, %v4457_v43 }
 0x30a   : > { %v4242_v38 = vpop.f32.mrf.mxu0 }
 0x30b   : > { %v4462_v38 = vrot.slane %v7144_v33, %v4461_v29 }
 0x325   : > { %v4278_v32 = vpop.f32.mrf.mxu1 }
 0x326   : > { %v4279_v42 = vadd.f32 %v4278_v32, %v4238_v22 }
 0x327   : > { %v4280_v34 = vpop.f32.mrf.mxu1 }
 0x328   : > { %v4281_v49 = vadd.f32 %v4280_v34, %v4240_v23 }
 0x329   : > { %v4282_v35 = vpop.f32.mrf.mxu1 }
 0x32b   : > { %v4283_v37 = vpop.f32.mrf.mxu1 }
 0x32c   : > { %v4487_v37 = vrot.slane %v7155_v44, %v4461_v29 }
 0x344   : > { %v4319_v46 = vpop.f32.mrf.mxu0 }
 0x345   : > { %v4360_v48 = vpop.f32.mrf.mxu1  ;;  %v4320_v52 = vadd.f32 %v4319_v46, %v4279_v42 }
 0x346   : > { %v4321_v53 = vpop.f32.mrf.mxu0 }
 0x347   : > { %v4362_v54 = vpop.f32.mrf.mxu1  ;;  %v4361_v40 = vadd.f32 %v4360_v48, %v4320_v52  ;;  %v4322_v56 = vadd.f32 %v4321_v53, %v4281_v49 }
 0x348   : > { %v4323_v57 = vpop.f32.mrf.mxu0 }
 0x349   : > { %v4364_v9 = vpop.f32.mrf.mxu1  ;;  %v4381_v17 = vrot.slane %v4361_v40, 4  ;;  %v4363_v60 = vadd.f32 %v4362_v54, %v4322_v56 }
 0x34a   : > { %v4324_v36 = vpop.f32.mrf.mxu0 }
 0x34b   : > { %v4365_v61 = vpop.f32.mrf.mxu1  ;;  %v4382_v62 = vadd.f32 %v4381_v17, %v4361_v40  ;;  %v4387_v45 = vrot.slane %v4363_v60, 4 }
 0x34d   : > { %v4383_v25 = vrot.slane %v4382_v62, 2  ;;  %v4388_v63 = vadd.f32 %v4387_v45, %v4363_v60 }
 0x34f   : > { %v4384_v0 = vadd.f32 %v4383_v25, %v4382_v62  ;;  %v4389_v1 = vrot.slane %v4388_v63, 2 }
 0x351   : > { %v4385_v41 = vrot.slane %v4384_v0, 1  ;;  %v4390_v6 = vadd.f32 %v4389_v1, %v4388_v63 }
 0x353   : > { %v4386_v2 = vadd.f32 %v4385_v41, %v4384_v0  ;;  %v4391_v3 = vrot.slane %v4390_v6, 1 }
 0x355   : > { %v4396_v51 = vmul.f32 0.125, %v4386_v2  ;;  %v4392_v4 = vadd.f32 %v4391_v3, %v4390_v6 }
 0x357   : > { %v4400_v12 = vsub.f32 %v4361_v40, %v4396_v51  ;;  %v4397_v14 = vmul.f32 0.125, %v4392_v4 }
 0x359   : > { %v4404_v5 = vmul.f32 %v4400_v12, %v4400_v12  ;;  %v4401_v8 = vsub.f32 %v4363_v60, %v4397_v14 }
 0x35b   : > { %v4418_v11 = vrot.slane %v4404_v5, 4  ;;  %v4405_v16 = vmul.f32 %v4401_v8, %v4401_v8 }
 0x35d   : > { %v4419_v13 = vadd.f32 %v4418_v11, %v4404_v5  ;;  %v4424_v15 = vrot.slane %v4405_v16, 4 }
 0x35f   : > { %v4420_v39 = vrot.slane %v4419_v13, 2  ;;  %v4425_v18 = vadd.f32 %v4424_v15, %v4405_v16 }
 0x361   : > { %v4421_v20 = vadd.f32 %v4420_v39, %v4419_v13  ;;  %v4426_v55 = vrot.slane %v4425_v18, 2 }
 0x363   : > { %v4422_v24 = vrot.slane %v4421_v20, 1  ;;  %v4427_v59 = vadd.f32 %v4426_v55, %v4425_v18 }
 0x365   : > { %v4423_v47 = vadd.f32 %v4422_v24, %v4421_v20  ;;  %v4428_v58 = vrot.slane %v4427_v59, 1 }
 0x367   : > { %v4432_v21 = vmul.f32 0.125, %v4423_v47  ;;  %v4429_v26 = vadd.f32 %v4428_v58, %v4427_v59 }
 0x369   : > { %v4436_v27 = vadd.f32 1e-05, %v4432_v21  ;;  %v4433_v28 = vmul.f32 0.125, %v4429_v26 }
 0x36b   : > { %6107 = vrsqrt.f32 %v4436_v27  ;;  %v4437_v50 = vadd.f32 1e-05, %v4433_v28 }
 0x36d   : > { %6109 = vrsqrt.f32 %v4437_v50 }
 0x378   : > { %v6108_v30 = vpop.eup %6107 }
 0x379   : > { %v4444_v31 = vmul.f32 %v6108_v30, %v4400_v12 }
 0x37a   : > { %v6110_v32 = vpop.eup %6109 }
 0x37b   : > { %v4469_v34 = vmul.f32 %v4458_v19, %v4444_v31  ;;  %v4445_v35 = vmul.f32 %v6110_v32, %v4401_v8 }
 0x37d   : > { %v4494_v22 = vadd.f32 %v4483_v7, %v4469_v34  ;;  %v4470_v23 = vmul.f32 %v4462_v38, %v4445_v35 }
 0x37f   : > { %v4495_v42 = vadd.f32 %v4487_v37, %v4470_v23  ;;  %v4498_v46 = vmax.f32 %v4494_v22, 0.0 }
 0x381   : > { %v4499_v48 = vmax.f32 %v4495_v42, 0.0 }
 0x383   : > { %v5214_v10 = vpack.c.bf16 %v4499_v48, %v4498_v46 }
 0x385   : > { %4517 = vst [vmem:[%s7182_s15 + $0x8] sm:$0xff] %v5214_v10 }
 0x386 PF: > { %p17_p4 = scmp.ge.s32.totalorder %s6290_s20, 5   ;;  %s7224_s15 = smov %s6226_s16 }
 0x387   : > { %s7225_s16 = smov %s6230_s17  ;;  %s7226_s17 = smov %s6300_s23 }
 0x388   : > { %s7227_s18 = smov %s6290_s20  ;;  %19 = sbr.rel (!%p17_p4) target bundleno = 5 (0x5), region = 100 }
 0x38d   :  { %4540 = vsyncpa [#allocation3], 1 }
 0x38e   :  { %4542 = vsyncpa [#allocation3 + $0x1], 1 }
 0x38f   :  { %4543 = vsyncpa [#allocation5], 1 }
 0x390   :  { %4545 = vsyncpa [#allocation5 + $0x1], 1 }

// kernel: network_forward.3
= control target key start
LH: loop header
LB: loop body
LE: loop exit
PB: predicated region body
PF: predicated region fallthrough
CT: control target
= control target key end

     0   :  { %11 = vsyncpa [#allocation5], 0  ;;  %s5770_s21 = smov 0   ;;  %s5772_s22 = smov 0   ;;  %s7176_s0 = inlined_call_operand.vmem [shape: bf16[8,1536], index: 0, kind: input, shape index: {}]   ;;  %s7177_s1 = inlined_call_operand.vmem [shape: bf16[1536,1536], index: 1, kind: input, shape index: {}]   ;;  %s7178_s2 = inlined_call_operand.vmem [shape: f32[1,1536], index: 2, kind: input, shape index: {}]   ;;  %s7179_s3 = inlined_call_operand.vmem [shape: f32[1,1536], index: 3, kind: input, shape index: {}]   ;;  %s7180_s4 = inlined_call_operand.vmem [shape: bf16[1536,128], index: 4, kind: input, shape index: {}]   ;;  %s7181_s5 = inlined_call_operand.vmem [shape: f32[1,128], index: 5, kind: input, shape index: {}]   ;;  %s7182_s6 = inlined_call_operand.hbm [shape: f32[8,128], index: 6, kind: output, shape index: {}]  }
   0x1   :  { %s5774_s23 = smov 0  }
   0x2 LB: > { %s5786_s24 = sadd.s32 4294967295, %s5731_s23   ;;  %s5789_s25 = sadd.s32 1, %s5731_s23   ;;  %s5731_s23 = sphi %s5774_s23, %s7185_s23   ;;  %s5727_s22 = sphi %s5772_s22, %s7184_s22   ;;  %s5723_s21 = sphi %s5770_s21, %s7183_s21  }
   0x3   : > { %s42_s26 = ssub.s32 %s5731_s23, %s5789_s25  ;;  %s45_s27 = sadd.s32 1, %s5727_s22 }
   0x4   : > { %p43_p0 = scmp.eq.s32.totalorder %s42_s26, 0  ;;  %p52_p1 = scmp.ne.s32.totalorder %s5727_s22, %s5723_s21 }
   0x5   : > { %p53_p2 = scmp.eq.s32.totalorder %s5731_s23, 0  ;;  %p4527_p4 = scmp.ge.s32.totalorder %s5731_s23, 3 }
   0x6   : > { %s5798_s28 = scalar_select %p43_p0, %s5727_s22, %s45_s27  }
   0x7   : > { %p54_p3 = por %p53_p2, %p52_p1  ;;  %204 = sbr.rel (%p4527_p4) target bundleno = 209 (0xd1), region = 24 }
   0xc   : > { %207 = sbr.rel (!%p54_p3) target bundleno = 209 (0xd1), region = 28  ;;  %s209_s29 = sand.u32 (%p54_p3), 1, %s5727_s22  }
   0xd   : > { %s4970_s30 = sshll.u32 (%p54_p3), %s5731_s23, 4  ;;  %s5015_s7 = smul.u32 (%p54_p3), 3072, %s209_s29 }
   0xe   : > { %s5806_s10 = scalar_lea.vmem (%p54_p3), %s7177_s1, %s4970_s30 }
   0xf   : > { %v227_v0 = vld [vmem:[%s5806_s10] sm:$0xff] (%p54_p3)  ;;  %v229_v1 = vld [vmem:[%s5806_s10 + $0x8] sm:$0xff] (%p54_p3)  ;;  %v231_v2 = vld [vmem:[%s5806_s10 + $0x30] sm:$0xff] (%p54_p3)  ;;  %s5814_s11 = scalar_lea.vmem (%p54_p3), [#allocation3], %s5015_s7 }
  0x10   : > { %v233_v3 = vld [vmem:[%s5806_s10 + $0x38] sm:$0xff] (%p54_p3)  ;;  %v235_v4 = vld [vmem:[%s5806_s10 + $0x60] sm:$0xff] (%p54_p3)  ;;  %v237_v5 = vld [vmem:[%s5806_s10 + $0x68] sm:$0xff] (%p54_p3)  ;;  %228 = vst [vmem:[%s5814_s11] sm:$0xff] (%p54_p3), %v227_v0 }
  0x11   : > { %230 = vst [vmem:[%s5814_s11 + $0x8] sm:$0xff] %v229_v1  ;;  %232 = vst [vmem:[%s5814_s11 + $0x10] sm:$0xff] %v231_v2  ;;  %v239_v6 = vld [vmem:[%s5806_s10 + $0x90] sm:$0xff]  ;;  %v241_v7 = vld [vmem:[%s5806_s10 + $0x98] sm:$0xff] }
  0x12   : > { %234 = vst [vmem:[%s5814_s11 + $0x18] sm:$0xff] %v233_v3  ;;  %236 = vst [vmem:[%s5814_s11 + $0x20] sm:$0xff] %v235_v4  ;;  %v243_v8 = vld [vmem:[%s5806_s10 + $0xc0] sm:$0xff]  ;;  %v245_v9 = vld [vmem:[%s5806_s10 + $0xc8] sm:$0xff] }
  0x13   : > { %238 = vst [vmem:[%s5814_s11 + $0x28] sm:$0xff] %v237_v5  ;;  %240 = vst [vmem:[%s5814_s11 + $0x30] sm:$0xff] %v239_v6  ;;  %v247_v10 = vld [vmem:[%s5806_s10 + $0xf0] sm:$0xff]  ;;  %v249_v11 = vld [vmem:[%s5806_s10 + $0xf8] sm:$0xff] }
  0x14   : > { %242 = vst [vmem:[%s5814_s11 + $0x38] sm:$0xff] %v241_v7  ;;  %244 = vst [vmem:[%s5814_s11 + $0x40] sm:$0xff] %v243_v8  ;;  %v251_v12 = vld [vmem:[%s5806_s10 + $0x120] sm:$0xff]  ;;  %v253_v13 = vld [vmem:[%s5806_s10 + $0x128] sm:$0xff] }
  0x15   : > { %246 = vst [vmem:[%s5814_s11 + $0x48] sm:$0xff] %v245_v9  ;;  %248 = vst [vmem:[%s5814_s11 + $0x50] sm:$0xff] %v247_v10  ;;  %v255_v14 = vld [vmem:[%s5806_s10 + $0x150] sm:$0xff]  ;;  %v257_v15 = vld [vmem:[%s5806_s10 + $0x158] sm:$0xff] }
  0x16   : > { %250 = vst [vmem:[%s5814_s11 + $0x58] sm:$0xff] %v249_v11  ;;  %252 = vst [vmem:[%s5814_s11 + $0x60] sm:$0xff] %v251_v12  ;;  %v259_v16 = vld [vmem:[%s5806_s10 + $0x180] sm:$0xff]  ;;  %v261_v17 = vld [vmem:[%s5806_s10 + $0x188] sm:$0xff] }
  0x17   : > { %254 = vst [vmem:[%s5814_s11 + $0x68] sm:$0xff] %v253_v13  ;;  %256 = vst [vmem:[%s5814_s11 + $0x70] sm:$0xff] %v255_v14  ;;  %v263_v18 = vld [vmem:[%s5806_s10 + $0x1b0] sm:$0xff]  ;;  %v265_v19 = vld [vmem:[%s5806_s10 + $0x1b8] sm:$0xff] }
  0x18   : > { %258 = vst [vmem:[%s5814_s11 + $0x78] sm:$0xff] %v257_v15  ;;  %260 = vst [vmem:[%s5814_s11 + $0x80] sm:$0xff] %v259_v16  ;;  %v267_v20 = vld [vmem:[%s5806_s10 + $0x1e0] sm:$0xff]  ;;  %v269_v21 = vld [vmem:[%s5806_s10 + $0x1e8] sm:$0xff] }
  0x19   : > { %262 = vst [vmem:[%s5814_s11 + $0x88] sm:$0xff] %v261_v17  ;;  %264 = vst [vmem:[%s5814_s11 + $0x90] sm:$0xff] %v263_v18  ;;  %v271_v22 = vld [vmem:[%s5806_s10 + $0x210] sm:$0xff]  ;;  %v273_v23 = vld [vmem:[%s5806_s10 + $0x218] sm:$0xff] }
  0x1a   : > { %266 = vst [vmem:[%s5814_s11 + $0x98] sm:$0xff] %v265_v19  ;;  %268 = vst [vmem:[%s5814_s11 + $0xa0] sm:$0xff] %v267_v20  ;;  %v275_v24 = vld [vmem:[%s5806_s10 + $0x240] sm:$0xff]  ;;  %v277_v25 = vld [vmem:[%s5806_s10 + $0x248] sm:$0xff] }
  0x1b   : > { %270 = vst [vmem:[%s5814_s11 + $0xa8] sm:$0xff] %v269_v21  ;;  %272 = vst [vmem:[%s5814_s11 + $0xb0] sm:$0xff] %v271_v22  ;;  %v279_v26 = vld [vmem:[%s5806_s10 + $0x270] sm:$0xff]  ;;  %v281_v27 = vld [vmem:[%s5806_s10 + $0x278] sm:$0xff] }
  0x1c   : > { %274 = vst [vmem:[%s5814_s11 + $0xb8] sm:$0xff] %v273_v23  ;;  %276 = vst [vmem:[%s5814_s11 + $0xc0] sm:$0xff] %v275_v24  ;;  %v283_v28 = vld [vmem:[%s5806_s10 + $0x2a0] sm:$0xff]  ;;  %v285_v29 = vld [vmem:[%s5806_s10 + $0x2a8] sm:$0xff] }
  0x1d   : > { %278 = vst [vmem:[%s5814_s11 + $0xc8] sm:$0xff] %v277_v25  ;;  %280 = vst [vmem:[%s5814_s11 + $0xd0] sm:$0xff] %v279_v26  ;;  %v287_v30 = vld [vmem:[%s5806_s10 + $0x2d0] sm:$0xff]  ;;  %v289_v31 = vld [vmem:[%s5806_s10 + $0x2d8] sm:$0xff] }
  0x1e   : > { %282 = vst [vmem:[%s5814_s11 + $0xd8] sm:$0xff] %v281_v27  ;;  %284 = vst [vmem:[%s5814_s11 + $0xe0] sm:$0xff] %v283_v28  ;;  %v291_v32 = vld [vmem:[%s5806_s10 + $0x300] sm:$0xff]  ;;  %v293_v33 = vld [vmem:[%s5806_s10 + $0x308] sm:$0xff] }
  0x1f   : > { %286 = vst [vmem:[%s5814_s11 + $0xe8] sm:$0xff] %v285_v29  ;;  %288 = vst [vmem:[%s5814_s11 + $0xf0] sm:$0xff] %v287_v30  ;;  %v295_v34 = vld [vmem:[%s5806_s10 + $0x330] sm:$0xff]  ;;  %v297_v35 = vld [vmem:[%s5806_s10 + $0x338] sm:$0xff] }
  0x20   : > { %290 = vst [vmem:[%s5814_s11 + $0xf8] sm:$0xff] %v289_v31  ;;  %292 = vst [vmem:[%s5814_s11 + $0x100] sm:$0xff] %v291_v32  ;;  %v299_v36 = vld [vmem:[%s5806_s10 + $0x360] sm:$0xff]  ;;  %v301_v37 = vld [vmem:[%s5806_s10 + $0x368] sm:$0xff] }
  0x21   : > { %294 = vst [vmem:[%s5814_s11 + $0x108] sm:$0xff] %v293_v33  ;;  %296 = vst [vmem:[%s5814_s11 + $0x110] sm:$0xff] %v295_v34  ;;  %v303_v38 = vld [vmem:[%s5806_s10 + $0x390] sm:$0xff]  ;;  %v305_v39 = vld [vmem:[%s5806_s10 + $0x398] sm:$0xff] }
  0x22   : > { %298 = vst [vmem:[%s5814_s11 + $0x118] sm:$0xff] %v297_v35  ;;  %300 = vst [vmem:[%s5814_s11 + $0x120] sm:$0xff] %v299_v36  ;;  %v307_v40 = vld [vmem:[%s5806_s10 + $0x3c0] sm:$0xff]  ;;  %v309_v41 = vld [vmem:[%s5806_s10 + $0x3c8] sm:$0xff] }
  0x23   : > { %302 = vst [vmem:[%s5814_s11 + $0x128] sm:$0xff] %v301_v37  ;;  %304 = vst [vmem:[%s5814_s11 + $0x130] sm:$0xff] %v303_v38  ;;  %v311_v42 = vld [vmem:[%s5806_s10 + $0x3f0] sm:$0xff]  ;;  %v313_v43 = vld [vmem:[%s5806_s10 + $0x3f8] sm:$0xff] }
  0x24   : > { %306 = vst [vmem:[%s5814_s11 + $0x138] sm:$0xff] %v305_v39  ;;  %308 = vst [vmem:[%s5814_s11 + $0x140] sm:$0xff] %v307_v40  ;;  %v315_v44 = vld [vmem:[%s5806_s10 + $0x420] sm:$0xff]  ;;  %v317_v45 = vld [vmem:[%s5806_s10 + $0x428] sm:$0xff] }
  0x25   : > { %310 = vst [vmem:[%s5814_s11 + $0x148] sm:$0xff] %v309_v41  ;;  %312 = vst [vmem:[%s5814_s11 + $0x150] sm:$0xff] %v311_v42  ;;  %v319_v46 = vld [vmem:[%s5806_s10 + $0x450] sm:$0xff]  ;;  %v321_v47 = vld [vmem:[%s5806_s10 + $0x458] sm:$0xff] }
  0x26   : > { %314 = vst [vmem:[%s5814_s11 + $0x158] sm:$0xff] %v313_v43  ;;  %316 = vst [vmem:[%s5814_s11 + $0x160] sm:$0xff] %v315_v44  ;;  %v323_v48 = vld [vmem:[%s5806_s10 + $0x480] sm:$0xff]  ;;  %v325_v49 = vld [vmem:[%s5806_s10 + $0x488] sm:$0xff] }
  0x27   : > { %318 = vst [vmem:[%s5814_s11 + $0x168] sm:$0xff] %v317_v45  ;;  %320 = vst [vmem:[%s5814_s11 + $0x170] sm:$0xff] %v319_v46  ;;  %v327_v50 = vld [vmem:[%s5806_s10 + $0x4b0] sm:$0xff]  ;;  %v329_v51 = vld [vmem:[%s5806_s10 + $0x4b8] sm:$0xff] }
  0x28   : > { %322 = vst [vmem:[%s5814_s11 + $0x178] sm:$0xff] %v321_v47  ;;  %324 = vst [vmem:[%s5814_s11 + $0x180] sm:$0xff] %v323_v48  ;;  %v331_v52 = vld [vmem:[%s5806_s10 + $0x4e0] sm:$0xff]  ;;  %v333_v53 = vld [vmem:[%s5806_s10 + $0x4e8] sm:$0xff] }
  0x29   : > { %326 = vst [vmem:[%s5814_s11 + $0x188] sm:$0xff] %v325_v49  ;;  %328 = vst [vmem:[%s5814_s11 + $0x190] sm:$0xff] %v327_v50  ;;  %v335_v54 = vld [vmem:[%s5806_s10 + $0x510] sm:$0xff]  ;;  %v337_v55 = vld [vmem:[%s5806_s10 + $0x518] sm:$0xff] }
  0x2a   : > { %330 = vst [vmem:[%s5814_s11 + $0x198] sm:$0xff] %v329_v51  ;;  %332 = vst [vmem:[%s5814_s11 + $0x1a0] sm:$0xff] %v331_v52  ;;  %v339_v56 = vld [vmem:[%s5806_s10 + $0x540] sm:$0xff]  ;;  %v341_v57 = vld [vmem:[%s5806_s10 + $0x548] sm:$0xff] }
  0x2b   : > { %334 = vst [vmem:[%s5814_s11 + $0x1a8] sm:$0xff] %v333_v53  ;;  %336 = vst [vmem:[%s5814_s11 + $0x1b0] sm:$0xff] %v335_v54  ;;  %v343_v58 = vld [vmem:[%s5806_s10 + $0x570] sm:$0xff]  ;;  %v345_v59 = vld [vmem:[%s5806_s10 + $0x578] sm:$0xff] }
  0x2c   : > { %338 = vst [vmem:[%s5814_s11 + $0x1b8] sm:$0xff] %v337_v55  ;;  %340 = vst [vmem:[%s5814_s11 + $0x1c0] sm:$0xff] %v339_v56  ;;  %v347_v60 = vld [vmem:[%s5806_s10 + $0x5a0] sm:$0xff]  ;;  %v349_v61 = vld [vmem:[%s5806_s10 + $0x5a8] sm:$0xff] }
  0x2d   : > { %342 = vst [vmem:[%s5814_s11 + $0x1c8] sm:$0xff] %v341_v57  ;;  %344 = vst [vmem:[%s5814_s11 + $0x1d0] sm:$0xff] %v343_v58  ;;  %v351_v62 = vld [vmem:[%s5806_s10 + $0x5d0] sm:$0xff]  ;;  %v353_v63 = vld [vmem:[%s5806_s10 + $0x5d8] sm:$0xff] }
  0x2e   : > { %346 = vst [vmem:[%s5814_s11 + $0x1d8] sm:$0xff] %v345_v59  ;;  %348 = vst [vmem:[%s5814_s11 + $0x1e0] sm:$0xff] %v347_v60  ;;  %v355_v0 = vld [vmem:[%s5806_s10 + $0x600] sm:$0xff]  ;;  %v357_v1 = vld [vmem:[%s5806_s10 + $0x608] sm:$0xff] }
  0x2f   : > { %350 = vst [vmem:[%s5814_s11 + $0x1e8] sm:$0xff] %v349_v61  ;;  %352 = vst [vmem:[%s5814_s11 + $0x1f0] sm:$0xff] %v351_v62  ;;  %v359_v2 = vld [vmem:[%s5806_s10 + $0x630] sm:$0xff]  ;;  %v361_v3 = vld [vmem:[%s5806_s10 + $0x638] sm:$0xff] }
  0x30   : > { %354 = vst [vmem:[%s5814_s11 + $0x1f8] sm:$0xff] %v353_v63  ;;  %356 = vst [vmem:[%s5814_s11 + $0x200] sm:$0xff] %v355_v0  ;;  %v363_v4 = vld [vmem:[%s5806_s10 + $0x660] sm:$0xff]  ;;  %v365_v5 = vld [vmem:[%s5806_s10 + $0x668] sm:$0xff] }
  0x31   : > { %358 = vst [vmem:[%s5814_s11 + $0x208] sm:$0xff] %v357_v1  ;;  %360 = vst [vmem:[%s5814_s11 + $0x210] sm:$0xff] %v359_v2  ;;  %v367_v6 = vld [vmem:[%s5806_s10 + $0x690] sm:$0xff]  ;;  %v369_v7 = vld [vmem:[%s5806_s10 + $0x698] sm:$0xff] }
  0x32   : > { %362 = vst [vmem:[%s5814_s11 + $0x218] sm:$0xff] %v361_v3  ;;  %364 = vst [vmem:[%s5814_s11 + $0x220] sm:$0xff] %v363_v4  ;;  %v371_v8 = vld [vmem:[%s5806_s10 + $0x6c0] sm:$0xff]  ;;  %v373_v9 = vld [vmem:[%s5806_s10 + $0x6c8] sm:$0xff] }
  0x33   : > { %366 = vst [vmem:[%s5814_s11 + $0x228] sm:$0xff] %v365_v5  ;;  %368 = vst [vmem:[%s5814_s11 + $0x230] sm:$0xff] %v367_v6  ;;  %v375_v10 = vld [vmem:[%s5806_s10 + $0x6f0] sm:$0xff]  ;;  %v377_v11 = vld [vmem:[%s5806_s10 + $0x6f8] sm:$0xff] }
  0x34   : > { %370 = vst [vmem:[%s5814_s11 + $0x238] sm:$0xff] %v369_v7  ;;  %372 = vst [vmem:[%s5814_s11 + $0x240] sm:$0xff] %v371_v8  ;;  %v379_v12 = vld [vmem:[%s5806_s10 + $0x720] sm:$0xff]  ;;  %v381_v13 = vld [vmem:[%s5806_s10 + $0x728] sm:$0xff] }
  0x35   : > { %374 = vst [vmem:[%s5814_s11 + $0x248] sm:$0xff] %v373_v9  ;;  %376 = vst [vmem:[%s5814_s11 + $0x250] sm:$0xff] %v375_v10  ;;  %v383_v14 = vld [vmem:[%s5806_s10 + $0x750] sm:$0xff]  ;;  %v385_v15 = vld [vmem:[%s5806_s10 + $0x758] sm:$0xff] }
  0x36   : > { %378 = vst [vmem:[%s5814_s11 + $0x258] sm:$0xff] %v377_v11  ;;  %380 = vst [vmem:[%s5814_s11 + $0x260] sm:$0xff] %v379_v12  ;;  %v387_v16 = vld [vmem:[%s5806_s10 + $0x780] sm:$0xff]  ;;  %v389_v17 = vld [vmem:[%s5806_s10 + $0x788] sm:$0xff] }
  0x37   : > { %382 = vst [vmem:[%s5814_s11 + $0x268] sm:$0xff] %v381_v13  ;;  %384 = vst [vmem:[%s5814_s11 + $0x270] sm:$0xff] %v383_v14  ;;  %v391_v18 = vld [vmem:[%s5806_s10 + $0x7b0] sm:$0xff]  ;;  %v393_v19 = vld [vmem:[%s5806_s10 + $0x7b8] sm:$0xff] }
  0x38   : > { %386 = vst [vmem:[%s5814_s11 + $0x278] sm:$0xff] %v385_v15  ;;  %388 = vst [vmem:[%s5814_s11 + $0x280] sm:$0xff] %v387_v16  ;;  %v395_v20 = vld [vmem:[%s5806_s10 + $0x7e0] sm:$0xff]  ;;  %v397_v21 = vld [vmem:[%s5806_s10 + $0x7e8] sm:$0xff] }
  0x39   : > { %390 = vst [vmem:[%s5814_s11 + $0x288] sm:$0xff] %v389_v17  ;;  %392 = vst [vmem:[%s5814_s11 + $0x290] sm:$0xff] %v391_v18  ;;  %v399_v22 = vld [vmem:[%s5806_s10 + $0x810] sm:$0xff]  ;;  %v401_v23 = vld [vmem:[%s5806_s10 + $0x818] sm:$0xff] }
  0x3a   : > { %394 = vst [vmem:[%s5814_s11 + $0x298] sm:$0xff] %v393_v19  ;;  %396 = vst [vmem:[%s5814_s11 + $0x2a0] sm:$0xff] %v395_v20  ;;  %v403_v24 = vld [vmem:[%s5806_s10 + $0x840] sm:$0xff]  ;;  %v405_v25 = vld [vmem:[%s5806_s10 + $0x848] sm:$0xff] }
  0x3b   : > { %398 = vst [vmem:[%s5814_s11 + $0x2a8] sm:$0xff] %v397_v21  ;;  %400 = vst [vmem:[%s5814_s11 + $0x2b0] sm:$0xff] %v399_v22  ;;  %v407_v26 = vld [vmem:[%s5806_s10 + $0x870] sm:$0xff]  ;;  %v409_v27 = vld [vmem:[%s5806_s10 + $0x878] sm:$0xff] }
  0x3c   : > { %402 = vst [vmem:[%s5814_s11 + $0x2b8] sm:$0xff] %v401_v23  ;;  %404 = vst [vmem:[%s5814_s11 + $0x2c0] sm:$0xff] %v403_v24  ;;  %v411_v28 = vld [vmem:[%s5806_s10 + $0x8a0] sm:$0xff]  ;;  %v413_v29 = vld [vmem:[%s5806_s10 + $0x8a8] sm:$0xff] }
  0x3d   : > { %406 = vst [vmem:[%s5814_s11 + $0x2c8] sm:$0xff] %v405_v25  ;;  %408 = vst [vmem:[%s5814_s11 + $0x2d0] sm:$0xff] %v407_v26  ;;  %v415_v30 = vld [vmem:[%s5806_s10 + $0x8d0] sm:$0xff]  ;;  %v417_v31 = vld [vmem:[%s5806_s10 + $0x8d8] sm:$0xff] }
  0x3e   : > { %410 = vst [vmem:[%s5814_s11 + $0x2d8] sm:$0xff] %v409_v27  ;;  %412 = vst [vmem:[%s5814_s11 + $0x2e0] sm:$0xff] %v411_v28  ;;  %v419_v32 = vld [vmem:[%s5806_s10 + $0x900] sm:$0xff]  ;;  %v421_v33 = vld [vmem:[%s5806_s10 + $0x908] sm:$0xff] }
  0x3f   : > { %414 = vst [vmem:[%s5814_s11 + $0x2e8] sm:$0xff] %v413_v29  ;;  %416 = vst [vmem:[%s5814_s11 + $0x2f0] sm:$0xff] %v415_v30  ;;  %v423_v34 = vld [vmem:[%s5806_s10 + $0x930] sm:$0xff]  ;;  %v425_v35 = vld [vmem:[%s5806_s10 + $0x938] sm:$0xff] }
  0x40   : > { %418 = vst [vmem:[%s5814_s11 + $0x2f8] sm:$0xff] %v417_v31  ;;  %420 = vst [vmem:[%s5814_s11 + $0x300] sm:$0xff] %v419_v32  ;;  %v427_v36 = vld [vmem:[%s5806_s10 + $0x960] sm:$0xff]  ;;  %v429_v37 = vld [vmem:[%s5806_s10 + $0x968] sm:$0xff] }
  0x41   : > { %422 = vst [vmem:[%s5814_s11 + $0x308] sm:$0xff] %v421_v33  ;;  %424 = vst [vmem:[%s5814_s11 + $0x310] sm:$0xff] %v423_v34  ;;  %v431_v38 = vld [vmem:[%s5806_s10 + $0x990] sm:$0xff]  ;;  %v433_v39 = vld [vmem:[%s5806_s10 + $0x998] sm:$0xff] }
  0x42   : > { %426 = vst [vmem:[%s5814_s11 + $0x318] sm:$0xff] %v425_v35  ;;  %428 = vst [vmem:[%s5814_s11 + $0x320] sm:$0xff] %v427_v36  ;;  %v435_v40 = vld [vmem:[%s5806_s10 + $0x9c0] sm:$0xff]  ;;  %v437_v41 = vld [vmem:[%s5806_s10 + $0x9c8] sm:$0xff] }
  0x43   : > { %430 = vst [vmem:[%s5814_s11 + $0x328] sm:$0xff] %v429_v37  ;;  %432 = vst [vmem:[%s5814_s11 + $0x330] sm:$0xff] %v431_v38  ;;  %v439_v42 = vld [vmem:[%s5806_s10 + $0x9f0] sm:$0xff]  ;;  %v441_v43 = vld [vmem:[%s5806_s10 + $0x9f8] sm:$0xff] }
  0x44   : > { %434 = vst [vmem:[%s5814_s11 + $0x338] sm:$0xff] %v433_v39  ;;  %436 = vst [vmem:[%s5814_s11 + $0x340] sm:$0xff] %v435_v40  ;;  %v443_v44 = vld [vmem:[%s5806_s10 + $0xa20] sm:$0xff]  ;;  %v445_v45 = vld [vmem:[%s5806_s10 + $0xa28] sm:$0xff] }
  0x45   : > { %438 = vst [vmem:[%s5814_s11 + $0x348] sm:$0xff] %v437_v41  ;;  %440 = vst [vmem:[%s5814_s11 + $0x350] sm:$0xff] %v439_v42  ;;  %v447_v46 = vld [vmem:[%s5806_s10 + $0xa50] sm:$0xff]  ;;  %v449_v47 = vld [vmem:[%s5806_s10 + $0xa58] sm:$0xff] }
  0x46   : > { %442 = vst [vmem:[%s5814_s11 + $0x358] sm:$0xff] %v441_v43  ;;  %444 = vst [vmem:[%s5814_s11 + $0x360] sm:$0xff] %v443_v44  ;;  %v451_v48 = vld [vmem:[%s5806_s10 + $0xa80] sm:$0xff]  ;;  %v453_v49 = vld [vmem:[%s5806_s10 + $0xa88] sm:$0xff] }
  0x47   : > { %446 = vst [vmem:[%s5814_s11 + $0x368] sm:$0xff] %v445_v45  ;;  %448 = vst [vmem:[%s5814_s11 + $0x370] sm:$0xff] %v447_v46  ;;  %v455_v50 = vld [vmem:[%s5806_s10 + $0xab0] sm:$0xff]  ;;  %v457_v51 = vld [vmem:[%s5806_s10 + $0xab8] sm:$0xff] }
  0x48   : > { %450 = vst [vmem:[%s5814_s11 + $0x378] sm:$0xff] %v449_v47  ;;  %452 = vst [vmem:[%s5814_s11 + $0x380] sm:$0xff] %v451_v48  ;;  %v459_v52 = vld [vmem:[%s5806_s10 + $0xae0] sm:$0xff]  ;;  %v461_v53 = vld [vmem:[%s5806_s10 + $0xae8] sm:$0xff] }
  0x49   : > { %454 = vst [vmem:[%s5814_s11 + $0x388] sm:$0xff] %v453_v49  ;;  %456 = vst [vmem:[%s5814_s11 + $0x390] sm:$0xff] %v455_v50  ;;  %v463_v54 = vld [vmem:[%s5806_s10 + $0xb10] sm:$0xff]  ;;  %v465_v55 = vld [vmem:[%s5806_s10 + $0xb18] sm:$0xff] }
  0x4a   : > { %458 = vst [vmem:[%s5814_s11 + $0x398] sm:$0xff] %v457_v51  ;;  %460 = vst [vmem:[%s5814_s11 + $0x3a0] sm:$0xff] %v459_v52  ;;  %v467_v56 = vld [vmem:[%s5806_s10 + $0xb40] sm:$0xff]  ;;  %v469_v57 = vld [vmem:[%s5806_s10 + $0xb48] sm:$0xff] }
  0x4b   : > { %462 = vst [vmem:[%s5814_s11 + $0x3a8] sm:$0xff] %v461_v53  ;;  %464 = vst [vmem:[%s5814_s11 + $0x3b0] sm:$0xff] %v463_v54  ;;  %v471_v58 = vld [vmem:[%s5806_s10 + $0xb70] sm:$0xff]  ;;  %v473_v59 = vld [vmem:[%s5806_s10 + $0xb78] sm:$0xff] }
  0x4c   : > { %466 = vst [vmem:[%s5814_s11 + $0x3b8] sm:$0xff] %v465_v55  ;;  %468 = vst [vmem:[%s5814_s11 + $0x3c0] sm:$0xff] %v467_v56  ;;  %v475_v60 = vld [vmem:[%s5806_s10 + $0xba0] sm:$0xff]  ;;  %v477_v61 = vld [vmem:[%s5806_s10 + $0xba8] sm:$0xff] }
  0x4d   : > { %470 = vst [vmem:[%s5814_s11 + $0x3c8] sm:$0xff] %v469_v57  ;;  %472 = vst [vmem:[%s5814_s11 + $0x3d0] sm:$0xff] %v471_v58  ;;  %v479_v62 = vld [vmem:[%s5806_s10 + $0xbd0] sm:$0xff]  ;;  %v481_v63 = vld [vmem:[%s5806_s10 + $0xbd8] sm:$0xff] }
  0x4e   : > { %474 = vst [vmem:[%s5814_s11 + $0x3d8] sm:$0xff] %v473_v59  ;;  %476 = vst [vmem:[%s5814_s11 + $0x3e0] sm:$0xff] %v475_v60  ;;  %v483_v0 = vld [vmem:[%s5806_s10 + $0xc00] sm:$0xff]  ;;  %v485_v1 = vld [vmem:[%s5806_s10 + $0xc08] sm:$0xff] }
  0x4f   : > { %478 = vst [vmem:[%s5814_s11 + $0x3e8] sm:$0xff] %v477_v61  ;;  %480 = vst [vmem:[%s5814_s11 + $0x3f0] sm:$0xff] %v479_v62  ;;  %v487_v2 = vld [vmem:[%s5806_s10 + $0xc30] sm:$0xff]  ;;  %v489_v3 = vld [vmem:[%s5806_s10 + $0xc38] sm:$0xff] }
  0x50   : > { %482 = vst [vmem:[%s5814_s11 + $0x3f8] sm:$0xff] %v481_v63  ;;  %484 = vst [vmem:[%s5814_s11 + $0x400] sm:$0xff] %v483_v0  ;;  %v491_v4 = vld [vmem:[%s5806_s10 + $0xc60] sm:$0xff]  ;;  %v493_v5 = vld [vmem:[%s5806_s10 + $0xc68] sm:$0xff] }
  0x51   : > { %486 = vst [vmem:[%s5814_s11 + $0x408] sm:$0xff] %v485_v1  ;;  %488 = vst [vmem:[%s5814_s11 + $0x410] sm:$0xff] %v487_v2  ;;  %v495_v6 = vld [vmem:[%s5806_s10 + $0xc90] sm:$0xff]  ;;  %v497_v7 = vld [vmem:[%s5806_s10 + $0xc98] sm:$0xff] }
  0x52   : > { %490 = vst [vmem:[%s5814_s11 + $0x418] sm:$0xff] %v489_v3  ;;  %492 = vst [vmem:[%s5814_s11 + $0x420] sm:$0xff] %v491_v4  ;;  %v499_v8 = vld [vmem:[%s5806_s10 + $0xcc0] sm:$0xff]  ;;  %v501_v9 = vld [vmem:[%s5806_s10 + $0xcc8] sm:$0xff] }
  0x53   : > { %494 = vst [vmem:[%s5814_s11 + $0x428] sm:$0xff] %v493_v5  ;;  %496 = vst [vmem:[%s5814_s11 + $0x430] sm:$0xff] %v495_v6  ;;  %v503_v10 = vld [vmem:[%s5806_s10 + $0xcf0] sm:$0xff]  ;;  %v505_v11 = vld [vmem:[%s5806_s10 + $0xcf8] sm:$0xff] }
  0x54   : > { %498 = vst [vmem:[%s5814_s11 + $0x438] sm:$0xff] %v497_v7  ;;  %500 = vst [vmem:[%s5814_s11 + $0x440] sm:$0xff] %v499_v8  ;;  %v507_v12 = vld [vmem:[%s5806_s10 + $0xd20] sm:$0xff]  ;;  %v509_v13 = vld [vmem:[%s5806_s10 + $0xd28] sm:$0xff] }
  0x55   : > { %502 = vst [vmem:[%s5814_s11 + $0x448] sm:$0xff] %v501_v9  ;;  %504 = vst [vmem:[%s5814_s11 + $0x450] sm:$0xff] %v503_v10  ;;  %v511_v14 = vld [vmem:[%s5806_s10 + $0xd50] sm:$0xff]  ;;  %v513_v15 = vld [vmem:[%s5806_s10 + $0xd58] sm:$0xff] }
  0x56   : > { %506 = vst [vmem:[%s5814_s11 + $0x458] sm:$0xff] %v505_v11  ;;  %508 = vst [vmem:[%s5814_s11 + $0x460] sm:$0xff] %v507_v12  ;;  %v515_v16 = vld [vmem:[%s5806_s10 + $0xd80] sm:$0xff]  ;;  %v517_v17 = vld [vmem:[%s5806_s10 + $0xd88] sm:$0xff] }
  0x57   : > { %510 = vst [vmem:[%s5814_s11 + $0x468] sm:$0xff] %v509_v13  ;;  %512 = vst [vmem:[%s5814_s11 + $0x470] sm:$0xff] %v511_v14  ;;  %v519_v18 = vld [vmem:[%s5806_s10 + $0xdb0] sm:$0xff]  ;;  %v521_v19 = vld [vmem:[%s5806_s10 + $0xdb8] sm:$0xff] }
  0x58   : > { %514 = vst [vmem:[%s5814_s11 + $0x478] sm:$0xff] %v513_v15  ;;  %516 = vst [vmem:[%s5814_s11 + $0x480] sm:$0xff] %v515_v16  ;;  %v523_v20 = vld [vmem:[%s5806_s10 + $0xde0] sm:$0xff]  ;;  %v525_v21 = vld [vmem:[%s5806_s10 + $0xde8] sm:$0xff] }
  0x59   : > { %518 = vst [vmem:[%s5814_s11 + $0x488] sm:$0xff] %v517_v17  ;;  %520 = vst [vmem:[%s5814_s11 + $0x490] sm:$0xff] %v519_v18  ;;  %v527_v22 = vld [vmem:[%s5806_s10 + $0xe10] sm:$0xff]  ;;  %v529_v23 = vld [vmem:[%s5806_s10 + $0xe18] sm:$0xff] }
  0x5a   : > { %522 = vst [vmem:[%s5814_s11 + $0x498] sm:$0xff] %v521_v19  ;;  %524 = vst [vmem:[%s5814_s11 + $0x4a0] sm:$0xff] %v523_v20  ;;  %v531_v24 = vld [vmem:[%s5806_s10 + $0xe40] sm:$0xff]  ;;  %v533_v25 = vld [vmem:[%s5806_s10 + $0xe48] sm:$0xff] }
  0x5b   : > { %526 = vst [vmem:[%s5814_s11 + $0x4a8] sm:$0xff] %v525_v21  ;;  %528 = vst [vmem:[%s5814_s11 + $0x4b0] sm:$0xff] %v527_v22  ;;  %v535_v26 = vld [vmem:[%s5806_s10 + $0xe70] sm:$0xff]  ;;  %v537_v27 = vld [vmem:[%s5806_s10 + $0xe78] sm:$0xff] }
  0x5c   : > { %530 = vst [vmem:[%s5814_s11 + $0x4b8] sm:$0xff] %v529_v23  ;;  %532 = vst [vmem:[%s5814_s11 + $0x4c0] sm:$0xff] %v531_v24  ;;  %v539_v28 = vld [vmem:[%s5806_s10 + $0xea0] sm:$0xff]  ;;  %v541_v29 = vld [vmem:[%s5806_s10 + $0xea8] sm:$0xff] }
  0x5d   : > { %534 = vst [vmem:[%s5814_s11 + $0x4c8] sm:$0xff] %v533_v25  ;;  %536 = vst [vmem:[%s5814_s11 + $0x4d0] sm:$0xff] %v535_v26  ;;  %v543_v30 = vld [vmem:[%s5806_s10 + $0xed0] sm:$0xff]  ;;  %v545_v31 = vld [vmem:[%s5806_s10 + $0xed8] sm:$0xff] }
  0x5e   : > { %538 = vst [vmem:[%s5814_s11 + $0x4d8] sm:$0xff] %v537_v27  ;;  %540 = vst [vmem:[%s5814_s11 + $0x4e0] sm:$0xff] %v539_v28  ;;  %v547_v32 = vld [vmem:[%s5806_s10 + $0xf00] sm:$0xff]  ;;  %v549_v33 = vld [vmem:[%s5806_s10 + $0xf08] sm:$0xff] }
  0x5f   : > { %542 = vst [vmem:[%s5814_s11 + $0x4e8] sm:$0xff] %v541_v29  ;;  %544 = vst [vmem:[%s5814_s11 + $0x4f0] sm:$0xff] %v543_v30  ;;  %v551_v34 = vld [vmem:[%s5806_s10 + $0xf30] sm:$0xff]  ;;  %v553_v35 = vld [vmem:[%s5806_s10 + $0xf38] sm:$0xff] }
  0x60   : > { %546 = vst [vmem:[%s5814_s11 + $0x4f8] sm:$0xff] %v545_v31  ;;  %548 = vst [vmem:[%s5814_s11 + $0x500] sm:$0xff] %v547_v32  ;;  %v555_v36 = vld [vmem:[%s5806_s10 + $0xf60] sm:$0xff]  ;;  %v557_v37 = vld [vmem:[%s5806_s10 + $0xf68] sm:$0xff] }
  0x61   : > { %550 = vst [vmem:[%s5814_s11 + $0x508] sm:$0xff] %v549_v33  ;;  %552 = vst [vmem:[%s5814_s11 + $0x510] sm:$0xff] %v551_v34  ;;  %v559_v38 = vld [vmem:[%s5806_s10 + $0xf90] sm:$0xff]  ;;  %v561_v39 = vld [vmem:[%s5806_s10 + $0xf98] sm:$0xff] }
  0x62   : > { %554 = vst [vmem:[%s5814_s11 + $0x518] sm:$0xff] %v553_v35  ;;  %556 = vst [vmem:[%s5814_s11 + $0x520] sm:$0xff] %v555_v36  ;;  %v563_v40 = vld [vmem:[%s5806_s10 + $0xfc0] sm:$0xff]  ;;  %v565_v41 = vld [vmem:[%s5806_s10 + $0xfc8] sm:$0xff] }
  0x63   : > { %558 = vst [vmem:[%s5814_s11 + $0x528] sm:$0xff] %v557_v37  ;;  %560 = vst [vmem:[%s5814_s11 + $0x530] sm:$0xff] %v559_v38  ;;  %v567_v42 = vld [vmem:[%s5806_s10 + $0xff0] sm:$0xff]  ;;  %v569_v43 = vld [vmem:[%s5806_s10 + $0xff8] sm:$0xff] }
  0x64   : > { %562 = vst [vmem:[%s5814_s11 + $0x538] sm:$0xff] %v561_v39  ;;  %564 = vst [vmem:[%s5814_s11 + $0x540] sm:$0xff] %v563_v40  ;;  %v571_v44 = vld [vmem:[%s5806_s10 + $0x1020] sm:$0xff]  ;;  %v573_v45 = vld [vmem:[%s5806_s10 + $0x1028] sm:$0xff] }
  0x65   : > { %566 = vst [vmem:[%s5814_s11 + $0x548] sm:$0xff] %v565_v41  ;;  %568 = vst [vmem:[%s5814_s11 + $0x550] sm:$0xff] %v567_v42  ;;  %v575_v46 = vld [vmem:[%s5806_s10 + $0x1050] sm:$0xff]  ;;  %v577_v47 = vld [vmem:[%s5806_s10 + $0x1058] sm:$0xff] }
  0x66   : > { %570 = vst [vmem:[%s5814_s11 + $0x558] sm:$0xff] %v569_v43  ;;  %572 = vst [vmem:[%s5814_s11 + $0x560] sm:$0xff] %v571_v44  ;;  %v579_v48 = vld [vmem:[%s5806_s10 + $0x1080] sm:$0xff]  ;;  %v581_v49 = vld [vmem:[%s5806_s10 + $0x1088] sm:$0xff] }
  0x67   : > { %574 = vst [vmem:[%s5814_s11 + $0x568] sm:$0xff] %v573_v45  ;;  %576 = vst [vmem:[%s5814_s11 + $0x570] sm:$0xff] %v575_v46  ;;  %v583_v50 = vld [vmem:[%s5806_s10 + $0x10b0] sm:$0xff]  ;;  %v585_v51 = vld [vmem:[%s5806_s10 + $0x10b8] sm:$0xff] }
  0x68   : > { %578 = vst [vmem:[%s5814_s11 + $0x578] sm:$0xff] %v577_v47  ;;  %580 = vst [vmem:[%s5814_s11 + $0x580] sm:$0xff] %v579_v48  ;;  %v587_v52 = vld [vmem:[%s5806_s10 + $0x10e0] sm:$0xff]  ;;  %v589_v53 = vld [vmem:[%s5806_s10 + $0x10e8] sm:$0xff] }
  0x69   : > { %582 = vst [vmem:[%s5814_s11 + $0x588] sm:$0xff] %v581_v49  ;;  %584 = vst [vmem:[%s5814_s11 + $0x590] sm:$0xff] %v583_v50  ;;  %v591_v54 = vld [vmem:[%s5806_s10 + $0x1110] sm:$0xff]  ;;  %v593_v55 = vld [vmem:[%s5806_s10 + $0x1118] sm:$0xff] }
  0x6a   : > { %586 = vst [vmem:[%s5814_s11 + $0x598] sm:$0xff] %v585_v51  ;;  %588 = vst [vmem:[%s5814_s11 + $0x5a0] sm:$0xff] %v587_v52  ;;  %v595_v56 = vld [vmem:[%s5806_s10 + $0x1140] sm:$0xff]  ;;  %v597_v57 = vld [vmem:[%s5806_s10 + $0x1148] sm:$0xff] }
  0x6b   : > { %590 = vst [vmem:[%s5814_s11 + $0x5a8] sm:$0xff] %v589_v53  ;;  %592 = vst [vmem:[%s5814_s11 + $0x5b0] sm:$0xff] %v591_v54  ;;  %v599_v58 = vld [vmem:[%s5806_s10 + $0x1170] sm:$0xff]  ;;  %v601_v59 = vld [vmem:[%s5806_s10 + $0x1178] sm:$0xff] }
  0x6c   : > { %594 = vst [vmem:[%s5814_s11 + $0x5b8] sm:$0xff] %v593_v55  ;;  %596 = vst [vmem:[%s5814_s11 + $0x5c0] sm:$0xff] %v595_v56  ;;  %v603_v60 = vld [vmem:[%s5806_s10 + $0x11a0] sm:$0xff]  ;;  %v605_v61 = vld [vmem:[%s5806_s10 + $0x11a8] sm:$0xff] }
  0x6d   : > { %598 = vst [vmem:[%s5814_s11 + $0x5c8] sm:$0xff] %v597_v57  ;;  %600 = vst [vmem:[%s5814_s11 + $0x5d0] sm:$0xff] %v599_v58  ;;  %v607_v62 = vld [vmem:[%s5806_s10 + $0x11d0] sm:$0xff]  ;;  %v609_v63 = vld [vmem:[%s5806_s10 + $0x11d8] sm:$0xff] }
  0x6e   : > { %602 = vst [vmem:[%s5814_s11 + $0x5d8] sm:$0xff] %v601_v59  ;;  %604 = vst [vmem:[%s5814_s11 + $0x5e0] sm:$0xff] %v603_v60  ;;  %v611_v0 = vld [vmem:[%s5806_s10 + $0x1200] sm:$0xff]  ;;  %v613_v1 = vld [vmem:[%s5806_s10 + $0x1208] sm:$0xff] }
  0x6f   : > { %606 = vst [vmem:[%s5814_s11 + $0x5e8] sm:$0xff] %v605_v61  ;;  %608 = vst [vmem:[%s5814_s11 + $0x5f0] sm:$0xff] %v607_v62  ;;  %v615_v2 = vld [vmem:[%s5806_s10 + $0x1230] sm:$0xff]  ;;  %v617_v3 = vld [vmem:[%s5806_s10 + $0x1238] sm:$0xff] }
  0x70   : > { %610 = vst [vmem:[%s5814_s11 + $0x5f8] sm:$0xff] %v609_v63  ;;  %612 = vst [vmem:[%s5814_s11 + $0x600] sm:$0xff] %v611_v0  ;;  %v619_v4 = vld [vmem:[%s5806_s10 + $0x1260] sm:$0xff]  ;;  %v621_v5 = vld [vmem:[%s5806_s10 + $0x1268] sm:$0xff] }
  0x71   : > { %614 = vst [vmem:[%s5814_s11 + $0x608] sm:$0xff] %v613_v1  ;;  %616 = vst [vmem:[%s5814_s11 + $0x610] sm:$0xff] %v615_v2  ;;  %v623_v6 = vld [vmem:[%s5806_s10 + $0x1290] sm:$0xff]  ;;  %v625_v7 = vld [vmem:[%s5806_s10 + $0x1298] sm:$0xff] }
  0x72   : > { %618 = vst [vmem:[%s5814_s11 + $0x618] sm:$0xff] %v617_v3  ;;  %620 = vst [vmem:[%s5814_s11 + $0x620] sm:$0xff] %v619_v4  ;;  %v627_v8 = vld [vmem:[%s5806_s10 + $0x12c0] sm:$0xff]  ;;  %v629_v9 = vld [vmem:[%s5806_s10 + $0x12c8] sm:$0xff] }
  0x73   : > { %622 = vst [vmem:[%s5814_s11 + $0x628] sm:$0xff] %v621_v5  ;;  %624 = vst [vmem:[%s5814_s11 + $0x630] sm:$0xff] %v623_v6  ;;  %v631_v10 = vld [vmem:[%s5806_s10 + $0x12f0] sm:$0xff]  ;;  %v633_v11 = vld [vmem:[%s5806_s10 + $0x12f8] sm:$0xff] }
  0x74   : > { %626 = vst [vmem:[%s5814_s11 + $0x638] sm:$0xff] %v625_v7  ;;  %628 = vst [vmem:[%s5814_s11 + $0x640] sm:$0xff] %v627_v8  ;;  %v635_v12 = vld [vmem:[%s5806_s10 + $0x1320] sm:$0xff]  ;;  %v637_v13 = vld [vmem:[%s5806_s10 + $0x1328] sm:$0xff] }
  0x75   : > { %630 = vst [vmem:[%s5814_s11 + $0x648] sm:$0xff] %v629_v9  ;;  %632 = vst [vmem:[%s5814_s11 + $0x650] sm:$0xff] %v631_v10  ;;  %v639_v14 = vld [vmem:[%s5806_s10 + $0x1350] sm:$0xff]  ;;  %v641_v15 = vld [vmem:[%s5806_s10 + $0x1358] sm:$0xff] }
  0x76   : > { %634 = vst [vmem:[%s5814_s11 + $0x658] sm:$0xff] %v633_v11  ;;  %636 = vst [vmem:[%s5814_s11 + $0x660] sm:$0xff] %v635_v12  ;;  %v643_v16 = vld [vmem:[%s5806_s10 + $0x1380] sm:$0xff]  ;;  %v645_v17 = vld [vmem:[%s5806_s10 + $0x1388] sm:$0xff] }
  0x77   : > { %638 = vst [vmem:[%s5814_s11 + $0x668] sm:$0xff] %v637_v13  ;;  %640 = vst [vmem:[%s5814_s11 + $0x670] sm:$0xff] %v639_v14  ;;  %v647_v18 = vld [vmem:[%s5806_s10 + $0x13b0] sm:$0xff]  ;;  %v649_v19 = vld [vmem:[%s5806_s10 + $0x13b8] sm:$0xff] }
  0x78   : > { %642 = vst [vmem:[%s5814_s11 + $0x678] sm:$0xff] %v641_v15  ;;  %644 = vst [vmem:[%s5814_s11 + $0x680] sm:$0xff] %v643_v16  ;;  %v651_v20 = vld [vmem:[%s5806_s10 + $0x13e0] sm:$0xff]  ;;  %v653_v21 = vld [vmem:[%s5806_s10 + $0x13e8] sm:$0xff] }
  0x79   : > { %646 = vst [vmem:[%s5814_s11 + $0x688] sm:$0xff] %v645_v17  ;;  %648 = vst [vmem:[%s5814_s11 + $0x690] sm:$0xff] %v647_v18  ;;  %v655_v22 = vld [vmem:[%s5806_s10 + $0x1410] sm:$0xff]  ;;  %v657_v23 = vld [vmem:[%s5806_s10 + $0x1418] sm:$0xff] }
  0x7a   : > { %650 = vst [vmem:[%s5814_s11 + $0x698] sm:$0xff] %v649_v19  ;;  %652 = vst [vmem:[%s5814_s11 + $0x6a0] sm:$0xff] %v651_v20  ;;  %v659_v24 = vld [vmem:[%s5806_s10 + $0x1440] sm:$0xff]  ;;  %v661_v25 = vld [vmem:[%s5806_s10 + $0x1448] sm:$0xff] }
  0x7b   : > { %654 = vst [vmem:[%s5814_s11 + $0x6a8] sm:$0xff] %v653_v21  ;;  %656 = vst [vmem:[%s5814_s11 + $0x6b0] sm:$0xff] %v655_v22  ;;  %v663_v26 = vld [vmem:[%s5806_s10 + $0x1470] sm:$0xff]  ;;  %v665_v27 = vld [vmem:[%s5806_s10 + $0x1478] sm:$0xff] }
  0x7c   : > { %658 = vst [vmem:[%s5814_s11 + $0x6b8] sm:$0xff] %v657_v23  ;;  %660 = vst [vmem:[%s5814_s11 + $0x6c0] sm:$0xff] %v659_v24  ;;  %v667_v28 = vld [vmem:[%s5806_s10 + $0x14a0] sm:$0xff]  ;;  %v669_v29 = vld [vmem:[%s5806_s10 + $0x14a8] sm:$0xff] }
  0x7d   : > { %662 = vst [vmem:[%s5814_s11 + $0x6c8] sm:$0xff] %v661_v25  ;;  %664 = vst [vmem:[%s5814_s11 + $0x6d0] sm:$0xff] %v663_v26  ;;  %v671_v30 = vld [vmem:[%s5806_s10 + $0x14d0] sm:$0xff]  ;;  %v673_v31 = vld [vmem:[%s5806_s10 + $0x14d8] sm:$0xff] }
  0x7e   : > { %666 = vst [vmem:[%s5814_s11 + $0x6d8] sm:$0xff] %v665_v27  ;;  %668 = vst [vmem:[%s5814_s11 + $0x6e0] sm:$0xff] %v667_v28  ;;  %v675_v32 = vld [vmem:[%s5806_s10 + $0x1500] sm:$0xff]  ;;  %v677_v33 = vld [vmem:[%s5806_s10 + $0x1508] sm:$0xff] }
  0x7f   : > { %670 = vst [vmem:[%s5814_s11 + $0x6e8] sm:$0xff] %v669_v29  ;;  %672 = vst [vmem:[%s5814_s11 + $0x6f0] sm:$0xff] %v671_v30  ;;  %v679_v34 = vld [vmem:[%s5806_s10 + $0x1530] sm:$0xff]  ;;  %v681_v35 = vld [vmem:[%s5806_s10 + $0x1538] sm:$0xff] }
  0x80   : > { %674 = vst [vmem:[%s5814_s11 + $0x6f8] sm:$0xff] %v673_v31  ;;  %676 = vst [vmem:[%s5814_s11 + $0x700] sm:$0xff] %v675_v32  ;;  %v683_v36 = vld [vmem:[%s5806_s10 + $0x1560] sm:$0xff]  ;;  %v685_v37 = vld [vmem:[%s5806_s10 + $0x1568] sm:$0xff] }
  0x81   : > { %678 = vst [vmem:[%s5814_s11 + $0x708] sm:$0xff] %v677_v33  ;;  %680 = vst [vmem:[%s5814_s11 + $0x710] sm:$0xff] %v679_v34  ;;  %v687_v38 = vld [vmem:[%s5806_s10 + $0x1590] sm:$0xff]  ;;  %v689_v39 = vld [vmem:[%s5806_s10 + $0x1598] sm:$0xff] }
  0x82   : > { %682 = vst [vmem:[%s5814_s11 + $0x718] sm:$0xff] %v681_v35  ;;  %684 = vst [vmem:[%s5814_s11 + $0x720] sm:$0xff] %v683_v36  ;;  %v691_v40 = vld [vmem:[%s5806_s10 + $0x15c0] sm:$0xff]  ;;  %v693_v41 = vld [vmem:[%s5806_s10 + $0x15c8] sm:$0xff] }
  0x83   : > { %686 = vst [vmem:[%s5814_s11 + $0x728] sm:$0xff] %v685_v37  ;;  %688 = vst [vmem:[%s5814_s11 + $0x730] sm:$0xff] %v687_v38  ;;  %v695_v42 = vld [vmem:[%s5806_s10 + $0x15f0] sm:$0xff]  ;;  %v697_v43 = vld [vmem:[%s5806_s10 + $0x15f8] sm:$0xff] }
  0x84   : > { %690 = vst [vmem:[%s5814_s11 + $0x738] sm:$0xff] %v689_v39  ;;  %692 = vst [vmem:[%s5814_s11 + $0x740] sm:$0xff] %v691_v40  ;;  %v699_v44 = vld [vmem:[%s5806_s10 + $0x1620] sm:$0xff]  ;;  %v701_v45 = vld [vmem:[%s5806_s10 + $0x1628] sm:$0xff] }
  0x85   : > { %694 = vst [vmem:[%s5814_s11 + $0x748] sm:$0xff] %v693_v41  ;;  %696 = vst [vmem:[%s5814_s11 + $0x750] sm:$0xff] %v695_v42  ;;  %v703_v46 = vld [vmem:[%s5806_s10 + $0x1650] sm:$0xff]  ;;  %v705_v47 = vld [vmem:[%s5806_s10 + $0x1658] sm:$0xff] }
  0x86   : > { %698 = vst [vmem:[%s5814_s11 + $0x758] sm:$0xff] %v697_v43  ;;  %700 = vst [vmem:[%s5814_s11 + $0x760] sm:$0xff] %v699_v44  ;;  %v707_v48 = vld [vmem:[%s5806_s10 + $0x1680] sm:$0xff]  ;;  %v709_v49 = vld [vmem:[%s5806_s10 + $0x1688] sm:$0xff] }
  0x87   : > { %702 = vst [vmem:[%s5814_s11 + $0x768] sm:$0xff] %v701_v45  ;;  %704 = vst [vmem:[%s5814_s11 + $0x770] sm:$0xff] %v703_v46  ;;  %v711_v50 = vld [vmem:[%s5806_s10 + $0x16b0] sm:$0xff]  ;;  %v713_v51 = vld [vmem:[%s5806_s10 + $0x16b8] sm:$0xff] }
  0x88   : > { %706 = vst [vmem:[%s5814_s11 + $0x778] sm:$0xff] %v705_v47  ;;  %708 = vst [vmem:[%s5814_s11 + $0x780] sm:$0xff] %v707_v48  ;;  %v715_v52 = vld [vmem:[%s5806_s10 + $0x16e0] sm:$0xff]  ;;  %v717_v53 = vld [vmem:[%s5806_s10 + $0x16e8] sm:$0xff] }
  0x89   : > { %710 = vst [vmem:[%s5814_s11 + $0x788] sm:$0xff] %v709_v49  ;;  %712 = vst [vmem:[%s5814_s11 + $0x790] sm:$0xff] %v711_v50  ;;  %v719_v54 = vld [vmem:[%s5806_s10 + $0x1710] sm:$0xff]  ;;  %v721_v55 = vld [vmem:[%s5806_s10 + $0x1718] sm:$0xff] }
  0x8a   : > { %714 = vst [vmem:[%s5814_s11 + $0x798] sm:$0xff] %v713_v51  ;;  %716 = vst [vmem:[%s5814_s11 + $0x7a0] sm:$0xff] %v715_v52  ;;  %v723_v56 = vld [vmem:[%s5806_s10 + $0x1740] sm:$0xff]  ;;  %v725_v57 = vld [vmem:[%s5806_s10 + $0x1748] sm:$0xff] }
  0x8b   : > { %718 = vst [vmem:[%s5814_s11 + $0x7a8] sm:$0xff] %v717_v53  ;;  %720 = vst [vmem:[%s5814_s11 + $0x7b0] sm:$0xff] %v719_v54  ;;  %v727_v58 = vld [vmem:[%s5806_s10 + $0x1770] sm:$0xff]  ;;  %v729_v59 = vld [vmem:[%s5806_s10 + $0x1778] sm:$0xff] }
  0x8c   : > { %722 = vst [vmem:[%s5814_s11 + $0x7b8] sm:$0xff] %v721_v55  ;;  %724 = vst [vmem:[%s5814_s11 + $0x7c0] sm:$0xff] %v723_v56  ;;  %v731_v60 = vld [vmem:[%s5806_s10 + $0x17a0] sm:$0xff]  ;;  %v733_v61 = vld [vmem:[%s5806_s10 + $0x17a8] sm:$0xff] }
  0x8d   : > { %726 = vst [vmem:[%s5814_s11 + $0x7c8] sm:$0xff] %v725_v57  ;;  %728 = vst [vmem:[%s5814_s11 + $0x7d0] sm:$0xff] %v727_v58  ;;  %v735_v62 = vld [vmem:[%s5806_s10 + $0x17d0] sm:$0xff]  ;;  %v737_v63 = vld [vmem:[%s5806_s10 + $0x17d8] sm:$0xff] }
  0x8e   : > { %730 = vst [vmem:[%s5814_s11 + $0x7d8] sm:$0xff] %v729_v59  ;;  %732 = vst [vmem:[%s5814_s11 + $0x7e0] sm:$0xff] %v731_v60  ;;  %v739_v0 = vld [vmem:[%s5806_s10 + $0x1800] sm:$0xff]  ;;  %v741_v1 = vld [vmem:[%s5806_s10 + $0x1808] sm:$0xff] }
  0x8f   : > { %734 = vst [vmem:[%s5814_s11 + $0x7e8] sm:$0xff] %v733_v61  ;;  %736 = vst [vmem:[%s5814_s11 + $0x7f0] sm:$0xff] %v735_v62  ;;  %v743_v2 = vld [vmem:[%s5806_s10 + $0x1830] sm:$0xff]  ;;  %v745_v3 = vld [vmem:[%s5806_s10 + $0x1838] sm:$0xff] }
  0x90   : > { %738 = vst [vmem:[%s5814_s11 + $0x7f8] sm:$0xff] %v737_v63  ;;  %740 = vst [vmem:[%s5814_s11 + $0x800] sm:$0xff] %v739_v0  ;;  %v747_v4 = vld [vmem:[%s5806_s10 + $0x1860] sm:$0xff]  ;;  %v749_v5 = vld [vmem:[%s5806_s10 + $0x1868] sm:$0xff] }
  0x91   : > { %742 = vst [vmem:[%s5814_s11 + $0x808] sm:$0xff] %v741_v1  ;;  %744 = vst [vmem:[%s5814_s11 + $0x810] sm:$0xff] %v743_v2  ;;  %v751_v6 = vld [vmem:[%s5806_s10 + $0x1890] sm:$0xff]  ;;  %v753_v7 = vld [vmem:[%s5806_s10 + $0x1898] sm:$0xff] }
  0x92   : > { %746 = vst [vmem:[%s5814_s11 + $0x818] sm:$0xff] %v745_v3  ;;  %748 = vst [vmem:[%s5814_s11 + $0x820] sm:$0xff] %v747_v4  ;;  %v755_v8 = vld [vmem:[%s5806_s10 + $0x18c0] sm:$0xff]  ;;  %v757_v9 = vld [vmem:[%s5806_s10 + $0x18c8] sm:$0xff] }
  0x93   : > { %750 = vst [vmem:[%s5814_s11 + $0x828] sm:$0xff] %v749_v5  ;;  %752 = vst [vmem:[%s5814_s11 + $0x830] sm:$0xff] %v751_v6  ;;  %v759_v10 = vld [vmem:[%s5806_s10 + $0x18f0] sm:$0xff]  ;;  %v761_v11 = vld [vmem:[%s5806_s10 + $0x18f8] sm:$0xff] }
  0x94   : > { %754 = vst [vmem:[%s5814_s11 + $0x838] sm:$0xff] %v753_v7  ;;  %756 = vst [vmem:[%s5814_s11 + $0x840] sm:$0xff] %v755_v8  ;;  %v763_v12 = vld [vmem:[%s5806_s10 + $0x1920] sm:$0xff]  ;;  %v765_v13 = vld [vmem:[%s5806_s10 + $0x1928] sm:$0xff] }
  0x95   : > { %758 = vst [vmem:[%s5814_s11 + $0x848] sm:$0xff] %v757_v9  ;;  %760 = vst [vmem:[%s5814_s11 + $0x850] sm:$0xff] %v759_v10  ;;  %v767_v14 = vld [vmem:[%s5806_s10 + $0x1950] sm:$0xff]  ;;  %v769_v15 = vld [vmem:[%s5806_s10 + $0x1958] sm:$0xff] }
  0x96   : > { %762 = vst [vmem:[%s5814_s11 + $0x858] sm:$0xff] %v761_v11  ;;  %764 = vst [vmem:[%s5814_s11 + $0x860] sm:$0xff] %v763_v12  ;;  %v771_v16 = vld [vmem:[%s5806_s10 + $0x1980] sm:$0xff]  ;;  %v773_v17 = vld [vmem:[%s5806_s10 + $0x1988] sm:$0xff] }
  0x97   : > { %766 = vst [vmem:[%s5814_s11 + $0x868] sm:$0xff] %v765_v13  ;;  %768 = vst [vmem:[%s5814_s11 + $0x870] sm:$0xff] %v767_v14  ;;  %v775_v18 = vld [vmem:[%s5806_s10 + $0x19b0] sm:$0xff]  ;;  %v777_v19 = vld [vmem:[%s5806_s10 + $0x19b8] sm:$0xff] }
  0x98   : > { %770 = vst [vmem:[%s5814_s11 + $0x878] sm:$0xff] %v769_v15  ;;  %772 = vst [vmem:[%s5814_s11 + $0x880] sm:$0xff] %v771_v16  ;;  %v779_v20 = vld [vmem:[%s5806_s10 + $0x19e0] sm:$0xff]  ;;  %v781_v21 = vld [vmem:[%s5806_s10 + $0x19e8] sm:$0xff] }
  0x99   : > { %774 = vst [vmem:[%s5814_s11 + $0x888] sm:$0xff] %v773_v17  ;;  %776 = vst [vmem:[%s5814_s11 + $0x890] sm:$0xff] %v775_v18  ;;  %v783_v22 = vld [vmem:[%s5806_s10 + $0x1a10] sm:$0xff]  ;;  %v785_v23 = vld [vmem:[%s5806_s10 + $0x1a18] sm:$0xff] }
  0x9a   : > { %778 = vst [vmem:[%s5814_s11 + $0x898] sm:$0xff] %v777_v19  ;;  %780 = vst [vmem:[%s5814_s11 + $0x8a0] sm:$0xff] %v779_v20  ;;  %v787_v24 = vld [vmem:[%s5806_s10 + $0x1a40] sm:$0xff]  ;;  %v789_v25 = vld [vmem:[%s5806_s10 + $0x1a48] sm:$0xff] }
  0x9b   : > { %782 = vst [vmem:[%s5814_s11 + $0x8a8] sm:$0xff] %v781_v21  ;;  %784 = vst [vmem:[%s5814_s11 + $0x8b0] sm:$0xff] %v783_v22  ;;  %v791_v26 = vld [vmem:[%s5806_s10 + $0x1a70] sm:$0xff]  ;;  %v793_v27 = vld [vmem:[%s5806_s10 + $0x1a78] sm:$0xff] }
  0x9c   : > { %786 = vst [vmem:[%s5814_s11 + $0x8b8] sm:$0xff] %v785_v23  ;;  %788 = vst [vmem:[%s5814_s11 + $0x8c0] sm:$0xff] %v787_v24  ;;  %v795_v28 = vld [vmem:[%s5806_s10 + $0x1aa0] sm:$0xff]  ;;  %v797_v29 = vld [vmem:[%s5806_s10 + $0x1aa8] sm:$0xff] }
  0x9d   : > { %790 = vst [vmem:[%s5814_s11 + $0x8c8] sm:$0xff] %v789_v25  ;;  %792 = vst [vmem:[%s5814_s11 + $0x8d0] sm:$0xff] %v791_v26  ;;  %v799_v30 = vld [vmem:[%s5806_s10 + $0x1ad0] sm:$0xff]  ;;  %v801_v31 = vld [vmem:[%s5806_s10 + $0x1ad8] sm:$0xff] }
  0x9e   : > { %794 = vst [vmem:[%s5814_s11 + $0x8d8] sm:$0xff] %v793_v27  ;;  %796 = vst [vmem:[%s5814_s11 + $0x8e0] sm:$0xff] %v795_v28  ;;  %v803_v32 = vld [vmem:[%s5806_s10 + $0x1b00] sm:$0xff]  ;;  %v805_v33 = vld [vmem:[%s5806_s10 + $0x1b08] sm:$0xff] }
  0x9f   : > { %798 = vst [vmem:[%s5814_s11 + $0x8e8] sm:$0xff] %v797_v29  ;;  %800 = vst [vmem:[%s5814_s11 + $0x8f0] sm:$0xff] %v799_v30  ;;  %v807_v34 = vld [vmem:[%s5806_s10 + $0x1b30] sm:$0xff]  ;;  %v809_v35 = vld [vmem:[%s5806_s10 + $0x1b38] sm:$0xff] }
  0xa0   : > { %802 = vst [vmem:[%s5814_s11 + $0x8f8] sm:$0xff] %v801_v31  ;;  %804 = vst [vmem:[%s5814_s11 + $0x900] sm:$0xff] %v803_v32  ;;  %v811_v36 = vld [vmem:[%s5806_s10 + $0x1b60] sm:$0xff]  ;;  %v813_v37 = vld [vmem:[%s5806_s10 + $0x1b68] sm:$0xff] }
  0xa1   : > { %806 = vst [vmem:[%s5814_s11 + $0x908] sm:$0xff] %v805_v33  ;;  %808 = vst [vmem:[%s5814_s11 + $0x910] sm:$0xff] %v807_v34  ;;  %v815_v38 = vld [vmem:[%s5806_s10 + $0x1b90] sm:$0xff]  ;;  %v817_v39 = vld [vmem:[%s5806_s10 + $0x1b98] sm:$0xff] }
  0xa2   : > { %810 = vst [vmem:[%s5814_s11 + $0x918] sm:$0xff] %v809_v35  ;;  %812 = vst [vmem:[%s5814_s11 + $0x920] sm:$0xff] %v811_v36  ;;  %v819_v40 = vld [vmem:[%s5806_s10 + $0x1bc0] sm:$0xff]  ;;  %v821_v41 = vld [vmem:[%s5806_s10 + $0x1bc8] sm:$0xff] }
  0xa3   : > { %814 = vst [vmem:[%s5814_s11 + $0x928] sm:$0xff] %v813_v37  ;;  %816 = vst [vmem:[%s5814_s11 + $0x930] sm:$0xff] %v815_v38  ;;  %v823_v42 = vld [vmem:[%s5806_s10 + $0x1bf0] sm:$0xff]  ;;  %v825_v43 = vld [vmem:[%s5806_s10 + $0x1bf8] sm:$0xff] }
  0xa4   : > { %818 = vst [vmem:[%s5814_s11 + $0x938] sm:$0xff] %v817_v39  ;;  %820 = vst [vmem:[%s5814_s11 + $0x940] sm:$0xff] %v819_v40  ;;  %v827_v44 = vld [vmem:[%s5806_s10 + $0x1c20] sm:$0xff]  ;;  %v829_v45 = vld [vmem:[%s5806_s10 + $0x1c28] sm:$0xff] }
  0xa5   : > { %822 = vst [vmem:[%s5814_s11 + $0x948] sm:$0xff] %v821_v41  ;;  %824 = vst [vmem:[%s5814_s11 + $0x950] sm:$0xff] %v823_v42  ;;  %v831_v46 = vld [vmem:[%s5806_s10 + $0x1c50] sm:$0xff]  ;;  %v833_v47 = vld [vmem:[%s5806_s10 + $0x1c58] sm:$0xff] }
  0xa6   : > { %826 = vst [vmem:[%s5814_s11 + $0x958] sm:$0xff] %v825_v43  ;;  %828 = vst [vmem:[%s5814_s11 + $0x960] sm:$0xff] %v827_v44  ;;  %v835_v48 = vld [vmem:[%s5806_s10 + $0x1c80] sm:$0xff]  ;;  %v837_v49 = vld [vmem:[%s5806_s10 + $0x1c88] sm:$0xff] }
  0xa7   : > { %830 = vst [vmem:[%s5814_s11 + $0x968] sm:$0xff] %v829_v45  ;;  %832 = vst [vmem:[%s5814_s11 + $0x970] sm:$0xff] %v831_v46  ;;  %v839_v50 = vld [vmem:[%s5806_s10 + $0x1cb0] sm:$0xff]  ;;  %v841_v51 = vld [vmem:[%s5806_s10 + $0x1cb8] sm:$0xff] }
  0xa8   : > { %834 = vst [vmem:[%s5814_s11 + $0x978] sm:$0xff] %v833_v47  ;;  %836 = vst [vmem:[%s5814_s11 + $0x980] sm:$0xff] %v835_v48  ;;  %v843_v52 = vld [vmem:[%s5806_s10 + $0x1ce0] sm:$0xff]  ;;  %v845_v53 = vld [vmem:[%s5806_s10 + $0x1ce8] sm:$0xff] }
  0xa9   : > { %838 = vst [vmem:[%s5814_s11 + $0x988] sm:$0xff] %v837_v49  ;;  %840 = vst [vmem:[%s5814_s11 + $0x990] sm:$0xff] %v839_v50  ;;  %v847_v54 = vld [vmem:[%s5806_s10 + $0x1d10] sm:$0xff]  ;;  %v849_v55 = vld [vmem:[%s5806_s10 + $0x1d18] sm:$0xff] }
  0xaa   : > { %842 = vst [vmem:[%s5814_s11 + $0x998] sm:$0xff] %v841_v51  ;;  %844 = vst [vmem:[%s5814_s11 + $0x9a0] sm:$0xff] %v843_v52  ;;  %v851_v56 = vld [vmem:[%s5806_s10 + $0x1d40] sm:$0xff]  ;;  %v853_v57 = vld [vmem:[%s5806_s10 + $0x1d48] sm:$0xff] }
  0xab   : > { %846 = vst [vmem:[%s5814_s11 + $0x9a8] sm:$0xff] %v845_v53  ;;  %848 = vst [vmem:[%s5814_s11 + $0x9b0] sm:$0xff] %v847_v54  ;;  %v855_v58 = vld [vmem:[%s5806_s10 + $0x1d70] sm:$0xff]  ;;  %v857_v59 = vld [vmem:[%s5806_s10 + $0x1d78] sm:$0xff] }
  0xac   : > { %850 = vst [vmem:[%s5814_s11 + $0x9b8] sm:$0xff] %v849_v55  ;;  %852 = vst [vmem:[%s5814_s11 + $0x9c0] sm:$0xff] %v851_v56  ;;  %v859_v60 = vld [vmem:[%s5806_s10 + $0x1da0] sm:$0xff]  ;;  %v861_v61 = vld [vmem:[%s5806_s10 + $0x1da8] sm:$0xff] }
  0xad   : > { %854 = vst [vmem:[%s5814_s11 + $0x9c8] sm:$0xff] %v853_v57  ;;  %856 = vst [vmem:[%s5814_s11 + $0x9d0] sm:$0xff] %v855_v58  ;;  %v863_v62 = vld [vmem:[%s5806_s10 + $0x1dd0] sm:$0xff]  ;;  %v865_v63 = vld [vmem:[%s5806_s10 + $0x1dd8] sm:$0xff] }
  0xae   : > { %858 = vst [vmem:[%s5814_s11 + $0x9d8] sm:$0xff] %v857_v59  ;;  %860 = vst [vmem:[%s5814_s11 + $0x9e0] sm:$0xff] %v859_v60  ;;  %v867_v0 = vld [vmem:[%s5806_s10 + $0x1e00] sm:$0xff]  ;;  %v869_v1 = vld [vmem:[%s5806_s10 + $0x1e08] sm:$0xff] }
  0xaf   : > { %862 = vst [vmem:[%s5814_s11 + $0x9e8] sm:$0xff] %v861_v61  ;;  %864 = vst [vmem:[%s5814_s11 + $0x9f0] sm:$0xff] %v863_v62  ;;  %v871_v2 = vld [vmem:[%s5806_s10 + $0x1e30] sm:$0xff]  ;;  %v873_v3 = vld [vmem:[%s5806_s10 + $0x1e38] sm:$0xff] }
  0xb0   : > { %866 = vst [vmem:[%s5814_s11 + $0x9f8] sm:$0xff] %v865_v63  ;;  %868 = vst [vmem:[%s5814_s11 + $0xa00] sm:$0xff] %v867_v0  ;;  %v875_v4 = vld [vmem:[%s5806_s10 + $0x1e60] sm:$0xff]  ;;  %v877_v5 = vld [vmem:[%s5806_s10 + $0x1e68] sm:$0xff] }
  0xb1   : > { %870 = vst [vmem:[%s5814_s11 + $0xa08] sm:$0xff] %v869_v1  ;;  %872 = vst [vmem:[%s5814_s11 + $0xa10] sm:$0xff] %v871_v2  ;;  %v879_v6 = vld [vmem:[%s5806_s10 + $0x1e90] sm:$0xff]  ;;  %v881_v7 = vld [vmem:[%s5806_s10 + $0x1e98] sm:$0xff] }
  0xb2   : > { %874 = vst [vmem:[%s5814_s11 + $0xa18] sm:$0xff] %v873_v3  ;;  %876 = vst [vmem:[%s5814_s11 + $0xa20] sm:$0xff] %v875_v4  ;;  %v883_v8 = vld [vmem:[%s5806_s10 + $0x1ec0] sm:$0xff]  ;;  %v885_v9 = vld [vmem:[%s5806_s10 + $0x1ec8] sm:$0xff] }
  0xb3   : > { %878 = vst [vmem:[%s5814_s11 + $0xa28] sm:$0xff] %v877_v5  ;;  %880 = vst [vmem:[%s5814_s11 + $0xa30] sm:$0xff] %v879_v6  ;;  %v887_v10 = vld [vmem:[%s5806_s10 + $0x1ef0] sm:$0xff]  ;;  %v889_v11 = vld [vmem:[%s5806_s10 + $0x1ef8] sm:$0xff] }
  0xb4   : > { %882 = vst [vmem:[%s5814_s11 + $0xa38] sm:$0xff] %v881_v7  ;;  %884 = vst [vmem:[%s5814_s11 + $0xa40] sm:$0xff] %v883_v8  ;;  %v891_v12 = vld [vmem:[%s5806_s10 + $0x1f20] sm:$0xff]  ;;  %v893_v13 = vld [vmem:[%s5806_s10 + $0x1f28] sm:$0xff] }
  0xb5   : > { %886 = vst [vmem:[%s5814_s11 + $0xa48] sm:$0xff] %v885_v9  ;;  %888 = vst [vmem:[%s5814_s11 + $0xa50] sm:$0xff] %v887_v10  ;;  %v895_v14 = vld [vmem:[%s5806_s10 + $0x1f50] sm:$0xff]  ;;  %v897_v15 = vld [vmem:[%s5806_s10 + $0x1f58] sm:$0xff] }
  0xb6   : > { %890 = vst [vmem:[%s5814_s11 + $0xa58] sm:$0xff] %v889_v11  ;;  %892 = vst [vmem:[%s5814_s11 + $0xa60] sm:$0xff] %v891_v12  ;;  %v899_v16 = vld [vmem:[%s5806_s10 + $0x1f80] sm:$0xff]  ;;  %v901_v17 = vld [vmem:[%s5806_s10 + $0x1f88] sm:$0xff] }
  0xb7   : > { %894 = vst [vmem:[%s5814_s11 + $0xa68] sm:$0xff] %v893_v13  ;;  %896 = vst [vmem:[%s5814_s11 + $0xa70] sm:$0xff] %v895_v14  ;;  %v903_v18 = vld [vmem:[%s5806_s10 + $0x1fb0] sm:$0xff]  ;;  %v905_v19 = vld [vmem:[%s5806_s10 + $0x1fb8] sm:$0xff] }
  0xb8   : > { %898 = vst [vmem:[%s5814_s11 + $0xa78] sm:$0xff] %v897_v15  ;;  %900 = vst [vmem:[%s5814_s11 + $0xa80] sm:$0xff] %v899_v16  ;;  %v907_v20 = vld [vmem:[%s5806_s10 + $0x1fe0] sm:$0xff]  ;;  %v909_v21 = vld [vmem:[%s5806_s10 + $0x1fe8] sm:$0xff] }
  0xb9   : > { %902 = vst [vmem:[%s5814_s11 + $0xa88] sm:$0xff] %v901_v17  ;;  %904 = vst [vmem:[%s5814_s11 + $0xa90] sm:$0xff] %v903_v18  ;;  %v911_v22 = vld [vmem:[%s5806_s10 + $0x2010] sm:$0xff]  ;;  %v913_v23 = vld [vmem:[%s5806_s10 + $0x2018] sm:$0xff] }
  0xba   : > { %906 = vst [vmem:[%s5814_s11 + $0xa98] sm:$0xff] %v905_v19  ;;  %908 = vst [vmem:[%s5814_s11 + $0xaa0] sm:$0xff] %v907_v20  ;;  %v915_v24 = vld [vmem:[%s5806_s10 + $0x2040] sm:$0xff]  ;;  %v917_v25 = vld [vmem:[%s5806_s10 + $0x2048] sm:$0xff] }
  0xbb   : > { %910 = vst [vmem:[%s5814_s11 + $0xaa8] sm:$0xff] %v909_v21  ;;  %912 = vst [vmem:[%s5814_s11 + $0xab0] sm:$0xff] %v911_v22  ;;  %v919_v26 = vld [vmem:[%s5806_s10 + $0x2070] sm:$0xff]  ;;  %v921_v27 = vld [vmem:[%s5806_s10 + $0x2078] sm:$0xff] }
  0xbc   : > { %914 = vst [vmem:[%s5814_s11 + $0xab8] sm:$0xff] %v913_v23  ;;  %916 = vst [vmem:[%s5814_s11 + $0xac0] sm:$0xff] %v915_v24  ;;  %v923_v28 = vld [vmem:[%s5806_s10 + $0x20a0] sm:$0xff]  ;;  %v925_v29 = vld [vmem:[%s5806_s10 + $0x20a8] sm:$0xff] }
  0xbd   : > { %918 = vst [vmem:[%s5814_s11 + $0xac8] sm:$0xff] %v917_v25  ;;  %920 = vst [vmem:[%s5814_s11 + $0xad0] sm:$0xff] %v919_v26  ;;  %v927_v30 = vld [vmem:[%s5806_s10 + $0x20d0] sm:$0xff]  ;;  %v929_v31 = vld [vmem:[%s5806_s10 + $0x20d8] sm:$0xff] }
  0xbe   : > { %922 = vst [vmem:[%s5814_s11 + $0xad8] sm:$0xff] %v921_v27  ;;  %924 = vst [vmem:[%s5814_s11 + $0xae0] sm:$0xff] %v923_v28  ;;  %v931_v32 = vld [vmem:[%s5806_s10 + $0x2100] sm:$0xff]  ;;  %v933_v33 = vld [vmem:[%s5806_s10 + $0x2108] sm:$0xff] }
  0xbf   : > { %926 = vst [vmem:[%s5814_s11 + $0xae8] sm:$0xff] %v925_v29  ;;  %928 = vst [vmem:[%s5814_s11 + $0xaf0] sm:$0xff] %v927_v30  ;;  %v935_v34 = vld [vmem:[%s5806_s10 + $0x2130] sm:$0xff]  ;;  %v937_v35 = vld [vmem:[%s5806_s10 + $0x2138] sm:$0xff] }
  0xc0   : > { %930 = vst [vmem:[%s5814_s11 + $0xaf8] sm:$0xff] %v929_v31  ;;  %932 = vst [vmem:[%s5814_s11 + $0xb00] sm:$0xff] %v931_v32  ;;  %v939_v36 = vld [vmem:[%s5806_s10 + $0x2160] sm:$0xff]  ;;  %v941_v37 = vld [vmem:[%s5806_s10 + $0x2168] sm:$0xff] }
  0xc1   : > { %934 = vst [vmem:[%s5814_s11 + $0xb08] sm:$0xff] %v933_v33  ;;  %936 = vst [vmem:[%s5814_s11 + $0xb10] sm:$0xff] %v935_v34  ;;  %v943_v38 = vld [vmem:[%s5806_s10 + $0x2190] sm:$0xff]  ;;  %v945_v39 = vld [vmem:[%s5806_s10 + $0x2198] sm:$0xff] }
  0xc2   : > { %938 = vst [vmem:[%s5814_s11 + $0xb18] sm:$0xff] %v937_v35  ;;  %940 = vst [vmem:[%s5814_s11 + $0xb20] sm:$0xff] %v939_v36  ;;  %v947_v40 = vld [vmem:[%s5806_s10 + $0x21c0] sm:$0xff]  ;;  %v949_v41 = vld [vmem:[%s5806_s10 + $0x21c8] sm:$0xff] }
  0xc3   : > { %942 = vst [vmem:[%s5814_s11 + $0xb28] sm:$0xff] %v941_v37  ;;  %944 = vst [vmem:[%s5814_s11 + $0xb30] sm:$0xff] %v943_v38  ;;  %v951_v42 = vld [vmem:[%s5806_s10 + $0x21f0] sm:$0xff]  ;;  %v953_v43 = vld [vmem:[%s5806_s10 + $0x21f8] sm:$0xff] }
  0xc4   : > { %946 = vst [vmem:[%s5814_s11 + $0xb38] sm:$0xff] %v945_v39  ;;  %948 = vst [vmem:[%s5814_s11 + $0xb40] sm:$0xff] %v947_v40  ;;  %v955_v44 = vld [vmem:[%s5806_s10 + $0x2220] sm:$0xff]  ;;  %v957_v45 = vld [vmem:[%s5806_s10 + $0x2228] sm:$0xff] }
  0xc5   : > { %950 = vst [vmem:[%s5814_s11 + $0xb48] sm:$0xff] %v949_v41  ;;  %952 = vst [vmem:[%s5814_s11 + $0xb50] sm:$0xff] %v951_v42  ;;  %v959_v46 = vld [vmem:[%s5806_s10 + $0x2250] sm:$0xff]  ;;  %v961_v47 = vld [vmem:[%s5806_s10 + $0x2258] sm:$0xff] }
  0xc6   : > { %954 = vst [vmem:[%s5814_s11 + $0xb58] sm:$0xff] %v953_v43  ;;  %956 = vst [vmem:[%s5814_s11 + $0xb60] sm:$0xff] %v955_v44  ;;  %v963_v48 = vld [vmem:[%s5806_s10 + $0x2280] sm:$0xff]  ;;  %v965_v49 = vld [vmem:[%s5806_s10 + $0x2288] sm:$0xff] }
  0xc7   : > { %958 = vst [vmem:[%s5814_s11 + $0xb68] sm:$0xff] %v957_v45  ;;  %960 = vst [vmem:[%s5814_s11 + $0xb70] sm:$0xff] %v959_v46  ;;  %v967_v50 = vld [vmem:[%s5806_s10 + $0x22b0] sm:$0xff]  ;;  %v969_v51 = vld [vmem:[%s5806_s10 + $0x22b8] sm:$0xff] }
  0xc8   : > { %962 = vst [vmem:[%s5814_s11 + $0xb78] sm:$0xff] %v961_v47  ;;  %964 = vst [vmem:[%s5814_s11 + $0xb80] sm:$0xff] %v963_v48  ;;  %v971_v52 = vld [vmem:[%s5806_s10 + $0x22e0] sm:$0xff]  ;;  %v973_v53 = vld [vmem:[%s5806_s10 + $0x22e8] sm:$0xff] }
  0xc9   : > { %966 = vst [vmem:[%s5814_s11 + $0xb88] sm:$0xff] %v965_v49  ;;  %968 = vst [vmem:[%s5814_s11 + $0xb90] sm:$0xff] %v967_v50  ;;  %v975_v54 = vld [vmem:[%s5806_s10 + $0x2310] sm:$0xff]  ;;  %v977_v55 = vld [vmem:[%s5806_s10 + $0x2318] sm:$0xff] }
  0xca   : > { %970 = vst [vmem:[%s5814_s11 + $0xb98] sm:$0xff] %v969_v51  ;;  %972 = vst [vmem:[%s5814_s11 + $0xba0] sm:$0xff] %v971_v52  ;;  %v979_v56 = vld [vmem:[%s5806_s10 + $0x2340] sm:$0xff]  ;;  %v981_v57 = vld [vmem:[%s5806_s10 + $0x2348] sm:$0xff] }
  0xcb   : > { %974 = vst [vmem:[%s5814_s11 + $0xba8] sm:$0xff] %v973_v53  ;;  %976 = vst [vmem:[%s5814_s11 + $0xbb0] sm:$0xff] %v975_v54  ;;  %v983_v58 = vld [vmem:[%s5806_s10 + $0x2370] sm:$0xff]  ;;  %v985_v59 = vld [vmem:[%s5806_s10 + $0x2378] sm:$0xff] }
  0xcc   : > { %978 = vst [vmem:[%s5814_s11 + $0xbb8] sm:$0xff] %v977_v55  ;;  %980 = vst [vmem:[%s5814_s11 + $0xbc0] sm:$0xff] %v979_v56  ;;  %v987_v60 = vld [vmem:[%s5806_s10 + $0x23a0] sm:$0xff]  ;;  %v989_v61 = vld [vmem:[%s5806_s10 + $0x23a8] sm:$0xff] }
  0xcd   : > { %982 = vst [vmem:[%s5814_s11 + $0xbc8] sm:$0xff] %v981_v57  ;;  %984 = vst [vmem:[%s5814_s11 + $0xbd0] sm:$0xff] %v983_v58  ;;  %v991_v62 = vld [vmem:[%s5806_s10 + $0x23d0] sm:$0xff]  ;;  %v993_v63 = vld [vmem:[%s5806_s10 + $0x23d8] sm:$0xff] }
  0xce   : > { %986 = vst [vmem:[%s5814_s11 + $0xbd8] sm:$0xff] %v985_v59  ;;  %988 = vst [vmem:[%s5814_s11 + $0xbe0] sm:$0xff] %v987_v60 }
  0xcf   : > { %990 = vst [vmem:[%s5814_s11 + $0xbe8] sm:$0xff] %v989_v61  ;;  %992 = vst [vmem:[%s5814_s11 + $0xbf0] sm:$0xff] %v991_v62 }
  0xd0   : > { %994 = vst [vmem:[%s5814_s11 + $0xbf8] sm:$0xff] %v993_v63 }
  0xd1 PF: > { %p4530_p5 = scmp.ge.s32.totalorder %s5731_s23, 1  ;;  %p1024_p6 = scmp.lt.s32.totalorder %s5731_s23, 4 }
  0xd3   : > { %p1025_p7 = pnand %p4530_p5, %p1024_p6 }
  0xd4   : > { %s1031_s12 = sand.u32 (!%p1025_p7), 1, %s5723_s21   ;;  %s4531_s13 = sshll.u32 (!%p1025_p7), %s5786_s24, 2 }
  0xd5   : > { %1028 = sbr.rel (%p1025_p7) target bundleno = 1157 (0x485), region = 63  ;;  %p1070_p8 = scmp.lt.s32.totalorder (!%p1025_p7), %s4531_s13, 11 }
  0xd6   : > { %s5016_s14 = smul.u32 (!%p1025_p7), 3072, %s1031_s12  ;;  %s4533_s15 = sshll.u32 (!%p1025_p7), %s5786_s24, 6 }
  0xd7   : > { %p1080_p9 = scmp.lt.s32.totalorder (!%p1025_p7), %s4533_s15, 191  ;;  %p4535_p10 = scmp.ne.s32.totalorder (!%p1025_p7), %s5786_s24, 0 }
  0xd8   : > { %s6598_s30 = scalar_lea.vmem (!%p1025_p7), [#allocation3], %s5016_s14 }
  0xda   : > { %s7187_s13 = smov (!%p1070_p8, %s4531_s13), 11  ;;  %s7189_s15 = smov (!%p1080_p9, %s4533_s15), 191 }
  0xdb   : > { %s1072_s18 = scalar_lea.vmem %s7178_s2, %s7187_s13  ;;  %s1077_s23 = scalar_lea.vmem %s7179_s3, %s7187_s13 }
  0xdc   : > { %s4534_s26 = sshll.u32 %s7189_s15, 2  ;;  %1089 = sbr.rel (%p4535_p10) target bundleno = 227 (0xe3), region = 71 }
  0xdd   : > { %s6596_s29 = scalar_lea.vmem %s7180_s4, %s4534_s26 }
  0xe1   : > { %v5733_v0 = vmov 0.0  }
  0xe2   : > { %1090 = vst [vmem:[#allocation2] sm:$0xff] %v5733_v0 }
  0xe3 PF: > { %v5049_v1 = vld [vmem:[%s6598_s30 + $0xe4] ss:$16 sps:$4 sm:$0xff]   ;;  %v5053_v3 = vld [vmem:[%s6598_s30 + $0xe0] ss:$16 sps:$4 sm:$0xff]   ;;  %v1091_v47 = vld [vmem:[%s7176_s0] sm:$0xff]  ;;  %p4964_p11 = scmp.ne.s32.totalorder %s5786_s24, 2 }
  0xe4   : > { %v5051_v2 = vld [vmem:[%s6598_s30 + $0x2e4] ss:$16 sps:$4 sm:$0xff]   ;;  %3443 = vmatprep.subr.bf16.mxu0 %v5049_v1  ;;  %v5054_v4 = vld [vmem:[%s6598_s30 + $0x2e0] ss:$16 sps:$4 sm:$0xff]   ;;  %v6650_v48 = vcombine.high %v1091_v47, %v1091_v47 }
  0xe5   : > { %3484 = vmatprep.subr.bf16.mxu1 %v5051_v2  ;;  %v5055_v5 = vld [vmem:[%s6598_s30 + $0xc4] ss:$16 sps:$4 sm:$0xff]   ;;  %3444 = vmatpush1.bf16.msra.mxu0 %v5053_v3  ;;  %v5059_v7 = vld [vmem:[%s6598_s30 + $0xc0] ss:$16 sps:$4 sm:$0xff]  }
  0xe6   : > { %3485 = vmatpush1.bf16.msra.mxu1 %v5054_v4  ;;  %v5057_v6 = vld [vmem:[%s6598_s30 + $0x2c4] ss:$16 sps:$4 sm:$0xff]   ;;  %3445 = vmatprep.subr.bf16.mxu0 %v5055_v5  ;;  %v5060_v8 = vld [vmem:[%s6598_s30 + $0x2c0] ss:$16 sps:$4 sm:$0xff]  }
  0xe7   : > { %3486 = vmatprep.subr.bf16.mxu1 %v5057_v6  ;;  %v5061_v9 = vld [vmem:[%s6598_s30 + $0xa4] ss:$16 sps:$4 sm:$0xff]   ;;  %v5065_v11 = vld [vmem:[%s6598_s30 + $0xa0] ss:$16 sps:$4 sm:$0xff]   ;;  %3475 = vmatprep.mubr.bf16.mxu0 %v6650_v48 }
  0xe8   : > { %v5063_v10 = vld [vmem:[%s6598_s30 + $0x2a4] ss:$16 sps:$4 sm:$0xff]   ;;  %v5066_v12 = vld [vmem:[%s6598_s30 + $0x2a0] ss:$16 sps:$4 sm:$0xff]  }
  0xe9   : > { %3446 = vmatpush1.bf16.msra.mxu0 %v5059_v7  ;;  %v5067_v13 = vld [vmem:[%s6598_s30 + $0x84] ss:$16 sps:$4 sm:$0xff]   ;;  %v5071_v15 = vld [vmem:[%s6598_s30 + $0x80] ss:$16 sps:$4 sm:$0xff]   ;;  %v6679_v7 = vcombine.low %v1091_v47, %v1091_v47 }
  0xea   : > { %3487 = vmatpush1.bf16.msra.mxu1 %v5060_v8  ;;  %3447 = vmatprep.subr.bf16.mxu0 %v5061_v9  ;;  %v5069_v14 = vld [vmem:[%s6598_s30 + $0x284] ss:$16 sps:$4 sm:$0xff]   ;;  %v5072_v16 = vld [vmem:[%s6598_s30 + $0x280] ss:$16 sps:$4 sm:$0xff]  }
  0xeb   : > { %3488 = vmatprep.subr.bf16.mxu1 %v5063_v10  ;;  %v5073_v17 = vld [vmem:[%s6598_s30 + $0x64] ss:$16 sps:$4 sm:$0xff]   ;;  %v5077_v19 = vld [vmem:[%s6598_s30 + $0x60] ss:$16 sps:$4 sm:$0xff]  }
  0xec   : > { %v5075_v18 = vld [vmem:[%s6598_s30 + $0x264] ss:$16 sps:$4 sm:$0xff]   ;;  %v5078_v20 = vld [vmem:[%s6598_s30 + $0x260] ss:$16 sps:$4 sm:$0xff]  }
  0xed   : > { %3448 = vmatpush1.bf16.msra.mxu0 %v5065_v11  ;;  %v5079_v21 = vld [vmem:[%s6598_s30 + $0x44] ss:$16 sps:$4 sm:$0xff]   ;;  %v5083_v23 = vld [vmem:[%s6598_s30 + $0x40] ss:$16 sps:$4 sm:$0xff]  }
  0xee   : > { %3489 = vmatpush1.bf16.msra.mxu1 %v5066_v12  ;;  %3449 = vmatprep.subr.bf16.mxu0 %v5067_v13  ;;  %v5081_v22 = vld [vmem:[%s6598_s30 + $0x244] ss:$16 sps:$4 sm:$0xff]   ;;  %v5084_v24 = vld [vmem:[%s6598_s30 + $0x240] ss:$16 sps:$4 sm:$0xff]  }
  0xef   : > { %3490 = vmatprep.subr.bf16.mxu1 %v5069_v14  ;;  %v5085_v25 = vld [vmem:[%s6598_s30 + $0x24] ss:$16 sps:$4 sm:$0xff]   ;;  %v5089_v27 = vld [vmem:[%s6598_s30 + $0x20] ss:$16 sps:$4 sm:$0xff]  }
  0xf0   : > { %v5087_v26 = vld [vmem:[%s6598_s30 + $0x224] ss:$16 sps:$4 sm:$0xff]   ;;  %v5090_v28 = vld [vmem:[%s6598_s30 + $0x220] ss:$16 sps:$4 sm:$0xff]  }
  0xf1   : > { %3450 = vmatpush1.bf16.msra.mxu0 %v5071_v15  ;;  %v5091_v29 = vld [vmem:[%s6598_s30 + $0x4] ss:$16 sps:$4 sm:$0xff]   ;;  %v5095_v31 = vld [vmem:[%s6598_s30] ss:$16 sps:$4 sm:$0xff]  }
  0xf2   : > { %3491 = vmatpush1.bf16.msra.mxu1 %v5072_v16  ;;  %3451 = vmatprep.subr.bf16.mxu0 %v5073_v17  ;;  %v5093_v30 = vld [vmem:[%s6598_s30 + $0x204] ss:$16 sps:$4 sm:$0xff]   ;;  %v5096_v32 = vld [vmem:[%s6598_s30 + $0x200] ss:$16 sps:$4 sm:$0xff]  }
  0xf3   : > { %3492 = vmatprep.subr.bf16.mxu1 %v5075_v18  ;;  %v5097_v33 = vld [vmem:[%s6598_s30 + $0x1e4] ss:$16 sps:$4 sm:$0xff]   ;;  %v5101_v35 = vld [vmem:[%s6598_s30 + $0x1e0] ss:$16 sps:$4 sm:$0xff]  }
  0xf4   : > { %v5099_v34 = vld [vmem:[%s6598_s30 + $0x3e4] ss:$16 sps:$4 sm:$0xff]   ;;  %v5102_v36 = vld [vmem:[%s6598_s30 + $0x3e0] ss:$16 sps:$4 sm:$0xff]  }
  0xf5   : > { %3452 = vmatpush1.bf16.msra.mxu0 %v5077_v19  ;;  %v5103_v37 = vld [vmem:[%s6598_s30 + $0x1c4] ss:$16 sps:$4 sm:$0xff]   ;;  %v5107_v39 = vld [vmem:[%s6598_s30 + $0x1c0] ss:$16 sps:$4 sm:$0xff]  }
  0xf6   : > { %3493 = vmatpush1.bf16.msra.mxu1 %v5078_v20  ;;  %3453 = vmatprep.subr.bf16.mxu0 %v5079_v21  ;;  %v5105_v38 = vld [vmem:[%s6598_s30 + $0x3c4] ss:$16 sps:$4 sm:$0xff]   ;;  %v5108_v40 = vld [vmem:[%s6598_s30 + $0x3c0] ss:$16 sps:$4 sm:$0xff]  }
  0xf7   : > { %3494 = vmatprep.subr.bf16.mxu1 %v5081_v22  ;;  %v5109_v41 = vld [vmem:[%s6598_s30 + $0x1a4] ss:$16 sps:$4 sm:$0xff]   ;;  %v5113_v43 = vld [vmem:[%s6598_s30 + $0x1a0] ss:$16 sps:$4 sm:$0xff]  }
  0xf8   : > { %v5111_v42 = vld [vmem:[%s6598_s30 + $0x3a4] ss:$16 sps:$4 sm:$0xff]   ;;  %v5114_v44 = vld [vmem:[%s6598_s30 + $0x3a0] ss:$16 sps:$4 sm:$0xff]  }
  0xf9   : > { %3454 = vmatpush1.bf16.msra.mxu0 %v5083_v23  ;;  %v5115_v45 = vld [vmem:[%s6598_s30 + $0x184] ss:$16 sps:$4 sm:$0xff]   ;;  %v5119_v50 = vld [vmem:[%s6598_s30 + $0x180] ss:$16 sps:$4 sm:$0xff]  }
  0xfa   : > { %3495 = vmatpush1.bf16.msra.mxu1 %v5084_v24  ;;  %3455 = vmatprep.subr.bf16.mxu0 %v5085_v25  ;;  %v5117_v46 = vld [vmem:[%s6598_s30 + $0x384] ss:$16 sps:$4 sm:$0xff]   ;;  %v5120_v51 = vld [vmem:[%s6598_s30 + $0x380] ss:$16 sps:$4 sm:$0xff]  }
  0xfb   : > { %3496 = vmatprep.subr.bf16.mxu1 %v5087_v26  ;;  %v1092_v49 = vld [vmem:[%s7176_s0 + $0x8] sm:$0xff] }
  0xfc   : > { %v6657_v52 = vcombine.high %v1092_v49, %v1092_v49  ;;  %v5121_v53 = vld [vmem:[%s6598_s30 + $0x164] ss:$16 sps:$4 sm:$0xff]   ;;  %v5125_v55 = vld [vmem:[%s6598_s30 + $0x160] ss:$16 sps:$4 sm:$0xff]   ;;  %v6681_v8 = vcombine.low %v1092_v49, %v1092_v49 }
  0xfd   : > { %3456 = vmatpush1.bf16.msra.mxu0 %v5089_v27  ;;  %v5123_v54 = vld [vmem:[%s6598_s30 + $0x364] ss:$16 sps:$4 sm:$0xff]   ;;  %v5126_v56 = vld [vmem:[%s6598_s30 + $0x360] ss:$16 sps:$4 sm:$0xff]  }
  0xfe   : > { %3497 = vmatpush1.bf16.msra.mxu1 %v5090_v28  ;;  %3457 = vmatprep.subr.bf16.mxu0 %v5091_v29  ;;  %v5127_v57 = vld [vmem:[%s6598_s30 + $0x144] ss:$16 sps:$4 sm:$0xff]   ;;  %v5131_v59 = vld [vmem:[%s6598_s30 + $0x140] ss:$16 sps:$4 sm:$0xff]  }
  0xff   : > { %3498 = vmatprep.subr.bf16.mxu1 %v5093_v30  ;;  %3516 = vmatprep.mubr.bf16.mxu1 %v6657_v52  ;;  %v5129_v58 = vld [vmem:[%s6598_s30 + $0x344] ss:$16 sps:$4 sm:$0xff]   ;;  %v5132_v60 = vld [vmem:[%s6598_s30 + $0x340] ss:$16 sps:$4 sm:$0xff]  }
 0x100   : > { %v5133_v61 = vld [vmem:[%s6598_s30 + $0x124] ss:$16 sps:$4 sm:$0xff]   ;;  %v5137_v63 = vld [vmem:[%s6598_s30 + $0x120] ss:$16 sps:$4 sm:$0xff]  }
 0x101   : > { %3458 = vmatpush1.bf16.msra.mxu0 %v5095_v31  ;;  %v5135_v62 = vld [vmem:[%s6598_s30 + $0x324] ss:$16 sps:$4 sm:$0xff]   ;;  %v5138_v0 = vld [vmem:[%s6598_s30 + $0x320] ss:$16 sps:$4 sm:$0xff]  }
 0x102   : > { %3499 = vmatpush1.bf16.msra.mxu1 %v5096_v32  ;;  %3459 = vmatprep.subr.bf16.mxu0 %v5097_v33  ;;  %v5139_v1 = vld [vmem:[%s6598_s30 + $0x104] ss:$16 sps:$4 sm:$0xff]   ;;  %v5143_v3 = vld [vmem:[%s6598_s30 + $0x100] ss:$16 sps:$4 sm:$0xff]   ;;  %v6712_v33 = vld [vmem:[%s7176_s0 + $0x10] sm:$0xff] }
 0x103   : > { %3500 = vmatprep.subr.bf16.mxu1 %v5099_v34  ;;  %v5141_v2 = vld [vmem:[%s6598_s30 + $0x304] ss:$16 sps:$4 sm:$0xff]   ;;  %v5144_v4 = vld [vmem:[%s6598_s30 + $0x300] ss:$16 sps:$4 sm:$0xff]  }
 0x104   : > { %v5151_v5 = vld [vmem:[%s6598_s30 + $0x4e4] ss:$16 sps:$4 sm:$0xff]   ;;  %v5149_v9 = vld [vmem:[%s6598_s30 + $0x4e0] ss:$16 sps:$4 sm:$0xff]  }
 0x105   : > { %3460 = vmatpush2.bf16.msra.mxu0 %v5101_v35  ;;  %v5154_v6 = vld [vmem:[%s6598_s30 + $0x6e4] ss:$16 sps:$4 sm:$0xff]   ;;  %v5152_v10 = vld [vmem:[%s6598_s30 + $0x6e0] ss:$16 sps:$4 sm:$0xff]  }
 0x106   : > { %3501 = vmatpush2.bf16.msra.mxu1 %v5102_v36  ;;  %3461 = vmatprep.subr.bf16.mxu0 %v5103_v37  ;;  %v5157_v11 = vld [vmem:[%s6598_s30 + $0x4c4] ss:$16 sps:$4 sm:$0xff]   ;;  %v5155_v13 = vld [vmem:[%s6598_s30 + $0x4c0] ss:$16 sps:$4 sm:$0xff]   ;;  %v6723_v37 = vcombine.high %v6712_v33, %v6712_v33 }
 0x107   : > { %3502 = vmatprep.subr.bf16.mxu1 %v5105_v38  ;;  %v5160_v12 = vld [vmem:[%s6598_s30 + $0x6c4] ss:$16 sps:$4 sm:$0xff]   ;;  %v5158_v14 = vld [vmem:[%s6598_s30 + $0x6c0] ss:$16 sps:$4 sm:$0xff]  }
 0x108   : > { %v5163_v15 = vld [vmem:[%s6598_s30 + $0x4a4] ss:$16 sps:$4 sm:$0xff]   ;;  %v5161_v17 = vld [vmem:[%s6598_s30 + $0x4a0] ss:$16 sps:$4 sm:$0xff]  }
 0x109   : > { %3462 = vmatpush2.bf16.msra.mxu0 %v5107_v39  ;;  %v5166_v16 = vld [vmem:[%s6598_s30 + $0x6a4] ss:$16 sps:$4 sm:$0xff]   ;;  %v5164_v18 = vld [vmem:[%s6598_s30 + $0x6a0] ss:$16 sps:$4 sm:$0xff]  }
 0x10a   : > { %3503 = vmatpush2.bf16.msra.mxu1 %v5108_v40  ;;  %3463 = vmatprep.subr.bf16.mxu0 %v5109_v41  ;;  %v5169_v19 = vld [vmem:[%s6598_s30 + $0x484] ss:$16 sps:$4 sm:$0xff]   ;;  %v5167_v21 = vld [vmem:[%s6598_s30 + $0x480] ss:$16 sps:$4 sm:$0xff]  }
 0x10b   : > { %3504 = vmatprep.subr.bf16.mxu1 %v5111_v42  ;;  %v5172_v20 = vld [vmem:[%s6598_s30 + $0x684] ss:$16 sps:$4 sm:$0xff]   ;;  %v5170_v22 = vld [vmem:[%s6598_s30 + $0x680] ss:$16 sps:$4 sm:$0xff]  }
 0x10c   : > { %v5175_v23 = vld [vmem:[%s6598_s30 + $0x464] ss:$16 sps:$4 sm:$0xff]   ;;  %v5173_v25 = vld [vmem:[%s6598_s30 + $0x460] ss:$16 sps:$4 sm:$0xff]  }
 0x10d   : > { %3464 = vmatpush2.bf16.msra.mxu0 %v5113_v43  ;;  %v5178_v24 = vld [vmem:[%s6598_s30 + $0x664] ss:$16 sps:$4 sm:$0xff]   ;;  %v5176_v26 = vld [vmem:[%s6598_s30 + $0x660] ss:$16 sps:$4 sm:$0xff]  }
 0x10e   : > { %3505 = vmatpush2.bf16.msra.mxu1 %v5114_v44  ;;  %3465 = vmatprep.subr.bf16.mxu0 %v5115_v45  ;;  %v5181_v27 = vld [vmem:[%s6598_s30 + $0x444] ss:$16 sps:$4 sm:$0xff]   ;;  %v5179_v29 = vld [vmem:[%s6598_s30 + $0x440] ss:$16 sps:$4 sm:$0xff]  }
 0x10f   : > { %3506 = vmatprep.subr.bf16.mxu1 %v5117_v46  ;;  %v5184_v28 = vld [vmem:[%s6598_s30 + $0x644] ss:$16 sps:$4 sm:$0xff]   ;;  %v5182_v30 = vld [vmem:[%s6598_s30 + $0x640] ss:$16 sps:$4 sm:$0xff]  }
 0x110   : > { %v5187_v31 = vld [vmem:[%s6598_s30 + $0x424] ss:$16 sps:$4 sm:$0xff]   ;;  %v5185_v35 = vld [vmem:[%s6598_s30 + $0x420] ss:$16 sps:$4 sm:$0xff]  }
 0x111   : > { %3466 = vmatpush2.bf16.msra.mxu0 %v5119_v50  ;;  %v5190_v32 = vld [vmem:[%s6598_s30 + $0x624] ss:$16 sps:$4 sm:$0xff]   ;;  %v5188_v36 = vld [vmem:[%s6598_s30 + $0x620] ss:$16 sps:$4 sm:$0xff]  }
 0x112   : > { %3507 = vmatpush2.bf16.msra.mxu1 %v5120_v51  ;;  %3467 = vmatprep.subr.bf16.mxu0 %v5121_v53  ;;  %v6717_v34 = vld [vmem:[%s7176_s0 + $0x18] sm:$0xff] }
 0x113   : > { %3508 = vmatprep.subr.bf16.mxu1 %v5123_v54  ;;  %v6727_v38 = vcombine.high %v6717_v34, %v6717_v34  ;;  %v5193_v39 = vld [vmem:[%s6598_s30 + $0x404] ss:$16 sps:$4 sm:$0xff]   ;;  %v5191_v41 = vld [vmem:[%s6598_s30 + $0x400] ss:$16 sps:$4 sm:$0xff]  }
 0x114   : > { %v5196_v40 = vld [vmem:[%s6598_s30 + $0x604] ss:$16 sps:$4 sm:$0xff]   ;;  %v5194_v42 = vld [vmem:[%s6598_s30 + $0x600] ss:$16 sps:$4 sm:$0xff]  }
 0x115   : > { %3468 = vmatpush2.bf16.msra.mxu0 %v5125_v55  ;;  %v5199_v43 = vld [vmem:[%s6598_s30 + $0x5e4] ss:$16 sps:$4 sm:$0xff]   ;;  %v5197_v45 = vld [vmem:[%s6598_s30 + $0x5e0] ss:$16 sps:$4 sm:$0xff]  }
 0x116   : > { %3509 = vmatpush2.bf16.msra.mxu1 %v5126_v56  ;;  %3469 = vmatprep.subr.bf16.mxu0 %v5127_v57  ;;  %v5202_v44 = vld [vmem:[%s6598_s30 + $0x7e4] ss:$16 sps:$4 sm:$0xff]   ;;  %v5200_v46 = vld [vmem:[%s6598_s30 + $0x7e0] ss:$16 sps:$4 sm:$0xff]  }
 0x117   : > { %3510 = vmatprep.subr.bf16.mxu1 %v5129_v58  ;;  %v5205_v47 = vld [vmem:[%s6598_s30 + $0x5c4] ss:$16 sps:$4 sm:$0xff]   ;;  %v5203_v50 = vld [vmem:[%s6598_s30 + $0x5c0] ss:$16 sps:$4 sm:$0xff]  }
 0x118   : > { %v5208_v49 = vld [vmem:[%s6598_s30 + $0x7c4] ss:$16 sps:$4 sm:$0xff]   ;;  %v5206_v51 = vld [vmem:[%s6598_s30 + $0x7c0] ss:$16 sps:$4 sm:$0xff]  }
 0x119   : > { %3470 = vmatpush2.bf16.msra.mxu0 %v5131_v59  ;;  %v5211_v53 = vld [vmem:[%s6598_s30 + $0x5a4] ss:$16 sps:$4 sm:$0xff]   ;;  %v5209_v55 = vld [vmem:[%s6598_s30 + $0x5a0] ss:$16 sps:$4 sm:$0xff]  }
 0x11a   : > { %3511 = vmatpush2.bf16.msra.mxu1 %v5132_v60  ;;  %3471 = vmatprep.subr.bf16.mxu0 %v5133_v61  ;;  %v5214_v54 = vld [vmem:[%s6598_s30 + $0x7a4] ss:$16 sps:$4 sm:$0xff]   ;;  %v5212_v56 = vld [vmem:[%s6598_s30 + $0x7a0] ss:$16 sps:$4 sm:$0xff]  }
 0x11b   : > { %3512 = vmatprep.subr.bf16.mxu1 %v5135_v62  ;;  %v5217_v57 = vld [vmem:[%s6598_s30 + $0x584] ss:$16 sps:$4 sm:$0xff]   ;;  %v5215_v59 = vld [vmem:[%s6598_s30 + $0x580] ss:$16 sps:$4 sm:$0xff]  }
 0x11c   : > { %v5220_v58 = vld [vmem:[%s6598_s30 + $0x784] ss:$16 sps:$4 sm:$0xff]   ;;  %v5218_v60 = vld [vmem:[%s6598_s30 + $0x780] ss:$16 sps:$4 sm:$0xff]  }
 0x11d   : > { %3472 = vmatpush2.bf16.msra.mxu0 %v5137_v63  ;;  %v5223_v61 = vld [vmem:[%s6598_s30 + $0x564] ss:$16 sps:$4 sm:$0xff]   ;;  %v5221_v63 = vld [vmem:[%s6598_s30 + $0x560] ss:$16 sps:$4 sm:$0xff]  }
 0x11e   : > { %3513 = vmatpush2.bf16.msra.mxu1 %v5138_v0  ;;  %3473 = vmatprep.subr.bf16.mxu0 %v5139_v1  ;;  %v5226_v62 = vld [vmem:[%s6598_s30 + $0x764] ss:$16 sps:$4 sm:$0xff]   ;;  %v5224_v0 = vld [vmem:[%s6598_s30 + $0x760] ss:$16 sps:$4 sm:$0xff]  }
 0x11f   : > { %3514 = vmatprep.subr.bf16.mxu1 %v5141_v2  ;;  %v5229_v1 = vld [vmem:[%s6598_s30 + $0x544] ss:$16 sps:$4 sm:$0xff]  }
 0x120   : > { %v5232_v2 = vld [vmem:[%s6598_s30 + $0x744] ss:$16 sps:$4 sm:$0xff]  }
 0x121   : > { %3474 = vmatpush2.bf16.msra.mxu0 %v5143_v3  ;;  %v5227_v3 = vld [vmem:[%s6598_s30 + $0x540] ss:$16 sps:$4 sm:$0xff]  }
 0x122   : > { %3515 = vmatpush2.bf16.msra.mxu1 %v5144_v4  ;;  %3525 = vmatprep.subr.bf16.mxu0 %v5151_v5  ;;  %v5230_v4 = vld [vmem:[%s6598_s30 + $0x740] ss:$16 sps:$4 sm:$0xff]   ;;  %v5235_v5 = vld [vmem:[%s6598_s30 + $0x524] ss:$16 sps:$4 sm:$0xff]  }
 0x123   : > { %3566 = vmatprep.subr.bf16.mxu1 %v5154_v6  ;;  %v5238_v6 = vld [vmem:[%s6598_s30 + $0x724] ss:$16 sps:$4 sm:$0xff]  }
 0x124   : > { %3476 = vmatmul.mubr.bf16.vlgmr.msra.gmra.mxu0 %v6679_v7 }
 0x125   : > { %3517 = vmatmul.mubr.bf16.vlgmr.msra.gmra.mxu1 %v6681_v8  ;;  %3526 = vmatpush1.bf16.msra.mxu0 %v5149_v9  ;;  %v5233_v9 = vld [vmem:[%s6598_s30 + $0x520] ss:$16 sps:$4 sm:$0xff]  }
 0x126   : > { %3567 = vmatpush1.bf16.msra.mxu1 %v5152_v10  ;;  %3527 = vmatprep.subr.bf16.mxu0 %v5157_v11  ;;  %v5236_v10 = vld [vmem:[%s6598_s30 + $0x720] ss:$16 sps:$4 sm:$0xff]   ;;  %v5241_v11 = vld [vmem:[%s6598_s30 + $0x504] ss:$16 sps:$4 sm:$0xff]  }
 0x127   : > { %3568 = vmatprep.subr.bf16.mxu1 %v5160_v12  ;;  %3557 = vmatprep.mubr.bf16.mxu0 %v6723_v37  ;;  %v5244_v12 = vld [vmem:[%s6598_s30 + $0x704] ss:$16 sps:$4 sm:$0xff]  }
 0x128   : > { %3598 = vmatprep.mubr.bf16.mxu1 %v6727_v38 }
 0x129   : > { %3528 = vmatpush1.bf16.msra.mxu0 %v5155_v13  ;;  %v5239_v13 = vld [vmem:[%s6598_s30 + $0x500] ss:$16 sps:$4 sm:$0xff]  }
 0x12a   : > { %3569 = vmatpush1.bf16.msra.mxu1 %v5158_v14  ;;  %3529 = vmatprep.subr.bf16.mxu0 %v5163_v15  ;;  %v5242_v14 = vld [vmem:[%s6598_s30 + $0x700] ss:$16 sps:$4 sm:$0xff]   ;;  %v5251_v15 = vld [vmem:[%s6598_s30 + $0x8e4] ss:$16 sps:$4 sm:$0xff]  }
 0x12b   : > { %3570 = vmatprep.subr.bf16.mxu1 %v5166_v16  ;;  %v5254_v16 = vld [vmem:[%s6598_s30 + $0xae4] ss:$16 sps:$4 sm:$0xff]  }
 0x12d   : > { %3530 = vmatpush1.bf16.msra.mxu0 %v5161_v17  ;;  %v6771_v17 = vcombine.low %v6712_v33, %v6712_v33  ;;  %v5269_v33 = vld [vmem:[%s6598_s30 + $0x884] ss:$16 sps:$4 sm:$0xff]  }
 0x12e   : > { %3571 = vmatpush1.bf16.msra.mxu1 %v5164_v18  ;;  %3531 = vmatprep.subr.bf16.mxu0 %v5169_v19  ;;  %v6775_v18 = vcombine.low %v6717_v34, %v6717_v34  ;;  %v5249_v19 = vld [vmem:[%s6598_s30 + $0x8e0] ss:$16 sps:$4 sm:$0xff]   ;;  %v5272_v34 = vld [vmem:[%s6598_s30 + $0xa84] ss:$16 sps:$4 sm:$0xff]  }
 0x12f   : > { %3572 = vmatprep.subr.bf16.mxu1 %v5172_v20  ;;  %v5252_v20 = vld [vmem:[%s6598_s30 + $0xae0] ss:$16 sps:$4 sm:$0xff]  }
 0x131   : > { %3532 = vmatpush1.bf16.msra.mxu0 %v5167_v21  ;;  %v5257_v21 = vld [vmem:[%s6598_s30 + $0x8c4] ss:$16 sps:$4 sm:$0xff]  }
 0x132   : > { %3573 = vmatpush1.bf16.msra.mxu1 %v5170_v22  ;;  %3533 = vmatprep.subr.bf16.mxu0 %v5175_v23  ;;  %v5260_v22 = vld [vmem:[%s6598_s30 + $0xac4] ss:$16 sps:$4 sm:$0xff]   ;;  %v6784_v23 = vld [vmem:[%s7176_s0 + $0x20] sm:$0xff] }
 0x133   : > { %3574 = vmatprep.subr.bf16.mxu1 %v5178_v24  ;;  %v6789_v24 = vld [vmem:[%s7176_s0 + $0x28] sm:$0xff] }
 0x135   : > { %3534 = vmatpush1.bf16.msra.mxu0 %v5173_v25  ;;  %v6793_v25 = vcombine.high %v6784_v23, %v6784_v23 }
 0x136   : > { %3575 = vmatpush1.bf16.msra.mxu1 %v5176_v26  ;;  %3535 = vmatprep.subr.bf16.mxu0 %v5181_v27  ;;  %v6797_v26 = vcombine.high %v6789_v24, %v6789_v24  ;;  %v5255_v27 = vld [vmem:[%s6598_s30 + $0x8c0] ss:$16 sps:$4 sm:$0xff]  }
 0x137   : > { %3576 = vmatprep.subr.bf16.mxu1 %v5184_v28  ;;  %v5258_v28 = vld [vmem:[%s6598_s30 + $0xac0] ss:$16 sps:$4 sm:$0xff]  }
 0x139   : > { %3536 = vmatpush1.bf16.msra.mxu0 %v5179_v29  ;;  %v5263_v29 = vld [vmem:[%s6598_s30 + $0x8a4] ss:$16 sps:$4 sm:$0xff]  }
 0x13a   : > { %3577 = vmatpush1.bf16.msra.mxu1 %v5182_v30  ;;  %3537 = vmatprep.subr.bf16.mxu0 %v5187_v31  ;;  %v5266_v30 = vld [vmem:[%s6598_s30 + $0xaa4] ss:$16 sps:$4 sm:$0xff]   ;;  %v5261_v31 = vld [vmem:[%s6598_s30 + $0x8a0] ss:$16 sps:$4 sm:$0xff]  }
 0x13b   : > { %3578 = vmatprep.subr.bf16.mxu1 %v5190_v32  ;;  %v5264_v32 = vld [vmem:[%s6598_s30 + $0xaa0] ss:$16 sps:$4 sm:$0xff]  }
 0x13d   : > { %3538 = vmatpush1.bf16.msra.mxu0 %v5185_v35  ;;  %v5267_v35 = vld [vmem:[%s6598_s30 + $0x880] ss:$16 sps:$4 sm:$0xff]  }
 0x13e   : > { %3579 = vmatpush1.bf16.msra.mxu1 %v5188_v36  ;;  %3539 = vmatprep.subr.bf16.mxu0 %v5193_v39  ;;  %v5270_v36 = vld [vmem:[%s6598_s30 + $0xa80] ss:$16 sps:$4 sm:$0xff]   ;;  %v5275_v39 = vld [vmem:[%s6598_s30 + $0x864] ss:$16 sps:$4 sm:$0xff]  }
 0x13f   : > { %3580 = vmatprep.subr.bf16.mxu1 %v5196_v40  ;;  %v5278_v40 = vld [vmem:[%s6598_s30 + $0xa64] ss:$16 sps:$4 sm:$0xff]  }
 0x141   : > { %3540 = vmatpush1.bf16.msra.mxu0 %v5191_v41  ;;  %v5273_v41 = vld [vmem:[%s6598_s30 + $0x860] ss:$16 sps:$4 sm:$0xff]  }
 0x142   : > { %3581 = vmatpush1.bf16.msra.mxu1 %v5194_v42  ;;  %3541 = vmatprep.subr.bf16.mxu0 %v5199_v43  ;;  %v5276_v42 = vld [vmem:[%s6598_s30 + $0xa60] ss:$16 sps:$4 sm:$0xff]   ;;  %v5281_v43 = vld [vmem:[%s6598_s30 + $0x844] ss:$16 sps:$4 sm:$0xff]  }
 0x143   : > { %3582 = vmatprep.subr.bf16.mxu1 %v5202_v44  ;;  %v5284_v44 = vld [vmem:[%s6598_s30 + $0xa44] ss:$16 sps:$4 sm:$0xff]  }
 0x145   : > { %3542 = vmatpush2.bf16.msra.mxu0 %v5197_v45  ;;  %v5279_v45 = vld [vmem:[%s6598_s30 + $0x840] ss:$16 sps:$4 sm:$0xff]  }
 0x146   : > { %3583 = vmatpush2.bf16.msra.mxu1 %v5200_v46  ;;  %3543 = vmatprep.subr.bf16.mxu0 %v5205_v47  ;;  %v5282_v46 = vld [vmem:[%s6598_s30 + $0xa40] ss:$16 sps:$4 sm:$0xff]   ;;  %v5287_v47 = vld [vmem:[%s6598_s30 + $0x824] ss:$16 sps:$4 sm:$0xff]  }
 0x147   : > { %3584 = vmatprep.subr.bf16.mxu1 %v5208_v49  ;;  %v5290_v49 = vld [vmem:[%s6598_s30 + $0xa24] ss:$16 sps:$4 sm:$0xff]  }
 0x149   : > { %3544 = vmatpush2.bf16.msra.mxu0 %v5203_v50  ;;  %v5285_v50 = vld [vmem:[%s6598_s30 + $0x820] ss:$16 sps:$4 sm:$0xff]  }
 0x14a   : > { %3585 = vmatpush2.bf16.msra.mxu1 %v5206_v51  ;;  %3545 = vmatprep.subr.bf16.mxu0 %v5211_v53  ;;  %v5288_v51 = vld [vmem:[%s6598_s30 + $0xa20] ss:$16 sps:$4 sm:$0xff]   ;;  %v5293_v53 = vld [vmem:[%s6598_s30 + $0x804] ss:$16 sps:$4 sm:$0xff]  }
 0x14b   : > { %3586 = vmatprep.subr.bf16.mxu1 %v5214_v54  ;;  %v5296_v54 = vld [vmem:[%s6598_s30 + $0xa04] ss:$16 sps:$4 sm:$0xff]  }
 0x14d   : > { %3546 = vmatpush2.bf16.msra.mxu0 %v5209_v55  ;;  %v5291_v55 = vld [vmem:[%s6598_s30 + $0x800] ss:$16 sps:$4 sm:$0xff]  }
 0x14e   : > { %3587 = vmatpush2.bf16.msra.mxu1 %v5212_v56  ;;  %3547 = vmatprep.subr.bf16.mxu0 %v5217_v57  ;;  %v5294_v56 = vld [vmem:[%s6598_s30 + $0xa00] ss:$16 sps:$4 sm:$0xff]   ;;  %v5299_v57 = vld [vmem:[%s6598_s30 + $0x9e4] ss:$16 sps:$4 sm:$0xff]  }
 0x14f   : > { %3588 = vmatprep.subr.bf16.mxu1 %v5220_v58  ;;  %v5302_v58 = vld [vmem:[%s6598_s30 + $0xbe4] ss:$16 sps:$4 sm:$0xff]  }
 0x151   : > { %3548 = vmatpush2.bf16.msra.mxu0 %v5215_v59  ;;  %v5297_v59 = vld [vmem:[%s6598_s30 + $0x9e0] ss:$16 sps:$4 sm:$0xff]  }
 0x152   : > { %3589 = vmatpush2.bf16.msra.mxu1 %v5218_v60  ;;  %3549 = vmatprep.subr.bf16.mxu0 %v5223_v61  ;;  %v5300_v60 = vld [vmem:[%s6598_s30 + $0xbe0] ss:$16 sps:$4 sm:$0xff]   ;;  %v5305_v61 = vld [vmem:[%s6598_s30 + $0x9c4] ss:$16 sps:$4 sm:$0xff]  }
 0x153   : > { %3590 = vmatprep.subr.bf16.mxu1 %v5226_v62  ;;  %v5308_v62 = vld [vmem:[%s6598_s30 + $0xbc4] ss:$16 sps:$4 sm:$0xff]  }
 0x155   : > { %3550 = vmatpush2.bf16.msra.mxu0 %v5221_v63  ;;  %v5303_v63 = vld [vmem:[%s6598_s30 + $0x9c0] ss:$16 sps:$4 sm:$0xff]  }
 0x156   : > { %3591 = vmatpush2.bf16.msra.mxu1 %v5224_v0  ;;  %3551 = vmatprep.subr.bf16.mxu0 %v5229_v1  ;;  %v5306_v0 = vld [vmem:[%s6598_s30 + $0xbc0] ss:$16 sps:$4 sm:$0xff]   ;;  %v5311_v1 = vld [vmem:[%s6598_s30 + $0x9a4] ss:$16 sps:$4 sm:$0xff]  }
 0x157   : > { %3592 = vmatprep.subr.bf16.mxu1 %v5232_v2  ;;  %v5314_v2 = vld [vmem:[%s6598_s30 + $0xba4] ss:$16 sps:$4 sm:$0xff]  }
 0x159   : > { %3552 = vmatpush2.bf16.msra.mxu0 %v5227_v3  ;;  %v5309_v3 = vld [vmem:[%s6598_s30 + $0x9a0] ss:$16 sps:$4 sm:$0xff]  }
 0x15a   : > { %3593 = vmatpush2.bf16.msra.mxu1 %v5230_v4  ;;  %3553 = vmatprep.subr.bf16.mxu0 %v5235_v5  ;;  %v5312_v4 = vld [vmem:[%s6598_s30 + $0xba0] ss:$16 sps:$4 sm:$0xff]   ;;  %v5317_v5 = vld [vmem:[%s6598_s30 + $0x984] ss:$16 sps:$4 sm:$0xff]  }
 0x15b   : > { %3594 = vmatprep.subr.bf16.mxu1 %v5238_v6  ;;  %v5320_v6 = vld [vmem:[%s6598_s30 + $0xb84] ss:$16 sps:$4 sm:$0xff]  }
 0x15d   : > { %3554 = vmatpush2.bf16.msra.mxu0 %v5233_v9  ;;  %v5315_v9 = vld [vmem:[%s6598_s30 + $0x980] ss:$16 sps:$4 sm:$0xff]  }
 0x15e   : > { %3595 = vmatpush2.bf16.msra.mxu1 %v5236_v10  ;;  %3555 = vmatprep.subr.bf16.mxu0 %v5241_v11  ;;  %v5318_v10 = vld [vmem:[%s6598_s30 + $0xb80] ss:$16 sps:$4 sm:$0xff]   ;;  %v5323_v11 = vld [vmem:[%s6598_s30 + $0x964] ss:$16 sps:$4 sm:$0xff]  }
 0x15f   : > { %3596 = vmatprep.subr.bf16.mxu1 %v5244_v12  ;;  %v5326_v12 = vld [vmem:[%s6598_s30 + $0xb64] ss:$16 sps:$4 sm:$0xff]  }
 0x161   : > { %3556 = vmatpush2.bf16.msra.mxu0 %v5239_v13  ;;  %v5321_v13 = vld [vmem:[%s6598_s30 + $0x960] ss:$16 sps:$4 sm:$0xff]  }
 0x162   : > { %3597 = vmatpush2.bf16.msra.mxu1 %v5242_v14  ;;  %3607 = vmatprep.subr.bf16.mxu0 %v5251_v15  ;;  %v5324_v14 = vld [vmem:[%s6598_s30 + $0xb60] ss:$16 sps:$4 sm:$0xff]   ;;  %v5329_v15 = vld [vmem:[%s6598_s30 + $0x944] ss:$16 sps:$4 sm:$0xff]  }
 0x163   : > { %3648 = vmatprep.subr.bf16.mxu1 %v5254_v16  ;;  %v5332_v16 = vld [vmem:[%s6598_s30 + $0xb44] ss:$16 sps:$4 sm:$0xff]  }
 0x164   : > { %3558 = vmatmul.mubr.bf16.vlgmr.msra.gmra.mxu0 %v6771_v17 }
 0x165   : > { %3599 = vmatmul.mubr.bf16.vlgmr.msra.gmra.mxu1 %v6775_v18  ;;  %3608 = vmatpush1.bf16.msra.mxu0 %v5249_v19  ;;  %v5327_v19 = vld [vmem:[%s6598_s30 + $0x940] ss:$16 sps:$4 sm:$0xff]  }
 0x166   : > { %3649 = vmatpush1.bf16.msra.mxu1 %v5252_v20  ;;  %3609 = vmatprep.subr.bf16.mxu0 %v5257_v21  ;;  %v5330_v20 = vld [vmem:[%s6598_s30 + $0xb40] ss:$16 sps:$4 sm:$0xff]   ;;  %v5335_v21 = vld [vmem:[%s6598_s30 + $0x924] ss:$16 sps:$4 sm:$0xff]  }
 0x167   : > { %3650 = vmatprep.subr.bf16.mxu1 %v5260_v22  ;;  %3639 = vmatprep.mubr.bf16.mxu0 %v6793_v25  ;;  %v5338_v22 = vld [vmem:[%s6598_s30 + $0xb24] ss:$16 sps:$4 sm:$0xff]  }
 0x168   : > { %3680 = vmatprep.mubr.bf16.mxu1 %v6797_v26 }
 0x169   : > { %3610 = vmatpush1.bf16.msra.mxu0 %v5255_v27  ;;  %v5333_v27 = vld [vmem:[%s6598_s30 + $0x920] ss:$16 sps:$4 sm:$0xff]  }
 0x16a   : > { %3651 = vmatpush1.bf16.msra.mxu1 %v5258_v28  ;;  %3611 = vmatprep.subr.bf16.mxu0 %v5263_v29  ;;  %v5336_v28 = vld [vmem:[%s6598_s30 + $0xb20] ss:$16 sps:$4 sm:$0xff]   ;;  %v5341_v29 = vld [vmem:[%s6598_s30 + $0x904] ss:$16 sps:$4 sm:$0xff]  }
 0x16b   : > { %3652 = vmatprep.subr.bf16.mxu1 %v5266_v30  ;;  %v5344_v30 = vld [vmem:[%s6598_s30 + $0xb04] ss:$16 sps:$4 sm:$0xff]  }
 0x16d   : > { %3612 = vmatpush1.bf16.msra.mxu0 %v5261_v31  ;;  %v5339_v31 = vld [vmem:[%s6598_s30 + $0x900] ss:$16 sps:$4 sm:$0xff]  }
 0x16e   : > { %3653 = vmatpush1.bf16.msra.mxu1 %v5264_v32  ;;  %3613 = vmatprep.subr.bf16.mxu0 %v5269_v33  ;;  %v5342_v32 = vld [vmem:[%s6598_s30 + $0xb00] ss:$16 sps:$4 sm:$0xff]   ;;  %v5351_v33 = vld [vmem:[%s6598_s30 + $0xec] ss:$16 sps:$4 sm:$0xff]  }
 0x16f   : > { %3654 = vmatprep.subr.bf16.mxu1 %v5272_v34  ;;  %v5354_v34 = vld [vmem:[%s6598_s30 + $0x2ec] ss:$16 sps:$4 sm:$0xff]  }
 0x171   : > { %3614 = vmatpush1.bf16.msra.mxu0 %v5267_v35  ;;  %v6865_v35 = vcombine.low %v6784_v23, %v6784_v23  ;;  %v5355_v23 = vld [vmem:[%s6598_s30 + $0xc8] ss:$16 sps:$4 sm:$0xff]  }
 0x172   : > { %3655 = vmatpush1.bf16.msra.mxu1 %v5270_v36  ;;  %3615 = vmatprep.subr.bf16.mxu0 %v5275_v39  ;;  %v6869_v36 = vcombine.low %v6789_v24, %v6789_v24  ;;  %v5349_v39 = vld [vmem:[%s6598_s30 + $0xe8] ss:$16 sps:$4 sm:$0xff]  }
 0x173   : > { %3656 = vmatprep.subr.bf16.mxu1 %v5278_v40  ;;  %v5352_v40 = vld [vmem:[%s6598_s30 + $0x2e8] ss:$16 sps:$4 sm:$0xff]  }
 0x174   : > { %v5358_v24 = vld [vmem:[%s6598_s30 + $0x2c8] ss:$16 sps:$4 sm:$0xff]  }
 0x175   : > { %3616 = vmatpush1.bf16.msra.mxu0 %v5273_v41  ;;  %v5357_v41 = vld [vmem:[%s6598_s30 + $0xcc] ss:$16 sps:$4 sm:$0xff]  }
 0x176   : > { %3657 = vmatpush1.bf16.msra.mxu1 %v5276_v42  ;;  %3617 = vmatprep.subr.bf16.mxu0 %v5281_v43  ;;  %v5360_v42 = vld [vmem:[%s6598_s30 + $0x2cc] ss:$16 sps:$4 sm:$0xff]  }
 0x177   : > { %3658 = vmatprep.subr.bf16.mxu1 %v5284_v44  ;;  %v5363_v43 = vld [vmem:[%s6598_s30 + $0xac] ss:$16 sps:$4 sm:$0xff]  }
 0x178   : > { %v5366_v44 = vld [vmem:[%s6598_s30 + $0x2ac] ss:$16 sps:$4 sm:$0xff]  }
 0x179   : > { %3618 = vmatpush1.bf16.msra.mxu0 %v5279_v45  ;;  %v5361_v45 = vld [vmem:[%s6598_s30 + $0xa8] ss:$16 sps:$4 sm:$0xff]  }
 0x17a   : > { %3659 = vmatpush1.bf16.msra.mxu1 %v5282_v46  ;;  %3619 = vmatprep.subr.bf16.mxu0 %v5287_v47  ;;  %v5364_v46 = vld [vmem:[%s6598_s30 + $0x2a8] ss:$16 sps:$4 sm:$0xff]   ;;  %v5369_v47 = vld [vmem:[%s6598_s30 + $0x8c] ss:$16 sps:$4 sm:$0xff]  }
 0x17b   : > { %3660 = vmatprep.subr.bf16.mxu1 %v5290_v49  ;;  %v5372_v49 = vld [vmem:[%s6598_s30 + $0x28c] ss:$16 sps:$4 sm:$0xff]  }
 0x17d   : > { %3620 = vmatpush1.bf16.msra.mxu0 %v5285_v50  ;;  %v5367_v50 = vld [vmem:[%s6598_s30 + $0x88] ss:$16 sps:$4 sm:$0xff]  }
 0x17e   : > { %3661 = vmatpush1.bf16.msra.mxu1 %v5288_v51  ;;  %3621 = vmatprep.subr.bf16.mxu0 %v5293_v53  ;;  %v5378_v51 = vld [vmem:[%s6598_s30 + $0x26c] ss:$16 sps:$4 sm:$0xff]   ;;  %v5373_v53 = vld [vmem:[%s6598_s30 + $0x68] ss:$16 sps:$4 sm:$0xff]  }
 0x17f   : > { %3662 = vmatprep.subr.bf16.mxu1 %v5296_v54  ;;  %v5376_v54 = vld [vmem:[%s6598_s30 + $0x268] ss:$16 sps:$4 sm:$0xff]  }
 0x181   : > { %3622 = vmatpush1.bf16.msra.mxu0 %v5291_v55  ;;  %v5381_v55 = vld [vmem:[%s6598_s30 + $0x4c] ss:$16 sps:$4 sm:$0xff]  }
 0x182   : > { %3663 = vmatpush1.bf16.msra.mxu1 %v5294_v56  ;;  %3623 = vmatprep.subr.bf16.mxu0 %v5299_v57  ;;  %v5384_v56 = vld [vmem:[%s6598_s30 + $0x24c] ss:$16 sps:$4 sm:$0xff]   ;;  %v5379_v57 = vld [vmem:[%s6598_s30 + $0x48] ss:$16 sps:$4 sm:$0xff]  }
 0x183   : > { %3664 = vmatprep.subr.bf16.mxu1 %v5302_v58  ;;  %v5382_v58 = vld [vmem:[%s6598_s30 + $0x248] ss:$16 sps:$4 sm:$0xff]  }
 0x185   : > { %3624 = vmatpush2.bf16.msra.mxu0 %v5297_v59  ;;  %v5387_v59 = vld [vmem:[%s6598_s30 + $0x2c] ss:$16 sps:$4 sm:$0xff]  }
 0x186   : > { %3665 = vmatpush2.bf16.msra.mxu1 %v5300_v60  ;;  %3625 = vmatprep.subr.bf16.mxu0 %v5305_v61  ;;  %v5390_v60 = vld [vmem:[%s6598_s30 + $0x22c] ss:$16 sps:$4 sm:$0xff]   ;;  %v5385_v61 = vld [vmem:[%s6598_s30 + $0x28] ss:$16 sps:$4 sm:$0xff]  }
 0x187   : > { %3666 = vmatprep.subr.bf16.mxu1 %v5308_v62  ;;  %v5388_v62 = vld [vmem:[%s6598_s30 + $0x228] ss:$16 sps:$4 sm:$0xff]  }
 0x189   : > { %3626 = vmatpush2.bf16.msra.mxu0 %v5303_v63  ;;  %v5393_v63 = vld [vmem:[%s6598_s30 + $0xc] ss:$16 sps:$4 sm:$0xff]  }
 0x18a   : > { %3667 = vmatpush2.bf16.msra.mxu1 %v5306_v0  ;;  %3627 = vmatprep.subr.bf16.mxu0 %v5311_v1  ;;  %v5396_v0 = vld [vmem:[%s6598_s30 + $0x20c] ss:$16 sps:$4 sm:$0xff]   ;;  %v5391_v1 = vld [vmem:[%s6598_s30 + $0x8] ss:$16 sps:$4 sm:$0xff]  }
 0x18b   : > { %3668 = vmatprep.subr.bf16.mxu1 %v5314_v2  ;;  %v5394_v2 = vld [vmem:[%s6598_s30 + $0x208] ss:$16 sps:$4 sm:$0xff]  }
 0x18d   : > { %3628 = vmatpush2.bf16.msra.mxu0 %v5309_v3  ;;  %v5399_v3 = vld [vmem:[%s6598_s30 + $0x1ec] ss:$16 sps:$4 sm:$0xff]  }
 0x18e   : > { %3669 = vmatpush2.bf16.msra.mxu1 %v5312_v4  ;;  %3629 = vmatprep.subr.bf16.mxu0 %v5317_v5  ;;  %v5402_v4 = vld [vmem:[%s6598_s30 + $0x3ec] ss:$16 sps:$4 sm:$0xff]   ;;  %v5397_v5 = vld [vmem:[%s6598_s30 + $0x1e8] ss:$16 sps:$4 sm:$0xff]  }
 0x18f   : > { %3670 = vmatprep.subr.bf16.mxu1 %v5320_v6  ;;  %v5400_v6 = vld [vmem:[%s6598_s30 + $0x3e8] ss:$16 sps:$4 sm:$0xff]  }
 0x191   : > { %3630 = vmatpush2.bf16.msra.mxu0 %v5315_v9  ;;  %v5405_v9 = vld [vmem:[%s6598_s30 + $0x1cc] ss:$16 sps:$4 sm:$0xff]  }
 0x192   : > { %3671 = vmatpush2.bf16.msra.mxu1 %v5318_v10  ;;  %3631 = vmatprep.subr.bf16.mxu0 %v5323_v11  ;;  %v5408_v10 = vld [vmem:[%s6598_s30 + $0x3cc] ss:$16 sps:$4 sm:$0xff]   ;;  %v5403_v11 = vld [vmem:[%s6598_s30 + $0x1c8] ss:$16 sps:$4 sm:$0xff]  }
 0x193   : > { %3672 = vmatprep.subr.bf16.mxu1 %v5326_v12  ;;  %v5406_v12 = vld [vmem:[%s6598_s30 + $0x3c8] ss:$16 sps:$4 sm:$0xff]  }
 0x195   : > { %3632 = vmatpush2.bf16.msra.mxu0 %v5321_v13  ;;  %v5411_v13 = vld [vmem:[%s6598_s30 + $0x1ac] ss:$16 sps:$4 sm:$0xff]  }
 0x196   : > { %3673 = vmatpush2.bf16.msra.mxu1 %v5324_v14  ;;  %3633 = vmatprep.subr.bf16.mxu0 %v5329_v15  ;;  %v5414_v14 = vld [vmem:[%s6598_s30 + $0x3ac] ss:$16 sps:$4 sm:$0xff]   ;;  %v5409_v15 = vld [vmem:[%s6598_s30 + $0x1a8] ss:$16 sps:$4 sm:$0xff]  }
 0x197   : > { %3674 = vmatprep.subr.bf16.mxu1 %v5332_v16  ;;  %v5412_v16 = vld [vmem:[%s6598_s30 + $0x3a8] ss:$16 sps:$4 sm:$0xff]  }
 0x199   : > { %3634 = vmatpush2.bf16.msra.mxu0 %v5327_v19  ;;  %v5417_v19 = vld [vmem:[%s6598_s30 + $0x18c] ss:$16 sps:$4 sm:$0xff]  }
 0x19a   : > { %3675 = vmatpush2.bf16.msra.mxu1 %v5330_v20  ;;  %3635 = vmatprep.subr.bf16.mxu0 %v5335_v21  ;;  %v5420_v20 = vld [vmem:[%s6598_s30 + $0x38c] ss:$16 sps:$4 sm:$0xff]   ;;  %v5415_v21 = vld [vmem:[%s6598_s30 + $0x188] ss:$16 sps:$4 sm:$0xff]  }
 0x19b   : > { %3676 = vmatprep.subr.bf16.mxu1 %v5338_v22  ;;  %v5418_v22 = vld [vmem:[%s6598_s30 + $0x388] ss:$16 sps:$4 sm:$0xff]  }
 0x19d   : > { %3636 = vmatpush2.bf16.msra.mxu0 %v5333_v27  ;;  %v5423_v27 = vld [vmem:[%s6598_s30 + $0x16c] ss:$16 sps:$4 sm:$0xff]  }
 0x19e   : > { %3677 = vmatpush2.bf16.msra.mxu1 %v5336_v28  ;;  %3637 = vmatprep.subr.bf16.mxu0 %v5341_v29  ;;  %v5426_v28 = vld [vmem:[%s6598_s30 + $0x36c] ss:$16 sps:$4 sm:$0xff]   ;;  %v5421_v29 = vld [vmem:[%s6598_s30 + $0x168] ss:$16 sps:$4 sm:$0xff]  }
 0x19f   : > { %3678 = vmatprep.subr.bf16.mxu1 %v5344_v30  ;;  %v5424_v30 = vld [vmem:[%s6598_s30 + $0x368] ss:$16 sps:$4 sm:$0xff]  }
 0x1a1   : > { %3638 = vmatpush2.bf16.msra.mxu0 %v5339_v31  ;;  %v5429_v31 = vld [vmem:[%s6598_s30 + $0x14c] ss:$16 sps:$4 sm:$0xff]  }
 0x1a2   : > { %3679 = vmatpush2.bf16.msra.mxu1 %v5342_v32  ;;  %3689 = vmatprep.subr.bf16.mxu0 %v5351_v33  ;;  %v5432_v32 = vld [vmem:[%s6598_s30 + $0x34c] ss:$16 sps:$4 sm:$0xff]   ;;  %v5427_v33 = vld [vmem:[%s6598_s30 + $0x148] ss:$16 sps:$4 sm:$0xff]  }
 0x1a3   : > { %3730 = vmatprep.subr.bf16.mxu1 %v5354_v34  ;;  %v5430_v34 = vld [vmem:[%s6598_s30 + $0x348] ss:$16 sps:$4 sm:$0xff]  }
 0x1a4   : > { %3640 = vmatmul.mubr.bf16.vlgmr.msra.gmra.mxu0 %v6865_v35 }
 0x1a5   : > { %3681 = vmatmul.mubr.bf16.vlgmr.msra.gmra.mxu1 %v6869_v36  ;;  %3690 = vmatpush1.bf16.msra.mxu0 %v5349_v39  ;;  %v5435_v39 = vld [vmem:[%s6598_s30 + $0x12c] ss:$16 sps:$4 sm:$0xff]  }
 0x1a6   : > { %3731 = vmatpush1.bf16.msra.mxu1 %v5352_v40  ;;  %3691 = vmatprep.subr.bf16.mxu0 %v5357_v41  ;;  %v5438_v40 = vld [vmem:[%s6598_s30 + $0x32c] ss:$16 sps:$4 sm:$0xff]   ;;  %v5433_v41 = vld [vmem:[%s6598_s30 + $0x128] ss:$16 sps:$4 sm:$0xff]  }
 0x1a7   : > { %3732 = vmatprep.subr.bf16.mxu1 %v5360_v42  ;;  %3721 = vmatprep.mubr.bf16.mxu0 %v6650_v48  ;;  %v5370_v48 = vld [vmem:[%s6598_s30 + $0x288] ss:$16 sps:$4 sm:$0xff]  }
 0x1a8   : > { %3762 = vmatprep.mubr.bf16.mxu1 %v6657_v52  ;;  %v5375_v52 = vld [vmem:[%s6598_s30 + $0x6c] ss:$16 sps:$4 sm:$0xff]   ;;  %v5436_v42 = vld [vmem:[%s6598_s30 + $0x328] ss:$16 sps:$4 sm:$0xff]  }
 0x1a9   : > { %3692 = vmatpush1.bf16.msra.mxu0 %v5355_v23  ;;  %v5441_v23 = vld [vmem:[%s6598_s30 + $0x10c] ss:$16 sps:$4 sm:$0xff]  }
 0x1aa   : > { %3733 = vmatpush1.bf16.msra.mxu1 %v5358_v24  ;;  %3693 = vmatprep.subr.bf16.mxu0 %v5363_v43  ;;  %v5444_v24 = vld [vmem:[%s6598_s30 + $0x30c] ss:$16 sps:$4 sm:$0xff]   ;;  %v5439_v43 = vld [vmem:[%s6598_s30 + $0x108] ss:$16 sps:$4 sm:$0xff]  }
 0x1ab   : > { %3734 = vmatprep.subr.bf16.mxu1 %v5366_v44  ;;  %v5442_v44 = vld [vmem:[%s6598_s30 + $0x308] ss:$16 sps:$4 sm:$0xff]  }
 0x1ad   : > { %3694 = vmatpush1.bf16.msra.mxu0 %v5361_v45  ;;  %v5447_v45 = vld [vmem:[%s6598_s30 + $0x4ec] ss:$16 sps:$4 sm:$0xff]  }
 0x1ae   : > { %3735 = vmatpush1.bf16.msra.mxu1 %v5364_v46  ;;  %3695 = vmatprep.subr.bf16.mxu0 %v5369_v47  ;;  %v5450_v46 = vld [vmem:[%s6598_s30 + $0x6ec] ss:$16 sps:$4 sm:$0xff]   ;;  %v5445_v47 = vld [vmem:[%s6598_s30 + $0x4e8] ss:$16 sps:$4 sm:$0xff]  }
 0x1af   : > { %3736 = vmatprep.subr.bf16.mxu1 %v5372_v49  ;;  %v5448_v49 = vld [vmem:[%s6598_s30 + $0x6e8] ss:$16 sps:$4 sm:$0xff]  }
 0x1b1   : > { %3696 = vmatpush1.bf16.msra.mxu0 %v5367_v50  ;;  %v5453_v50 = vld [vmem:[%s6598_s30 + $0x4cc] ss:$16 sps:$4 sm:$0xff]  }
 0x1b2   : > { %3737 = vmatpush1.bf16.msra.mxu1 %v5370_v48  ;;  %3697 = vmatprep.subr.bf16.mxu0 %v5375_v52  ;;  %v5456_v48 = vld [vmem:[%s6598_s30 + $0x6cc] ss:$16 sps:$4 sm:$0xff]   ;;  %v5451_v52 = vld [vmem:[%s6598_s30 + $0x4c8] ss:$16 sps:$4 sm:$0xff]  }
 0x1b3   : > { %3738 = vmatprep.subr.bf16.mxu1 %v5378_v51  ;;  %v5454_v51 = vld [vmem:[%s6598_s30 + $0x6c8] ss:$16 sps:$4 sm:$0xff]  }
 0x1b5   : > { %3698 = vmatpush1.bf16.msra.mxu0 %v5373_v53 }
 0x1b6   : > { %3739 = vmatpush1.bf16.msra.mxu1 %v5376_v54  ;;  %3699 = vmatprep.subr.bf16.mxu0 %v5381_v55  ;;  %v5459_v55 = vld [vmem:[%s6598_s30 + $0x4ac] ss:$16 sps:$4 sm:$0xff]  }
 0x1b7   : > { %3740 = vmatprep.subr.bf16.mxu1 %v5384_v56  ;;  %v5462_v56 = vld [vmem:[%s6598_s30 + $0x6ac] ss:$16 sps:$4 sm:$0xff]  }
 0x1b9   : > { %3700 = vmatpush1.bf16.msra.mxu0 %v5379_v57 }
 0x1ba   : > { %3741 = vmatpush1.bf16.msra.mxu1 %v5382_v58  ;;  %3701 = vmatprep.subr.bf16.mxu0 %v5387_v59 }
 0x1bb   : > { %3742 = vmatprep.subr.bf16.mxu1 %v5390_v60 }
 0x1bd   : > { %3702 = vmatpush1.bf16.msra.mxu0 %v5385_v61  ;;  %v5457_v61 = vld [vmem:[%s6598_s30 + $0x4a8] ss:$16 sps:$4 sm:$0xff]  }
 0x1be   : > { %3743 = vmatpush1.bf16.msra.mxu1 %v5388_v62  ;;  %3703 = vmatprep.subr.bf16.mxu0 %v5393_v63  ;;  %v5465_v63 = vld [vmem:[%s6598_s30 + $0x48c] ss:$16 sps:$4 sm:$0xff]  }
 0x1bf   : > { %3744 = vmatprep.subr.bf16.mxu1 %v5396_v0  ;;  %v5468_v0 = vld [vmem:[%s6598_s30 + $0x68c] ss:$16 sps:$4 sm:$0xff]  }
 0x1c1   : > { %3704 = vmatpush1.bf16.msra.mxu0 %v5391_v1 }
 0x1c2   : > { %3745 = vmatpush1.bf16.msra.mxu1 %v5394_v2  ;;  %3705 = vmatprep.subr.bf16.mxu0 %v5399_v3  ;;  %v5463_v3 = vld [vmem:[%s6598_s30 + $0x488] ss:$16 sps:$4 sm:$0xff]  }
 0x1c3   : > { %3746 = vmatprep.subr.bf16.mxu1 %v5402_v4  ;;  %v5466_v4 = vld [vmem:[%s6598_s30 + $0x688] ss:$16 sps:$4 sm:$0xff]  }
 0x1c5   : > { %3706 = vmatpush2.bf16.msra.mxu0 %v5397_v5  ;;  %v5469_v5 = vld [vmem:[%s6598_s30 + $0x468] ss:$16 sps:$4 sm:$0xff]  }
 0x1c6   : > { %3747 = vmatpush2.bf16.msra.mxu1 %v5400_v6  ;;  %3707 = vmatprep.subr.bf16.mxu0 %v5405_v9  ;;  %v5472_v6 = vld [vmem:[%s6598_s30 + $0x668] ss:$16 sps:$4 sm:$0xff]   ;;  %v5477_v9 = vld [vmem:[%s6598_s30 + $0x44c] ss:$16 sps:$4 sm:$0xff]  }
 0x1c7   : > { %3748 = vmatprep.subr.bf16.mxu1 %v5408_v10  ;;  %v5480_v10 = vld [vmem:[%s6598_s30 + $0x64c] ss:$16 sps:$4 sm:$0xff]  }
 0x1c9   : > { %3708 = vmatpush2.bf16.msra.mxu0 %v5403_v11  ;;  %v5475_v11 = vld [vmem:[%s6598_s30 + $0x448] ss:$16 sps:$4 sm:$0xff]  }
 0x1ca   : > { %3749 = vmatpush2.bf16.msra.mxu1 %v5406_v12  ;;  %3709 = vmatprep.subr.bf16.mxu0 %v5411_v13  ;;  %v5478_v12 = vld [vmem:[%s6598_s30 + $0x648] ss:$16 sps:$4 sm:$0xff]   ;;  %v5483_v13 = vld [vmem:[%s6598_s30 + $0x42c] ss:$16 sps:$4 sm:$0xff]  }
 0x1cb   : > { %3750 = vmatprep.subr.bf16.mxu1 %v5414_v14  ;;  %v5486_v14 = vld [vmem:[%s6598_s30 + $0x62c] ss:$16 sps:$4 sm:$0xff]  }
 0x1cd   : > { %3710 = vmatpush2.bf16.msra.mxu0 %v5409_v15  ;;  %v5481_v15 = vld [vmem:[%s6598_s30 + $0x428] ss:$16 sps:$4 sm:$0xff]  }
 0x1ce   : > { %3751 = vmatpush2.bf16.msra.mxu1 %v5412_v16  ;;  %3711 = vmatprep.subr.bf16.mxu0 %v5417_v19  ;;  %v5484_v16 = vld [vmem:[%s6598_s30 + $0x628] ss:$16 sps:$4 sm:$0xff]   ;;  %v5489_v19 = vld [vmem:[%s6598_s30 + $0x40c] ss:$16 sps:$4 sm:$0xff]  }
 0x1cf   : > { %3752 = vmatprep.subr.bf16.mxu1 %v5420_v20  ;;  %v5492_v20 = vld [vmem:[%s6598_s30 + $0x60c] ss:$16 sps:$4 sm:$0xff]  }
 0x1d1   : > { %3712 = vmatpush2.bf16.msra.mxu0 %v5415_v21  ;;  %v5487_v21 = vld [vmem:[%s6598_s30 + $0x408] ss:$16 sps:$4 sm:$0xff]  }
 0x1d2   : > { %3753 = vmatpush2.bf16.msra.mxu1 %v5418_v22  ;;  %3713 = vmatprep.subr.bf16.mxu0 %v5423_v27  ;;  %v5490_v22 = vld [vmem:[%s6598_s30 + $0x608] ss:$16 sps:$4 sm:$0xff]   ;;  %v5495_v27 = vld [vmem:[%s6598_s30 + $0x5ec] ss:$16 sps:$4 sm:$0xff]  }
 0x1d3   : > { %3754 = vmatprep.subr.bf16.mxu1 %v5426_v28  ;;  %v5498_v28 = vld [vmem:[%s6598_s30 + $0x7ec] ss:$16 sps:$4 sm:$0xff]  }
 0x1d5   : > { %3714 = vmatpush2.bf16.msra.mxu0 %v5421_v29  ;;  %v5493_v29 = vld [vmem:[%s6598_s30 + $0x5e8] ss:$16 sps:$4 sm:$0xff]  }
 0x1d6   : > { %3755 = vmatpush2.bf16.msra.mxu1 %v5424_v30  ;;  %3715 = vmatprep.subr.bf16.mxu0 %v5429_v31  ;;  %v5496_v30 = vld [vmem:[%s6598_s30 + $0x7e8] ss:$16 sps:$4 sm:$0xff]   ;;  %v5501_v31 = vld [vmem:[%s6598_s30 + $0x5cc] ss:$16 sps:$4 sm:$0xff]  }
 0x1d7   : > { %3756 = vmatprep.subr.bf16.mxu1 %v5432_v32  ;;  %v5504_v32 = vld [vmem:[%s6598_s30 + $0x7cc] ss:$16 sps:$4 sm:$0xff]  }
 0x1d9   : > { %3716 = vmatpush2.bf16.msra.mxu0 %v5427_v33  ;;  %v5499_v33 = vld [vmem:[%s6598_s30 + $0x5c8] ss:$16 sps:$4 sm:$0xff]  }
 0x1da   : > { %3757 = vmatpush2.bf16.msra.mxu1 %v5430_v34  ;;  %3717 = vmatprep.subr.bf16.mxu0 %v5435_v39  ;;  %v5502_v34 = vld [vmem:[%s6598_s30 + $0x7c8] ss:$16 sps:$4 sm:$0xff]   ;;  %v5507_v39 = vld [vmem:[%s6598_s30 + $0x5ac] ss:$16 sps:$4 sm:$0xff]  }
 0x1db   : > { %3758 = vmatprep.subr.bf16.mxu1 %v5438_v40  ;;  %v5510_v40 = vld [vmem:[%s6598_s30 + $0x7ac] ss:$16 sps:$4 sm:$0xff]  }
 0x1dd   : > { %3718 = vmatpush2.bf16.msra.mxu0 %v5433_v41  ;;  %v5505_v41 = vld [vmem:[%s6598_s30 + $0x5a8] ss:$16 sps:$4 sm:$0xff]  }
 0x1de   : > { %3759 = vmatpush2.bf16.msra.mxu1 %v5436_v42  ;;  %3719 = vmatprep.subr.bf16.mxu0 %v5441_v23  ;;  %v5508_v42 = vld [vmem:[%s6598_s30 + $0x7a8] ss:$16 sps:$4 sm:$0xff]   ;;  %v5513_v23 = vld [vmem:[%s6598_s30 + $0x58c] ss:$16 sps:$4 sm:$0xff]  }
 0x1df   : > { %3760 = vmatprep.subr.bf16.mxu1 %v5444_v24  ;;  %v5516_v24 = vld [vmem:[%s6598_s30 + $0x78c] ss:$16 sps:$4 sm:$0xff]  }
 0x1e1   : > { %3720 = vmatpush2.bf16.msra.mxu0 %v5439_v43  ;;  %v5511_v43 = vld [vmem:[%s6598_s30 + $0x588] ss:$16 sps:$4 sm:$0xff]  }
 0x1e2   : > { %3761 = vmatpush2.bf16.msra.mxu1 %v5442_v44  ;;  %3771 = vmatprep.subr.bf16.mxu0 %v5447_v45  ;;  %v5514_v44 = vld [vmem:[%s6598_s30 + $0x788] ss:$16 sps:$4 sm:$0xff]   ;;  %v5519_v45 = vld [vmem:[%s6598_s30 + $0x56c] ss:$16 sps:$4 sm:$0xff]  }
 0x1e3   : > { %3812 = vmatprep.subr.bf16.mxu1 %v5450_v46  ;;  %v5522_v46 = vld [vmem:[%s6598_s30 + $0x76c] ss:$16 sps:$4 sm:$0xff]  }
 0x1e4   : > { %v3477_v53 = vpop.f32.mrf.mxu0  ;;  %3722 = vmatmul.mubr.bf16.vlgmr.msra.gmra.mxu0 %v6679_v7  ;;  %v5460_v7 = vld [vmem:[%s6598_s30 + $0x6a8] ss:$16 sps:$4 sm:$0xff]  }
 0x1e5   : > { %v3518_v54 = vpop.f32.mrf.mxu1  ;;  %3763 = vmatmul.mubr.bf16.vlgmr.msra.gmra.mxu1 %v6681_v8  ;;  %3772 = vmatpush1.bf16.msra.mxu0 %v5445_v47  ;;  %v5517_v47 = vld [vmem:[%s6598_s30 + $0x568] ss:$16 sps:$4 sm:$0xff]  }
 0x1e6   : > { %v6949_v57 = vadd.f32 %v3518_v54, %v3477_v53  ;;  %3813 = vmatpush1.bf16.msra.mxu1 %v5448_v49  ;;  %v3479_v58 = vpop.f32.mrf.mxu0  ;;  %3773 = vmatprep.subr.bf16.mxu0 %v5453_v50  ;;  %v5520_v49 = vld [vmem:[%s6598_s30 + $0x768] ss:$16 sps:$4 sm:$0xff]   ;;  %v5525_v50 = vld [vmem:[%s6598_s30 + $0x54c] ss:$16 sps:$4 sm:$0xff]  }
 0x1e7   : > { %v3520_v59 = vpop.f32.mrf.mxu1  ;;  %3814 = vmatprep.subr.bf16.mxu1 %v5456_v48  ;;  %3803 = vmatprep.mubr.bf16.mxu0 %v6723_v37  ;;  %v5471_v37 = vld [vmem:[%s6598_s30 + $0x46c] ss:$16 sps:$4 sm:$0xff]  }
 0x1e8   : > { %v6951_v60 = vadd.f32 %v3520_v59, %v3479_v58  ;;  %3844 = vmatprep.mubr.bf16.mxu1 %v6727_v38  ;;  %v3481_v8 = vpop.f32.mrf.mxu0  ;;  %v5474_v38 = vld [vmem:[%s6598_s30 + $0x66c] ss:$16 sps:$4 sm:$0xff]  }
 0x1e9   : > { %v3522_v62 = vpop.f32.mrf.mxu1  ;;  %3774 = vmatpush1.bf16.msra.mxu0 %v5451_v52  ;;  %v5528_v48 = vld [vmem:[%s6598_s30 + $0x74c] ss:$16 sps:$4 sm:$0xff]   ;;  %v5523_v52 = vld [vmem:[%s6598_s30 + $0x548] ss:$16 sps:$4 sm:$0xff]  }
 0x1ea   : > { %3815 = vmatpush1.bf16.msra.mxu1 %v5454_v51  ;;  %v3482_v1 = vpop.f32.mrf.mxu0  ;;  %3775 = vmatprep.subr.bf16.mxu0 %v5459_v55  ;;  %v5526_v51 = vld [vmem:[%s6598_s30 + $0x748] ss:$16 sps:$4 sm:$0xff]   ;;  %v5531_v53 = vld [vmem:[%s6598_s30 + $0x52c] ss:$16 sps:$4 sm:$0xff]  }
 0x1eb   : > { %v3523_v2 = vpop.f32.mrf.mxu1  ;;  %3816 = vmatprep.subr.bf16.mxu1 %v5462_v56  ;;  %v5534_v54 = vld [vmem:[%s6598_s30 + $0x72c] ss:$16 sps:$4 sm:$0xff]   ;;  %v5529_v55 = vld [vmem:[%s6598_s30 + $0x528] ss:$16 sps:$4 sm:$0xff]  }
 0x1ec   : > { %v5532_v56 = vld [vmem:[%s6598_s30 + $0x728] ss:$16 sps:$4 sm:$0xff]   ;;  %v5537_v58 = vld [vmem:[%s6598_s30 + $0x50c] ss:$16 sps:$4 sm:$0xff]  }
 0x1ed   : > { %3776 = vmatpush1.bf16.msra.mxu0 %v5457_v61  ;;  %v5540_v59 = vld [vmem:[%s6598_s30 + $0x70c] ss:$16 sps:$4 sm:$0xff]   ;;  %v5535_v61 = vld [vmem:[%s6598_s30 + $0x508] ss:$16 sps:$4 sm:$0xff]  }
 0x1ee   : > { %3817 = vmatpush1.bf16.msra.mxu1 %v5460_v7  ;;  %3777 = vmatprep.subr.bf16.mxu0 %v5465_v63  ;;  %v5538_v7 = vld [vmem:[%s6598_s30 + $0x708] ss:$16 sps:$4 sm:$0xff]   ;;  %v5543_v8 = vld [vmem:[%s6598_s30 + $0x8ec] ss:$16 sps:$4 sm:$0xff]  }
 0x1ef   : > { %3818 = vmatprep.subr.bf16.mxu1 %v5468_v0  ;;  %v5546_v62 = vld [vmem:[%s6598_s30 + $0xaec] ss:$16 sps:$4 sm:$0xff]   ;;  %v5541_v63 = vld [vmem:[%s6598_s30 + $0x8e8] ss:$16 sps:$4 sm:$0xff]  }
 0x1f0   : > { %v5544_v0 = vld [vmem:[%s6598_s30 + $0xae8] ss:$16 sps:$4 sm:$0xff]   ;;  %v5549_v1 = vld [vmem:[%s6598_s30 + $0x8cc] ss:$16 sps:$4 sm:$0xff]  }
 0x1f1   : > { %3778 = vmatpush1.bf16.msra.mxu0 %v5463_v3  ;;  %v5552_v2 = vld [vmem:[%s6598_s30 + $0xacc] ss:$16 sps:$4 sm:$0xff]  }
 0x1f2   : > { %3819 = vmatpush1.bf16.msra.mxu1 %v5466_v4  ;;  %3779 = vmatprep.subr.bf16.mxu0 %v5471_v37 }
 0x1f3   : > { %3820 = vmatprep.subr.bf16.mxu1 %v5474_v38  ;;  %v5547_v38 = vld [vmem:[%s6598_s30 + $0x8c8] ss:$16 sps:$4 sm:$0xff]  }
 0x1f5   : > { %3780 = vmatpush1.bf16.msra.mxu0 %v5469_v5  ;;  %v5550_v5 = vld [vmem:[%s6598_s30 + $0xac8] ss:$16 sps:$4 sm:$0xff]  }
 0x1f6   : > { %3821 = vmatpush1.bf16.msra.mxu1 %v5472_v6  ;;  %3781 = vmatprep.subr.bf16.mxu0 %v5477_v9 }
 0x1f7   : > { %3822 = vmatprep.subr.bf16.mxu1 %v5480_v10  ;;  %v5555_v10 = vld [vmem:[%s6598_s30 + $0x8ac] ss:$16 sps:$4 sm:$0xff]  }
 0x1f9   : > { %3782 = vmatpush1.bf16.msra.mxu0 %v5475_v11 }
 0x1fa   : > { %3823 = vmatpush1.bf16.msra.mxu1 %v5478_v12  ;;  %3783 = vmatprep.subr.bf16.mxu0 %v5483_v13  ;;  %v5553_v12 = vld [vmem:[%s6598_s30 + $0x8a8] ss:$16 sps:$4 sm:$0xff]  }
 0x1fb   : > { %3824 = vmatprep.subr.bf16.mxu1 %v5486_v14  ;;  %v5556_v13 = vld [vmem:[%s6598_s30 + $0xaa8] ss:$16 sps:$4 sm:$0xff]  }
 0x1fd   : > { %3784 = vmatpush1.bf16.msra.mxu0 %v5481_v15 }
 0x1fe   : > { %3825 = vmatpush1.bf16.msra.mxu1 %v5484_v16  ;;  %3785 = vmatprep.subr.bf16.mxu0 %v5489_v19  ;;  %v5561_v16 = vld [vmem:[%s6598_s30 + $0x88c] ss:$16 sps:$4 sm:$0xff]   ;;  %v5562_v19 = vld [vmem:[%s6598_s30 + $0xa88] ss:$16 sps:$4 sm:$0xff]  }
 0x1ff   : > { %3826 = vmatprep.subr.bf16.mxu1 %v5492_v20  ;;  %v5567_v20 = vld [vmem:[%s6598_s30 + $0x86c] ss:$16 sps:$4 sm:$0xff]  }
 0x201   : > { %3786 = vmatpush1.bf16.msra.mxu0 %v5487_v21  ;;  %v5570_v21 = vld [vmem:[%s6598_s30 + $0xa6c] ss:$16 sps:$4 sm:$0xff]  }
 0x202   : > { %3827 = vmatpush1.bf16.msra.mxu1 %v5490_v22  ;;  %3787 = vmatprep.subr.bf16.mxu0 %v5495_v27  ;;  %v5565_v22 = vld [vmem:[%s6598_s30 + $0x868] ss:$16 sps:$4 sm:$0xff]  }
 0x203   : > { %3828 = vmatprep.subr.bf16.mxu1 %v5498_v28  ;;  %v5568_v27 = vld [vmem:[%s6598_s30 + $0xa68] ss:$16 sps:$4 sm:$0xff]   ;;  %v5573_v28 = vld [vmem:[%s6598_s30 + $0x84c] ss:$16 sps:$4 sm:$0xff]  }
 0x205   : > { %3788 = vmatpush2.bf16.msra.mxu0 %v5493_v29  ;;  %v5576_v29 = vld [vmem:[%s6598_s30 + $0xa4c] ss:$16 sps:$4 sm:$0xff]  }
 0x206   : > { %3829 = vmatpush2.bf16.msra.mxu1 %v5496_v30  ;;  %3789 = vmatprep.subr.bf16.mxu0 %v5501_v31  ;;  %v5571_v30 = vld [vmem:[%s6598_s30 + $0x848] ss:$16 sps:$4 sm:$0xff]  }
 0x207   : > { %3830 = vmatprep.subr.bf16.mxu1 %v5504_v32  ;;  %v5574_v31 = vld [vmem:[%s6598_s30 + $0xa48] ss:$16 sps:$4 sm:$0xff]   ;;  %v5579_v32 = vld [vmem:[%s6598_s30 + $0x82c] ss:$16 sps:$4 sm:$0xff]  }
 0x209   : > { %3790 = vmatpush2.bf16.msra.mxu0 %v5499_v33  ;;  %v5582_v33 = vld [vmem:[%s6598_s30 + $0xa2c] ss:$16 sps:$4 sm:$0xff]  }
 0x20a   : > { %3831 = vmatpush2.bf16.msra.mxu1 %v5502_v34  ;;  %3791 = vmatprep.subr.bf16.mxu0 %v5507_v39  ;;  %v5577_v34 = vld [vmem:[%s6598_s30 + $0x828] ss:$16 sps:$4 sm:$0xff]  }
 0x20b   : > { %3832 = vmatprep.subr.bf16.mxu1 %v5510_v40  ;;  %v5580_v39 = vld [vmem:[%s6598_s30 + $0xa28] ss:$16 sps:$4 sm:$0xff]   ;;  %v5585_v40 = vld [vmem:[%s6598_s30 + $0x80c] ss:$16 sps:$4 sm:$0xff]  }
 0x20d   : > { %3792 = vmatpush2.bf16.msra.mxu0 %v5505_v41  ;;  %v5588_v41 = vld [vmem:[%s6598_s30 + $0xa0c] ss:$16 sps:$4 sm:$0xff]  }
 0x20e   : > { %3833 = vmatpush2.bf16.msra.mxu1 %v5508_v42  ;;  %3793 = vmatprep.subr.bf16.mxu0 %v5513_v23  ;;  %v5583_v42 = vld [vmem:[%s6598_s30 + $0x808] ss:$16 sps:$4 sm:$0xff]  }
 0x20f   : > { %3834 = vmatprep.subr.bf16.mxu1 %v5516_v24  ;;  %v5586_v23 = vld [vmem:[%s6598_s30 + $0xa08] ss:$16 sps:$4 sm:$0xff]   ;;  %v5591_v24 = vld [vmem:[%s6598_s30 + $0x9ec] ss:$16 sps:$4 sm:$0xff]  }
 0x211   : > { %3794 = vmatpush2.bf16.msra.mxu0 %v5511_v43  ;;  %v5594_v43 = vld [vmem:[%s6598_s30 + $0xbec] ss:$16 sps:$4 sm:$0xff]  }
 0x212   : > { %3835 = vmatpush2.bf16.msra.mxu1 %v5514_v44  ;;  %3795 = vmatprep.subr.bf16.mxu0 %v5519_v45  ;;  %v5589_v44 = vld [vmem:[%s6598_s30 + $0x9e8] ss:$16 sps:$4 sm:$0xff]  }
 0x213   : > { %3836 = vmatprep.subr.bf16.mxu1 %v5522_v46  ;;  %v5592_v45 = vld [vmem:[%s6598_s30 + $0xbe8] ss:$16 sps:$4 sm:$0xff]   ;;  %v5597_v46 = vld [vmem:[%s6598_s30 + $0x9cc] ss:$16 sps:$4 sm:$0xff]  }
 0x215   : > { %3796 = vmatpush2.bf16.msra.mxu0 %v5517_v47  ;;  %v5600_v47 = vld [vmem:[%s6598_s30 + $0xbcc] ss:$16 sps:$4 sm:$0xff]  }
 0x216   : > { %3837 = vmatpush2.bf16.msra.mxu1 %v5520_v49  ;;  %3797 = vmatprep.subr.bf16.mxu0 %v5525_v50  ;;  %v5595_v49 = vld [vmem:[%s6598_s30 + $0x9c8] ss:$16 sps:$4 sm:$0xff]  }
 0x217   : > { %3838 = vmatprep.subr.bf16.mxu1 %v5528_v48  ;;  %v5598_v50 = vld [vmem:[%s6598_s30 + $0xbc8] ss:$16 sps:$4 sm:$0xff]   ;;  %v5603_v48 = vld [vmem:[%s6598_s30 + $0x9ac] ss:$16 sps:$4 sm:$0xff]  }
 0x219   : > { %3798 = vmatpush2.bf16.msra.mxu0 %v5523_v52  ;;  %v5606_v52 = vld [vmem:[%s6598_s30 + $0xbac] ss:$16 sps:$4 sm:$0xff]  }
 0x21a   : > { %3839 = vmatpush2.bf16.msra.mxu1 %v5526_v51  ;;  %3799 = vmatprep.subr.bf16.mxu0 %v5531_v53  ;;  %v5601_v51 = vld [vmem:[%s6598_s30 + $0x9a8] ss:$16 sps:$4 sm:$0xff]  }
 0x21b   : > { %3840 = vmatprep.subr.bf16.mxu1 %v5534_v54  ;;  %v5604_v53 = vld [vmem:[%s6598_s30 + $0xba8] ss:$16 sps:$4 sm:$0xff]   ;;  %v5609_v54 = vld [vmem:[%s6598_s30 + $0x98c] ss:$16 sps:$4 sm:$0xff]  }
 0x21d   : > { %3800 = vmatpush2.bf16.msra.mxu0 %v5529_v55  ;;  %v5612_v55 = vld [vmem:[%s6598_s30 + $0xb8c] ss:$16 sps:$4 sm:$0xff]  }
 0x21e   : > { %3841 = vmatpush2.bf16.msra.mxu1 %v5532_v56  ;;  %3801 = vmatprep.subr.bf16.mxu0 %v5537_v58  ;;  %v5607_v56 = vld [vmem:[%s6598_s30 + $0x988] ss:$16 sps:$4 sm:$0xff]  }
 0x21f   : > { %3842 = vmatprep.subr.bf16.mxu1 %v5540_v59  ;;  %v5610_v58 = vld [vmem:[%s6598_s30 + $0xb88] ss:$16 sps:$4 sm:$0xff]   ;;  %v5615_v59 = vld [vmem:[%s6598_s30 + $0x96c] ss:$16 sps:$4 sm:$0xff]  }
 0x221   : > { %3802 = vmatpush2.bf16.msra.mxu0 %v5535_v61  ;;  %v5618_v61 = vld [vmem:[%s6598_s30 + $0xb6c] ss:$16 sps:$4 sm:$0xff]  }
 0x222   : > { %3843 = vmatpush2.bf16.msra.mxu1 %v5538_v7  ;;  %3853 = vmatprep.subr.bf16.mxu0 %v5543_v8  ;;  %v5613_v7 = vld [vmem:[%s6598_s30 + $0x968] ss:$16 sps:$4 sm:$0xff]  }
 0x223   : > { %3894 = vmatprep.subr.bf16.mxu1 %v5546_v62  ;;  %v5616_v8 = vld [vmem:[%s6598_s30 + $0xb68] ss:$16 sps:$4 sm:$0xff]   ;;  %v5621_v62 = vld [vmem:[%s6598_s30 + $0x94c] ss:$16 sps:$4 sm:$0xff]  }
 0x224   : > { %v3559_v3 = vpop.f32.mrf.mxu0  ;;  %3804 = vmatmul.mubr.bf16.vlgmr.msra.gmra.mxu0 %v6771_v17  ;;  %v5558_v17 = vld [vmem:[%s6598_s30 + $0xaac] ss:$16 sps:$4 sm:$0xff]  }
 0x225   : > { %v3600_v4 = vpop.f32.mrf.mxu1  ;;  %3845 = vmatmul.mubr.bf16.vlgmr.msra.gmra.mxu1 %v6775_v18  ;;  %v3560_v37 = vadd.f32 %v3559_v3, %v6949_v57  ;;  %3854 = vmatpush1.bf16.msra.mxu0 %v5541_v63  ;;  %v5624_v63 = vld [vmem:[%s6598_s30 + $0xb4c] ss:$16 sps:$4 sm:$0xff]  }
 0x226   : > { %3895 = vmatpush1.bf16.msra.mxu1 %v5544_v0  ;;  %v7020_v6 = vpop.f32.mrf.mxu0  ;;  %3855 = vmatprep.subr.bf16.mxu0 %v5549_v1  ;;  %v5619_v0 = vld [vmem:[%s6598_s30 + $0x948] ss:$16 sps:$4 sm:$0xff]   ;;  %v5630_v3 = vld [vmem:[%s6598_s30 + $0xb2c] ss:$16 sps:$4 sm:$0xff]  }
 0x227   : > { %v7022_v9 = vpop.f32.mrf.mxu1  ;;  %3896 = vmatprep.subr.bf16.mxu1 %v5552_v2  ;;  %v7026_v11 = vadd.f32 %v3600_v4, %v3560_v37  ;;  %3885 = vmatprep.mubr.bf16.mxu0 %v6793_v25  ;;  %v5564_v25 = vld [vmem:[%s6598_s30 + $0xa8c] ss:$16 sps:$4 sm:$0xff]   ;;  %v5622_v1 = vld [vmem:[%s6598_s30 + $0xb48] ss:$16 sps:$4 sm:$0xff]  }
 0x228   : > { %3926 = vmatprep.mubr.bf16.mxu1 %v6797_v26  ;;  %v3563_v18 = vpop.f32.mrf.mxu0  ;;  %v5559_v26 = vld [vmem:[%s6598_s30 + $0x888] ss:$16 sps:$4 sm:$0xff]   ;;  %v5627_v2 = vld [vmem:[%s6598_s30 + $0x92c] ss:$16 sps:$4 sm:$0xff]  }
 0x229   : > { %v3604_v57 = vpop.f32.mrf.mxu1  ;;  %3856 = vmatpush1.bf16.msra.mxu0 %v5547_v38  ;;  %v5625_v4 = vld [vmem:[%s6598_s30 + $0x928] ss:$16 sps:$4 sm:$0xff]   ;;  %v5633_v38 = vld [vmem:[%s6598_s30 + $0x90c] ss:$16 sps:$4 sm:$0xff]   ;;  %v5637_v18 = vld [vmem:[%s6596_s29 + $0x78] sm:$0xff]  }
 0x22a   : > { %3897 = vmatpush1.bf16.msra.mxu1 %v5550_v5  ;;  %v3564_v14 = vpop.f32.mrf.mxu0  ;;  %3857 = vmatprep.subr.bf16.mxu0 %v5555_v10  ;;  %v5628_v37 = vld [vmem:[%s6598_s30 + $0xb28] ss:$16 sps:$4 sm:$0xff]   ;;  %v5636_v5 = vld [vmem:[%s6598_s30 + $0xb0c] ss:$16 sps:$4 sm:$0xff]   ;;  %v3562_v57 = vadd.f32 %v7020_v6, %v6951_v60 }
 0x22b   : > { %v3605_v15 = vpop.f32.mrf.mxu1  ;;  %3898 = vmatprep.subr.bf16.mxu1 %v5558_v17  ;;  %v5631_v10 = vld [vmem:[%s6598_s30 + $0x908] ss:$16 sps:$4 sm:$0xff]  }
 0x22c   : > { %v5634_v17 = vld [vmem:[%s6598_s30 + $0xb08] ss:$16 sps:$4 sm:$0xff]  }
 0x22d   : > { %3858 = vmatpush1.bf16.msra.mxu0 %v5553_v12  ;;  %v5638_v12 = vld [vmem:[%s6596_s29 + $0x38] sm:$0xff]  }
 0x22e   : > { %3899 = vmatpush1.bf16.msra.mxu1 %v5556_v13  ;;  %3859 = vmatprep.subr.bf16.mxu0 %v5561_v16  ;;  %v5639_v13 = vld [vmem:[%s6596_s29 + $0x70] sm:$0xff]   ;;  %v3603_v16 = vadd.f32 %v7022_v9, %v3562_v57 }
 0x22f   : > { %3900 = vmatprep.subr.bf16.mxu1 %v5564_v25 }
 0x231   : > { %3860 = vmatpush1.bf16.msra.mxu0 %v5559_v26  ;;  %v5640_v26 = vld [vmem:[%s6596_s29 + $0x30] sm:$0xff]  }
 0x232   : > { %3901 = vmatpush1.bf16.msra.mxu1 %v5562_v19  ;;  %3861 = vmatprep.subr.bf16.mxu0 %v5567_v20  ;;  %v5641_v19 = vld [vmem:[%s6596_s29 + $0x68] sm:$0xff]  }
 0x233   : > { %3902 = vmatprep.subr.bf16.mxu1 %v5570_v21 }
 0x235   : > { %3862 = vmatpush1.bf16.msra.mxu0 %v5565_v22 }
 0x236   : > { %3903 = vmatpush1.bf16.msra.mxu1 %v5568_v27  ;;  %3863 = vmatprep.subr.bf16.mxu0 %v5573_v28  ;;  %v5642_v28 = vld [vmem:[%s6596_s29 + $0x28] sm:$0xff]  }
 0x237   : > { %3904 = vmatprep.subr.bf16.mxu1 %v5576_v29 }
 0x239   : > { %3864 = vmatpush1.bf16.msra.mxu0 %v5571_v30 }
 0x23a   : > { %3905 = vmatpush1.bf16.msra.mxu1 %v5574_v31  ;;  %3865 = vmatprep.subr.bf16.mxu0 %v5579_v32 }
 0x23b   : > { %3906 = vmatprep.subr.bf16.mxu1 %v5582_v33 }
 0x23d   : > { %3866 = vmatpush1.bf16.msra.mxu0 %v5577_v34  ;;  %v5644_v34 = vld [vmem:[%s6596_s29 + $0x20] sm:$0xff]  }
 0x23e   : > { %3907 = vmatpush1.bf16.msra.mxu1 %v5580_v39  ;;  %3867 = vmatprep.subr.bf16.mxu0 %v5585_v40  ;;  %v5645_v39 = vld [vmem:[%s6596_s29 + $0x58] sm:$0xff]  }
 0x23f   : > { %3908 = vmatprep.subr.bf16.mxu1 %v5588_v41 }
 0x241   : > { %3868 = vmatpush1.bf16.msra.mxu0 %v5583_v42 }
 0x242   : > { %3909 = vmatpush1.bf16.msra.mxu1 %v5586_v23  ;;  %3869 = vmatprep.subr.bf16.mxu0 %v5591_v24  ;;  %v5646_v24 = vld [vmem:[%s6596_s29 + $0x18] sm:$0xff]  }
 0x243   : > { %3910 = vmatprep.subr.bf16.mxu1 %v5594_v43  ;;  %v5647_v43 = vld [vmem:[%s6596_s29 + $0x50] sm:$0xff]  }
 0x245   : > { %3870 = vmatpush2.bf16.msra.mxu0 %v5589_v44 }
 0x246   : > { %3911 = vmatpush2.bf16.msra.mxu1 %v5592_v45  ;;  %3871 = vmatprep.subr.bf16.mxu0 %v5597_v46 }
 0x247   : > { %3912 = vmatprep.subr.bf16.mxu1 %v5600_v47 }
 0x249   : > { %3872 = vmatpush2.bf16.msra.mxu0 %v5595_v49  ;;  %v5648_v49 = vld [vmem:[%s6596_s29 + $0x10] sm:$0xff]  }
 0x24a   : > { %3913 = vmatpush2.bf16.msra.mxu1 %v5598_v50  ;;  %3873 = vmatprep.subr.bf16.mxu0 %v5603_v48  ;;  %v5649_v50 = vld [vmem:[%s6596_s29 + $0x48] sm:$0xff]  }
 0x24b   : > { %3914 = vmatprep.subr.bf16.mxu1 %v5606_v52 }
 0x24d   : > { %3874 = vmatpush2.bf16.msra.mxu0 %v5601_v51 }
 0x24e   : > { %3915 = vmatpush2.bf16.msra.mxu1 %v5604_v53  ;;  %3875 = vmatprep.subr.bf16.mxu0 %v5609_v54  ;;  %v5650_v54 = vld [vmem:[%s6596_s29 + $0x8] sm:$0xff]  }
 0x24f   : > { %3916 = vmatprep.subr.bf16.mxu1 %v5612_v55  ;;  %v5651_v55 = vld [vmem:[%s6596_s29 + $0x40] sm:$0xff]  }
 0x251   : > { %3876 = vmatpush2.bf16.msra.mxu0 %v5607_v56 }
 0x252   : > { %3917 = vmatpush2.bf16.msra.mxu1 %v5610_v58  ;;  %3877 = vmatprep.subr.bf16.mxu0 %v5615_v59 }
 0x253   : > { %3918 = vmatprep.subr.bf16.mxu1 %v5618_v61 }
 0x255   : > { %3878 = vmatpush2.bf16.msra.mxu0 %v5613_v7  ;;  %v5652_v7 = vld [vmem:[%s6596_s29] sm:$0xff]  }
 0x256   : > { %3919 = vmatpush2.bf16.msra.mxu1 %v5616_v8  ;;  %3879 = vmatprep.subr.bf16.mxu0 %v5621_v62 }
 0x257   : > { %3920 = vmatprep.subr.bf16.mxu1 %v5624_v63 }
 0x259   : > { %3880 = vmatpush2.bf16.msra.mxu0 %v5619_v0 }
 0x25a   : > { %3921 = vmatpush2.bf16.msra.mxu1 %v5622_v1  ;;  %3881 = vmatprep.subr.bf16.mxu0 %v5627_v2 }
 0x25b   : > { %3922 = vmatprep.subr.bf16.mxu1 %v5630_v3 }
 0x25d   : > { %3882 = vmatpush2.bf16.msra.mxu0 %v5625_v4 }
 0x25e   : > { %3923 = vmatpush2.bf16.msra.mxu1 %v5628_v37  ;;  %3883 = vmatprep.subr.bf16.mxu0 %v5633_v38 }
 0x25f   : > { %3924 = vmatprep.subr.bf16.mxu1 %v5636_v5 }
 0x261   : > { %3884 = vmatpush2.bf16.msra.mxu0 %v5631_v10 }
 0x262   : > { %3925 = vmatpush2.bf16.msra.mxu1 %v5634_v17  ;;  %4971 = vmatprep.subr.bf16.mxu0 %v5637_v18  ;;  %v4015_v17 = vlaneseq }
 0x264   : > { %v3641_v14 = vpop.f32.mrf.mxu0  ;;  %3886 = vmatmul.mubr.bf16.vlgmr.msra.gmra.mxu0 %v6865_v35  ;;  %v7106_v57 = vshrl.u32 %v4015_v17, 7 }
 0x265   : > { %v3682_v15 = vpop.f32.mrf.mxu1  ;;  %3927 = vmatmul.mubr.bf16.vlgmr.msra.gmra.mxu1 %v6869_v36  ;;  %v3642_v25 = vadd.f32 %v3641_v14, %v7026_v11  ;;  %4972 = vmatpush3.bf16.msra.mxu0 %v5638_v12  ;;  %v5643_v11 = vld [vmem:[%s6596_s29 + $0x60] sm:$0xff]  }
 0x266   : > { %v3643_v60 = vpop.f32.mrf.mxu0  ;;  %4973 = vmatprep.subr.bf16.mxu0 %v5639_v13  ;;  %v4017_v12 = vsub.s32 0, %v7106_v57  ;;  %v7114_v13 = vld [vmem:[%s1072_s18] sm:$0xf]  ;;  %v4021_v14 = vsub.s32 1, %v7106_v57 }
 0x267   : > { %v3684_v6 = vpop.f32.mrf.mxu1  ;;  %v3683_v20 = vadd.f32 %v3682_v15, %v3642_v25  ;;  %v3644_v21 = vadd.f32 %v3643_v60, %v3603_v16  ;;  %v7122_v15 = vld [vmem:[%s1077_s23] sm:$0xf] }
 0x268   : > { %v3645_v22 = vpop.f32.mrf.mxu0  ;;  %v4018_v16 = vrot.slane %v7114_v13, %v4017_v12  ;;  %v4022_v60 = vrot.slane %v7114_v13, %v4021_v14 }
 0x269   : > { %v3686_v27 = vpop.f32.mrf.mxu1  ;;  %v3937_v35 = vrot.slane %v3683_v20, 4  ;;  %v3685_v36 = vadd.f32 %v3684_v6, %v3644_v21  ;;  %4974 = vmatpush3.bf16.msra.mxu0 %v5640_v26  ;;  %v4043_v6 = vrot.slane %v7122_v15, %v4017_v12  ;;  %v4047_v22 = vrot.slane %v7122_v15, %v4021_v14 }
 0x26a   : > { %v3646_v9 = vpop.f32.mrf.mxu0  ;;  %4975 = vmatprep.subr.bf16.mxu0 %v5641_v19 }
 0x26b   : > { %v3687_v29 = vpop.f32.mrf.mxu1  ;;  %v3938_v30 = vadd.f32 %v3937_v35, %v3683_v20  ;;  %v3943_v31 = vrot.slane %v3685_v36, 4 }
 0x26d   : > { %v3939_v32 = vrot.slane %v3938_v30, 2  ;;  %v3944_v33 = vadd.f32 %v3943_v31, %v3685_v36  ;;  %4976 = vmatpush3.bf16.msra.mxu0 %v5642_v28 }
 0x26e   : > { %4977 = vmatprep.subr.bf16.mxu0 %v5643_v11 }
 0x26f   : > { %v3940_v40 = vadd.f32 %v3939_v32, %v3938_v30  ;;  %v3945_v41 = vrot.slane %v3944_v33, 2 }
 0x271   : > { %v3941_v42 = vrot.slane %v3940_v40, 1  ;;  %v3946_v23 = vadd.f32 %v3945_v41, %v3944_v33  ;;  %4978 = vmatpush3.bf16.msra.mxu0 %v5644_v34 }
 0x272   : > { %4979 = vmatprep.subr.bf16.mxu0 %v5645_v39 }
 0x273   : > { %v3942_v44 = vadd.f32 %v3941_v42, %v3940_v40  ;;  %v3947_v45 = vrot.slane %v3946_v23, 1 }
 0x275   : > { %v3962_v46 = vmul.f32 0.125, %v3942_v44  ;;  %v3948_v47 = vadd.f32 %v3947_v45, %v3946_v23  ;;  %4980 = vmatpush3.bf16.msra.mxu0 %v5646_v24  ;;  %v5653_v24 = vld [vmem:[%s6596_s29 + $0xf8] sm:$0xff]   ;;  %v5655_v44 = vld [vmem:[%s6596_s29 + $0xf0] sm:$0xff]  }
 0x276   : > { %4981 = vmatprep.subr.bf16.mxu0 %v5647_v43  ;;  %v5654_v43 = vld [vmem:[%s6596_s29 + $0xb8] sm:$0xff]   ;;  %4993 = vmatprep.subr.bf16.mxu1 %v5653_v24  ;;  %v5656_v45 = vld [vmem:[%s6596_s29 + $0xb0] sm:$0xff]  }
 0x277   : > { %v3966_v48 = vsub.f32 %v3683_v20, %v3962_v46  ;;  %v3963_v52 = vmul.f32 0.125, %v3948_v47  ;;  %4994 = vmatpush3.bf16.msra.mxu1 %v5654_v43  ;;  %v5657_v46 = vld [vmem:[%s6596_s29 + $0xe8] sm:$0xff]  }
 0x278   : > { %4995 = vmatprep.subr.bf16.mxu1 %v5655_v44  ;;  %v5658_v47 = vld [vmem:[%s6596_s29 + $0xa8] sm:$0xff]  }
 0x279   : > { %v3970_v51 = vmul.f32 %v3966_v48, %v3966_v48  ;;  %v3967_v53 = vsub.f32 %v3685_v36, %v3963_v52  ;;  %4982 = vmatpush3.bf16.msra.mxu0 %v5648_v49  ;;  %v5659_v49 = vld [vmem:[%s6596_s29 + $0xe0] sm:$0xff]   ;;  %v5662_v52 = vld [vmem:[%s6596_s29 + $0x98] sm:$0xff]  }
 0x27a   : > { %4983 = vmatprep.subr.bf16.mxu0 %v5649_v50  ;;  %v5660_v50 = vld [vmem:[%s6596_s29 + $0xa0] sm:$0xff]  }
 0x27b   : > { %v3974_v56 = vrot.slane %v3970_v51, 4  ;;  %v3971_v58 = vmul.f32 %v3967_v53, %v3967_v53  ;;  %4996 = vmatpush3.bf16.msra.mxu1 %v5656_v45 }
 0x27c   : > { %4997 = vmatprep.subr.bf16.mxu1 %v5657_v46 }
 0x27d   : > { %v3975_v59 = vadd.f32 %v3974_v56, %v3970_v51  ;;  %v3980_v61 = vrot.slane %v3971_v58, 4  ;;  %4984 = vmatpush3.bf16.msra.mxu0 %v5650_v54  ;;  %v5663_v51 = vld [vmem:[%s6596_s29 + $0xd0] sm:$0xff]   ;;  %v5665_v54 = vld [vmem:[%s6596_s29 + $0xc8] sm:$0xff]   ;;  %v5667_v56 = vld [vmem:[%s6596_s29 + $0xc0] sm:$0xff]  }
 0x27e   : > { %4985 = vmatprep.subr.bf16.mxu0 %v5651_v55  ;;  %v5666_v55 = vld [vmem:[%s6596_s29 + $0x88] sm:$0xff]  }
 0x27f   : > { %v3976_v8 = vrot.slane %v3975_v59, 2  ;;  %v3981_v62 = vadd.f32 %v3980_v61, %v3971_v58  ;;  %4998 = vmatpush3.bf16.msra.mxu1 %v5658_v47  ;;  %v5668_v58 = vld [vmem:[%s6596_s29 + $0x80] sm:$0xff]  }
 0x280   : > { %4999 = vmatprep.subr.bf16.mxu1 %v5659_v49 }
 0x281   : > { %v3977_v63 = vadd.f32 %v3976_v8, %v3975_v59  ;;  %v3982_v0 = vrot.slane %v3981_v62, 2  ;;  %4986 = vmatpush3.bf16.msra.mxu0 %v5652_v7 }
 0x283   : > { %v3978_v1 = vrot.slane %v3977_v63, 1  ;;  %v3983_v2 = vadd.f32 %v3982_v0, %v3981_v62  ;;  %5000 = vmatpush3.bf16.msra.mxu1 %v5660_v50 }
 0x285   : > { %v3979_v3 = vadd.f32 %v3978_v1, %v3977_v63  ;;  %v3984_v4 = vrot.slane %v3983_v2, 1 }
 0x287   : > { %v3998_v37 = vmul.f32 0.125, %v3979_v3  ;;  %v3985_v38 = vadd.f32 %v3984_v4, %v3983_v2 }
 0x289   : > { %v4002_v5 = vadd.f32 1e-05, %v3998_v37  ;;  %v3999_v10 = vmul.f32 0.125, %v3985_v38 }
 0x28b   : > { %5669 = vrsqrt.f32 %v4002_v5  ;;  %v4003_v18 = vadd.f32 1e-05, %v3999_v10 }
 0x28d   : > { %5671 = vrsqrt.f32 %v4003_v18 }
 0x298   : > { %v5670_v25 = vpop.eup %5669 }
 0x299   : > { %v4010_v26 = vmul.f32 %v5670_v25, %v3966_v48  ;;  %v5661_v48 = vld [vmem:[%s6596_s29 + $0xd8] sm:$0xff]  }
 0x29a   : > { %v5672_v19 = vpop.eup %5671  ;;  %5001 = vmatprep.subr.bf16.mxu1 %v5661_v48 }
 0x29b   : > { %v4035_v20 = vmul.f32 %v4018_v16, %v4010_v26  ;;  %v4011_v21 = vmul.f32 %v5672_v19, %v3967_v53  ;;  %5002 = vmatpush3.bf16.msra.mxu1 %v5662_v52  ;;  %v5664_v53 = vld [vmem:[%s6596_s29 + $0x90] sm:$0xff]  }
 0x29c   : > { %5003 = vmatprep.subr.bf16.mxu1 %v5663_v51 }
 0x29d   : > { %v4036_v27 = vmul.f32 %v4022_v60, %v4011_v21  ;;  %v4060_v35 = vadd.f32 %v4043_v6, %v4035_v20 }
 0x29f   : > { %v4061_v36 = vadd.f32 %v4047_v22, %v4036_v27  ;;  %v4064_v28 = vmax.f32 %v4060_v35, 0.0  ;;  %5004 = vmatpush3.bf16.msra.mxu1 %v5664_v53 }
 0x2a0   : > { %5005 = vmatprep.subr.bf16.mxu1 %v5665_v54 }
 0x2a1   : > { %v4065_v9 = vmax.f32 %v4061_v36, 0.0  ;;  %v4069_v31 = vpack.c.bf16 %v4064_v28, %v4064_v28 }
 0x2a3   : > { %v4070_v29 = vpack.c.bf16 %v4065_v9, %v4065_v9  ;;  %5006 = vmatpush3.bf16.msra.mxu1 %v5666_v55  ;;  %v4025_v55 = vsub.s32 2, %v7106_v57 }
 0x2a4   : > { %v3723_v11 = vpop.f32.mrf.mxu0  ;;  %5007 = vmatprep.subr.bf16.mxu1 %v5667_v56  ;;  %v4029_v56 = vsub.s32 3, %v7106_v57 }
 0x2a5   : > { %v3764_v30 = vpop.f32.mrf.mxu1  ;;  %4361 = vmatprep.mubr.bf16.mxu0 %v4070_v29 }
 0x2a6   : > { %v3765_v32 = vadd.f32 %v3764_v30, %v3723_v11  ;;  %v3725_v33 = vpop.f32.mrf.mxu0  ;;  %4362 = vmatmul.mubr.bf16.vlgmr.msra.gmra.mxu0 %v4069_v31 }
 0x2a7   : > { %v3766_v34 = vpop.f32.mrf.mxu1  ;;  %5008 = vmatpush3.bf16.msra.mxu1 %v5668_v58  ;;  %v4026_v58 = vrot.slane %v7114_v13, %v4025_v55 }
 0x2a8   : > { %v3767_v39 = vadd.f32 %v3766_v34, %v3725_v33  ;;  %v3727_v40 = vpop.f32.mrf.mxu0 }
 0x2a9   : > { %v3768_v41 = vpop.f32.mrf.mxu1 }
 0x2aa   : > { %v3728_v42 = vpop.f32.mrf.mxu0 }
 0x2ab   : > { %v3769_v23 = vpop.f32.mrf.mxu1 }
 0x2e4   : > { %v3805_v59 = vpop.f32.mrf.mxu0 }
 0x2e5   : > { %v3846_v61 = vpop.f32.mrf.mxu1  ;;  %v3806_v7 = vadd.f32 %v3805_v59, %v3765_v32 }
 0x2e6   : > { %v3807_v8 = vpop.f32.mrf.mxu0 }
 0x2e7   : > { %v3848_v62 = vpop.f32.mrf.mxu1  ;;  %v3847_v63 = vadd.f32 %v3846_v61, %v3806_v7  ;;  %v3808_v4 = vadd.f32 %v3807_v8, %v3767_v39  ;;  %v4030_v7 = vrot.slane %v7114_v13, %v4029_v56  ;;  %v4051_v8 = vrot.slane %v7122_v15, %v4025_v55 }
 0x2e8   : > { %v3809_v0 = vpop.f32.mrf.mxu0 }
 0x2e9   : > { %v3850_v1 = vpop.f32.mrf.mxu1  ;;  %v3849_v5 = vadd.f32 %v3848_v62, %v3808_v4 }
 0x2ea   : > { %v3810_v2 = vpop.f32.mrf.mxu0  ;;  %v4055_v1 = vrot.slane %v7122_v15, %v4029_v56 }
 0x2eb   : > { %v3851_v3 = vpop.f32.mrf.mxu1 }
 0x324   : > { %v3887_v37 = vpop.f32.mrf.mxu0 }
 0x325   : > { %v3928_v38 = vpop.f32.mrf.mxu1  ;;  %v3888_v10 = vadd.f32 %v3887_v37, %v3847_v63 }
 0x326   : > { %v3889_v17 = vpop.f32.mrf.mxu0 }
 0x327   : > { %v3930_v18 = vpop.f32.mrf.mxu1  ;;  %v3929_v12 = vadd.f32 %v3928_v38, %v3888_v10  ;;  %v3890_v14 = vadd.f32 %v3889_v17, %v3849_v5 }
 0x328   : > { %v3891_v16 = vpop.f32.mrf.mxu0 }
 0x329   : > { %v3932_v25 = vpop.f32.mrf.mxu1  ;;  %v3949_v26 = vrot.slane %v3929_v12, 4  ;;  %v3931_v60 = vadd.f32 %v3930_v18, %v3890_v14 }
 0x32a   : > { %v3892_v6 = vpop.f32.mrf.mxu0 }
 0x32b   : > { %v3933_v19 = vpop.f32.mrf.mxu1  ;;  %v3950_v20 = vadd.f32 %v3949_v26, %v3929_v12  ;;  %v3955_v21 = vrot.slane %v3931_v60, 4  ;;  %v4068_v26 = vld [vmem:[#allocation2] sm:$0xff] }
 0x32d   : > { %v3951_v22 = vrot.slane %v3950_v20, 2  ;;  %v3956_v27 = vadd.f32 %v3955_v21, %v3931_v60 }
 0x32f   : > { %v3952_v35 = vadd.f32 %v3951_v22, %v3950_v20  ;;  %v3957_v36 = vrot.slane %v3956_v27, 2 }
 0x331   : > { %v3953_v28 = vrot.slane %v3952_v35, 1  ;;  %v3958_v9 = vadd.f32 %v3957_v36, %v3956_v27 }
 0x333   : > { %v3954_v29 = vadd.f32 %v3953_v28, %v3952_v35  ;;  %v3959_v11 = vrot.slane %v3958_v9, 1 }
 0x335   : > { %v3964_v30 = vmul.f32 0.125, %v3954_v29  ;;  %v3960_v31 = vadd.f32 %v3959_v11, %v3958_v9 }
 0x337   : > { %v3968_v32 = vsub.f32 %v3929_v12, %v3964_v30  ;;  %v3965_v33 = vmul.f32 0.125, %v3960_v31 }
 0x339   : > { %v3972_v34 = vmul.f32 %v3968_v32, %v3968_v32  ;;  %v3969_v39 = vsub.f32 %v3931_v60, %v3965_v33 }
 0x33b   : > { %v3986_v40 = vrot.slane %v3972_v34, 4  ;;  %v3973_v41 = vmul.f32 %v3969_v39, %v3969_v39 }
 0x33d   : > { %v3987_v42 = vadd.f32 %v3986_v40, %v3972_v34  ;;  %v3992_v23 = vrot.slane %v3973_v41, 4 }
 0x33f   : > { %v3988_v24 = vrot.slane %v3987_v42, 2  ;;  %v3993_v43 = vadd.f32 %v3992_v23, %v3973_v41 }
 0x341   : > { %v3989_v44 = vadd.f32 %v3988_v24, %v3987_v42  ;;  %v3994_v45 = vrot.slane %v3993_v43, 2 }
 0x343   : > { %v3990_v46 = vrot.slane %v3989_v44, 1  ;;  %v3995_v47 = vadd.f32 %v3994_v45, %v3993_v43 }
 0x345   : > { %v3991_v49 = vadd.f32 %v3990_v46, %v3989_v44  ;;  %v3996_v50 = vrot.slane %v3995_v47, 1 }
 0x347   : > { %v4000_v48 = vmul.f32 0.125, %v3991_v49  ;;  %v3997_v52 = vadd.f32 %v3996_v50, %v3995_v47 }
 0x349   : > { %v4004_v51 = vadd.f32 1e-05, %v4000_v48  ;;  %v4001_v53 = vmul.f32 0.125, %v3997_v52 }
 0x34b   : > { %5673 = vrsqrt.f32 %v4004_v51  ;;  %v4005_v54 = vadd.f32 1e-05, %v4001_v53 }
 0x34d   : > { %5675 = vrsqrt.f32 %v4005_v54 }
 0x358   : > { %v5674_v59 = vpop.eup %5673 }
 0x359   : > { %v4012_v61 = vmul.f32 %v5674_v59, %v3968_v32 }
 0x35a   : > { %v5676_v62 = vpop.eup %5675 }
 0x35b   : > { %v4037_v63 = vmul.f32 %v4026_v58, %v4012_v61  ;;  %v4013_v0 = vmul.f32 %v5676_v62, %v3969_v39 }
 0x35d   : > { %v4038_v2 = vmul.f32 %v4030_v7, %v4013_v0  ;;  %v4062_v3 = vadd.f32 %v4051_v8, %v4037_v63 }
 0x35f   : > { %v4063_v4 = vadd.f32 %v4055_v1, %v4038_v2  ;;  %v4066_v37 = vmax.f32 %v4062_v3, 0.0 }
 0x361   : > { %v4067_v38 = vmax.f32 %v4063_v4, 0.0  ;;  %v4071_v57 = vpack.c.bf16 %v4066_v37, %v4066_v37 }
 0x363   : > { %v4072_v5 = vpack.c.bf16 %v4067_v38, %v4067_v38 }
 0x365   : > { %4401 = vmatprep.mubr.bf16.mxu1 %v4072_v5 }
 0x366   : > { %v4987_v10 = vpop.f32.mrf.mxu0  ;;  %4402 = vmatmul.mubr.bf16.vlgmr.msra.gmra.mxu1 %v4071_v57 }
 0x368   : > { %v4988_v17 = vpop.f32.mrf.mxu0 }
 0x369   : > { %v4989_v18 = vadd.f32 %v4988_v17, %v4987_v10 }
 0x36a   : > { %v4990_v13 = vpop.f32.mrf.mxu0 }
 0x36c   : > { %v4991_v12 = vpop.f32.mrf.mxu0 }
 0x426   : > { %v5009_v14 = vpop.f32.mrf.mxu1 }
 0x428   : > { %v5010_v16 = vpop.f32.mrf.mxu1 }
 0x429   : > { %v5011_v25 = vadd.f32 %v5010_v16, %v5009_v14 }
 0x42a   : > { %v5012_v60 = vpop.f32.mrf.mxu1 }
 0x42b   : > { %v4404_v15 = vadd.f32 %v5011_v25, %v4989_v18  ;;  %4414 = sbr.rel (%p4964_p11) target bundleno = 1142 (0x476), region = 75 }
 0x42c   : > { %v5013_v6 = vpop.f32.mrf.mxu1 }
 0x42d   : > { %v4409_v19 = vadd.f32 %v4404_v15, %v4068_v26 }
 0x42f   : > { %4410 = vst [vmem:[#allocation2] sm:$0xff] %v4409_v19 }
 0x430   : > { %v4965_v21 = vld [vmem:[%s7181_s5] ss:$0 sm:$0xff] }
 0x436   : > { %v4415_v20 = vld [vmem:[#allocation2] sm:$0xff] }
 0x437   : > { %v4423_v22 = vadd.f32 %v4965_v21, %v4415_v20 }
 0x439   : > { %v4424_v27 = vrot.slane %v4423_v22, 4 }
 0x43b   : > { %v4425_v35 = vmax.f32 %v4423_v22, %v4424_v27 }
 0x43d   : > { %v4426_v36 = vrot.slane %v4425_v35, 2 }
 0x43f   : > { %v4427_v28 = vmax.f32 %v4425_v35, %v4426_v36 }
 0x441   : > { %v4428_v9 = vrot.slane %v4427_v28, 1 }
 0x443   : > { %v4429_v29 = vmax.f32 %v4427_v28, %v4428_v9 }
 0x445   : > { %v4430_v11 = vsub.f32 %v4423_v22, %v4429_v29 }
 0x447   : > { %v4431_v30 = vmul.f32 1.442695, %v4430_v11 }
 0x449   : > { %5677 = vpow2.f32 %v4431_v30 }
 0x456   : > { %v5678_v31 = vpop.eup %5677 }
 0x457   : > { %v4433_v32 = vrot.slane %v5678_v31, 4 }
 0x459   : > { %v4434_v33 = vadd.f32 %v5678_v31, %v4433_v32 }
 0x45b   : > { %v4435_v34 = vrot.slane %v4434_v33, 2 }
 0x45d   : > { %v4436_v39 = vadd.f32 %v4435_v34, %v4434_v33 }
 0x45f   : > { %v4437_v40 = vrot.slane %v4436_v39, 1 }
 0x461   : > { %v4438_v41 = vadd.f32 %v4437_v40, %v4436_v39 }
 0x463   : > { %5679 = vlog2.f32 %v4438_v41 }
 0x470   : > { %v5680_v42 = vpop.eup %5679 }
 0x471   : > { %v4440_v23 = vmul.f32 0.6931472, %v5680_v42 }
 0x473   : > { %v4441_v24 = vsub.f32 %v4430_v11, %v4440_v23 }
 0x475   : > { %4442 = vst [vmem:[#allocation4] sm:$0xff] %v4441_v24 }
 0x476 PF: > { %p5021_p12 = scmp.eq.s32.totalorder %s5786_s24, 2  ;;  %s5734_s23 = smov [#allocation4]  }
 0x477   : > { %s4450_s29 = sshll.u32 %s5734_s23, 4  ;;  %s4451_s29 = int_to_ptr.vmem [resolvable:$true] %s4450_s29 }
 0x478   : > { %s5681_s7 = scalar_lea.vmem %s4451_s29, 128  ;;  %p5688_p2 = scmp.lt.s32.totalorder %s4451_s29, %s4451_s29 }
 0x479   : > { %p5682_p13 = scmp.ne.s32.totalorder %s4451_s29, %s5681_s7  ;;  %p5689_p3 = scmp.lt.s32.totalorder %s5681_s7, %s5681_s7 }
 0x47b   : > { %p5683_p0 = pnand %p5682_p13, %p5021_p12  ;;  %p5690_p4 = por %p5689_p3, %p5688_p2 }
 0x47d   : > { %p5684_p1 = pneg %p5683_p0 }
 0x47f   : > { %p5691_p5 = pnand %p5690_p4, %p5684_p1 }
 0x481   : > { %5694 = shalt.err (!%p5691_p5)
}
 0x482   : > { %5018 = dma.vmem_to_hbm [thread:$0]  (%p5021_p12), %s4451_s29, 128, %s7182_s6, [#allocation5]  }
 0x483   : > { %5718 = dma.done.wait (%p5021_p12), [#allocation5], 128  }
 0x484   : > { %5720 = vsyncadd (%p5021_p12), [#allocation5], 4294967168 }
 0x485 PF: > { %p14_p6 = scmp.ge.s32.totalorder %s5789_s25, 5   ;;  %s7183_s21 = smov %s5727_s22 }
 0x486   : > { %s7184_s22 = smov %s5798_s28  ;;  %s7185_s23 = smov %s5789_s25 }
 0x487   :  { %16 = sbr.rel (!%p14_p6) target bundleno = 2 (0x2), region = 116 }
 0x48c   :  { %4463 = vsyncpa [#allocation5], 1 }
 0x48d   :  { %4465 = vsyncpa [#allocation5 + $0x1], 1 }

</bundles_post_ra>
